<compile_context>
chip_gen: v7x
topology: tpu7x:2x2x1
jax: 0.10.0
libtpu: 0.0.40
codegen_flags: <defaults>
</compile_context>

<pallas_src>
import jax
import jax.numpy as jnp
from jax.experimental import pallas as pl
from jax.experimental.pallas import tpu as pltpu

IN_FEATS = 7          # raw input features
IN_PAD = 8            # padded input features (MXU/lane friendly)
HIDDEN = 256          # latent / per-slot feature width
N_SLOTS = 210         # 7 * 3 * 10
FOOD_VOCAB = 223
DEC_H1 = 128          # slot_decoder first hidden width
DEC_H2 = 64           # slot_decoder second hidden width
HEAD_PAD = 256        # 223 food logits + 1 amount + 32 zero pad -> lane-dense
BN_EPS = 1e-5


# --------------------------------------------------------------------------
# Fused kernel: encoder -> folded projection -> per-slot decoder -> head
# --------------------------------------------------------------------------
def _fused_kernel(x_ref, ew1_ref, eb1_ref, ew2_ref, eb2_ref,
                  pw_ref, pb_ref, dw2_ref, db2_ref, hw_ref, hb_ref, out_ref):
    # --- input_encoder (tiny; weights VMEM-resident, recomputed per step) ---
    # Linear(7->128)+ReLU, BN folded into next Linear, Dropout == identity,
    # Linear(128->256)+ReLU.
    h = jnp.dot(x_ref[...], ew1_ref[...],
                preferred_element_type=jnp.float32) + eb1_ref[...]
    h = jnp.maximum(h, 0.0)
    latent = jnp.dot(h, ew2_ref[...],
                     preferred_element_type=jnp.float32) + eb2_ref[...]
    latent = jnp.maximum(latent, 0.0)

    # --- folded slot_proj ∘ slot_decoder[0]: bf16 weights, f32 accumulate ---
    z = jnp.dot(latent.astype(jnp.bfloat16), pw_ref[...],
                preferred_element_type=jnp.float32) + pb_ref[...]
    z = jnp.maximum(z, 0.0)                     # (bt, S*128), ReLU of layer 1

    dw2 = dw2_ref[...]
    db2 = db2_ref[...]
    hw = hw_ref[...]
    hb = hb_ref[...]

    # --- per-slot decoder layer 2 + merged lane-dense head (unrolled) -------
    n_s = pw_ref.shape[1] // DEC_H1             # static slots in this tile
    for s in range(n_s):
        zs = z[:, s * DEC_H1:(s + 1) * DEC_H1]              # (bt, 128)
        h2 = jnp.dot(zs, dw2, preferred_element_type=jnp.float32) + db2
        h2 = jnp.maximum(h2, 0.0)                            # (bt, 64)
        o = jnp.dot(h2, hw, preferred_element_type=jnp.float32) + hb
        out_ref[:, s * HEAD_PAD:(s + 1) * HEAD_PAD] = o      # (bt, 256)


# --------------------------------------------------------------------------
# pallas_call wrapper
# --------------------------------------------------------------------------
def _full_spec(a):
    n = a.ndim
    return pl.BlockSpec(a.shape, lambda *idx: (0,) * n)


def _tile_config():
    """(slots_per_tile, batch_tile_cap) per TPU generation.

    All choices fit the default scoped-VMEM limits (no flags):
      v7x : 105 slots (2 tiles -> one per TensorCore), ~20 MiB peak
      v6e :  70 slots (3 tiles),                        ~18 MiB peak
      else:  42 slots (5 tiles), conservative           ~ 8 MiB peak
    """
    try:
        kind = jax.devices()[0].device_kind.lower()
    except Exception:
        kind = ""
    if "v7" in kind:
        return 105, 32
    if "v6" in kind:
        return 70, 64
    return 42, 32


def menu_generator_forward(x, kp, slots_per_tile=None, batch_tile=None):
    """x: (B, 7) float32. Returns (food_logits (B,7,3,10,223), amounts (B,7,3,10))."""
    B = x.shape[0]
    S, bt_cap = _tile_config()
    if slots_per_tile is not None:
        S = slots_per_tile
    assert N_SLOTS % S == 0
    bt = batch_tile or (B if B <= bt_cap else bt_cap)

    # Pad batch to a multiple of the batch tile and features 7 -> 8.
    Bp = ((B + bt - 1) // bt) * bt
    xp = jnp.zeros((Bp, IN_PAD), x.dtype).at[:B, :IN_FEATS].set(x)

    n_slot_tiles = N_SLOTS // S
    n_batch_tiles = Bp // bt

    out = pl.pallas_call(
        _fused_kernel,
        out_shape=jax.ShapeDtypeStruct((Bp, N_SLOTS * HEAD_PAD), jnp.float32),
        # Slot-tile (weight) axis OUTER, batch axis INNER: the dominant pw1
        # stream is DMA'd from HBM exactly once regardless of batch size.
        grid=(n_slot_tiles, n_batch_tiles),
        in_specs=[
            pl.BlockSpec((bt, IN_PAD), lambda j, i: (i, 0)),
            _full_spec(kp["e_w1"]), _full_spec(kp["e_b1"]),
            _full_spec(kp["e_w2f"]), _full_spec(kp["e_b2f"]),
            pl.BlockSpec((HIDDEN, S * DEC_H1), lambda j, i: (0, j)),
            pl.BlockSpec((1, S * DEC_H1), lambda j, i: (0, j)),
            _full_spec(kp["d_w2"]), _full_spec(kp["d_b2"]),
            _full_spec(kp["head_w"]), _full_spec(kp["head_b"]),
        ],
        out_specs=pl.BlockSpec((bt, S * HEAD_PAD), lambda j, i: (i, j)),
        compiler_params=pltpu.CompilerParams(
            dimension_semantics=("parallel", "parallel")),
    )(xp, kp["e_w1"], kp["e_b1"], kp["e_w2f"], kp["e_b2f"],
      kp["pw1"], kp["pb1"], kp["d_w2"], kp["d_b2"],
      kp["head_w"], kp["head_b"])

    out = out[:B].reshape(B, N_SLOTS, HEAD_PAD)
    food_logits = out[..., :FOOD_VOCAB].reshape(B, 7, 3, 10, FOOD_VOCAB)
    amounts = jnp.maximum(out[..., FOOD_VOCAB], 0.0).reshape(B, 7, 3, 10)
    return food_logits, amounts


# --------------------------------------------------------------------------
# Parameters: PyTorch-equivalent init + exact folds for the kernel
# --------------------------------------------------------------------------
def init_params(key):
    def linear(k, fan_in, fan_out):
        kw, kb = jax.random.split(k)
        bound = 1.0 / jnp.sqrt(jnp.float32(fan_in))
        w = jax.random.uniform(kw, (fan_in, fan_out), jnp.float32, -bound, bound)
        b = jax.random.uniform(kb, (1, fan_out), jnp.float32, -bound, bound)
        return w, b

    keys = jax.random.split(key, 7)
    p = {}
    p["e_w1"], p["e_b1"] = linear(keys[0], IN_FEATS, 128)
    p["e_w2"], p["e_b2"] = linear(keys[1], 128, HIDDEN)
    p["p_w"], p["p_b"] = linear(keys[2], HIDDEN, N_SLOTS * HIDDEN)
    p["d_w1"], p["d_b1"] = linear(keys[3], HIDDEN, DEC_H1)
    p["d_w2"], p["d_b2"] = linear(keys[4], DEC_H1, DEC_H2)
    p["f_w"], p["f_b"] = linear(keys[5], DEC_H2, FOOD_VOCAB)
    p["a_w"], p["a_b"] = linear(keys[6], DEC_H2, 1)
    # BatchNorm1d(128) defaults (eval mode running stats / affine).
    p["bn_gamma"] = jnp.ones((1, 128), jnp.float32)
    p["bn_beta"] = jnp.zeros((1, 128), jnp.float32)
    p["bn_mean"] = jnp.zeros((1, 128), jnp.float32)
    p["bn_var"] = jnp.ones((1, 128), jnp.float32)
    return p


def prepare_kernel_params(p):
    """One-time parameter folds for the fused kernel:
       - input feature pad 7 -> 8 (zero row in e_w1),
       - eval-mode BatchNorm folded into the second encoder Linear,
       - slot_proj composed with slot_decoder's first Linear (exact), stored bf16,
       - food_id_head and amount_head merged into one zero-padded lane-dense head."""
    kp = {}
    # Padded first encoder Linear.
    kp["e_w1"] = jnp.zeros((IN_PAD, 128), jnp.float32).at[:IN_FEATS].set(p["e_w1"])
    kp["e_b1"] = p["e_b1"]
    # BN fold into the second encoder Linear.
    scale = p["bn_gamma"] / jnp.sqrt(p["bn_var"] + BN_EPS)      # (1, 128)
    shift = p["bn_beta"] - p["bn_mean"] * scale                 # (1, 128)
    kp["e_w2f"] = p["e_w2"] * scale.reshape(128, 1)
    kp["e_b2f"] = shift @ p["e_w2"] + p["e_b2"]
    # slot_proj (256 -> 210*256) composed with slot_decoder[0] (256 -> 128).
    pw3 = p["p_w"].reshape(HIDDEN, N_SLOTS, HIDDEN)             # (k, s, c)
    pw1 = jnp.einsum("ksc,cj->ksj", pw3, p["d_w1"])             # (k, s, j)
    kp["pw1"] = pw1.reshape(HIDDEN, N_SLOTS * DEC_H1).astype(jnp.bfloat16)
    pb3 = p["p_b"].reshape(N_SLOTS, HIDDEN)
    kp["pb1"] = (pb3 @ p["d_w1"] + p["d_b1"]).reshape(1, N_SLOTS * DEC_H1)
    # Second decoder Linear (tiny, VMEM-resident) stays f32.
    kp["d_w2"], kp["d_b2"] = p["d_w2"], p["d_b2"]
    # Merged, zero-padded lane-dense head.
    head_w = jnp.zeros((DEC_H2, HEAD_PAD), jnp.float32)
    head_w = head_w.at[:, :FOOD_VOCAB].set(p["f_w"])
    head_w = head_w.at[:, FOOD_VOCAB:FOOD_VOCAB + 1].set(p["a_w"])
    head_b = jnp.zeros((1, HEAD_PAD), jnp.float32)
    head_b = head_b.at[:, :FOOD_VOCAB].set(p["f_b"])
    head_b = head_b.at[:, FOOD_VOCAB:FOOD_VOCAB + 1].set(p["a_b"])
    kp["head_w"], kp["head_b"] = head_w, head_b
    return kp


# --------------------------------------------------------------------------
# References
# --------------------------------------------------------------------------
def _reference_forward(x, p):
    # Pure-JAX reference on the ORIGINAL (unfolded, full f32) parameters.
    B = x.shape[0]
    h = jnp.maximum(x @ p["e_w1"] + p["e_b1"], 0.0)
    scale = p["bn_gamma"] / jnp.sqrt(p["bn_var"] + BN_EPS)
    shift = p["bn_beta"] - p["bn_mean"] * scale
    h = h * scale + shift
    latent = jnp.maximum(h @ p["e_w2"] + p["e_b2"], 0.0)
    slot = (latent @ p["p_w"] + p["p_b"]).reshape(B * N_SLOTS, HIDDEN)
    d = jnp.maximum(slot @ p["d_w1"] + p["d_b1"], 0.0)
    d = jnp.maximum(d @ p["d_w2"] + p["d_b2"], 0.0)
    food = (d @ p["f_w"] + p["f_b"]).reshape(B, 7, 3, 10, FOOD_VOCAB)
    amt = jnp.maximum(d @ p["a_w"] + p["a_b"], 0.0).reshape(B, 7, 3, 10)
    return food, amt


def _emulated_forward(x, kp):
    # Pure-JAX reference replicating the kernel math (folded params, bf16 pw1).
    B = x.shape[0]
    xp = jnp.zeros((B, IN_PAD), x.dtype).at[:, :IN_FEATS].set(x)
    h = jnp.maximum(xp @ kp["e_w1"] + kp["e_b1"], 0.0)
    latent = jnp.maximum(h @ kp["e_w2f"] + kp["e_b2f"], 0.0)
    z = jnp.dot(latent.astype(jnp.bfloat16), kp["pw1"],
                preferred_element_type=jnp.float32) + kp["pb1"]
    z = jnp.maximum(z, 0.0).reshape(B * N_SLOTS, DEC_H1)
    h2 = jnp.maximum(z @ kp["d_w2"] + kp["d_b2"], 0.0)
    o = (h2 @ kp["head_w"] + kp["head_b"]).reshape(B, N_SLOTS, HEAD_PAD)
    food = o[..., :FOOD_VOCAB].reshape(B, 7, 3, 10, FOOD_VOCAB)
    amt = jnp.maximum(o[..., FOOD_VOCAB], 0.0).reshape(B, 7, 3, 10)
    return food, amt


if __name__ == "__main__":
    key = jax.random.PRNGKey(0)
    kx, kparam = jax.random.split(key)
    B = 2
    x = jax.random.normal(kx, (B, IN_FEATS), dtype=jnp.float32)

    params = init_params(kparam)
    kernel_params = prepare_kernel_params(params)

    fwd = jax.jit(menu_generator_forward)
    food_logits, amounts = fwd(x, kernel_params)
    jax.block_until_ready((food_logits, amounts))

    assert food_logits.shape == (B, 7, 3, 10, FOOD_VOCAB)
    assert amounts.shape == (B, 7, 3, 10)

    # Tight check: kernel vs. same-precision (bf16-folded) emulation.
    emu_food, emu_amt = _emulated_forward(x, kernel_params)
    assert jnp.allclose(food_logits, emu_food, atol=5e-3, rtol=5e-3), \
        float(jnp.max(jnp.abs(food_logits - emu_food)))
    assert jnp.allclose(amounts, emu_amt, atol=5e-3, rtol=5e-3), \
        float(jnp.max(jnp.abs(amounts - emu_amt)))

    # Loose check: bf16 weight quantization vs. the full-f32 original model.
    ref_food, ref_amt = _reference_forward(x, params)
    assert jnp.allclose(food_logits, ref_food, atol=5e-2, rtol=5e-2), \
        float(jnp.max(jnp.abs(food_logits - ref_food)))
    assert jnp.allclose(amounts, ref_amt, atol=5e-2, rtol=5e-2), \
        float(jnp.max(jnp.abs(amounts - ref_amt)))

    print("KERNEL_OK")
</pallas_src>

<mosaic_0001>
module attributes {stable_mosaic.version = 11 : i64} {
  func.func @_fused_kernel(%arg0: i32, %arg1: i32, %arg2: memref<2x8xf32, #tpu.memory_space<vmem>>, %arg3: memref<8x128xf32, #tpu.memory_space<vmem>>, %arg4: memref<1x128xf32, #tpu.memory_space<vmem>>, %arg5: memref<128x256xf32, #tpu.memory_space<vmem>>, %arg6: memref<1x256xf32, #tpu.memory_space<vmem>>, %arg7: memref<256x5376xbf16, #tpu.memory_space<vmem>>, %arg8: memref<1x5376xf32, #tpu.memory_space<vmem>>, %arg9: memref<128x64xf32, #tpu.memory_space<vmem>>, %arg10: memref<1x64xf32, #tpu.memory_space<vmem>>, %arg11: memref<64x256xf32, #tpu.memory_space<vmem>>, %arg12: memref<1x256xf32, #tpu.memory_space<vmem>>, %arg13: memref<2x10752xf32, #tpu.memory_space<vmem>>) attributes {dimension_semantics = [#tpu.dimension_semantics<parallel>, #tpu.dimension_semantics<parallel>], iteration_bounds = array<i64: 5, 1>, scalar_prefetch = 0 : i64, scratch_operands = 0 : i64, tpu.core_type = #tpu.core_type<tc>, window_params = [{transform_indices = @transform_0, window_bounds = array<i64: 2, 8>}, {pipeline_mode = #tpu.pipeline_mode<synchronous>, transform_indices = @transform_1, window_bounds = array<i64: 8, 128>}, {pipeline_mode = #tpu.pipeline_mode<synchronous>, transform_indices = @transform_2, window_bounds = array<i64: 1, 128>}, {pipeline_mode = #tpu.pipeline_mode<synchronous>, transform_indices = @transform_3, window_bounds = array<i64: 128, 256>}, {pipeline_mode = #tpu.pipeline_mode<synchronous>, transform_indices = @transform_4, window_bounds = array<i64: 1, 256>}, {transform_indices = @transform_5, window_bounds = array<i64: 256, 5376>}, {transform_indices = @transform_6, window_bounds = array<i64: 1, 5376>}, {pipeline_mode = #tpu.pipeline_mode<synchronous>, transform_indices = @transform_7, window_bounds = array<i64: 128, 64>}, {pipeline_mode = #tpu.pipeline_mode<synchronous>, transform_indices = @transform_8, window_bounds = array<i64: 1, 64>}, {pipeline_mode = #tpu.pipeline_mode<synchronous>, transform_indices = @transform_9, window_bounds = array<i64: 64, 256>}, {pipeline_mode = #tpu.pipeline_mode<synchronous>, transform_indices = @transform_10, window_bounds = array<i64: 1, 256>}, {transform_indices = @transform_11, window_bounds = array<i64: 2, 10752>}]} {
    %c0 = arith.constant 0 : index
    %c0_0 = arith.constant 0 : index
    %0 = vector.load %arg2[%c0, %c0_0] : memref<2x8xf32, #tpu.memory_space<vmem>>, vector<2x8xf32>
    %c0_1 = arith.constant 0 : index
    %c0_2 = arith.constant 0 : index
    %1 = vector.load %arg3[%c0_1, %c0_2] : memref<8x128xf32, #tpu.memory_space<vmem>>, vector<8x128xf32>
    %cst = arith.constant dense<0.000000e+00> : vector<2x128xf32>
    %2 = tpu.matmul %0, %1, %cst {dimension_numbers = #tpu.dot_dimension_numbers<[1], [0], [0], [1], [0, 0, 1, 1], [], []>} : vector<2x8xf32>, vector<8x128xf32>, vector<2x128xf32> -> vector<2x128xf32>
    %c0_3 = arith.constant 0 : index
    %c0_4 = arith.constant 0 : index
    %3 = vector.load %arg4[%c0_3, %c0_4] : memref<1x128xf32, #tpu.memory_space<vmem>>, vector<1x128xf32>
    %4 = vector.broadcast %3 : vector<1x128xf32> to vector<2x128xf32>
    %5 = arith.addf %2, %4 : vector<2x128xf32>
    %cst_5 = arith.constant 0.000000e+00 : f32
    %6 = vector.broadcast %cst_5 : f32 to vector<2x128xf32>
    %7 = arith.maximumf %5, %6 : vector<2x128xf32>
    %c0_6 = arith.constant 0 : index
    %c0_7 = arith.constant 0 : index
    %8 = vector.load %arg5[%c0_6, %c0_7] : memref<128x256xf32, #tpu.memory_space<vmem>>, vector<128x256xf32>
    %cst_8 = arith.constant dense<0.000000e+00> : vector<2x256xf32>
    %9 = tpu.matmul %7, %8, %cst_8 {dimension_numbers = #tpu.dot_dimension_numbers<[1], [0], [0], [1], [0, 0, 1, 1], [], []>} : vector<2x128xf32>, vector<128x256xf32>, vector<2x256xf32> -> vector<2x256xf32>
    %c0_9 = arith.constant 0 : index
    %c0_10 = arith.constant 0 : index
    %10 = vector.load %arg6[%c0_9, %c0_10] : memref<1x256xf32, #tpu.memory_space<vmem>>, vector<1x256xf32>
    %11 = vector.broadcast %10 : vector<1x256xf32> to vector<2x256xf32>
    %12 = arith.addf %9, %11 : vector<2x256xf32>
    %cst_11 = arith.constant 0.000000e+00 : f32
    %13 = vector.broadcast %cst_11 : f32 to vector<2x256xf32>
    %14 = arith.maximumf %12, %13 : vector<2x256xf32>
    %15 = arith.truncf %14 : vector<2x256xf32> to vector<2x256xbf16>
    %c0_12 = arith.constant 0 : index
    %c0_13 = arith.constant 0 : index
    %16 = vector.load %arg7[%c0_12, %c0_13] : memref<256x5376xbf16, #tpu.memory_space<vmem>>, vector<256x5376xbf16>
    %cst_14 = arith.constant dense<0.000000e+00> : vector<2x5376xf32>
    %17 = tpu.matmul %15, %16, %cst_14 {dimension_numbers = #tpu.dot_dimension_numbers<[1], [0], [0], [1], [0, 0, 1, 1], [], []>} : vector<2x256xbf16>, vector<256x5376xbf16>, vector<2x5376xf32> -> vector<2x5376xf32>
    %c0_15 = arith.constant 0 : index
    %c0_16 = arith.constant 0 : index
    %18 = vector.load %arg8[%c0_15, %c0_16] : memref<1x5376xf32, #tpu.memory_space<vmem>>, vector<1x5376xf32>
    %19 = vector.broadcast %18 : vector<1x5376xf32> to vector<2x5376xf32>
    %20 = arith.addf %17, %19 : vector<2x5376xf32>
    %cst_17 = arith.constant 0.000000e+00 : f32
    %21 = vector.broadcast %cst_17 : f32 to vector<2x5376xf32>
    %22 = arith.maximumf %20, %21 : vector<2x5376xf32>
    %c0_18 = arith.constant 0 : index
    %c0_19 = arith.constant 0 : index
    %23 = vector.load %arg9[%c0_18, %c0_19] : memref<128x64xf32, #tpu.memory_space<vmem>>, vector<128x64xf32>
    %c0_20 = arith.constant 0 : index
    %c0_21 = arith.constant 0 : index
    %24 = vector.load %arg10[%c0_20, %c0_21] : memref<1x64xf32, #tpu.memory_space<vmem>>, vector<1x64xf32>
    %c0_22 = arith.constant 0 : index
    %c0_23 = arith.constant 0 : index
    %25 = vector.load %arg11[%c0_22, %c0_23] : memref<64x256xf32, #tpu.memory_space<vmem>>, vector<64x256xf32>
    %c0_24 = arith.constant 0 : index
    %c0_25 = arith.constant 0 : index
    %26 = vector.load %arg12[%c0_24, %c0_25] : memref<1x256xf32, #tpu.memory_space<vmem>>, vector<1x256xf32>
    %27 = vector.extract_strided_slice %22 {offsets = [0, 0], sizes = [2, 128], strides = [1, 1]} : vector<2x5376xf32> to vector<2x128xf32>
    %cst_26 = arith.constant dense<0.000000e+00> : vector<2x64xf32>
    %28 = tpu.matmul %27, %23, %cst_26 {dimension_numbers = #tpu.dot_dimension_numbers<[1], [0], [0], [1], [0, 0, 1, 1], [], []>} : vector<2x128xf32>, vector<128x64xf32>, vector<2x64xf32> -> vector<2x64xf32>
    %29 = vector.broadcast %24 : vector<1x64xf32> to vector<2x64xf32>
    %30 = arith.addf %28, %29 : vector<2x64xf32>
    %cst_27 = arith.constant 0.000000e+00 : f32
    %31 = vector.broadcast %cst_27 : f32 to vector<2x64xf32>
    %32 = arith.maximumf %30, %31 : vector<2x64xf32>
    %cst_28 = arith.constant dense<0.000000e+00> : vector<2x256xf32>
    %33 = tpu.matmul %32, %25, %cst_28 {dimension_numbers = #tpu.dot_dimension_numbers<[1], [0], [0], [1], [0, 0, 1, 1], [], []>} : vector<2x64xf32>, vector<64x256xf32>, vector<2x256xf32> -> vector<2x256xf32>
    %34 = vector.broadcast %26 : vector<1x256xf32> to vector<2x256xf32>
    %35 = arith.addf %33, %34 : vector<2x256xf32>
    %c0_29 = arith.constant 0 : index
    %c0_30 = arith.constant 0 : index
    %36 = vector.load %arg13[%c0_29, %c0_30] : memref<2x10752xf32, #tpu.memory_space<vmem>>, vector<2x256xf32>
    tpu.vector_store %arg13[%c0_29, %c0_30], %35 {strides = array<i32>} : memref<2x10752xf32, #tpu.memory_space<vmem>>, vector<2x256xf32>,
    %37 = vector.extract_strided_slice %22 {offsets = [0, 128], sizes = [2, 128], strides = [1, 1]} : vector<2x5376xf32> to vector<2x128xf32>
    %cst_31 = arith.constant dense<0.000000e+00> : vector<2x64xf32>
    %38 = tpu.matmul %37, %23, %cst_31 {dimension_numbers = #tpu.dot_dimension_numbers<[1], [0], [0], [1], [0, 0, 1, 1], [], []>} : vector<2x128xf32>, vector<128x64xf32>, vector<2x64xf32> -> vector<2x64xf32>
    %39 = vector.broadcast %24 : vector<1x64xf32> to vector<2x64xf32>
    %40 = arith.addf %38, %39 : vector<2x64xf32>
    %cst_32 = arith.constant 0.000000e+00 : f32
    %41 = vector.broadcast %cst_32 : f32 to vector<2x64xf32>
    %42 = arith.maximumf %40, %41 : vector<2x64xf32>
    %cst_33 = arith.constant dense<0.000000e+00> : vector<2x256xf32>
    %43 = tpu.matmul %42, %25, %cst_33 {dimension_numbers = #tpu.dot_dimension_numbers<[1], [0], [0], [1], [0, 0, 1, 1], [], []>} : vector<2x64xf32>, vector<64x256xf32>, vector<2x256xf32> -> vector<2x256xf32>
    %44 = vector.broadcast %26 : vector<1x256xf32> to vector<2x256xf32>
    %45 = arith.addf %43, %44 : vector<2x256xf32>
    %c0_34 = arith.constant 0 : index
    %c256 = arith.constant 256 : index
    %46 = vector.load %arg13[%c0_34, %c256] : memref<2x10752xf32, #tpu.memory_space<vmem>>, vector<2x256xf32>
    tpu.vector_store %arg13[%c0_34, %c256], %45 {strides = array<i32>} : memref<2x10752xf32, #tpu.memory_space<vmem>>, vector<2x256xf32>,
    %47 = vector.extract_strided_slice %22 {offsets = [0, 256], sizes = [2, 128], strides = [1, 1]} : vector<2x5376xf32> to vector<2x128xf32>
    %cst_35 = arith.constant dense<0.000000e+00> : vector<2x64xf32>
    %48 = tpu.matmul %47, %23, %cst_35 {dimension_numbers = #tpu.dot_dimension_numbers<[1], [0], [0], [1], [0, 0, 1, 1], [], []>} : vector<2x128xf32>, vector<128x64xf32>, vector<2x64xf32> -> vector<2x64xf32>
    %49 = vector.broadcast %24 : vector<1x64xf32> to vector<2x64xf32>
    %50 = arith.addf %48, %49 : vector<2x64xf32>
    %cst_36 = arith.constant 0.000000e+00 : f32
    %51 = vector.broadcast %cst_36 : f32 to vector<2x64xf32>
    %52 = arith.maximumf %50, %51 : vector<2x64xf32>
    %cst_37 = arith.constant dense<0.000000e+00> : vector<2x256xf32>
    %53 = tpu.matmul %52, %25, %cst_37 {dimension_numbers = #tpu.dot_dimension_numbers<[1], [0], [0], [1], [0, 0, 1, 1], [], []>} : vector<2x64xf32>, vector<64x256xf32>, vector<2x256xf32> -> vector<2x256xf32>
    %54 = vector.broadcast %26 : vector<1x256xf32> to vector<2x256xf32>
    %55 = arith.addf %53, %54 : vector<2x256xf32>
    %c0_38 = arith.constant 0 : index
    %c512 = arith.constant 512 : index
    %56 = vector.load %arg13[%c0_38, %c512] : memref<2x10752xf32, #tpu.memory_space<vmem>>, vector<2x256xf32>
    tpu.vector_store %arg13[%c0_38, %c512], %55 {strides = array<i32>} : memref<2x10752xf32, #tpu.memory_space<vmem>>, vector<2x256xf32>,
    %57 = vector.extract_strided_slice %22 {offsets = [0, 384], sizes = [2, 128], strides = [1, 1]} : vector<2x5376xf32> to vector<2x128xf32>
    %cst_39 = arith.constant dense<0.000000e+00> : vector<2x64xf32>
    %58 = tpu.matmul %57, %23, %cst_39 {dimension_numbers = #tpu.dot_dimension_numbers<[1], [0], [0], [1], [0, 0, 1, 1], [], []>} : vector<2x128xf32>, vector<128x64xf32>, vector<2x64xf32> -> vector<2x64xf32>
    %59 = vector.broadcast %24 : vector<1x64xf32> to vector<2x64xf32>
    %60 = arith.addf %58, %59 : vector<2x64xf32>
    %cst_40 = arith.constant 0.000000e+00 : f32
    %61 = vector.broadcast %cst_40 : f32 to vector<2x64xf32>
    %62 = arith.maximumf %60, %61 : vector<2x64xf32>
    %cst_41 = arith.constant dense<0.000000e+00> : vector<2x256xf32>
    %63 = tpu.matmul %62, %25, %cst_41 {dimension_numbers = #tpu.dot_dimension_numbers<[1], [0], [0], [1], [0, 0, 1, 1], [], []>} : vector<2x64xf32>, vector<64x256xf32>, vector<2x256xf32> -> vector<2x256xf32>
    %64 = vector.broadcast %26 : vector<1x256xf32> to vector<2x256xf32>
    %65 = arith.addf %63, %64 : vector<2x256xf32>
    %c0_42 = arith.constant 0 : index
    %c768 = arith.constant 768 : index
    %66 = vector.load %arg13[%c0_42, %c768] : memref<2x10752xf32, #tpu.memory_space<vmem>>, vector<2x256xf32>
    tpu.vector_store %arg13[%c0_42, %c768], %65 {strides = array<i32>} : memref<2x10752xf32, #tpu.memory_space<vmem>>, vector<2x256xf32>,
    %67 = vector.extract_strided_slice %22 {offsets = [0, 512], sizes = [2, 128], strides = [1, 1]} : vector<2x5376xf32> to vector<2x128xf32>
    %cst_43 = arith.constant dense<0.000000e+00> : vector<2x64xf32>
    %68 = tpu.matmul %67, %23, %cst_43 {dimension_numbers = #tpu.dot_dimension_numbers<[1], [0], [0], [1], [0, 0, 1, 1], [], []>} : vector<2x128xf32>, vector<128x64xf32>, vector<2x64xf32> -> vector<2x64xf32>
    %69 = vector.broadcast %24 : vector<1x64xf32> to vector<2x64xf32>
    %70 = arith.addf %68, %69 : vector<2x64xf32>
    %cst_44 = arith.constant 0.000000e+00 : f32
    %71 = vector.broadcast %cst_44 : f32 to vector<2x64xf32>
    %72 = arith.maximumf %70, %71 : vector<2x64xf32>
    %cst_45 = arith.constant dense<0.000000e+00> : vector<2x256xf32>
    %73 = tpu.matmul %72, %25, %cst_45 {dimension_numbers = #tpu.dot_dimension_numbers<[1], [0], [0], [1], [0, 0, 1, 1], [], []>} : vector<2x64xf32>, vector<64x256xf32>, vector<2x256xf32> -> vector<2x256xf32>
    %74 = vector.broadcast %26 : vector<1x256xf32> to vector<2x256xf32>
    %75 = arith.addf %73, %74 : vector<2x256xf32>
    %c0_46 = arith.constant 0 : index
    %c1024 = arith.constant 1024 : index
    %76 = vector.load %arg13[%c0_46, %c1024] : memref<2x10752xf32, #tpu.memory_space<vmem>>, vector<2x256xf32>
    tpu.vector_store %arg13[%c0_46, %c1024], %75 {strides = array<i32>} : memref<2x10752xf32, #tpu.memory_space<vmem>>, vector<2x256xf32>,
    %77 = vector.extract_strided_slice %22 {offsets = [0, 640], sizes = [2, 128], strides = [1, 1]} : vector<2x5376xf32> to vector<2x128xf32>
    %cst_47 = arith.constant dense<0.000000e+00> : vector<2x64xf32>
    %78 = tpu.matmul %77, %23, %cst_47 {dimension_numbers = #tpu.dot_dimension_numbers<[1], [0], [0], [1], [0, 0, 1, 1], [], []>} : vector<2x128xf32>, vector<128x64xf32>, vector<2x64xf32> -> vector<2x64xf32>
    %79 = vector.broadcast %24 : vector<1x64xf32> to vector<2x64xf32>
    %80 = arith.addf %78, %79 : vector<2x64xf32>
    %cst_48 = arith.constant 0.000000e+00 : f32
    %81 = vector.broadcast %cst_48 : f32 to vector<2x64xf32>
    %82 = arith.maximumf %80, %81 : vector<2x64xf32>
    %cst_49 = arith.constant dense<0.000000e+00> : vector<2x256xf32>
    %83 = tpu.matmul %82, %25, %cst_49 {dimension_numbers = #tpu.dot_dimension_numbers<[1], [0], [0], [1], [0, 0, 1, 1], [], []>} : vector<2x64xf32>, vector<64x256xf32>, vector<2x256xf32> -> vector<2x256xf32>
    %84 = vector.broadcast %26 : vector<1x256xf32> to vector<2x256xf32>
    %85 = arith.addf %83, %84 : vector<2x256xf32>
    %c0_50 = arith.constant 0 : index
    %c1280 = arith.constant 1280 : index
    %86 = vector.load %arg13[%c0_50, %c1280] : memref<2x10752xf32, #tpu.memory_space<vmem>>, vector<2x256xf32>
    tpu.vector_store %arg13[%c0_50, %c1280], %85 {strides = array<i32>} : memref<2x10752xf32, #tpu.memory_space<vmem>>, vector<2x256xf32>,
    %87 = vector.extract_strided_slice %22 {offsets = [0, 768], sizes = [2, 128], strides = [1, 1]} : vector<2x5376xf32> to vector<2x128xf32>
    %cst_51 = arith.constant dense<0.000000e+00> : vector<2x64xf32>
    %88 = tpu.matmul %87, %23, %cst_51 {dimension_numbers = #tpu.dot_dimension_numbers<[1], [0], [0], [1], [0, 0, 1, 1], [], []>} : vector<2x128xf32>, vector<128x64xf32>, vector<2x64xf32> -> vector<2x64xf32>
    %89 = vector.broadcast %24 : vector<1x64xf32> to vector<2x64xf32>
    %90 = arith.addf %88, %89 : vector<2x64xf32>
    %cst_52 = arith.constant 0.000000e+00 : f32
    %91 = vector.broadcast %cst_52 : f32 to vector<2x64xf32>
    %92 = arith.maximumf %90, %91 : vector<2x64xf32>
    %cst_53 = arith.constant dense<0.000000e+00> : vector<2x256xf32>
    %93 = tpu.matmul %92, %25, %cst_53 {dimension_numbers = #tpu.dot_dimension_numbers<[1], [0], [0], [1], [0, 0, 1, 1], [], []>} : vector<2x64xf32>, vector<64x256xf32>, vector<2x256xf32> -> vector<2x256xf32>
    %94 = vector.broadcast %26 : vector<1x256xf32> to vector<2x256xf32>
    %95 = arith.addf %93, %94 : vector<2x256xf32>
    %c0_54 = arith.constant 0 : index
    %c1536 = arith.constant 1536 : index
    %96 = vector.load %arg13[%c0_54, %c1536] : memref<2x10752xf32, #tpu.memory_space<vmem>>, vector<2x256xf32>
    tpu.vector_store %arg13[%c0_54, %c1536], %95 {strides = array<i32>} : memref<2x10752xf32, #tpu.memory_space<vmem>>, vector<2x256xf32>,
    %97 = vector.extract_strided_slice %22 {offsets = [0, 896], sizes = [2, 128], strides = [1, 1]} : vector<2x5376xf32> to vector<2x128xf32>
    %cst_55 = arith.constant dense<0.000000e+00> : vector<2x64xf32>
    %98 = tpu.matmul %97, %23, %cst_55 {dimension_numbers = #tpu.dot_dimension_numbers<[1], [0], [0], [1], [0, 0, 1, 1], [], []>} : vector<2x128xf32>, vector<128x64xf32>, vector<2x64xf32> -> vector<2x64xf32>
    %99 = vector.broadcast %24 : vector<1x64xf32> to vector<2x64xf32>
    %100 = arith.addf %98, %99 : vector<2x64xf32>
    %cst_56 = arith.constant 0.000000e+00 : f32
    %101 = vector.broadcast %cst_56 : f32 to vector<2x64xf32>
    %102 = arith.maximumf %100, %101 : vector<2x64xf32>
    %cst_57 = arith.constant dense<0.000000e+00> : vector<2x256xf32>
    %103 = tpu.matmul %102, %25, %cst_57 {dimension_numbers = #tpu.dot_dimension_numbers<[1], [0], [0], [1], [0, 0, 1, 1], [], []>} : vector<2x64xf32>, vector<64x256xf32>, vector<2x256xf32> -> vector<2x256xf32>
    %104 = vector.broadcast %26 : vector<1x256xf32> to vector<2x256xf32>
    %105 = arith.addf %103, %104 : vector<2x256xf32>
    %c0_58 = arith.constant 0 : index
    %c1792 = arith.constant 1792 : index
    %106 = vector.load %arg13[%c0_58, %c1792] : memref<2x10752xf32, #tpu.memory_space<vmem>>, vector<2x256xf32>
    tpu.vector_store %arg13[%c0_58, %c1792], %105 {strides = array<i32>} : memref<2x10752xf32, #tpu.memory_space<vmem>>, vector<2x256xf32>,
    %107 = vector.extract_strided_slice %22 {offsets = [0, 1024], sizes = [2, 128], strides = [1, 1]} : vector<2x5376xf32> to vector<2x128xf32>
    %cst_59 = arith.constant dense<0.000000e+00> : vector<2x64xf32>
    %108 = tpu.matmul %107, %23, %cst_59 {dimension_numbers = #tpu.dot_dimension_numbers<[1], [0], [0], [1], [0, 0, 1, 1], [], []>} : vector<2x128xf32>, vector<128x64xf32>, vector<2x64xf32> -> vector<2x64xf32>
    %109 = vector.broadcast %24 : vector<1x64xf32> to vector<2x64xf32>
    %110 = arith.addf %108, %109 : vector<2x64xf32>
    %cst_60 = arith.constant 0.000000e+00 : f32
    %111 = vector.broadcast %cst_60 : f32 to vector<2x64xf32>
    %112 = arith.maximumf %110, %111 : vector<2x64xf32>
    %cst_61 = arith.constant dense<0.000000e+00> : vector<2x256xf32>
    %113 = tpu.matmul %112, %25, %cst_61 {dimension_numbers = #tpu.dot_dimension_numbers<[1], [0], [0], [1], [0, 0, 1, 1], [], []>} : vector<2x64xf32>, vector<64x256xf32>, vector<2x256xf32> -> vector<2x256xf32>
    %114 = vector.broadcast %26 : vector<1x256xf32> to vector<2x256xf32>
    %115 = arith.addf %113, %114 : vector<2x256xf32>
    %c0_62 = arith.constant 0 : index
    %c2048 = arith.constant 2048 : index
    %116 = vector.load %arg13[%c0_62, %c2048] : memref<2x10752xf32, #tpu.memory_space<vmem>>, vector<2x256xf32>
    tpu.vector_store %arg13[%c0_62, %c2048], %115 {strides = array<i32>} : memref<2x10752xf32, #tpu.memory_space<vmem>>, vector<2x256xf32>,
    %117 = vector.extract_strided_slice %22 {offsets = [0, 1152], sizes = [2, 128], strides = [1, 1]} : vector<2x5376xf32> to vector<2x128xf32>
    %cst_63 = arith.constant dense<0.000000e+00> : vector<2x64xf32>
    %118 = tpu.matmul %117, %23, %cst_63 {dimension_numbers = #tpu.dot_dimension_numbers<[1], [0], [0], [1], [0, 0, 1, 1], [], []>} : vector<2x128xf32>, vector<128x64xf32>, vector<2x64xf32> -> vector<2x64xf32>
    %119 = vector.broadcast %24 : vector<1x64xf32> to vector<2x64xf32>
    %120 = arith.addf %118, %119 : vector<2x64xf32>
    %cst_64 = arith.constant 0.000000e+00 : f32
    %121 = vector.broadcast %cst_64 : f32 to vector<2x64xf32>
    %122 = arith.maximumf %120, %121 : vector<2x64xf32>
    %cst_65 = arith.constant dense<0.000000e+00> : vector<2x256xf32>
    %123 = tpu.matmul %122, %25, %cst_65 {dimension_numbers = #tpu.dot_dimension_numbers<[1], [0], [0], [1], [0, 0, 1, 1], [], []>} : vector<2x64xf32>, vector<64x256xf32>, vector<2x256xf32> -> vector<2x256xf32>
    %124 = vector.broadcast %26 : vector<1x256xf32> to vector<2x256xf32>
    %125 = arith.addf %123, %124 : vector<2x256xf32>
    %c0_66 = arith.constant 0 : index
    %c2304 = arith.constant 2304 : index
    %126 = vector.load %arg13[%c0_66, %c2304] : memref<2x10752xf32, #tpu.memory_space<vmem>>, vector<2x256xf32>
    tpu.vector_store %arg13[%c0_66, %c2304], %125 {strides = array<i32>} : memref<2x10752xf32, #tpu.memory_space<vmem>>, vector<2x256xf32>,
    %127 = vector.extract_strided_slice %22 {offsets = [0, 1280], sizes = [2, 128], strides = [1, 1]} : vector<2x5376xf32> to vector<2x128xf32>
    %cst_67 = arith.constant dense<0.000000e+00> : vector<2x64xf32>
    %128 = tpu.matmul %127, %23, %cst_67 {dimension_numbers = #tpu.dot_dimension_numbers<[1], [0], [0], [1], [0, 0, 1, 1], [], []>} : vector<2x128xf32>, vector<128x64xf32>, vector<2x64xf32> -> vector<2x64xf32>
    %129 = vector.broadcast %24 : vector<1x64xf32> to vector<2x64xf32>
    %130 = arith.addf %128, %129 : vector<2x64xf32>
    %cst_68 = arith.constant 0.000000e+00 : f32
    %131 = vector.broadcast %cst_68 : f32 to vector<2x64xf32>
    %132 = arith.maximumf %130, %131 : vector<2x64xf32>
    %cst_69 = arith.constant dense<0.000000e+00> : vector<2x256xf32>
    %133 = tpu.matmul %132, %25, %cst_69 {dimension_numbers = #tpu.dot_dimension_numbers<[1], [0], [0], [1], [0, 0, 1, 1], [], []>} : vector<2x64xf32>, vector<64x256xf32>, vector<2x256xf32> -> vector<2x256xf32>
    %134 = vector.broadcast %26 : vector<1x256xf32> to vector<2x256xf32>
    %135 = arith.addf %133, %134 : vector<2x256xf32>
    %c0_70 = arith.constant 0 : index
    %c2560 = arith.constant 2560 : index
    %136 = vector.load %arg13[%c0_70, %c2560] : memref<2x10752xf32, #tpu.memory_space<vmem>>, vector<2x256xf32>
    tpu.vector_store %arg13[%c0_70, %c2560], %135 {strides = array<i32>} : memref<2x10752xf32, #tpu.memory_space<vmem>>, vector<2x256xf32>,
    %137 = vector.extract_strided_slice %22 {offsets = [0, 1408], sizes = [2, 128], strides = [1, 1]} : vector<2x5376xf32> to vector<2x128xf32>
    %cst_71 = arith.constant dense<0.000000e+00> : vector<2x64xf32>
    %138 = tpu.matmul %137, %23, %cst_71 {dimension_numbers = #tpu.dot_dimension_numbers<[1], [0], [0], [1], [0, 0, 1, 1], [], []>} : vector<2x128xf32>, vector<128x64xf32>, vector<2x64xf32> -> vector<2x64xf32>
    %139 = vector.broadcast %24 : vector<1x64xf32> to vector<2x64xf32>
    %140 = arith.addf %138, %139 : vector<2x64xf32>
    %cst_72 = arith.constant 0.000000e+00 : f32
    %141 = vector.broadcast %cst_72 : f32 to vector<2x64xf32>
    %142 = arith.maximumf %140, %141 : vector<2x64xf32>
    %cst_73 = arith.constant dense<0.000000e+00> : vector<2x256xf32>
    %143 = tpu.matmul %142, %25, %cst_73 {dimension_numbers = #tpu.dot_dimension_numbers<[1], [0], [0], [1], [0, 0, 1, 1], [], []>} : vector<2x64xf32>, vector<64x256xf32>, vector<2x256xf32> -> vector<2x256xf32>
    %144 = vector.broadcast %26 : vector<1x256xf32> to vector<2x256xf32>
    %145 = arith.addf %143, %144 : vector<2x256xf32>
    %c0_74 = arith.constant 0 : index
    %c2816 = arith.constant 2816 : index
    %146 = vector.load %arg13[%c0_74, %c2816] : memref<2x10752xf32, #tpu.memory_space<vmem>>, vector<2x256xf32>
    tpu.vector_store %arg13[%c0_74, %c2816], %145 {strides = array<i32>} : memref<2x10752xf32, #tpu.memory_space<vmem>>, vector<2x256xf32>,
    %147 = vector.extract_strided_slice %22 {offsets = [0, 1536], sizes = [2, 128], strides = [1, 1]} : vector<2x5376xf32> to vector<2x128xf32>
    %cst_75 = arith.constant dense<0.000000e+00> : vector<2x64xf32>
    %148 = tpu.matmul %147, %23, %cst_75 {dimension_numbers = #tpu.dot_dimension_numbers<[1], [0], [0], [1], [0, 0, 1, 1], [], []>} : vector<2x128xf32>, vector<128x64xf32>, vector<2x64xf32> -> vector<2x64xf32>
    %149 = vector.broadcast %24 : vector<1x64xf32> to vector<2x64xf32>
    %150 = arith.addf %148, %149 : vector<2x64xf32>
    %cst_76 = arith.constant 0.000000e+00 : f32
    %151 = vector.broadcast %cst_76 : f32 to vector<2x64xf32>
    %152 = arith.maximumf %150, %151 : vector<2x64xf32>
    %cst_77 = arith.constant dense<0.000000e+00> : vector<2x256xf32>
    %153 = tpu.matmul %152, %25, %cst_77 {dimension_numbers = #tpu.dot_dimension_numbers<[1], [0], [0], [1], [0, 0, 1, 1], [], []>} : vector<2x64xf32>, vector<64x256xf32>, vector<2x256xf32> -> vector<2x256xf32>
    %154 = vector.broadcast %26 : vector<1x256xf32> to vector<2x256xf32>
    %155 = arith.addf %153, %154 : vector<2x256xf32>
    %c0_78 = arith.constant 0 : index
    %c3072 = arith.constant 3072 : index
    %156 = vector.load %arg13[%c0_78, %c3072] : memref<2x10752xf32, #tpu.memory_space<vmem>>, vector<2x256xf32>
    tpu.vector_store %arg13[%c0_78, %c3072], %155 {strides = array<i32>} : memref<2x10752xf32, #tpu.memory_space<vmem>>, vector<2x256xf32>,
    %157 = vector.extract_strided_slice %22 {offsets = [0, 1664], sizes = [2, 128], strides = [1, 1]} : vector<2x5376xf32> to vector<2x128xf32>
    %cst_79 = arith.constant dense<0.000000e+00> : vector<2x64xf32>
    %158 = tpu.matmul %157, %23, %cst_79 {dimension_numbers = #tpu.dot_dimension_numbers<[1], [0], [0], [1], [0, 0, 1, 1], [], []>} : vector<2x128xf32>, vector<128x64xf32>, vector<2x64xf32> -> vector<2x64xf32>
    %159 = vector.broadcast %24 : vector<1x64xf32> to vector<2x64xf32>
    %160 = arith.addf %158, %159 : vector<2x64xf32>
    %cst_80 = arith.constant 0.000000e+00 : f32
    %161 = vector.broadcast %cst_80 : f32 to vector<2x64xf32>
    %162 = arith.maximumf %160, %161 : vector<2x64xf32>
    %cst_81 = arith.constant dense<0.000000e+00> : vector<2x256xf32>
    %163 = tpu.matmul %162, %25, %cst_81 {dimension_numbers = #tpu.dot_dimension_numbers<[1], [0], [0], [1], [0, 0, 1, 1], [], []>} : vector<2x64xf32>, vector<64x256xf32>, vector<2x256xf32> -> vector<2x256xf32>
    %164 = vector.broadcast %26 : vector<1x256xf32> to vector<2x256xf32>
    %165 = arith.addf %163, %164 : vector<2x256xf32>
    %c0_82 = arith.constant 0 : index
    %c3328 = arith.constant 3328 : index
    %166 = vector.load %arg13[%c0_82, %c3328] : memref<2x10752xf32, #tpu.memory_space<vmem>>, vector<2x256xf32>
    tpu.vector_store %arg13[%c0_82, %c3328], %165 {strides = array<i32>} : memref<2x10752xf32, #tpu.memory_space<vmem>>, vector<2x256xf32>,
    %167 = vector.extract_strided_slice %22 {offsets = [0, 1792], sizes = [2, 128], strides = [1, 1]} : vector<2x5376xf32> to vector<2x128xf32>
    %cst_83 = arith.constant dense<0.000000e+00> : vector<2x64xf32>
    %168 = tpu.matmul %167, %23, %cst_83 {dimension_numbers = #tpu.dot_dimension_numbers<[1], [0], [0], [1], [0, 0, 1, 1], [], []>} : vector<2x128xf32>, vector<128x64xf32>, vector<2x64xf32> -> vector<2x64xf32>
    %169 = vector.broadcast %24 : vector<1x64xf32> to vector<2x64xf32>
    %170 = arith.addf %168, %169 : vector<2x64xf32>
    %cst_84 = arith.constant 0.000000e+00 : f32
    %171 = vector.broadcast %cst_84 : f32 to vector<2x64xf32>
    %172 = arith.maximumf %170, %171 : vector<2x64xf32>
    %cst_85 = arith.constant dense<0.000000e+00> : vector<2x256xf32>
    %173 = tpu.matmul %172, %25, %cst_85 {dimension_numbers = #tpu.dot_dimension_numbers<[1], [0], [0], [1], [0, 0, 1, 1], [], []>} : vector<2x64xf32>, vector<64x256xf32>, vector<2x256xf32> -> vector<2x256xf32>
    %174 = vector.broadcast %26 : vector<1x256xf32> to vector<2x256xf32>
    %175 = arith.addf %173, %174 : vector<2x256xf32>
    %c0_86 = arith.constant 0 : index
    %c3584 = arith.constant 3584 : index
    %176 = vector.load %arg13[%c0_86, %c3584] : memref<2x10752xf32, #tpu.memory_space<vmem>>, vector<2x256xf32>
    tpu.vector_store %arg13[%c0_86, %c3584], %175 {strides = array<i32>} : memref<2x10752xf32, #tpu.memory_space<vmem>>, vector<2x256xf32>,
    %177 = vector.extract_strided_slice %22 {offsets = [0, 1920], sizes = [2, 128], strides = [1, 1]} : vector<2x5376xf32> to vector<2x128xf32>
    %cst_87 = arith.constant dense<0.000000e+00> : vector<2x64xf32>
    %178 = tpu.matmul %177, %23, %cst_87 {dimension_numbers = #tpu.dot_dimension_numbers<[1], [0], [0], [1], [0, 0, 1, 1], [], []>} : vector<2x128xf32>, vector<128x64xf32>, vector<2x64xf32> -> vector<2x64xf32>
    %179 = vector.broadcast %24 : vector<1x64xf32> to vector<2x64xf32>
    %180 = arith.addf %178, %179 : vector<2x64xf32>
    %cst_88 = arith.constant 0.000000e+00 : f32
    %181 = vector.broadcast %cst_88 : f32 to vector<2x64xf32>
    %182 = arith.maximumf %180, %181 : vector<2x64xf32>
    %cst_89 = arith.constant dense<0.000000e+00> : vector<2x256xf32>
    %183 = tpu.matmul %182, %25, %cst_89 {dimension_numbers = #tpu.dot_dimension_numbers<[1], [0], [0], [1], [0, 0, 1, 1], [], []>} : vector<2x64xf32>, vector<64x256xf32>, vector<2x256xf32> -> vector<2x256xf32>
    %184 = vector.broadcast %26 : vector<1x256xf32> to vector<2x256xf32>
    %185 = arith.addf %183, %184 : vector<2x256xf32>
    %c0_90 = arith.constant 0 : index
    %c3840 = arith.constant 3840 : index
    %186 = vector.load %arg13[%c0_90, %c3840] : memref<2x10752xf32, #tpu.memory_space<vmem>>, vector<2x256xf32>
    tpu.vector_store %arg13[%c0_90, %c3840], %185 {strides = array<i32>} : memref<2x10752xf32, #tpu.memory_space<vmem>>, vector<2x256xf32>,
    %187 = vector.extract_strided_slice %22 {offsets = [0, 2048], sizes = [2, 128], strides = [1, 1]} : vector<2x5376xf32> to vector<2x128xf32>
    %cst_91 = arith.constant dense<0.000000e+00> : vector<2x64xf32>
    %188 = tpu.matmul %187, %23, %cst_91 {dimension_numbers = #tpu.dot_dimension_numbers<[1], [0], [0], [1], [0, 0, 1, 1], [], []>} : vector<2x128xf32>, vector<128x64xf32>, vector<2x64xf32> -> vector<2x64xf32>
    %189 = vector.broadcast %24 : vector<1x64xf32> to vector<2x64xf32>
    %190 = arith.addf %188, %189 : vector<2x64xf32>
    %cst_92 = arith.constant 0.000000e+00 : f32
    %191 = vector.broadcast %cst_92 : f32 to vector<2x64xf32>
    %192 = arith.maximumf %190, %191 : vector<2x64xf32>
    %cst_93 = arith.constant dense<0.000000e+00> : vector<2x256xf32>
    %193 = tpu.matmul %192, %25, %cst_93 {dimension_numbers = #tpu.dot_dimension_numbers<[1], [0], [0], [1], [0, 0, 1, 1], [], []>} : vector<2x64xf32>, vector<64x256xf32>, vector<2x256xf32> -> vector<2x256xf32>
    %194 = vector.broadcast %26 : vector<1x256xf32> to vector<2x256xf32>
    %195 = arith.addf %193, %194 : vector<2x256xf32>
    %c0_94 = arith.constant 0 : index
    %c4096 = arith.constant 4096 : index
    %196 = vector.load %arg13[%c0_94, %c4096] : memref<2x10752xf32, #tpu.memory_space<vmem>>, vector<2x256xf32>
    tpu.vector_store %arg13[%c0_94, %c4096], %195 {strides = array<i32>} : memref<2x10752xf32, #tpu.memory_space<vmem>>, vector<2x256xf32>,
    %197 = vector.extract_strided_slice %22 {offsets = [0, 2176], sizes = [2, 128], strides = [1, 1]} : vector<2x5376xf32> to vector<2x128xf32>
    %cst_95 = arith.constant dense<0.000000e+00> : vector<2x64xf32>
    %198 = tpu.matmul %197, %23, %cst_95 {dimension_numbers = #tpu.dot_dimension_numbers<[1], [0], [0], [1], [0, 0, 1, 1], [], []>} : vector<2x128xf32>, vector<128x64xf32>, vector<2x64xf32> -> vector<2x64xf32>
    %199 = vector.broadcast %24 : vector<1x64xf32> to vector<2x64xf32>
    %200 = arith.addf %198, %199 : vector<2x64xf32>
    %cst_96 = arith.constant 0.000000e+00 : f32
    %201 = vector.broadcast %cst_96 : f32 to vector<2x64xf32>
    %202 = arith.maximumf %200, %201 : vector<2x64xf32>
    %cst_97 = arith.constant dense<0.000000e+00> : vector<2x256xf32>
    %203 = tpu.matmul %202, %25, %cst_97 {dimension_numbers = #tpu.dot_dimension_numbers<[1], [0], [0], [1], [0, 0, 1, 1], [], []>} : vector<2x64xf32>, vector<64x256xf32>, vector<2x256xf32> -> vector<2x256xf32>
    %204 = vector.broadcast %26 : vector<1x256xf32> to vector<2x256xf32>
    %205 = arith.addf %203, %204 : vector<2x256xf32>
    %c0_98 = arith.constant 0 : index
    %c4352 = arith.constant 4352 : index
    %206 = vector.load %arg13[%c0_98, %c4352] : memref<2x10752xf32, #tpu.memory_space<vmem>>, vector<2x256xf32>
    tpu.vector_store %arg13[%c0_98, %c4352], %205 {strides = array<i32>} : memref<2x10752xf32, #tpu.memory_space<vmem>>, vector<2x256xf32>,
    %207 = vector.extract_strided_slice %22 {offsets = [0, 2304], sizes = [2, 128], strides = [1, 1]} : vector<2x5376xf32> to vector<2x128xf32>
    %cst_99 = arith.constant dense<0.000000e+00> : vector<2x64xf32>
    %208 = tpu.matmul %207, %23, %cst_99 {dimension_numbers = #tpu.dot_dimension_numbers<[1], [0], [0], [1], [0, 0, 1, 1], [], []>} : vector<2x128xf32>, vector<128x64xf32>, vector<2x64xf32> -> vector<2x64xf32>
    %209 = vector.broadcast %24 : vector<1x64xf32> to vector<2x64xf32>
    %210 = arith.addf %208, %209 : vector<2x64xf32>
    %cst_100 = arith.constant 0.000000e+00 : f32
    %211 = vector.broadcast %cst_100 : f32 to vector<2x64xf32>
    %212 = arith.maximumf %210, %211 : vector<2x64xf32>
    %cst_101 = arith.constant dense<0.000000e+00> : vector<2x256xf32>
    %213 = tpu.matmul %212, %25, %cst_101 {dimension_numbers = #tpu.dot_dimension_numbers<[1], [0], [0], [1], [0, 0, 1, 1], [], []>} : vector<2x64xf32>, vector<64x256xf32>, vector<2x256xf32> -> vector<2x256xf32>
    %214 = vector.broadcast %26 : vector<1x256xf32> to vector<2x256xf32>
    %215 = arith.addf %213, %214 : vector<2x256xf32>
    %c0_102 = arith.constant 0 : index
    %c4608 = arith.constant 4608 : index
    %216 = vector.load %arg13[%c0_102, %c4608] : memref<2x10752xf32, #tpu.memory_space<vmem>>, vector<2x256xf32>
    tpu.vector_store %arg13[%c0_102, %c4608], %215 {strides = array<i32>} : memref<2x10752xf32, #tpu.memory_space<vmem>>, vector<2x256xf32>,
    %217 = vector.extract_strided_slice %22 {offsets = [0, 2432], sizes = [2, 128], strides = [1, 1]} : vector<2x5376xf32> to vector<2x128xf32>
    %cst_103 = arith.constant dense<0.000000e+00> : vector<2x64xf32>
    %218 = tpu.matmul %217, %23, %cst_103 {dimension_numbers = #tpu.dot_dimension_numbers<[1], [0], [0], [1], [0, 0, 1, 1], [], []>} : vector<2x128xf32>, vector<128x64xf32>, vector<2x64xf32> -> vector<2x64xf32>
    %219 = vector.broadcast %24 : vector<1x64xf32> to vector<2x64xf32>
    %220 = arith.addf %218, %219 : vector<2x64xf32>
    %cst_104 = arith.constant 0.000000e+00 : f32
    %221 = vector.broadcast %cst_104 : f32 to vector<2x64xf32>
    %222 = arith.maximumf %220, %221 : vector<2x64xf32>
    %cst_105 = arith.constant dense<0.000000e+00> : vector<2x256xf32>
    %223 = tpu.matmul %222, %25, %cst_105 {dimension_numbers = #tpu.dot_dimension_numbers<[1], [0], [0], [1], [0, 0, 1, 1], [], []>} : vector<2x64xf32>, vector<64x256xf32>, vector<2x256xf32> -> vector<2x256xf32>
    %224 = vector.broadcast %26 : vector<1x256xf32> to vector<2x256xf32>
    %225 = arith.addf %223, %224 : vector<2x256xf32>
    %c0_106 = arith.constant 0 : index
    %c4864 = arith.constant 4864 : index
    %226 = vector.load %arg13[%c0_106, %c4864] : memref<2x10752xf32, #tpu.memory_space<vmem>>, vector<2x256xf32>
    tpu.vector_store %arg13[%c0_106, %c4864], %225 {strides = array<i32>} : memref<2x10752xf32, #tpu.memory_space<vmem>>, vector<2x256xf32>,
    %227 = vector.extract_strided_slice %22 {offsets = [0, 2560], sizes = [2, 128], strides = [1, 1]} : vector<2x5376xf32> to vector<2x128xf32>
    %cst_107 = arith.constant dense<0.000000e+00> : vector<2x64xf32>
    %228 = tpu.matmul %227, %23, %cst_107 {dimension_numbers = #tpu.dot_dimension_numbers<[1], [0], [0], [1], [0, 0, 1, 1], [], []>} : vector<2x128xf32>, vector<128x64xf32>, vector<2x64xf32> -> vector<2x64xf32>
    %229 = vector.broadcast %24 : vector<1x64xf32> to vector<2x64xf32>
    %230 = arith.addf %228, %229 : vector<2x64xf32>
    %cst_108 = arith.constant 0.000000e+00 : f32
    %231 = vector.broadcast %cst_108 : f32 to vector<2x64xf32>
    %232 = arith.maximumf %230, %231 : vector<2x64xf32>
    %cst_109 = arith.constant dense<0.000000e+00> : vector<2x256xf32>
    %233 = tpu.matmul %232, %25, %cst_109 {dimension_numbers = #tpu.dot_dimension_numbers<[1], [0], [0], [1], [0, 0, 1, 1], [], []>} : vector<2x64xf32>, vector<64x256xf32>, vector<2x256xf32> -> vector<2x256xf32>
    %234 = vector.broadcast %26 : vector<1x256xf32> to vector<2x256xf32>
    %235 = arith.addf %233, %234 : vector<2x256xf32>
    %c0_110 = arith.constant 0 : index
    %c5120 = arith.constant 5120 : index
    %236 = vector.load %arg13[%c0_110, %c5120] : memref<2x10752xf32, #tpu.memory_space<vmem>>, vector<2x256xf32>
    tpu.vector_store %arg13[%c0_110, %c5120], %235 {strides = array<i32>} : memref<2x10752xf32, #tpu.memory_space<vmem>>, vector<2x256xf32>,
    %237 = vector.extract_strided_slice %22 {offsets = [0, 2688], sizes = [2, 128], strides = [1, 1]} : vector<2x5376xf32> to vector<2x128xf32>
    %cst_111 = arith.constant dense<0.000000e+00> : vector<2x64xf32>
    %238 = tpu.matmul %237, %23, %cst_111 {dimension_numbers = #tpu.dot_dimension_numbers<[1], [0], [0], [1], [0, 0, 1, 1], [], []>} : vector<2x128xf32>, vector<128x64xf32>, vector<2x64xf32> -> vector<2x64xf32>
    %239 = vector.broadcast %24 : vector<1x64xf32> to vector<2x64xf32>
    %240 = arith.addf %238, %239 : vector<2x64xf32>
    %cst_112 = arith.constant 0.000000e+00 : f32
    %241 = vector.broadcast %cst_112 : f32 to vector<2x64xf32>
    %242 = arith.maximumf %240, %241 : vector<2x64xf32>
    %cst_113 = arith.constant dense<0.000000e+00> : vector<2x256xf32>
    %243 = tpu.matmul %242, %25, %cst_113 {dimension_numbers = #tpu.dot_dimension_numbers<[1], [0], [0], [1], [0, 0, 1, 1], [], []>} : vector<2x64xf32>, vector<64x256xf32>, vector<2x256xf32> -> vector<2x256xf32>
    %244 = vector.broadcast %26 : vector<1x256xf32> to vector<2x256xf32>
    %245 = arith.addf %243, %244 : vector<2x256xf32>
    %c0_114 = arith.constant 0 : index
    %c5376 = arith.constant 5376 : index
    %246 = vector.load %arg13[%c0_114, %c5376] : memref<2x10752xf32, #tpu.memory_space<vmem>>, vector<2x256xf32>
    tpu.vector_store %arg13[%c0_114, %c5376], %245 {strides = array<i32>} : memref<2x10752xf32, #tpu.memory_space<vmem>>, vector<2x256xf32>,
    %247 = vector.extract_strided_slice %22 {offsets = [0, 2816], sizes = [2, 128], strides = [1, 1]} : vector<2x5376xf32> to vector<2x128xf32>
    %cst_115 = arith.constant dense<0.000000e+00> : vector<2x64xf32>
    %248 = tpu.matmul %247, %23, %cst_115 {dimension_numbers = #tpu.dot_dimension_numbers<[1], [0], [0], [1], [0, 0, 1, 1], [], []>} : vector<2x128xf32>, vector<128x64xf32>, vector<2x64xf32> -> vector<2x64xf32>
    %249 = vector.broadcast %24 : vector<1x64xf32> to vector<2x64xf32>
    %250 = arith.addf %248, %249 : vector<2x64xf32>
    %cst_116 = arith.constant 0.000000e+00 : f32
    %251 = vector.broadcast %cst_116 : f32 to vector<2x64xf32>
    %252 = arith.maximumf %250, %251 : vector<2x64xf32>
    %cst_117 = arith.constant dense<0.000000e+00> : vector<2x256xf32>
    %253 = tpu.matmul %252, %25, %cst_117 {dimension_numbers = #tpu.dot_dimension_numbers<[1], [0], [0], [1], [0, 0, 1, 1], [], []>} : vector<2x64xf32>, vector<64x256xf32>, vector<2x256xf32> -> vector<2x256xf32>
    %254 = vector.broadcast %26 : vector<1x256xf32> to vector<2x256xf32>
    %255 = arith.addf %253, %254 : vector<2x256xf32>
    %c0_118 = arith.constant 0 : index
    %c5632 = arith.constant 5632 : index
    %256 = vector.load %arg13[%c0_118, %c5632] : memref<2x10752xf32, #tpu.memory_space<vmem>>, vector<2x256xf32>
    tpu.vector_store %arg13[%c0_118, %c5632], %255 {strides = array<i32>} : memref<2x10752xf32, #tpu.memory_space<vmem>>, vector<2x256xf32>,
    %257 = vector.extract_strided_slice %22 {offsets = [0, 2944], sizes = [2, 128], strides = [1, 1]} : vector<2x5376xf32> to vector<2x128xf32>
    %cst_119 = arith.constant dense<0.000000e+00> : vector<2x64xf32>
    %258 = tpu.matmul %257, %23, %cst_119 {dimension_numbers = #tpu.dot_dimension_numbers<[1], [0], [0], [1], [0, 0, 1, 1], [], []>} : vector<2x128xf32>, vector<128x64xf32>, vector<2x64xf32> -> vector<2x64xf32>
    %259 = vector.broadcast %24 : vector<1x64xf32> to vector<2x64xf32>
    %260 = arith.addf %258, %259 : vector<2x64xf32>
    %cst_120 = arith.constant 0.000000e+00 : f32
    %261 = vector.broadcast %cst_120 : f32 to vector<2x64xf32>
    %262 = arith.maximumf %260, %261 : vector<2x64xf32>
    %cst_121 = arith.constant dense<0.000000e+00> : vector<2x256xf32>
    %263 = tpu.matmul %262, %25, %cst_121 {dimension_numbers = #tpu.dot_dimension_numbers<[1], [0], [0], [1], [0, 0, 1, 1], [], []>} : vector<2x64xf32>, vector<64x256xf32>, vector<2x256xf32> -> vector<2x256xf32>
    %264 = vector.broadcast %26 : vector<1x256xf32> to vector<2x256xf32>
    %265 = arith.addf %263, %264 : vector<2x256xf32>
    %c0_122 = arith.constant 0 : index
    %c5888 = arith.constant 5888 : index
    %266 = vector.load %arg13[%c0_122, %c5888] : memref<2x10752xf32, #tpu.memory_space<vmem>>, vector<2x256xf32>
    tpu.vector_store %arg13[%c0_122, %c5888], %265 {strides = array<i32>} : memref<2x10752xf32, #tpu.memory_space<vmem>>, vector<2x256xf32>,
    %267 = vector.extract_strided_slice %22 {offsets = [0, 3072], sizes = [2, 128], strides = [1, 1]} : vector<2x5376xf32> to vector<2x128xf32>
    %cst_123 = arith.constant dense<0.000000e+00> : vector<2x64xf32>
    %268 = tpu.matmul %267, %23, %cst_123 {dimension_numbers = #tpu.dot_dimension_numbers<[1], [0], [0], [1], [0, 0, 1, 1], [], []>} : vector<2x128xf32>, vector<128x64xf32>, vector<2x64xf32> -> vector<2x64xf32>
    %269 = vector.broadcast %24 : vector<1x64xf32> to vector<2x64xf32>
    %270 = arith.addf %268, %269 : vector<2x64xf32>
    %cst_124 = arith.constant 0.000000e+00 : f32
    %271 = vector.broadcast %cst_124 : f32 to vector<2x64xf32>
    %272 = arith.maximumf %270, %271 : vector<2x64xf32>
    %cst_125 = arith.constant dense<0.000000e+00> : vector<2x256xf32>
    %273 = tpu.matmul %272, %25, %cst_125 {dimension_numbers = #tpu.dot_dimension_numbers<[1], [0], [0], [1], [0, 0, 1, 1], [], []>} : vector<2x64xf32>, vector<64x256xf32>, vector<2x256xf32> -> vector<2x256xf32>
    %274 = vector.broadcast %26 : vector<1x256xf32> to vector<2x256xf32>
    %275 = arith.addf %273, %274 : vector<2x256xf32>
    %c0_126 = arith.constant 0 : index
    %c6144 = arith.constant 6144 : index
    %276 = vector.load %arg13[%c0_126, %c6144] : memref<2x10752xf32, #tpu.memory_space<vmem>>, vector<2x256xf32>
    tpu.vector_store %arg13[%c0_126, %c6144], %275 {strides = array<i32>} : memref<2x10752xf32, #tpu.memory_space<vmem>>, vector<2x256xf32>,
    %277 = vector.extract_strided_slice %22 {offsets = [0, 3200], sizes = [2, 128], strides = [1, 1]} : vector<2x5376xf32> to vector<2x128xf32>
    %cst_127 = arith.constant dense<0.000000e+00> : vector<2x64xf32>
    %278 = tpu.matmul %277, %23, %cst_127 {dimension_numbers = #tpu.dot_dimension_numbers<[1], [0], [0], [1], [0, 0, 1, 1], [], []>} : vector<2x128xf32>, vector<128x64xf32>, vector<2x64xf32> -> vector<2x64xf32>
    %279 = vector.broadcast %24 : vector<1x64xf32> to vector<2x64xf32>
    %280 = arith.addf %278, %279 : vector<2x64xf32>
    %cst_128 = arith.constant 0.000000e+00 : f32
    %281 = vector.broadcast %cst_128 : f32 to vector<2x64xf32>
    %282 = arith.maximumf %280, %281 : vector<2x64xf32>
    %cst_129 = arith.constant dense<0.000000e+00> : vector<2x256xf32>
    %283 = tpu.matmul %282, %25, %cst_129 {dimension_numbers = #tpu.dot_dimension_numbers<[1], [0], [0], [1], [0, 0, 1, 1], [], []>} : vector<2x64xf32>, vector<64x256xf32>, vector<2x256xf32> -> vector<2x256xf32>
    %284 = vector.broadcast %26 : vector<1x256xf32> to vector<2x256xf32>
    %285 = arith.addf %283, %284 : vector<2x256xf32>
    %c0_130 = arith.constant 0 : index
    %c6400 = arith.constant 6400 : index
    %286 = vector.load %arg13[%c0_130, %c6400] : memref<2x10752xf32, #tpu.memory_space<vmem>>, vector<2x256xf32>
    tpu.vector_store %arg13[%c0_130, %c6400], %285 {strides = array<i32>} : memref<2x10752xf32, #tpu.memory_space<vmem>>, vector<2x256xf32>,
    %287 = vector.extract_strided_slice %22 {offsets = [0, 3328], sizes = [2, 128], strides = [1, 1]} : vector<2x5376xf32> to vector<2x128xf32>
    %cst_131 = arith.constant dense<0.000000e+00> : vector<2x64xf32>
    %288 = tpu.matmul %287, %23, %cst_131 {dimension_numbers = #tpu.dot_dimension_numbers<[1], [0], [0], [1], [0, 0, 1, 1], [], []>} : vector<2x128xf32>, vector<128x64xf32>, vector<2x64xf32> -> vector<2x64xf32>
    %289 = vector.broadcast %24 : vector<1x64xf32> to vector<2x64xf32>
    %290 = arith.addf %288, %289 : vector<2x64xf32>
    %cst_132 = arith.constant 0.000000e+00 : f32
    %291 = vector.broadcast %cst_132 : f32 to vector<2x64xf32>
    %292 = arith.maximumf %290, %291 : vector<2x64xf32>
    %cst_133 = arith.constant dense<0.000000e+00> : vector<2x256xf32>
    %293 = tpu.matmul %292, %25, %cst_133 {dimension_numbers = #tpu.dot_dimension_numbers<[1], [0], [0], [1], [0, 0, 1, 1], [], []>} : vector<2x64xf32>, vector<64x256xf32>, vector<2x256xf32> -> vector<2x256xf32>
    %294 = vector.broadcast %26 : vector<1x256xf32> to vector<2x256xf32>
    %295 = arith.addf %293, %294 : vector<2x256xf32>
    %c0_134 = arith.constant 0 : index
    %c6656 = arith.constant 6656 : index
    %296 = vector.load %arg13[%c0_134, %c6656] : memref<2x10752xf32, #tpu.memory_space<vmem>>, vector<2x256xf32>
    tpu.vector_store %arg13[%c0_134, %c6656], %295 {strides = array<i32>} : memref<2x10752xf32, #tpu.memory_space<vmem>>, vector<2x256xf32>,
    %297 = vector.extract_strided_slice %22 {offsets = [0, 3456], sizes = [2, 128], strides = [1, 1]} : vector<2x5376xf32> to vector<2x128xf32>
    %cst_135 = arith.constant dense<0.000000e+00> : vector<2x64xf32>
    %298 = tpu.matmul %297, %23, %cst_135 {dimension_numbers = #tpu.dot_dimension_numbers<[1], [0], [0], [1], [0, 0, 1, 1], [], []>} : vector<2x128xf32>, vector<128x64xf32>, vector<2x64xf32> -> vector<2x64xf32>
    %299 = vector.broadcast %24 : vector<1x64xf32> to vector<2x64xf32>
    %300 = arith.addf %298, %299 : vector<2x64xf32>
    %cst_136 = arith.constant 0.000000e+00 : f32
    %301 = vector.broadcast %cst_136 : f32 to vector<2x64xf32>
    %302 = arith.maximumf %300, %301 : vector<2x64xf32>
    %cst_137 = arith.constant dense<0.000000e+00> : vector<2x256xf32>
    %303 = tpu.matmul %302, %25, %cst_137 {dimension_numbers = #tpu.dot_dimension_numbers<[1], [0], [0], [1], [0, 0, 1, 1], [], []>} : vector<2x64xf32>, vector<64x256xf32>, vector<2x256xf32> -> vector<2x256xf32>
    %304 = vector.broadcast %26 : vector<1x256xf32> to vector<2x256xf32>
    %305 = arith.addf %303, %304 : vector<2x256xf32>
    %c0_138 = arith.constant 0 : index
    %c6912 = arith.constant 6912 : index
    %306 = vector.load %arg13[%c0_138, %c6912] : memref<2x10752xf32, #tpu.memory_space<vmem>>, vector<2x256xf32>
    tpu.vector_store %arg13[%c0_138, %c6912], %305 {strides = array<i32>} : memref<2x10752xf32, #tpu.memory_space<vmem>>, vector<2x256xf32>,
    %307 = vector.extract_strided_slice %22 {offsets = [0, 3584], sizes = [2, 128], strides = [1, 1]} : vector<2x5376xf32> to vector<2x128xf32>
    %cst_139 = arith.constant dense<0.000000e+00> : vector<2x64xf32>
    %308 = tpu.matmul %307, %23, %cst_139 {dimension_numbers = #tpu.dot_dimension_numbers<[1], [0], [0], [1], [0, 0, 1, 1], [], []>} : vector<2x128xf32>, vector<128x64xf32>, vector<2x64xf32> -> vector<2x64xf32>
    %309 = vector.broadcast %24 : vector<1x64xf32> to vector<2x64xf32>
    %310 = arith.addf %308, %309 : vector<2x64xf32>
    %cst_140 = arith.constant 0.000000e+00 : f32
    %311 = vector.broadcast %cst_140 : f32 to vector<2x64xf32>
    %312 = arith.maximumf %310, %311 : vector<2x64xf32>
    %cst_141 = arith.constant dense<0.000000e+00> : vector<2x256xf32>
    %313 = tpu.matmul %312, %25, %cst_141 {dimension_numbers = #tpu.dot_dimension_numbers<[1], [0], [0], [1], [0, 0, 1, 1], [], []>} : vector<2x64xf32>, vector<64x256xf32>, vector<2x256xf32> -> vector<2x256xf32>
    %314 = vector.broadcast %26 : vector<1x256xf32> to vector<2x256xf32>
    %315 = arith.addf %313, %314 : vector<2x256xf32>
    %c0_142 = arith.constant 0 : index
    %c7168 = arith.constant 7168 : index
    %316 = vector.load %arg13[%c0_142, %c7168] : memref<2x10752xf32, #tpu.memory_space<vmem>>, vector<2x256xf32>
    tpu.vector_store %arg13[%c0_142, %c7168], %315 {strides = array<i32>} : memref<2x10752xf32, #tpu.memory_space<vmem>>, vector<2x256xf32>,
    %317 = vector.extract_strided_slice %22 {offsets = [0, 3712], sizes = [2, 128], strides = [1, 1]} : vector<2x5376xf32> to vector<2x128xf32>
    %cst_143 = arith.constant dense<0.000000e+00> : vector<2x64xf32>
    %318 = tpu.matmul %317, %23, %cst_143 {dimension_numbers = #tpu.dot_dimension_numbers<[1], [0], [0], [1], [0, 0, 1, 1], [], []>} : vector<2x128xf32>, vector<128x64xf32>, vector<2x64xf32> -> vector<2x64xf32>
    %319 = vector.broadcast %24 : vector<1x64xf32> to vector<2x64xf32>
    %320 = arith.addf %318, %319 : vector<2x64xf32>
    %cst_144 = arith.constant 0.000000e+00 : f32
    %321 = vector.broadcast %cst_144 : f32 to vector<2x64xf32>
    %322 = arith.maximumf %320, %321 : vector<2x64xf32>
    %cst_145 = arith.constant dense<0.000000e+00> : vector<2x256xf32>
    %323 = tpu.matmul %322, %25, %cst_145 {dimension_numbers = #tpu.dot_dimension_numbers<[1], [0], [0], [1], [0, 0, 1, 1], [], []>} : vector<2x64xf32>, vector<64x256xf32>, vector<2x256xf32> -> vector<2x256xf32>
    %324 = vector.broadcast %26 : vector<1x256xf32> to vector<2x256xf32>
    %325 = arith.addf %323, %324 : vector<2x256xf32>
    %c0_146 = arith.constant 0 : index
    %c7424 = arith.constant 7424 : index
    %326 = vector.load %arg13[%c0_146, %c7424] : memref<2x10752xf32, #tpu.memory_space<vmem>>, vector<2x256xf32>
    tpu.vector_store %arg13[%c0_146, %c7424], %325 {strides = array<i32>} : memref<2x10752xf32, #tpu.memory_space<vmem>>, vector<2x256xf32>,
    %327 = vector.extract_strided_slice %22 {offsets = [0, 3840], sizes = [2, 128], strides = [1, 1]} : vector<2x5376xf32> to vector<2x128xf32>
    %cst_147 = arith.constant dense<0.000000e+00> : vector<2x64xf32>
    %328 = tpu.matmul %327, %23, %cst_147 {dimension_numbers = #tpu.dot_dimension_numbers<[1], [0], [0], [1], [0, 0, 1, 1], [], []>} : vector<2x128xf32>, vector<128x64xf32>, vector<2x64xf32> -> vector<2x64xf32>
    %329 = vector.broadcast %24 : vector<1x64xf32> to vector<2x64xf32>
    %330 = arith.addf %328, %329 : vector<2x64xf32>
    %cst_148 = arith.constant 0.000000e+00 : f32
    %331 = vector.broadcast %cst_148 : f32 to vector<2x64xf32>
    %332 = arith.maximumf %330, %331 : vector<2x64xf32>
    %cst_149 = arith.constant dense<0.000000e+00> : vector<2x256xf32>
    %333 = tpu.matmul %332, %25, %cst_149 {dimension_numbers = #tpu.dot_dimension_numbers<[1], [0], [0], [1], [0, 0, 1, 1], [], []>} : vector<2x64xf32>, vector<64x256xf32>, vector<2x256xf32> -> vector<2x256xf32>
    %334 = vector.broadcast %26 : vector<1x256xf32> to vector<2x256xf32>
    %335 = arith.addf %333, %334 : vector<2x256xf32>
    %c0_150 = arith.constant 0 : index
    %c7680 = arith.constant 7680 : index
    %336 = vector.load %arg13[%c0_150, %c7680] : memref<2x10752xf32, #tpu.memory_space<vmem>>, vector<2x256xf32>
    tpu.vector_store %arg13[%c0_150, %c7680], %335 {strides = array<i32>} : memref<2x10752xf32, #tpu.memory_space<vmem>>, vector<2x256xf32>,
    %337 = vector.extract_strided_slice %22 {offsets = [0, 3968], sizes = [2, 128], strides = [1, 1]} : vector<2x5376xf32> to vector<2x128xf32>
    %cst_151 = arith.constant dense<0.000000e+00> : vector<2x64xf32>
    %338 = tpu.matmul %337, %23, %cst_151 {dimension_numbers = #tpu.dot_dimension_numbers<[1], [0], [0], [1], [0, 0, 1, 1], [], []>} : vector<2x128xf32>, vector<128x64xf32>, vector<2x64xf32> -> vector<2x64xf32>
    %339 = vector.broadcast %24 : vector<1x64xf32> to vector<2x64xf32>
    %340 = arith.addf %338, %339 : vector<2x64xf32>
    %cst_152 = arith.constant 0.000000e+00 : f32
    %341 = vector.broadcast %cst_152 : f32 to vector<2x64xf32>
    %342 = arith.maximumf %340, %341 : vector<2x64xf32>
    %cst_153 = arith.constant dense<0.000000e+00> : vector<2x256xf32>
    %343 = tpu.matmul %342, %25, %cst_153 {dimension_numbers = #tpu.dot_dimension_numbers<[1], [0], [0], [1], [0, 0, 1, 1], [], []>} : vector<2x64xf32>, vector<64x256xf32>, vector<2x256xf32> -> vector<2x256xf32>
    %344 = vector.broadcast %26 : vector<1x256xf32> to vector<2x256xf32>
    %345 = arith.addf %343, %344 : vector<2x256xf32>
    %c0_154 = arith.constant 0 : index
    %c7936 = arith.constant 7936 : index
    %346 = vector.load %arg13[%c0_154, %c7936] : memref<2x10752xf32, #tpu.memory_space<vmem>>, vector<2x256xf32>
    tpu.vector_store %arg13[%c0_154, %c7936], %345 {strides = array<i32>} : memref<2x10752xf32, #tpu.memory_space<vmem>>, vector<2x256xf32>,
    %347 = vector.extract_strided_slice %22 {offsets = [0, 4096], sizes = [2, 128], strides = [1, 1]} : vector<2x5376xf32> to vector<2x128xf32>
    %cst_155 = arith.constant dense<0.000000e+00> : vector<2x64xf32>
    %348 = tpu.matmul %347, %23, %cst_155 {dimension_numbers = #tpu.dot_dimension_numbers<[1], [0], [0], [1], [0, 0, 1, 1], [], []>} : vector<2x128xf32>, vector<128x64xf32>, vector<2x64xf32> -> vector<2x64xf32>
    %349 = vector.broadcast %24 : vector<1x64xf32> to vector<2x64xf32>
    %350 = arith.addf %348, %349 : vector<2x64xf32>
    %cst_156 = arith.constant 0.000000e+00 : f32
    %351 = vector.broadcast %cst_156 : f32 to vector<2x64xf32>
    %352 = arith.maximumf %350, %351 : vector<2x64xf32>
    %cst_157 = arith.constant dense<0.000000e+00> : vector<2x256xf32>
    %353 = tpu.matmul %352, %25, %cst_157 {dimension_numbers = #tpu.dot_dimension_numbers<[1], [0], [0], [1], [0, 0, 1, 1], [], []>} : vector<2x64xf32>, vector<64x256xf32>, vector<2x256xf32> -> vector<2x256xf32>
    %354 = vector.broadcast %26 : vector<1x256xf32> to vector<2x256xf32>
    %355 = arith.addf %353, %354 : vector<2x256xf32>
    %c0_158 = arith.constant 0 : index
    %c8192 = arith.constant 8192 : index
    %356 = vector.load %arg13[%c0_158, %c8192] : memref<2x10752xf32, #tpu.memory_space<vmem>>, vector<2x256xf32>
    tpu.vector_store %arg13[%c0_158, %c8192], %355 {strides = array<i32>} : memref<2x10752xf32, #tpu.memory_space<vmem>>, vector<2x256xf32>,
    %357 = vector.extract_strided_slice %22 {offsets = [0, 4224], sizes = [2, 128], strides = [1, 1]} : vector<2x5376xf32> to vector<2x128xf32>
    %cst_159 = arith.constant dense<0.000000e+00> : vector<2x64xf32>
    %358 = tpu.matmul %357, %23, %cst_159 {dimension_numbers = #tpu.dot_dimension_numbers<[1], [0], [0], [1], [0, 0, 1, 1], [], []>} : vector<2x128xf32>, vector<128x64xf32>, vector<2x64xf32> -> vector<2x64xf32>
    %359 = vector.broadcast %24 : vector<1x64xf32> to vector<2x64xf32>
    %360 = arith.addf %358, %359 : vector<2x64xf32>
    %cst_160 = arith.constant 0.000000e+00 : f32
    %361 = vector.broadcast %cst_160 : f32 to vector<2x64xf32>
    %362 = arith.maximumf %360, %361 : vector<2x64xf32>
    %cst_161 = arith.constant dense<0.000000e+00> : vector<2x256xf32>
    %363 = tpu.matmul %362, %25, %cst_161 {dimension_numbers = #tpu.dot_dimension_numbers<[1], [0], [0], [1], [0, 0, 1, 1], [], []>} : vector<2x64xf32>, vector<64x256xf32>, vector<2x256xf32> -> vector<2x256xf32>
    %364 = vector.broadcast %26 : vector<1x256xf32> to vector<2x256xf32>
    %365 = arith.addf %363, %364 : vector<2x256xf32>
    %c0_162 = arith.constant 0 : index
    %c8448 = arith.constant 8448 : index
    %366 = vector.load %arg13[%c0_162, %c8448] : memref<2x10752xf32, #tpu.memory_space<vmem>>, vector<2x256xf32>
    tpu.vector_store %arg13[%c0_162, %c8448], %365 {strides = array<i32>} : memref<2x10752xf32, #tpu.memory_space<vmem>>, vector<2x256xf32>,
    %367 = vector.extract_strided_slice %22 {offsets = [0, 4352], sizes = [2, 128], strides = [1, 1]} : vector<2x5376xf32> to vector<2x128xf32>
    %cst_163 = arith.constant dense<0.000000e+00> : vector<2x64xf32>
    %368 = tpu.matmul %367, %23, %cst_163 {dimension_numbers = #tpu.dot_dimension_numbers<[1], [0], [0], [1], [0, 0, 1, 1], [], []>} : vector<2x128xf32>, vector<128x64xf32>, vector<2x64xf32> -> vector<2x64xf32>
    %369 = vector.broadcast %24 : vector<1x64xf32> to vector<2x64xf32>
    %370 = arith.addf %368, %369 : vector<2x64xf32>
    %cst_164 = arith.constant 0.000000e+00 : f32
    %371 = vector.broadcast %cst_164 : f32 to vector<2x64xf32>
    %372 = arith.maximumf %370, %371 : vector<2x64xf32>
    %cst_165 = arith.constant dense<0.000000e+00> : vector<2x256xf32>
    %373 = tpu.matmul %372, %25, %cst_165 {dimension_numbers = #tpu.dot_dimension_numbers<[1], [0], [0], [1], [0, 0, 1, 1], [], []>} : vector<2x64xf32>, vector<64x256xf32>, vector<2x256xf32> -> vector<2x256xf32>
    %374 = vector.broadcast %26 : vector<1x256xf32> to vector<2x256xf32>
    %375 = arith.addf %373, %374 : vector<2x256xf32>
    %c0_166 = arith.constant 0 : index
    %c8704 = arith.constant 8704 : index
    %376 = vector.load %arg13[%c0_166, %c8704] : memref<2x10752xf32, #tpu.memory_space<vmem>>, vector<2x256xf32>
    tpu.vector_store %arg13[%c0_166, %c8704], %375 {strides = array<i32>} : memref<2x10752xf32, #tpu.memory_space<vmem>>, vector<2x256xf32>,
    %377 = vector.extract_strided_slice %22 {offsets = [0, 4480], sizes = [2, 128], strides = [1, 1]} : vector<2x5376xf32> to vector<2x128xf32>
    %cst_167 = arith.constant dense<0.000000e+00> : vector<2x64xf32>
    %378 = tpu.matmul %377, %23, %cst_167 {dimension_numbers = #tpu.dot_dimension_numbers<[1], [0], [0], [1], [0, 0, 1, 1], [], []>} : vector<2x128xf32>, vector<128x64xf32>, vector<2x64xf32> -> vector<2x64xf32>
    %379 = vector.broadcast %24 : vector<1x64xf32> to vector<2x64xf32>
    %380 = arith.addf %378, %379 : vector<2x64xf32>
    %cst_168 = arith.constant 0.000000e+00 : f32
    %381 = vector.broadcast %cst_168 : f32 to vector<2x64xf32>
    %382 = arith.maximumf %380, %381 : vector<2x64xf32>
    %cst_169 = arith.constant dense<0.000000e+00> : vector<2x256xf32>
    %383 = tpu.matmul %382, %25, %cst_169 {dimension_numbers = #tpu.dot_dimension_numbers<[1], [0], [0], [1], [0, 0, 1, 1], [], []>} : vector<2x64xf32>, vector<64x256xf32>, vector<2x256xf32> -> vector<2x256xf32>
    %384 = vector.broadcast %26 : vector<1x256xf32> to vector<2x256xf32>
    %385 = arith.addf %383, %384 : vector<2x256xf32>
    %c0_170 = arith.constant 0 : index
    %c8960 = arith.constant 8960 : index
    %386 = vector.load %arg13[%c0_170, %c8960] : memref<2x10752xf32, #tpu.memory_space<vmem>>, vector<2x256xf32>
    tpu.vector_store %arg13[%c0_170, %c8960], %385 {strides = array<i32>} : memref<2x10752xf32, #tpu.memory_space<vmem>>, vector<2x256xf32>,
    %387 = vector.extract_strided_slice %22 {offsets = [0, 4608], sizes = [2, 128], strides = [1, 1]} : vector<2x5376xf32> to vector<2x128xf32>
    %cst_171 = arith.constant dense<0.000000e+00> : vector<2x64xf32>
    %388 = tpu.matmul %387, %23, %cst_171 {dimension_numbers = #tpu.dot_dimension_numbers<[1], [0], [0], [1], [0, 0, 1, 1], [], []>} : vector<2x128xf32>, vector<128x64xf32>, vector<2x64xf32> -> vector<2x64xf32>
    %389 = vector.broadcast %24 : vector<1x64xf32> to vector<2x64xf32>
    %390 = arith.addf %388, %389 : vector<2x64xf32>
    %cst_172 = arith.constant 0.000000e+00 : f32
    %391 = vector.broadcast %cst_172 : f32 to vector<2x64xf32>
    %392 = arith.maximumf %390, %391 : vector<2x64xf32>
    %cst_173 = arith.constant dense<0.000000e+00> : vector<2x256xf32>
    %393 = tpu.matmul %392, %25, %cst_173 {dimension_numbers = #tpu.dot_dimension_numbers<[1], [0], [0], [1], [0, 0, 1, 1], [], []>} : vector<2x64xf32>, vector<64x256xf32>, vector<2x256xf32> -> vector<2x256xf32>
    %394 = vector.broadcast %26 : vector<1x256xf32> to vector<2x256xf32>
    %395 = arith.addf %393, %394 : vector<2x256xf32>
    %c0_174 = arith.constant 0 : index
    %c9216 = arith.constant 9216 : index
    %396 = vector.load %arg13[%c0_174, %c9216] : memref<2x10752xf32, #tpu.memory_space<vmem>>, vector<2x256xf32>
    tpu.vector_store %arg13[%c0_174, %c9216], %395 {strides = array<i32>} : memref<2x10752xf32, #tpu.memory_space<vmem>>, vector<2x256xf32>,
    %397 = vector.extract_strided_slice %22 {offsets = [0, 4736], sizes = [2, 128], strides = [1, 1]} : vector<2x5376xf32> to vector<2x128xf32>
    %cst_175 = arith.constant dense<0.000000e+00> : vector<2x64xf32>
    %398 = tpu.matmul %397, %23, %cst_175 {dimension_numbers = #tpu.dot_dimension_numbers<[1], [0], [0], [1], [0, 0, 1, 1], [], []>} : vector<2x128xf32>, vector<128x64xf32>, vector<2x64xf32> -> vector<2x64xf32>
    %399 = vector.broadcast %24 : vector<1x64xf32> to vector<2x64xf32>
    %400 = arith.addf %398, %399 : vector<2x64xf32>
    %cst_176 = arith.constant 0.000000e+00 : f32
    %401 = vector.broadcast %cst_176 : f32 to vector<2x64xf32>
    %402 = arith.maximumf %400, %401 : vector<2x64xf32>
    %cst_177 = arith.constant dense<0.000000e+00> : vector<2x256xf32>
    %403 = tpu.matmul %402, %25, %cst_177 {dimension_numbers = #tpu.dot_dimension_numbers<[1], [0], [0], [1], [0, 0, 1, 1], [], []>} : vector<2x64xf32>, vector<64x256xf32>, vector<2x256xf32> -> vector<2x256xf32>
    %404 = vector.broadcast %26 : vector<1x256xf32> to vector<2x256xf32>
    %405 = arith.addf %403, %404 : vector<2x256xf32>
    %c0_178 = arith.constant 0 : index
    %c9472 = arith.constant 9472 : index
    %406 = vector.load %arg13[%c0_178, %c9472] : memref<2x10752xf32, #tpu.memory_space<vmem>>, vector<2x256xf32>
    tpu.vector_store %arg13[%c0_178, %c9472], %405 {strides = array<i32>} : memref<2x10752xf32, #tpu.memory_space<vmem>>, vector<2x256xf32>,
    %407 = vector.extract_strided_slice %22 {offsets = [0, 4864], sizes = [2, 128], strides = [1, 1]} : vector<2x5376xf32> to vector<2x128xf32>
    %cst_179 = arith.constant dense<0.000000e+00> : vector<2x64xf32>
    %408 = tpu.matmul %407, %23, %cst_179 {dimension_numbers = #tpu.dot_dimension_numbers<[1], [0], [0], [1], [0, 0, 1, 1], [], []>} : vector<2x128xf32>, vector<128x64xf32>, vector<2x64xf32> -> vector<2x64xf32>
    %409 = vector.broadcast %24 : vector<1x64xf32> to vector<2x64xf32>
    %410 = arith.addf %408, %409 : vector<2x64xf32>
    %cst_180 = arith.constant 0.000000e+00 : f32
    %411 = vector.broadcast %cst_180 : f32 to vector<2x64xf32>
    %412 = arith.maximumf %410, %411 : vector<2x64xf32>
    %cst_181 = arith.constant dense<0.000000e+00> : vector<2x256xf32>
    %413 = tpu.matmul %412, %25, %cst_181 {dimension_numbers = #tpu.dot_dimension_numbers<[1], [0], [0], [1], [0, 0, 1, 1], [], []>} : vector<2x64xf32>, vector<64x256xf32>, vector<2x256xf32> -> vector<2x256xf32>
    %414 = vector.broadcast %26 : vector<1x256xf32> to vector<2x256xf32>
    %415 = arith.addf %413, %414 : vector<2x256xf32>
    %c0_182 = arith.constant 0 : index
    %c9728 = arith.constant 9728 : index
    %416 = vector.load %arg13[%c0_182, %c9728] : memref<2x10752xf32, #tpu.memory_space<vmem>>, vector<2x256xf32>
    tpu.vector_store %arg13[%c0_182, %c9728], %415 {strides = array<i32>} : memref<2x10752xf32, #tpu.memory_space<vmem>>, vector<2x256xf32>,
    %417 = vector.extract_strided_slice %22 {offsets = [0, 4992], sizes = [2, 128], strides = [1, 1]} : vector<2x5376xf32> to vector<2x128xf32>
    %cst_183 = arith.constant dense<0.000000e+00> : vector<2x64xf32>
    %418 = tpu.matmul %417, %23, %cst_183 {dimension_numbers = #tpu.dot_dimension_numbers<[1], [0], [0], [1], [0, 0, 1, 1], [], []>} : vector<2x128xf32>, vector<128x64xf32>, vector<2x64xf32> -> vector<2x64xf32>
    %419 = vector.broadcast %24 : vector<1x64xf32> to vector<2x64xf32>
    %420 = arith.addf %418, %419 : vector<2x64xf32>
    %cst_184 = arith.constant 0.000000e+00 : f32
    %421 = vector.broadcast %cst_184 : f32 to vector<2x64xf32>
    %422 = arith.maximumf %420, %421 : vector<2x64xf32>
    %cst_185 = arith.constant dense<0.000000e+00> : vector<2x256xf32>
    %423 = tpu.matmul %422, %25, %cst_185 {dimension_numbers = #tpu.dot_dimension_numbers<[1], [0], [0], [1], [0, 0, 1, 1], [], []>} : vector<2x64xf32>, vector<64x256xf32>, vector<2x256xf32> -> vector<2x256xf32>
    %424 = vector.broadcast %26 : vector<1x256xf32> to vector<2x256xf32>
    %425 = arith.addf %423, %424 : vector<2x256xf32>
    %c0_186 = arith.constant 0 : index
    %c9984 = arith.constant 9984 : index
    %426 = vector.load %arg13[%c0_186, %c9984] : memref<2x10752xf32, #tpu.memory_space<vmem>>, vector<2x256xf32>
    tpu.vector_store %arg13[%c0_186, %c9984], %425 {strides = array<i32>} : memref<2x10752xf32, #tpu.memory_space<vmem>>, vector<2x256xf32>,
    %427 = vector.extract_strided_slice %22 {offsets = [0, 5120], sizes = [2, 128], strides = [1, 1]} : vector<2x5376xf32> to vector<2x128xf32>
    %cst_187 = arith.constant dense<0.000000e+00> : vector<2x64xf32>
    %428 = tpu.matmul %427, %23, %cst_187 {dimension_numbers = #tpu.dot_dimension_numbers<[1], [0], [0], [1], [0, 0, 1, 1], [], []>} : vector<2x128xf32>, vector<128x64xf32>, vector<2x64xf32> -> vector<2x64xf32>
    %429 = vector.broadcast %24 : vector<1x64xf32> to vector<2x64xf32>
    %430 = arith.addf %428, %429 : vector<2x64xf32>
    %cst_188 = arith.constant 0.000000e+00 : f32
    %431 = vector.broadcast %cst_188 : f32 to vector<2x64xf32>
    %432 = arith.maximumf %430, %431 : vector<2x64xf32>
    %cst_189 = arith.constant dense<0.000000e+00> : vector<2x256xf32>
    %433 = tpu.matmul %432, %25, %cst_189 {dimension_numbers = #tpu.dot_dimension_numbers<[1], [0], [0], [1], [0, 0, 1, 1], [], []>} : vector<2x64xf32>, vector<64x256xf32>, vector<2x256xf32> -> vector<2x256xf32>
    %434 = vector.broadcast %26 : vector<1x256xf32> to vector<2x256xf32>
    %435 = arith.addf %433, %434 : vector<2x256xf32>
    %c0_190 = arith.constant 0 : index
    %c10240 = arith.constant 10240 : index
    %436 = vector.load %arg13[%c0_190, %c10240] : memref<2x10752xf32, #tpu.memory_space<vmem>>, vector<2x256xf32>
    tpu.vector_store %arg13[%c0_190, %c10240], %435 {strides = array<i32>} : memref<2x10752xf32, #tpu.memory_space<vmem>>, vector<2x256xf32>,
    %437 = vector.extract_strided_slice %22 {offsets = [0, 5248], sizes = [2, 128], strides = [1, 1]} : vector<2x5376xf32> to vector<2x128xf32>
    %cst_191 = arith.constant dense<0.000000e+00> : vector<2x64xf32>
    %438 = tpu.matmul %437, %23, %cst_191 {dimension_numbers = #tpu.dot_dimension_numbers<[1], [0], [0], [1], [0, 0, 1, 1], [], []>} : vector<2x128xf32>, vector<128x64xf32>, vector<2x64xf32> -> vector<2x64xf32>
    %439 = vector.broadcast %24 : vector<1x64xf32> to vector<2x64xf32>
    %440 = arith.addf %438, %439 : vector<2x64xf32>
    %cst_192 = arith.constant 0.000000e+00 : f32
    %441 = vector.broadcast %cst_192 : f32 to vector<2x64xf32>
    %442 = arith.maximumf %440, %441 : vector<2x64xf32>
    %cst_193 = arith.constant dense<0.000000e+00> : vector<2x256xf32>
    %443 = tpu.matmul %442, %25, %cst_193 {dimension_numbers = #tpu.dot_dimension_numbers<[1], [0], [0], [1], [0, 0, 1, 1], [], []>} : vector<2x64xf32>, vector<64x256xf32>, vector<2x256xf32> -> vector<2x256xf32>
    %444 = vector.broadcast %26 : vector<1x256xf32> to vector<2x256xf32>
    %445 = arith.addf %443, %444 : vector<2x256xf32>
    %c0_194 = arith.constant 0 : index
    %c10496 = arith.constant 10496 : index
    %446 = vector.load %arg13[%c0_194, %c10496] : memref<2x10752xf32, #tpu.memory_space<vmem>>, vector<2x256xf32>
    tpu.vector_store %arg13[%c0_194, %c10496], %445 {strides = array<i32>} : memref<2x10752xf32, #tpu.memory_space<vmem>>, vector<2x256xf32>,
    return
  }
  func.func @transform_0(%arg0: i32, %arg1: i32) -> (i32, i32) {
    %c0_i32 = arith.constant 0 : i32
    %c0_i32_0 = arith.constant 0 : i32
    return %arg1, %c0_i32 : i32, i32
  }
  func.func @transform_1(%arg0: i32, %arg1: i32) -> (i32, i32) {
    %c0_i32 = arith.constant 0 : i32
    %c0_i32_0 = arith.constant 0 : i32
    %c0_i32_1 = arith.constant 0 : i32
    return %c0_i32, %c0_i32_0 : i32, i32
  }
  func.func @transform_2(%arg0: i32, %arg1: i32) -> (i32, i32) {
    %c0_i32 = arith.constant 0 : i32
    %c0_i32_0 = arith.constant 0 : i32
    %c0_i32_1 = arith.constant 0 : i32
    return %c0_i32, %c0_i32_0 : i32, i32
  }
  func.func @transform_3(%arg0: i32, %arg1: i32) -> (i32, i32) {
    %c0_i32 = arith.constant 0 : i32
    %c0_i32_0 = arith.constant 0 : i32
    %c0_i32_1 = arith.constant 0 : i32
    return %c0_i32, %c0_i32_0 : i32, i32
  }
  func.func @transform_4(%arg0: i32, %arg1: i32) -> (i32, i32) {
    %c0_i32 = arith.constant 0 : i32
    %c0_i32_0 = arith.constant 0 : i32
    %c0_i32_1 = arith.constant 0 : i32
    return %c0_i32, %c0_i32_0 : i32, i32
  }
  func.func @transform_5(%arg0: i32, %arg1: i32) -> (i32, i32) {
    %c0_i32 = arith.constant 0 : i32
    %c0_i32_0 = arith.constant 0 : i32
    return %c0_i32, %arg0 : i32, i32
  }
  func.func @transform_6(%arg0: i32, %arg1: i32) -> (i32, i32) {
    %c0_i32 = arith.constant 0 : i32
    %c0_i32_0 = arith.constant 0 : i32
    return %c0_i32, %arg0 : i32, i32
  }
  func.func @transform_7(%arg0: i32, %arg1: i32) -> (i32, i32) {
    %c0_i32 = arith.constant 0 : i32
    %c0_i32_0 = arith.constant 0 : i32
    %c0_i32_1 = arith.constant 0 : i32
    return %c0_i32, %c0_i32_0 : i32, i32
  }
  func.func @transform_8(%arg0: i32, %arg1: i32) -> (i32, i32) {
    %c0_i32 = arith.constant 0 : i32
    %c0_i32_0 = arith.constant 0 : i32
    %c0_i32_1 = arith.constant 0 : i32
    return %c0_i32, %c0_i32_0 : i32, i32
  }
  func.func @transform_9(%arg0: i32, %arg1: i32) -> (i32, i32) {
    %c0_i32 = arith.constant 0 : i32
    %c0_i32_0 = arith.constant 0 : i32
    %c0_i32_1 = arith.constant 0 : i32
    return %c0_i32, %c0_i32_0 : i32, i32
  }
  func.func @transform_10(%arg0: i32, %arg1: i32) -> (i32, i32) {
    %c0_i32 = arith.constant 0 : i32
    %c0_i32_0 = arith.constant 0 : i32
    %c0_i32_1 = arith.constant 0 : i32
    return %c0_i32, %c0_i32_0 : i32, i32
  }
  func.func @transform_11(%arg0: i32, %arg1: i32) -> (i32, i32) {
    %c0_i32 = arith.constant 0 : i32
    return %arg1, %arg0 : i32, i32
  }
}

</mosaic_0001>

<bundles_post_ra>
// kernel: menu_generator_forward.1
= control target key start
LH: loop header
LB: loop body
LE: loop exit
PB: predicated region body
PF: predicated region fallthrough
CT: control target
= control target key end

     0   :  { %s21799_s0 = inlined_call_operand.vmem [shape: f32[2,8], index: 0, kind: input, shape index: {}]   ;;  %s21800_s1 = inlined_call_operand.hbm [shape: f32[8,128], index: 1, kind: input, shape index: {}]   ;;  %s21801_s2 = inlined_call_operand.hbm [shape: f32[1,128], index: 2, kind: input, shape index: {}]   ;;  %s21802_s3 = inlined_call_operand.hbm [shape: f32[128,256], index: 3, kind: input, shape index: {}]   ;;  %s21803_s4 = inlined_call_operand.hbm [shape: f32[1,256], index: 4, kind: input, shape index: {}]   ;;  %s21804_s5 = inlined_call_operand.hbm [shape: bf16[256,26880], index: 5, kind: input, shape index: {}]   ;;  %s21805_s6 = inlined_call_operand.hbm [shape: f32[1,26880], index: 6, kind: input, shape index: {}]   ;;  %s21806_s7 = inlined_call_operand.vmem [shape: f32[128,64], index: 7, kind: input, shape index: {}]   ;;  %s21807_s8 = inlined_call_operand.hbm [shape: f32[1,64], index: 8, kind: input, shape index: {}]   ;;  %s21808_s9 = inlined_call_operand.hbm [shape: f32[64,256], index: 9, kind: input, shape index: {}]   ;;  %s21809_s10 = inlined_call_operand.hbm [shape: f32[1,256], index: 10, kind: input, shape index: {}]   ;;  %s21810_s11 = inlined_call_operand.vmem [shape: f32[2,53760], index: 11, kind: output, shape index: {}]  }
   0x1   :  { %21830 = sst [smem:[#allocation38_spill]] %s21799_s0 }
   0x2   :  { %21831 = sst [smem:[#allocation39_spill]] %s21800_s1 }
   0x3   :  { %21832 = sst [smem:[#allocation40_spill]] %s21801_s2 }
   0x4   :  { %21833 = sst [smem:[#allocation41_spill]] %s21802_s3 }
   0x5   :  { %21834 = sst [smem:[#allocation42_spill]] %s21803_s4 }
   0x6   :  { %21835 = sst [smem:[#allocation43_spill]] %s21804_s5 }
   0x7   :  { %21836 = sst [smem:[#allocation44_spill]] %s21806_s7 }
   0x8   :  { %21837 = sst [smem:[#allocation45_spill]] %s21810_s11 }
   0x9   :  { %16 = vsyncpa [#allocation3], 0 }
   0xa   :  { %17 = vsyncpa [#allocation5], 0 }
   0xb   :  { %18 = vsyncpa [#allocation8], 0 }
   0xc   :  { %19 = vsyncpa [#allocation14], 0  ;;  %s19025_s17 = smov 0   ;;  %s19027_s18 = smov 0  }
   0xd   :  { %s19029_s19 = smov 0   ;;  %s19031_s20 = smov 0  }
   0xe   :  { %s19033_s21 = smov 0   ;;  %s19035_s22 = smov 0  }
   0xf LB: > { %21838 = sst [smem:[#allocation22_spill]] %s18938_s20  ;;  %s21811_s23 = sadd.s32 4294967295, %s18946_s22   ;;  %s18946_s22 = sphi %s19035_s22, %s25_s22   ;;  %s18942_s21 = sphi %s19033_s21, %s21902_s21   ;;  %s18938_s20 = sphi %s19031_s20, %s21901_s20   ;;  %s18934_s19 = sphi %s19029_s19, %s21900_s19   ;;  %s18930_s18 = sphi %s19027_s18, %s21899_s18   ;;  %s18926_s17 = sphi %s19025_s17, %s21898_s17  }
  0x10   : > { %p12774_p0 = scmp.ge.s32.totalorder %s18946_s22, 1  ;;  %p19059_p1 = scmp.eq.s32.totalorder %s21811_s23, 0 }
  0x11   : > { %p316_p2 = scmp.lt.s32.totalorder %s18946_s22, 6  ;;  %s18948_s26 = smov [#allocation2]  }
  0x12   : > { %s21839_s24 = scalar_select %p19059_p1, 1, 0 }
  0x13   : > { %p19064_p3 = pnand %p12774_p0, %p316_p2  ;;  %s336_s27 = sshll.u32 %s18948_s26, 4  ;;  %s337_s27 = int_to_ptr.vmem [resolvable:$true] %s336_s27 }
  0x14   : > { %s18949_s28 = smov [#allocation4]   ;;  %s18950_s12 = smov [#allocation6]  }
  0x15   : > { %s21840_s25 = scalar_select %p19064_p3, 1, 0 }
  0x16   : > { %p17497_p4 = pneg %p19064_p3  ;;  %s347_s29 = sshll.u32 %s18949_s28, 4  ;;  %s19076_s29 = int_to_ptr.vmem [resolvable:$true] %s347_s29 }
  0x17   : > { %s357_s13 = sshll.u32 %s18950_s12, 4  ;;  %s21842_s1 = sld [smem:[#allocation39_spill]]  ;;  %s19078_s13 = int_to_ptr.vmem [resolvable:$true] %s357_s13 }
  0x18   : > { %p19072_p5 = pnand %p17497_p4, %p19059_p1 }
  0x1a   : > { %s21841_s30 = scalar_select %p19072_p5, 1, 0 }
  0x1b   : > { %p19088_p7 = pneg %p19072_p5 }
  0x1d   : > { %s18616_s16 = scalar_lea.hbm %s21842_s1, 128 }
  0x1e   : > { %p18617_p6 = scmp.ne.s32.totalorder %s21842_s1, %s18616_s16  ;;  %p18623_p10 = scmp.lt.u32.totalorder %s18616_s16, %s21842_s1 }
  0x20   : > { %p18619_p8 = pnand %p19088_p7, %p18617_p6 }
  0x22   : > { %p18620_p9 = pneg %p18619_p8 }
  0x24   : > { %p18625_p11 = pnand %p18623_p10, %p18620_p9 }
  0x26   : > { %18628 = shalt.err (!%p18625_p11)
}
  0x27   : > { %s18629_s14 = scalar_lea.vmem %s337_s27, 128  ;;  %p18637_p2 = scmp.lt.s32.totalorder %s337_s27, %s337_s27 }
  0x28   : > { %p18630_p12 = scmp.ne.s32.totalorder %s337_s27, %s18629_s14  ;;  %p18638_p4 = scmp.lt.s32.totalorder %s18629_s14, %s18629_s14 }
  0x2a   : > { %p18632_p13 = pnand %p18630_p12, %p19088_p7  ;;  %p18639_p3 = por %p18638_p4, %p18637_p2 }
  0x2c   : > { %p18633_p0 = pneg %p18632_p13 }
  0x2e   : > { %p18640_p1 = pnand %p18639_p3, %p18633_p0 }
  0x30   : > { %18643 = shalt.err (!%p18640_p1)
}
  0x31   : > { %17500 = dma.hbm_to_vmem [thread:$0]  (!%p19072_p5), %s21842_s1, 128, %s337_s27, [#allocation3]  }
  0x32   : > { %s21844_s2 = sld [smem:[#allocation40_spill]] }
  0x38   : > { %s18644_s26 = scalar_lea.hbm %s21844_s2, 16 }
  0x39   : > { %p18645_p6 = scmp.ne.s32.totalorder %s21844_s2, %s18644_s26  ;;  %p18651_p1 = scmp.lt.u32.totalorder %s18644_s26, %s21844_s2 }
  0x3b   : > { %p18647_p8 = pnand %p18645_p6, %p19088_p7 }
  0x3d   : > { %p18648_p9 = pneg %p18647_p8 }
  0x3f   : > { %p18653_p3 = pnand %p18651_p1, %p18648_p9 }
  0x41   : > { %18656 = shalt.err (!%p18653_p3)
}
  0x42   : > { %s18657_s27 = scalar_lea.vmem %s19076_s29, 16  ;;  %s18664_s20 = scalar_lea.vmem %s19076_s29, 32 }
  0x43   : > { %p18658_p10 = scmp.ne.s32.totalorder %s19076_s29, %s18657_s27  ;;  %p18665_p13 = scmp.lt.s32.totalorder %s19076_s29, %s19076_s29 }
  0x44   : > { %p18666_p0 = scmp.lt.s32.totalorder %s18664_s20, %s18657_s27 }
  0x45   : > { %p18660_p11 = pnand %p18658_p10, %p19088_p7 }
  0x46   : > { %p18667_p2 = por %p18666_p0, %p18665_p13 }
  0x47   : > { %p18661_p12 = pneg %p18660_p11 }
  0x49   : > { %p18668_p4 = pnand %p18667_p2, %p18661_p12 }
  0x4b   : > { %18671 = shalt.err (!%p18668_p4)
}
  0x4c   : > { %17503 = dma.hbm_to_vmem [thread:$0]  (!%p19072_p5), %s21844_s2, 16, %s19076_s29, [#allocation5]  }
  0x4d   : > { %s21845_s3 = sld [smem:[#allocation41_spill]] }
  0x53   : > { %s18672_s16 = scalar_lea.hbm %s21845_s3, 4096 }
  0x54   : > { %p18673_p6 = scmp.ne.s32.totalorder %s21845_s3, %s18672_s16  ;;  %p18679_p1 = scmp.lt.u32.totalorder %s18672_s16, %s21845_s3 }
  0x56   : > { %p18675_p8 = pnand %p18673_p6, %p19088_p7 }
  0x58   : > { %p18676_p9 = pneg %p18675_p8 }
  0x5a   : > { %p18681_p3 = pnand %p18679_p1, %p18676_p9 }
  0x5c   : > { %18684 = shalt.err (!%p18681_p3)
}
  0x5d   : > { %s18685_s29 = scalar_lea.vmem %s19078_s13, 4096  ;;  %p18693_p13 = scmp.lt.s32.totalorder %s19078_s13, %s19078_s13 }
  0x5e   : > { %p18686_p10 = scmp.ne.s32.totalorder %s19078_s13, %s18685_s29  ;;  %p18694_p0 = scmp.lt.s32.totalorder %s18685_s29, %s18685_s29 }
  0x60   : > { %p18688_p11 = pnand %p18686_p10, %p19088_p7  ;;  %p18695_p2 = por %p18694_p0, %p18693_p13 }
  0x62   : > { %p18689_p12 = pneg %p18688_p11 }
  0x64   : > { %p18696_p4 = pnand %p18695_p2, %p18689_p12 }
  0x66   : > { %18699 = shalt.err (!%p18696_p4)
}
  0x67   : > { %s21817_s20 = smov 256   ;;  %s21818_s7 = smov 16  }
  0x68   : > { %17506 = dma.hbm_to_vmem [thread:$0]  (!%p19072_p5), %s21845_s3, 4096, %s19078_s13, [#allocation5], %s21817_s20, %s21817_s20, %s21818_s7  }
  0x69   : > { %s18953_s11 = smov [#allocation7]   ;;  %s21846_s4 = sld [smem:[#allocation42_spill]] }
  0x6a   : > { %s371_s16 = sshll.u32 %s18953_s11, 4  ;;  %s372_s16 = int_to_ptr.vmem [resolvable:$true] %s371_s16 }
  0x6f   : > { %s18700_s14 = scalar_lea.hbm %s21846_s4, 32 }
  0x70   : > { %p18701_p6 = scmp.ne.s32.totalorder %s21846_s4, %s18700_s14  ;;  %p18707_p1 = scmp.lt.u32.totalorder %s18700_s14, %s21846_s4 }
  0x72   : > { %p18703_p8 = pnand %p18701_p6, %p19088_p7 }
  0x74   : > { %p18704_p9 = pneg %p18703_p8 }
  0x76   : > { %p18709_p3 = pnand %p18707_p1, %p18704_p9 }
  0x78   : > { %18712 = shalt.err (!%p18709_p3)
}
  0x79   : > { %s18713_s13 = scalar_lea.vmem %s372_s16, 32  ;;  %p18721_p13 = scmp.lt.s32.totalorder %s372_s16, %s372_s16 }
  0x7a   : > { %p18714_p10 = scmp.ne.s32.totalorder %s372_s16, %s18713_s13  ;;  %p18722_p0 = scmp.lt.s32.totalorder %s18713_s13, %s18713_s13 }
  0x7c   : > { %p18716_p11 = pnand %p18714_p10, %p19088_p7  ;;  %p18723_p2 = por %p18722_p0, %p18721_p13 }
  0x7e   : > { %p18717_p12 = pneg %p18716_p11 }
  0x80   : > { %p18724_p4 = pnand %p18723_p2, %p18717_p12 }
  0x82   : > { %18727 = shalt.err (!%p18724_p4)
}
  0x83   : > { %17509 = dma.hbm_to_vmem [thread:$0]  (!%p19072_p5), %s21846_s4, 32, %s372_s16, [#allocation8]  }
  0x84   : > { %s37_s1 = sadd.s32 1, %s18942_s21  ;;  %s154_s2 = sadd.s32 1, %s18934_s19 }
  0x85   : > { %p39_p6 = scmp.ge.s32.totalorder %s37_s1, 5  ;;  %p161_p8 = scmp.ne.s32.totalorder %s18934_s19, %s18930_s18 }
  0x86   : > { %p162_p9 = scmp.eq.s32.totalorder %s18946_s22, 0  ;;  %p167_p1 = scmp.ne.s32.totalorder %s18930_s18, %s18926_s17 }
  0x87   : > { %s21904_s1 = smov (%p39_p6, %s37_s1), 0  ;;  %p21848_p10 = scmp.ne.s32.totalorder %s21839_s24, 0 }
  0x88   : > { %21847 = sst [smem:[#allocation23_spill]] %s21904_s1  ;;  %p163_p3 = por %p162_p9, %p161_p8 }
  0x89   : > { %p19183_p11 = por %p21848_p10, %p167_p1  ;;  %s151_s26 = ssub.s32 %s18942_s21, %s21904_s1 }
  0x8a   : > { %p17533_p12 = scmp.lt.s32.totalorder %s18946_s22, 5  ;;  %p152_p13 = scmp.eq.s32.totalorder %s151_s26, 0 }
  0x8b   : > { %s21849_s11 = scalar_select %p19183_p11, 1, 0 }
  0x8c   : > { %s420_s16 = sand.u32 1, %s18946_s22   ;;  %s21816_s12 = sand.u32 1, %s18934_s19  }
  0x8d   : > { %s19193_s14 = scalar_select %p152_p13, %s18934_s19, %s154_s2  }
  0x8e   : > { %s17461_s27 = smul.u32 5376, %s21816_s12  ;;  %p19197_p0 = pnand %p17533_p12, %p163_p3 }
  0x8f   : > { %21850 = sst [smem:[#allocation24_spill]] %s19193_s14  ;;  %s13556_s29 = smul.u32 2688, %s18942_s21 }
  0x90   : > { %s21851_s17 = scalar_select %p19197_p0, 1, 0 }
  0x91   : > { %s21852_s5 = sld [smem:[#allocation43_spill]]  ;;  %s424_s2 = scalar_lea.vmem [#allocation9], %s17461_s27 }
  0x92   : > { %s431_s26 = sshll.u32 %s424_s2, 4  ;;  %s19209_s12 = scalar_lea.sflag [#allocation3], %s420_s16  ;;  %s19207_s26 = int_to_ptr.vmem [resolvable:$true] %s431_s26 }
  0x93   : > { %p21823_p4 = pneg %p19197_p0 }
  0x97   : > { %s19205_s15 = scalar_lea.hbm %s21852_s5, %s13556_s29  ;;  %s18733_s23 = scalar_lea.hbm %s21852_s5, 430080 }
  0x98   : > { %s18728_s20 = scalar_lea.hbm %s19205_s15, 86016  ;;  %p18734_p9 = scmp.lt.u32.totalorder %s19205_s15, %s21852_s5 }
  0x99   : > { %p18729_p2 = scmp.ne.s32.totalorder %s19205_s15, %s18728_s20  ;;  %p18735_p1 = scmp.lt.u32.totalorder %s18733_s23, %s18728_s20 }
  0x9a   : > { %p18737_p10 = scmp.lt.u32.totalorder %s18728_s20, %s19205_s15 }
  0x9b   : > { %p18731_p6 = pnand %p21823_p4, %p18729_p2  ;;  %p18736_p3 = por %p18735_p1, %p18734_p9 }
  0x9d   : > { %p18732_p8 = pneg %p18731_p6  ;;  %p18738_p12 = por %p18737_p10, %p18736_p3 }
  0x9f   : > { %p18739_p13 = pnand %p18738_p12, %p18732_p8 }
  0xa1   : > { %18742 = shalt.err (!%p18739_p13)
}
  0xa2   : > { %s18743_s16 = scalar_lea.vmem %s19207_s26, 86016  ;;  %s18954_s27 = smov [#allocation9]  }
  0xa3   : > { %p18744_p2 = scmp.ne.s32.totalorder %s19207_s26, %s18743_s16  ;;  %s18748_s2 = sshll.u32 %s18954_s27, 4  ;;  %s18749_s2 = int_to_ptr.vmem [resolvable:$false] %s18748_s2 }
  0xa4   : > { %s18750_s3 = scalar_lea.vmem %s18749_s2, 172032  ;;  %p18751_p5 = scmp.lt.s32.totalorder %s19207_s26, %s18749_s2 }
  0xa5   : > { %p18746_p6 = pnand %p18744_p2, %p21823_p4  ;;  %p18752_p9 = scmp.lt.s32.totalorder %s18750_s3, %s18743_s16 }
  0xa7   : > { %p18747_p11 = pneg %p18746_p6  ;;  %p18753_p1 = por %p18752_p9, %p18751_p5 }
  0xa9   : > { %p18754_p3 = pnand %p18753_p1, %p18747_p11 }
  0xab   : > { %18757 = shalt.err (!%p18754_p3)
}
  0xac   : > { %s18955_s20 = smov 13440   ;;  %s18956_s7 = smov 2688  }
  0xad   : > { %s18957_s29 = smov 168   ;;  %s18958_s13 = smov [#allocation11]  }
  0xae   : > { %17522 = dma.hbm_to_vmem [thread:$0]  (!%p19197_p0), %s19205_s15, 86016, %s19207_s26, %s19209_s12, %s18955_s20, %s18956_s7, %s18957_s29  }
  0xaf   : > { %s385_s23 = sshll.u32 %s18958_s13, 4  ;;  %s18959_s27 = smov [#allocation12]   ;;  %s386_s23 = int_to_ptr.vmem [resolvable:$true] %s385_s23 }
  0xb0   : > { %s395_s4 = sshll.u32 %s18959_s27, 4  ;;  %s18758_s3 = scalar_lea.hbm %s21807_s8, 16  ;;  %s396_s4 = int_to_ptr.vmem [resolvable:$true] %s395_s4 }
  0xb1   : > { %p18759_p5 = scmp.ne.s32.totalorder %s21807_s8, %s18758_s3  ;;  %p18765_p10 = scmp.lt.u32.totalorder %s18758_s3, %s21807_s8 }
  0xb3   : > { %p18761_p11 = pnand %p18759_p5, %p19088_p7 }
  0xb5   : > { %p18762_p8 = pneg %p18761_p11 }
  0xb7   : > { %p18767_p12 = pnand %p18765_p10, %p18762_p8 }
  0xb9   : > { %18770 = shalt.err (!%p18767_p12)
}
  0xba   : > { %s18771_s15 = scalar_lea.vmem %s386_s23, 16  ;;  %s18778_s26 = scalar_lea.vmem %s386_s23, 32 }
  0xbb   : > { %p18772_p13 = scmp.ne.s32.totalorder %s386_s23, %s18771_s15  ;;  %p18779_p9 = scmp.lt.s32.totalorder %s386_s23, %s386_s23 }
  0xbc   : > { %p18780_p1 = scmp.lt.s32.totalorder %s18778_s26, %s18771_s15 }
  0xbd   : > { %p18774_p2 = pnand %p18772_p13, %p19088_p7 }
  0xbe   : > { %p18781_p3 = por %p18780_p1, %p18779_p9 }
  0xbf   : > { %p18775_p6 = pneg %p18774_p2 }
  0xc1   : > { %p18782_p4 = pnand %p18781_p3, %p18775_p6 }
  0xc3   : > { %18785 = shalt.err (!%p18782_p4)
}
  0xc4   : > { %p21853_p5 = scmp.ne.s32.totalorder %s21841_s30, 0  ;;  %s18786_s20 = scalar_lea.hbm %s21808_s9, 2048 }
  0xc5   : > { %p18787_p11 = scmp.ne.s32.totalorder %s21808_s9, %s18786_s20  ;;  %p18793_p4 = scmp.lt.u32.totalorder %s18786_s20, %s21808_s9 }
  0xc6   : > { %17512 = dma.hbm_to_vmem [thread:$0]  (!%p21853_p5), %s21807_s8, 16, %s386_s23, [#allocation5]  }
  0xc7   : > { %p18789_p8 = pnand %p18787_p11, %p19088_p7 }
  0xc9   : > { %p18790_p10 = pneg %p18789_p8 }
  0xcb   : > { %p18795_p12 = pnand %p18793_p4, %p18790_p10 }
  0xcd   : > { %18798 = shalt.err (!%p18795_p12)
}
  0xce   : > { %s18799_s2 = scalar_lea.vmem %s396_s4, 2048  ;;  %p18807_p9 = scmp.lt.s32.totalorder %s396_s4, %s396_s4 }
  0xcf   : > { %p18800_p13 = scmp.ne.s32.totalorder %s396_s4, %s18799_s2  ;;  %p18808_p1 = scmp.lt.s32.totalorder %s18799_s2, %s18799_s2 }
  0xd1   : > { %p18802_p2 = pnand %p18800_p13, %p19088_p7  ;;  %p18809_p3 = por %p18808_p1, %p18807_p9 }
  0xd3   : > { %p18803_p6 = pneg %p18802_p2 }
  0xd5   : > { %p18810_p0 = pnand %p18809_p3, %p18803_p6 }
  0xd7   : > { %18813 = shalt.err (!%p18810_p0)
}
  0xd8   : > { %s21854_s23 = smov 16   ;;  %s21855_s16 = smov 256  }
  0xd9   : > { %17515 = dma.hbm_to_vmem [thread:$0]  (!%p21853_p5), %s21808_s9, 2048, %s396_s4, [#allocation8], %s21855_s16, %s21855_s16, %s21854_s23  }
  0xda   : > { %s18960_s26 = smov [#allocation13]   ;;  %s21856_s1 = sand.u32 1, %s18934_s19  }
  0xdb   : > { %s409_s5 = sshll.u32 %s18960_s26, 4  ;;  %s17462_s0 = smul.u32 42, %s21856_s1  ;;  %s410_s5 = int_to_ptr.vmem [resolvable:$true] %s409_s5 }
  0xdc   : > { %s13557_s14 = smul.u32 672, %s18942_s21  ;;  %s18814_s29 = scalar_lea.hbm %s21809_s10, 32 }
  0xdd   : > { %p18815_p0 = scmp.ne.s32.totalorder %s21809_s10, %s18814_s29  ;;  %p18821_p10 = scmp.lt.u32.totalorder %s18814_s29, %s21809_s10 }
  0xdf   : > { %p18817_p11 = pnand %p18815_p0, %p19088_p7 }
  0xe1   : > { %p18818_p8 = pneg %p18817_p11 }
  0xe3   : > { %p18823_p4 = pnand %p18821_p10, %p18818_p8 }
  0xe5   : > { %18826 = shalt.err (!%p18823_p4)
}
  0xe6   : > { %s18827_s4 = scalar_lea.vmem %s410_s5, 32  ;;  %p18835_p6 = scmp.lt.s32.totalorder %s410_s5, %s410_s5 }
  0xe7   : > { %p18828_p12 = scmp.ne.s32.totalorder %s410_s5, %s18827_s4  ;;  %p18836_p9 = scmp.lt.s32.totalorder %s18827_s4, %s18827_s4 }
  0xe9   : > { %p18830_p13 = pnand %p18828_p12, %p19088_p7  ;;  %p18837_p1 = por %p18836_p9, %p18835_p6 }
  0xeb   : > { %p18831_p2 = pneg %p18830_p13 }
  0xed   : > { %p18838_p3 = pnand %p18837_p1, %p18831_p2 }
  0xef   : > { %18841 = shalt.err (!%p18838_p3)
}
  0xf0   : > { %17518 = dma.hbm_to_vmem [thread:$0]  (!%p21853_p5), %s21809_s10, 32, %s410_s5, [#allocation14]  }
  0xf1   : > { %s19300_s1 = scalar_lea.hbm %s21805_s6, %s13557_s14  ;;  %s445_s28 = scalar_lea.vmem [#allocation10], %s17462_s0 }
  0xf2   : > { %s453_s20 = sshll.u32 %s445_s28, 4  ;;  %s18842_s7 = scalar_lea.hbm %s19300_s1, 672  ;;  %s454_s20 = int_to_ptr.vmem [resolvable:$true] %s453_s20 }
  0xf3   : > { %p18843_p7 = scmp.ne.s32.totalorder %s19300_s1, %s18842_s7  ;;  %p21857_p0 = scmp.ne.s32.totalorder %s21851_s17, 0 }
  0xf4   : > { %s18847_s29 = scalar_lea.hbm %s21805_s6, 3360  ;;  %p18848_p5 = scmp.lt.u32.totalorder %s19300_s1, %s21805_s6 }
  0xf5   : > { %p21858_p11 = pneg %p21857_p0  ;;  %p18849_p4 = scmp.lt.u32.totalorder %s18847_s29, %s18842_s7 }
  0xf6   : > { %p18851_p13 = scmp.lt.u32.totalorder %s18842_s7, %s19300_s1 }
  0xf7   : > { %p18845_p8 = pnand %p18843_p7, %p21858_p11  ;;  %p18850_p12 = por %p18849_p4, %p18848_p5 }
  0xf9   : > { %p18846_p10 = pneg %p18845_p8  ;;  %p18852_p2 = por %p18851_p13, %p18850_p12 }
  0xfb   : > { %p18853_p6 = pnand %p18852_p2, %p18846_p10 }
  0xfd   : > { %18856 = shalt.err (!%p18853_p6)
}
  0xfe   : > { %s18857_s0 = scalar_lea.vmem %s454_s20, 672  ;;  %p21859_p1 = pmov %p21858_p11 }
  0xff   : > { %p18858_p9 = scmp.ne.s32.totalorder %s454_s20, %s18857_s0  ;;  %s18961_s27 = smov [#allocation10]  }
 0x100   : > { %s18862_s2 = sshll.u32 %s18961_s27, 4  ;;  %s18863_s2 = int_to_ptr.vmem [resolvable:$false] %s18862_s2 }
 0x101   : > { %p18860_p3 = pnand %p18858_p9, %p21859_p1  ;;  %s18864_s3 = scalar_lea.vmem %s18863_s2, 1344 }
 0x102   : > { %p18865_p11 = scmp.lt.s32.totalorder %s454_s20, %s18863_s2  ;;  %p18866_p8 = scmp.lt.s32.totalorder %s18864_s3, %s18857_s0 }
 0x103   : > { %p18861_p7 = pneg %p18860_p3 }
 0x104   : > { %p18867_p4 = por %p18866_p8, %p18865_p11 }
 0x106   : > { %p18868_p5 = pnand %p18867_p4, %p18861_p7 }
 0x108   : > { %18871 = shalt.err (!%p18868_p5)
}
 0x109   : > { %17525 = dma.hbm_to_vmem [thread:$0]  (!%p21857_p0), %s19300_s1, 672, %s454_s20, %s19209_s12  }
 0x10a   : > { %p21860_p10 = scmp.ne.s32.totalorder %s21840_s25, 0 }
 0x10c   : > { %462 = sbr.rel (%p21860_p10) target bundleno = 11765 (0x2df5), region = 64 }
 0x113   : > { %p21861_p12 = scmp.ne.s32.totalorder %s21839_s24, 0 }
 0x115   : > { %18897 = dma.done.wait (%p21861_p12), [#allocation3], 128  }
 0x116   : > { %18899 = vsyncadd (%p21861_p12), [#allocation3], 4294967168 }
 0x117   : > { %18901 = dma.done.wait (%p21861_p12), [#allocation5], 4112  }
 0x118   : > { %18903 = vsyncadd (%p21861_p12), [#allocation5], 4294963184 }
 0x119   : > { %18905 = dma.done.wait (%p21861_p12), [#allocation8], 32  }
 0x11a   : > { %18907 = vsyncadd (%p21861_p12), [#allocation8], 4294967264  ;;  %s21862_s25 = sadd.s32 4294967295, %s18946_s22   ;;  %s482_s17 = sand.u32 1, %s18930_s18  }
 0x11b   : > { %s480_s12 = sand.u32 1, %s21862_s25   ;;  %s17463_s4 = smul.u32 5376, %s482_s17 }
 0x11c   : > { %s481_s23 = scalar_lea.sflag [#allocation3], %s480_s12  ;;  %p21863_p0 = scmp.ne.s32.totalorder %s21849_s11, 0 }
 0x11d   : > { %s19339_s16 = scalar_lea.vmem [#allocation9], %s17463_s4 }
 0x11e   : > { %18909 = dma.done.wait (%p21863_p0), %s481_s23, 86688  }
 0x11f   : > { %18911 = vsyncadd (%p21863_p0), %s481_s23, 4294880608  ;;  %s17464_s15 = smul.u32 42, %s482_s17 }
 0x121   : > { %s19345_s26 = scalar_lea.vmem [#allocation10], %s17464_s15 }
 0x122   : > { %18913 = dma.done.wait (%p21861_p12), [#allocation5], 16  }
 0x123   : > { %18915 = vsyncadd (%p21861_p12), [#allocation5], 4294967280 }
 0x124   : > { %18917 = dma.done.wait (%p21861_p12), [#allocation8], 2048  }
 0x125   : > { %18919 = vsyncadd (%p21861_p12), [#allocation8], 4294965248 }
 0x126   : > { %18921 = dma.done.wait (%p21861_p12), [#allocation14], 32  }
 0x127   : > { %18923 = vsyncadd (%p21861_p12), [#allocation14], 4294967264  ;;  %v21828_v0 = vmov 0.0   ;;  %vm18963_vm0 = vmmov 0   ;;  %vm582_vm1 = vcmask 64512   ;;  %v574_v1 = vld [vmem:[#allocation2] sm:$0xff] }
 0x128   : > { %14274 = vmatprep.subr.mxu0 %v21828_v0  ;;  %14276 = vmatprep.mubr.msk.f32.mxu0 %vm18963_vm0, %v21828_v0  ;;  %s21864_s28 = sld [smem:[#allocation38_spill]]  ;;  %v658_v3 = vld [vmem:[#allocation6 + $0x8] sm:$0xff]  ;;  %v660_v4 = vld [vmem:[#allocation6 + $0x18] sm:$0xff]  ;;  %v657_v5 = vld [vmem:[#allocation6] sm:$0xff]  ;;  %s21865_s7 = sld [smem:[#allocation44_spill]]  ;;  %vm6055_vm2 = vcmask 523264  }
 0x129   : > { %765 = vmatprep.mubr.f32.mxu1 %v21828_v0  ;;  %14275 = vmatpush3.msra.mxu0 %v574_v1  ;;  %v659_v6 = vld [vmem:[#allocation6 + $0x10] sm:$0xff]  ;;  %v15749_v7 = vpack.c.bf16 %v660_v4, %v658_v3  ;;  %v662_v9 = vld [vmem:[#allocation6 + $0x28] sm:$0xff]  ;;  %v664_v10 = vld [vmem:[#allocation6 + $0x38] sm:$0xff]  ;;  %s21882_s15 = sld [smem:[#allocation45_spill]] }
 0x12a   : > { %v15751_v8 = vpack.c.bf16 %v659_v6, %v657_v5  ;;  %v661_v11 = vld [vmem:[#allocation6 + $0x20] sm:$0xff]  ;;  %v15753_v12 = vpack.c.bf16 %v664_v10, %v662_v9  ;;  %v663_v13 = vld [vmem:[#allocation6 + $0x30] sm:$0xff]  ;;  %v666_v14 = vld [vmem:[#allocation6 + $0x48] sm:$0xff] }
 0x12b   : > { %v668_v15 = vld [vmem:[#allocation6 + $0x58] sm:$0xff]  ;;  %15750 = vmatprep.subr.bf16.mxu1 %v15749_v7  ;;  %v15755_v16 = vpack.c.bf16 %v663_v13, %v661_v11  ;;  %v665_v18 = vld [vmem:[#allocation6 + $0x40] sm:$0xff]  ;;  %v667_v19 = vld [vmem:[#allocation6 + $0x50] sm:$0xff] }
 0x12c   : > { %15752 = vmatpush1.bf16.msra.mxu1 %v15751_v8  ;;  %v15757_v17 = vpack.c.bf16 %v668_v15, %v666_v14  ;;  %v670_v20 = vld [vmem:[#allocation6 + $0x68] sm:$0xff]  ;;  %v672_v21 = vld [vmem:[#allocation6 + $0x78] sm:$0xff]  ;;  %v15759_v22 = vpack.c.bf16 %v667_v19, %v665_v18  ;;  %v669_v23 = vld [vmem:[#allocation6 + $0x60] sm:$0xff] }
 0x12d   : > { %15754 = vmatprep.subr.bf16.mxu1 %v15753_v12  ;;  %v671_v24 = vld [vmem:[#allocation6 + $0x70] sm:$0xff]  ;;  %v674_v25 = vld [vmem:[#allocation6 + $0x88] sm:$0xff]  ;;  %v15761_v26 = vpack.c.bf16 %v672_v21, %v670_v20  ;;  %v676_v27 = vld [vmem:[#allocation6 + $0x98] sm:$0xff] }
 0x12e   : > { %v573_v2 = vld [vmem:[%s21864_s28] sm:$0x3]  ;;  %v673_v28 = vld [vmem:[#allocation6 + $0x80] sm:$0xff]  ;;  %v15763_v30 = vpack.c.bf16 %v671_v24, %v669_v23  ;;  %v678_v31 = vld [vmem:[#allocation6 + $0xa8] sm:$0xff]  ;;  %v15765_v33 = vpack.c.bf16 %v676_v27, %v674_v25 }
 0x12f   : > { %14277 = vmatmul.mubr.msk.f32.vlgmr.msra.gmra.mrb[0].mxu0 %vm582_vm1, %v573_v2  ;;  %v675_v29 = vld [vmem:[#allocation6 + $0x90] sm:$0xff]  ;;  %v680_v32 = vld [vmem:[#allocation6 + $0xb8] sm:$0xff]  ;;  %v677_v34 = vld [vmem:[#allocation6 + $0xa0] sm:$0xff] }
 0x130   : > { %15756 = vmatpush1.bf16.msra.mxu1 %v15755_v16  ;;  %v679_v35 = vld [vmem:[#allocation6 + $0xb0] sm:$0xff]  ;;  %v15767_v36 = vpack.c.bf16 %v675_v29, %v673_v28  ;;  %v682_v37 = vld [vmem:[#allocation6 + $0xc8] sm:$0xff]  ;;  %v684_v38 = vld [vmem:[#allocation6 + $0xd8] sm:$0xff]  ;;  %v15769_v39 = vpack.c.bf16 %v680_v32, %v678_v31 }
 0x131   : > { %15758 = vmatprep.subr.bf16.mxu1 %v15757_v17  ;;  %v681_v40 = vld [vmem:[#allocation6 + $0xc0] sm:$0xff]  ;;  %v683_v41 = vld [vmem:[#allocation6 + $0xd0] sm:$0xff]  ;;  %v15771_v42 = vpack.c.bf16 %v679_v35, %v677_v34  ;;  %v15773_v43 = vpack.c.bf16 %v684_v38, %v682_v37  ;;  %v686_v45 = vld [vmem:[#allocation6 + $0xe8] sm:$0xff] }
 0x132   : > { %v15775_v44 = vpack.c.bf16 %v683_v41, %v681_v40  ;;  %v688_v46 = vld [vmem:[#allocation6 + $0xf8] sm:$0xff]  ;;  %v685_v48 = vld [vmem:[#allocation6 + $0xe0] sm:$0xff]  ;;  %v687_v49 = vld [vmem:[#allocation6 + $0xf0] sm:$0xff] }
 0x133   : > { %v15777_v47 = vpack.c.bf16 %v688_v46, %v686_v45  ;;  %v15779_v50 = vpack.c.bf16 %v687_v49, %v685_v48  ;;  %v17604_v51 = vld [vmem:[%s19339_s16] ss:$168 sps:$4 sm:$0xff]   ;;  %v17606_v52 = vld [vmem:[%s19339_s16 + $0x4] ss:$168 sps:$4 sm:$0xff]   ;;  %v17612_v54 = vld [vmem:[%s19339_s16 + $0x154] ss:$168 sps:$4 sm:$0xff]  }
 0x134   : > { %15760 = vmatpush1.bf16.msra.mxu1 %v15759_v22  ;;  %v17609_v53 = vld [vmem:[%s19339_s16 + $0xc] ss:$168 sps:$4 sm:$0xff]   ;;  %5030 = vmatprep.subr.bf16.mxu0 %v17606_v52  ;;  %v17610_v55 = vld [vmem:[%s19339_s16 + $0x150] ss:$168 sps:$4 sm:$0xff]   ;;  %v17616_v57 = vld [vmem:[%s19339_s16 + $0x2a0] ss:$168 sps:$4 sm:$0xff]  }
 0x135   : > { %15762 = vmatprep.subr.bf16.mxu1 %v15761_v26  ;;  %5031 = vmatpush1.bf16.msra.mxu0 %v17604_v51  ;;  %v17618_v56 = vld [vmem:[%s19339_s16 + $0x2a4] ss:$168 sps:$4 sm:$0xff]   ;;  %v17624_v58 = vld [vmem:[%s19339_s16 + $0x3f4] ss:$168 sps:$4 sm:$0xff]   ;;  %v17622_v59 = vld [vmem:[%s19339_s16 + $0x3f0] ss:$168 sps:$4 sm:$0xff]  }
 0x136   : > { %5032 = vmatprep.subr.bf16.mxu0 %v17612_v54  ;;  %v17630_v60 = vld [vmem:[%s19339_s16 + $0x544] ss:$168 sps:$4 sm:$0xff]   ;;  %v17628_v61 = vld [vmem:[%s19339_s16 + $0x540] ss:$168 sps:$4 sm:$0xff]   ;;  %v17636_v62 = vld [vmem:[%s19339_s16 + $0x694] ss:$168 sps:$4 sm:$0xff]  }
 0x137   : > { %v17634_v63 = vld [vmem:[%s19339_s16 + $0x690] ss:$168 sps:$4 sm:$0xff]   ;;  %v17642_v1 = vld [vmem:[%s19339_s16 + $0x7e4] ss:$168 sps:$4 sm:$0xff]   ;;  %v17640_v2 = vld [vmem:[%s19339_s16 + $0x7e0] ss:$168 sps:$4 sm:$0xff]  }
 0x138   : > { %15764 = vmatpush1.bf16.msra.mxu1 %v15763_v30  ;;  %v17648_v3 = vld [vmem:[%s19339_s16 + $0x934] ss:$168 sps:$4 sm:$0xff]   ;;  %v17646_v4 = vld [vmem:[%s19339_s16 + $0x930] ss:$168 sps:$4 sm:$0xff]   ;;  %v17654_v5 = vld [vmem:[%s19339_s16 + $0xa84] ss:$168 sps:$4 sm:$0xff]  }
 0x139   : > { %15766 = vmatprep.subr.bf16.mxu1 %v15765_v33  ;;  %5033 = vmatpush1.bf16.msra.mxu0 %v17610_v55  ;;  %v17652_v6 = vld [vmem:[%s19339_s16 + $0xa80] ss:$168 sps:$4 sm:$0xff]   ;;  %v17660_v7 = vld [vmem:[%s19339_s16 + $0xbd4] ss:$168 sps:$4 sm:$0xff]   ;;  %v17658_v8 = vld [vmem:[%s19339_s16 + $0xbd0] ss:$168 sps:$4 sm:$0xff]  }
 0x13a   : > { %5034 = vmatprep.subr.bf16.mxu0 %v17618_v56  ;;  %v17666_v9 = vld [vmem:[%s19339_s16 + $0xd24] ss:$168 sps:$4 sm:$0xff]   ;;  %v17664_v10 = vld [vmem:[%s19339_s16 + $0xd20] ss:$168 sps:$4 sm:$0xff]   ;;  %v17672_v11 = vld [vmem:[%s19339_s16 + $0xe74] ss:$168 sps:$4 sm:$0xff]  }
 0x13b   : > { %v17670_v12 = vld [vmem:[%s19339_s16 + $0xe70] ss:$168 sps:$4 sm:$0xff]   ;;  %v17678_v13 = vld [vmem:[%s19339_s16 + $0xfc4] ss:$168 sps:$4 sm:$0xff]   ;;  %v17676_v14 = vld [vmem:[%s19339_s16 + $0xfc0] ss:$168 sps:$4 sm:$0xff]  }
 0x13c   : > { %15768 = vmatpush1.bf16.msra.mxu1 %v15767_v36  ;;  %v17684_v15 = vld [vmem:[%s19339_s16 + $0x1114] ss:$168 sps:$4 sm:$0xff]   ;;  %v17682_v16 = vld [vmem:[%s19339_s16 + $0x1110] ss:$168 sps:$4 sm:$0xff]   ;;  %v17690_v49 = vld [vmem:[%s19339_s16 + $0x1264] ss:$168 sps:$4 sm:$0xff]  }
 0x13d   : > { %15770 = vmatprep.subr.bf16.mxu1 %v15769_v39  ;;  %5035 = vmatpush1.bf16.msra.mxu0 %v17616_v57  ;;  %v12795_v17 = vld [vmem:[#allocation4] ss:$0 sm:$0xff]  ;;  %v17607_v19 = vld [vmem:[%s19339_s16 + $0x8] ss:$168 sps:$4 sm:$0xff]   ;;  %v17613_v24 = vld [vmem:[%s19339_s16 + $0x158] ss:$168 sps:$4 sm:$0xff]  }
 0x13e   : > { %5036 = vmatprep.subr.bf16.mxu0 %v17624_v58  ;;  %v17615_v22 = vld [vmem:[%s19339_s16 + $0x15c] ss:$168 sps:$4 sm:$0xff]   ;;  %v17621_v25 = vld [vmem:[%s19339_s16 + $0x2ac] ss:$168 sps:$4 sm:$0xff]   ;;  %v17619_v26 = vld [vmem:[%s19339_s16 + $0x2a8] ss:$168 sps:$4 sm:$0xff]  }
 0x13f   : > { %v17627_v27 = vld [vmem:[%s19339_s16 + $0x3fc] ss:$168 sps:$4 sm:$0xff]   ;;  %v17625_v28 = vld [vmem:[%s19339_s16 + $0x3f8] ss:$168 sps:$4 sm:$0xff]   ;;  %v17633_v29 = vld [vmem:[%s19339_s16 + $0x54c] ss:$168 sps:$4 sm:$0xff]  }
 0x140   : > { %15772 = vmatpush1.bf16.msra.mxu1 %v15771_v42  ;;  %v17631_v30 = vld [vmem:[%s19339_s16 + $0x548] ss:$168 sps:$4 sm:$0xff]   ;;  %v17639_v31 = vld [vmem:[%s19339_s16 + $0x69c] ss:$168 sps:$4 sm:$0xff]   ;;  %v17637_v32 = vld [vmem:[%s19339_s16 + $0x698] ss:$168 sps:$4 sm:$0xff]  }
 0x141   : > { %15774 = vmatprep.subr.bf16.mxu1 %v15773_v43  ;;  %5037 = vmatpush1.bf16.msra.mxu0 %v17622_v59  ;;  %v17645_v33 = vld [vmem:[%s19339_s16 + $0x7ec] ss:$168 sps:$4 sm:$0xff]   ;;  %v17643_v34 = vld [vmem:[%s19339_s16 + $0x7e8] ss:$168 sps:$4 sm:$0xff]   ;;  %v17651_v35 = vld [vmem:[%s19339_s16 + $0x93c] ss:$168 sps:$4 sm:$0xff]   ;;  %v691_v59 = vlaneseq }
 0x142   : > { %5038 = vmatprep.subr.bf16.mxu0 %v17630_v60  ;;  %v17649_v36 = vld [vmem:[%s19339_s16 + $0x938] ss:$168 sps:$4 sm:$0xff]   ;;  %v17657_v37 = vld [vmem:[%s19339_s16 + $0xa8c] ss:$168 sps:$4 sm:$0xff]   ;;  %v17655_v38 = vld [vmem:[%s19339_s16 + $0xa88] ss:$168 sps:$4 sm:$0xff]  }
 0x143   : > { %v17663_v39 = vld [vmem:[%s19339_s16 + $0xbdc] ss:$168 sps:$4 sm:$0xff]   ;;  %v17661_v40 = vld [vmem:[%s19339_s16 + $0xbd8] ss:$168 sps:$4 sm:$0xff]   ;;  %v17669_v41 = vld [vmem:[%s19339_s16 + $0xd2c] ss:$168 sps:$4 sm:$0xff]  }
 0x144   : > { %15776 = vmatpush1.bf16.msra.mxu1 %v15775_v44  ;;  %v17667_v42 = vld [vmem:[%s19339_s16 + $0xd28] ss:$168 sps:$4 sm:$0xff]   ;;  %v17675_v43 = vld [vmem:[%s19339_s16 + $0xe7c] ss:$168 sps:$4 sm:$0xff]   ;;  %v17673_v44 = vld [vmem:[%s19339_s16 + $0xe78] ss:$168 sps:$4 sm:$0xff]  }
 0x145   : > { %15778 = vmatprep.subr.bf16.mxu1 %v15777_v47  ;;  %5039 = vmatpush1.bf16.msra.mxu0 %v17628_v61  ;;  %v17681_v45 = vld [vmem:[%s19339_s16 + $0xfcc] ss:$168 sps:$4 sm:$0xff]   ;;  %v17679_v46 = vld [vmem:[%s19339_s16 + $0xfc8] ss:$168 sps:$4 sm:$0xff]   ;;  %v17687_v47 = vld [vmem:[%s19339_s16 + $0x111c] ss:$168 sps:$4 sm:$0xff]  }
 0x146   : > { %5040 = vmatprep.subr.bf16.mxu0 %v17636_v62  ;;  %v17685_v48 = vld [vmem:[%s19339_s16 + $0x1118] ss:$168 sps:$4 sm:$0xff]   ;;  %v17691_v52 = vld [vmem:[%s19339_s16 + $0x1268] ss:$168 sps:$4 sm:$0xff]   ;;  %v17699_v54 = vld [vmem:[%s19339_s16 + $0x13bc] ss:$168 sps:$4 sm:$0xff]  }
 0x147   : > { %v17688_v51 = vld [vmem:[%s19339_s16 + $0x1260] ss:$168 sps:$4 sm:$0xff]   ;;  %v17694_v55 = vld [vmem:[%s19339_s16 + $0x13b0] ss:$168 sps:$4 sm:$0xff]   ;;  %v17702_v57 = vld [vmem:[%s19339_s16 + $0x14] ss:$168 sps:$4 sm:$0xff]  }
 0x148   : > { %15780 = vmatpush1.bf16.msra.mxu1 %v15779_v50  ;;  %v17693_v50 = vld [vmem:[%s19339_s16 + $0x126c] ss:$168 sps:$4 sm:$0xff]   ;;  %v17697_v56 = vld [vmem:[%s19339_s16 + $0x13b8] ss:$168 sps:$4 sm:$0xff]   ;;  %v17705_v58 = vld [vmem:[%s19339_s16 + $0x1c] ss:$168 sps:$4 sm:$0xff]  }
 0x149   : > { %5071 = vmatprep.subr.bf16.mxu1 %v17609_v53  ;;  %5041 = vmatpush1.bf16.msra.mxu0 %v17634_v63  ;;  %v17696_v53 = vld [vmem:[%s19339_s16 + $0x13b4] ss:$168 sps:$4 sm:$0xff]   ;;  %v19432_v60 = vshrl.u32 %v691_v59, 7  ;;  %v17772_v59 = vld [vmem:[%s19339_s16 + $0xfd0] ss:$168 sps:$4 sm:$0xff]  }
 0x14a   : > { %5042 = vmatprep.subr.bf16.mxu0 %v17642_v1  ;;  %v689_v62 = vld [vmem:[#allocation7] sm:$0x3] }
 0x14b   : > { %v19435_v61 = vsub.s32 0, %v19432_v60  ;;  %v19438_v63 = vsub.s32 1, %v19432_v60 }
 0x14d   : > { %5043 = vmatpush1.bf16.msra.mxu0 %v17640_v2  ;;  %v694_v1 = vrot.slane %v689_v62, %v19435_v61  ;;  %v698_v2 = vrot.slane %v689_v62, %v19438_v63  ;;  %v17775_v62 = vld [vmem:[%s19339_s16 + $0xfd8] ss:$168 sps:$4 sm:$0xff]  }
 0x14e   : > { %5044 = vmatprep.subr.bf16.mxu0 %v17648_v3 }
 0x151   : > { %5045 = vmatpush1.bf16.msra.mxu0 %v17646_v4 }
 0x152   : > { %5046 = vmatprep.subr.bf16.mxu0 %v17654_v5 }
 0x155   : > { %5047 = vmatpush1.bf16.msra.mxu0 %v17652_v6 }
 0x156   : > { %5048 = vmatprep.subr.bf16.mxu0 %v17660_v7 }
 0x159   : > { %5049 = vmatpush1.bf16.msra.mxu0 %v17658_v8 }
 0x15a   : > { %5050 = vmatprep.subr.bf16.mxu0 %v17666_v9 }
 0x15d   : > { %5051 = vmatpush1.bf16.msra.mxu0 %v17664_v10  ;;  %v17700_v10 = vld [vmem:[%s19339_s16 + $0x10] ss:$168 sps:$4 sm:$0xff]  }
 0x15e   : > { %5052 = vmatprep.subr.bf16.mxu0 %v17672_v11  ;;  %v17703_v11 = vld [vmem:[%s19339_s16 + $0x18] ss:$168 sps:$4 sm:$0xff]  }
 0x161   : > { %5053 = vmatpush1.bf16.msra.mxu0 %v17670_v12 }
 0x162   : > { %5054 = vmatprep.subr.bf16.mxu0 %v17678_v13  ;;  %v17708_v13 = vld [vmem:[%s19339_s16 + $0x164] ss:$168 sps:$4 sm:$0xff]  }
 0x165   : > { %5055 = vmatpush1.bf16.msra.mxu0 %v17676_v14  ;;  %v17711_v14 = vld [vmem:[%s19339_s16 + $0x16c] ss:$168 sps:$4 sm:$0xff]  }
 0x166   : > { %5056 = vmatprep.subr.bf16.mxu0 %v17684_v15  ;;  %v17706_v15 = vld [vmem:[%s19339_s16 + $0x160] ss:$168 sps:$4 sm:$0xff]  }
 0x169   : > { %5057 = vmatpush1.bf16.msra.mxu0 %v17682_v16  ;;  %v17709_v16 = vld [vmem:[%s19339_s16 + $0x168] ss:$168 sps:$4 sm:$0xff]  }
 0x16a   : > { %5058 = vmatprep.subr.bf16.mxu0 %v17690_v49  ;;  %v17762_v49 = vld [vmem:[%s19339_s16 + $0xd34] ss:$168 sps:$4 sm:$0xff]  }
 0x16d   : > { %5059 = vmatpush1.bf16.msra.mxu0 %v17688_v51  ;;  %v17760_v51 = vld [vmem:[%s19339_s16 + $0xd30] ss:$168 sps:$4 sm:$0xff]  }
 0x16e   : > { %5060 = vmatprep.subr.bf16.mxu0 %v17696_v53  ;;  %v17768_v53 = vld [vmem:[%s19339_s16 + $0xe84] ss:$168 sps:$4 sm:$0xff]  }
 0x171   : > { %5061 = vmatpush1.bf16.msra.mxu0 %v17694_v55  ;;  %v17766_v55 = vld [vmem:[%s19339_s16 + $0xe80] ss:$168 sps:$4 sm:$0xff]  }
 0x172   : > { %5112 = vmatprep.subr.bf16.mxu0 %v17702_v57  ;;  %v17774_v57 = vld [vmem:[%s19339_s16 + $0xfd4] ss:$168 sps:$4 sm:$0xff]  }
 0x202   : > { %v652_v18 = vpop.f32.mrb[0].mxu0 }
 0x203   : > { %v653_v20 = vadd.f32 %v12795_v17, %v652_v18  ;;  %v14278_v21 = vpop.f32.mrb[1].mxu0  ;;  %v17714_v17 = vld [vmem:[%s19339_s16 + $0x2b4] ss:$168 sps:$4 sm:$0xff]  }
 0x204   : > { %v17717_v18 = vld [vmem:[%s19339_s16 + $0x2bc] ss:$168 sps:$4 sm:$0xff]  }
 0x205   : > { %v656_v23 = vmax.f32 %v653_v20, 0.0  ;;  %v17715_v20 = vld [vmem:[%s19339_s16 + $0x2b8] ss:$168 sps:$4 sm:$0xff]   ;;  %v17720_v21 = vld [vmem:[%s19339_s16 + $0x404] ss:$168 sps:$4 sm:$0xff]  }
 0x207   : > { %766 = vmatmul.mubr.f32.vlgmr.msra.gmra.mrb[0].mxu1 %v656_v23  ;;  %v17718_v23 = vld [vmem:[%s19339_s16 + $0x400] ss:$168 sps:$4 sm:$0xff]  }
 0x208   : > { %5072 = vmatpush1.bf16.msra.mxu1 %v17607_v19  ;;  %v17712_v19 = vld [vmem:[%s19339_s16 + $0x2b0] ss:$168 sps:$4 sm:$0xff]  }
 0x209   : > { %5073 = vmatprep.subr.bf16.mxu1 %v17615_v22  ;;  %v17723_v22 = vld [vmem:[%s19339_s16 + $0x40c] ss:$168 sps:$4 sm:$0xff]  }
 0x20c   : > { %5074 = vmatpush1.bf16.msra.mxu1 %v17613_v24  ;;  %v17721_v24 = vld [vmem:[%s19339_s16 + $0x408] ss:$168 sps:$4 sm:$0xff]  }
 0x20d   : > { %5075 = vmatprep.subr.bf16.mxu1 %v17621_v25  ;;  %v17726_v25 = vld [vmem:[%s19339_s16 + $0x554] ss:$168 sps:$4 sm:$0xff]  }
 0x210   : > { %5076 = vmatpush1.bf16.msra.mxu1 %v17619_v26  ;;  %v17729_v26 = vld [vmem:[%s19339_s16 + $0x55c] ss:$168 sps:$4 sm:$0xff]  }
 0x211   : > { %5077 = vmatprep.subr.bf16.mxu1 %v17627_v27  ;;  %v17724_v27 = vld [vmem:[%s19339_s16 + $0x550] ss:$168 sps:$4 sm:$0xff]  }
 0x214   : > { %5078 = vmatpush1.bf16.msra.mxu1 %v17625_v28  ;;  %v17727_v28 = vld [vmem:[%s19339_s16 + $0x558] ss:$168 sps:$4 sm:$0xff]  }
 0x215   : > { %5079 = vmatprep.subr.bf16.mxu1 %v17633_v29  ;;  %v17732_v29 = vld [vmem:[%s19339_s16 + $0x6a4] ss:$168 sps:$4 sm:$0xff]  }
 0x218   : > { %5080 = vmatpush1.bf16.msra.mxu1 %v17631_v30  ;;  %v17735_v30 = vld [vmem:[%s19339_s16 + $0x6ac] ss:$168 sps:$4 sm:$0xff]  }
 0x219   : > { %5081 = vmatprep.subr.bf16.mxu1 %v17639_v31  ;;  %v17730_v31 = vld [vmem:[%s19339_s16 + $0x6a0] ss:$168 sps:$4 sm:$0xff]  }
 0x21c   : > { %5082 = vmatpush1.bf16.msra.mxu1 %v17637_v32  ;;  %v17733_v32 = vld [vmem:[%s19339_s16 + $0x6a8] ss:$168 sps:$4 sm:$0xff]  }
 0x21d   : > { %5083 = vmatprep.subr.bf16.mxu1 %v17645_v33  ;;  %v17738_v33 = vld [vmem:[%s19339_s16 + $0x7f4] ss:$168 sps:$4 sm:$0xff]  }
 0x220   : > { %5084 = vmatpush1.bf16.msra.mxu1 %v17643_v34  ;;  %v17741_v34 = vld [vmem:[%s19339_s16 + $0x7fc] ss:$168 sps:$4 sm:$0xff]  }
 0x221   : > { %5085 = vmatprep.subr.bf16.mxu1 %v17651_v35  ;;  %v17736_v35 = vld [vmem:[%s19339_s16 + $0x7f0] ss:$168 sps:$4 sm:$0xff]  }
 0x224   : > { %5086 = vmatpush1.bf16.msra.mxu1 %v17649_v36  ;;  %v17739_v36 = vld [vmem:[%s19339_s16 + $0x7f8] ss:$168 sps:$4 sm:$0xff]  }
 0x225   : > { %5087 = vmatprep.subr.bf16.mxu1 %v17657_v37  ;;  %v17744_v37 = vld [vmem:[%s19339_s16 + $0x944] ss:$168 sps:$4 sm:$0xff]  }
 0x228   : > { %5088 = vmatpush1.bf16.msra.mxu1 %v17655_v38  ;;  %v17747_v38 = vld [vmem:[%s19339_s16 + $0x94c] ss:$168 sps:$4 sm:$0xff]  }
 0x229   : > { %5089 = vmatprep.subr.bf16.mxu1 %v17663_v39  ;;  %v17742_v39 = vld [vmem:[%s19339_s16 + $0x940] ss:$168 sps:$4 sm:$0xff]  }
 0x22c   : > { %5090 = vmatpush1.bf16.msra.mxu1 %v17661_v40  ;;  %v17745_v40 = vld [vmem:[%s19339_s16 + $0x948] ss:$168 sps:$4 sm:$0xff]  }
 0x22d   : > { %5091 = vmatprep.subr.bf16.mxu1 %v17669_v41  ;;  %v17750_v41 = vld [vmem:[%s19339_s16 + $0xa94] ss:$168 sps:$4 sm:$0xff]  }
 0x230   : > { %5092 = vmatpush1.bf16.msra.mxu1 %v17667_v42  ;;  %v17753_v42 = vld [vmem:[%s19339_s16 + $0xa9c] ss:$168 sps:$4 sm:$0xff]  }
 0x231   : > { %5093 = vmatprep.subr.bf16.mxu1 %v17675_v43  ;;  %v17748_v43 = vld [vmem:[%s19339_s16 + $0xa90] ss:$168 sps:$4 sm:$0xff]  }
 0x234   : > { %5094 = vmatpush1.bf16.msra.mxu1 %v17673_v44  ;;  %v17751_v44 = vld [vmem:[%s19339_s16 + $0xa98] ss:$168 sps:$4 sm:$0xff]  }
 0x235   : > { %5095 = vmatprep.subr.bf16.mxu1 %v17681_v45  ;;  %v17756_v45 = vld [vmem:[%s19339_s16 + $0xbe4] ss:$168 sps:$4 sm:$0xff]  }
 0x238   : > { %5096 = vmatpush1.bf16.msra.mxu1 %v17679_v46  ;;  %v17759_v46 = vld [vmem:[%s19339_s16 + $0xbec] ss:$168 sps:$4 sm:$0xff]  }
 0x239   : > { %5097 = vmatprep.subr.bf16.mxu1 %v17687_v47  ;;  %v17754_v47 = vld [vmem:[%s19339_s16 + $0xbe0] ss:$168 sps:$4 sm:$0xff]  }
 0x23c   : > { %5098 = vmatpush1.bf16.msra.mxu1 %v17685_v48  ;;  %v17757_v48 = vld [vmem:[%s19339_s16 + $0xbe8] ss:$168 sps:$4 sm:$0xff]  }
 0x23d   : > { %5099 = vmatprep.subr.bf16.mxu1 %v17693_v50  ;;  %v17765_v50 = vld [vmem:[%s19339_s16 + $0xd3c] ss:$168 sps:$4 sm:$0xff]  }
 0x240   : > { %5100 = vmatpush1.bf16.msra.mxu1 %v17691_v52  ;;  %v17763_v52 = vld [vmem:[%s19339_s16 + $0xd38] ss:$168 sps:$4 sm:$0xff]  }
 0x241   : > { %5101 = vmatprep.subr.bf16.mxu1 %v17699_v54  ;;  %v17771_v54 = vld [vmem:[%s19339_s16 + $0xe8c] ss:$168 sps:$4 sm:$0xff]  }
 0x244   : > { %5102 = vmatpush1.bf16.msra.mxu1 %v17697_v56  ;;  %v17769_v56 = vld [vmem:[%s19339_s16 + $0xe88] ss:$168 sps:$4 sm:$0xff]  }
 0x245   : > { %5153 = vmatprep.subr.bf16.mxu1 %v17705_v58  ;;  %v17777_v58 = vld [vmem:[%s19339_s16 + $0xfdc] ss:$168 sps:$4 sm:$0xff]  }
 0x2da   : > { %v767_v3 = vpop.f32.mrb[0].mxu1 }
 0x2db   : > { %v768_v4 = vadd.f32 %v767_v3, %v694_v1  ;;  %v769_v5 = vpop.f32.mrb[1].mxu1  ;;  %v17780_v1 = vld [vmem:[%s19339_s16 + $0x1124] ss:$168 sps:$4 sm:$0xff]   ;;  %v17778_v3 = vld [vmem:[%s19339_s16 + $0x1120] ss:$168 sps:$4 sm:$0xff]  }
 0x2dc   : > { %v770_v6 = vadd.f32 %v769_v5, %v698_v2  ;;  %v17783_v2 = vld [vmem:[%s19339_s16 + $0x112c] ss:$168 sps:$4 sm:$0xff]  }
 0x2dd   : > { %v772_v7 = vmax.f32 %v768_v4, 0.0  ;;  %v17781_v4 = vld [vmem:[%s19339_s16 + $0x1128] ss:$168 sps:$4 sm:$0xff]   ;;  %v17786_v5 = vld [vmem:[%s19339_s16 + $0x1274] ss:$168 sps:$4 sm:$0xff]  }
 0x2de   : > { %v773_v8 = vmax.f32 %v770_v6, 0.0  ;;  %v17789_v6 = vld [vmem:[%s19339_s16 + $0x127c] ss:$168 sps:$4 sm:$0xff]  }
 0x2df   : > { %v19446_v12 = vpack.c.bf16 %v772_v7, %v772_v7  ;;  %v17784_v7 = vld [vmem:[%s19339_s16 + $0x1270] ss:$168 sps:$4 sm:$0xff]  }
 0x2e0   : > { %v19442_v9 = vpack.c.bf16 %v773_v8, %v773_v8  ;;  %v17787_v8 = vld [vmem:[%s19339_s16 + $0x1278] ss:$168 sps:$4 sm:$0xff]  }
 0x2e2   : > { %5062 = vmatprep.mubr.bf16.mxu0 %v19442_v9  ;;  %5103 = vmatprep.mubr.bf16.mxu1 %v19442_v9 }
 0x2e3   : > { %5063 = vmatmul.mubr.bf16.vlgmr.msra.gmra.mrb[4].mxu0 %v19446_v12  ;;  %5104 = vmatmul.mubr.bf16.vlgmr.msra.gmra.mrb[4].mxu1 %v19446_v12 }
 0x2e4   : > { %5113 = vmatpush1.bf16.msra.mxu0 %v17700_v10  ;;  %5154 = vmatpush1.bf16.msra.mxu1 %v17703_v11  ;;  %v17792_v10 = vld [vmem:[%s19339_s16 + $0x13c4] ss:$168 sps:$4 sm:$0xff]  }
 0x2e5   : > { %5144 = vmatprep.mubr.bf16.mxu0 %v19442_v9  ;;  %5185 = vmatprep.mubr.bf16.mxu1 %v19442_v9  ;;  %v17795_v11 = vld [vmem:[%s19339_s16 + $0x13cc] ss:$168 sps:$4 sm:$0xff]  }
 0x2e6   : > { %5114 = vmatprep.subr.bf16.mxu0 %v17708_v13  ;;  %5155 = vmatprep.subr.bf16.mxu1 %v17711_v14  ;;  %v17790_v13 = vld [vmem:[%s19339_s16 + $0x13c0] ss:$168 sps:$4 sm:$0xff]  }
 0x2e7   : > { %v17793_v14 = vld [vmem:[%s19339_s16 + $0x13c8] ss:$168 sps:$4 sm:$0xff]  }
 0x2e8   : > { %5115 = vmatpush1.bf16.msra.mxu0 %v17706_v15  ;;  %5156 = vmatpush1.bf16.msra.mxu1 %v17709_v16  ;;  %v17798_v15 = vld [vmem:[%s19339_s16 + $0x24] ss:$168 sps:$4 sm:$0xff]  }
 0x2e9   : > { %5116 = vmatprep.subr.bf16.mxu0 %v17714_v17  ;;  %5157 = vmatprep.subr.bf16.mxu1 %v17717_v18  ;;  %v17801_v16 = vld [vmem:[%s19339_s16 + $0x2c] ss:$168 sps:$4 sm:$0xff]   ;;  %v17796_v17 = vld [vmem:[%s19339_s16 + $0x20] ss:$168 sps:$4 sm:$0xff]  }
 0x2ea   : > { %v17799_v18 = vld [vmem:[%s19339_s16 + $0x28] ss:$168 sps:$4 sm:$0xff]  }
 0x2ec   : > { %5117 = vmatpush1.bf16.msra.mxu0 %v17712_v19  ;;  %5158 = vmatpush1.bf16.msra.mxu1 %v17715_v20  ;;  %v17804_v19 = vld [vmem:[%s19339_s16 + $0x174] ss:$168 sps:$4 sm:$0xff]  }
 0x2ed   : > { %5118 = vmatprep.subr.bf16.mxu0 %v17720_v21  ;;  %5159 = vmatprep.subr.bf16.mxu1 %v17723_v22  ;;  %v17807_v20 = vld [vmem:[%s19339_s16 + $0x17c] ss:$168 sps:$4 sm:$0xff]   ;;  %v17802_v21 = vld [vmem:[%s19339_s16 + $0x170] ss:$168 sps:$4 sm:$0xff]  }
 0x2ee   : > { %v17805_v22 = vld [vmem:[%s19339_s16 + $0x178] ss:$168 sps:$4 sm:$0xff]  }
 0x2f0   : > { %5119 = vmatpush1.bf16.msra.mxu0 %v17718_v23  ;;  %5160 = vmatpush1.bf16.msra.mxu1 %v17721_v24  ;;  %v17810_v23 = vld [vmem:[%s19339_s16 + $0x2c4] ss:$168 sps:$4 sm:$0xff]  }
 0x2f1   : > { %5120 = vmatprep.subr.bf16.mxu0 %v17726_v25  ;;  %5161 = vmatprep.subr.bf16.mxu1 %v17729_v26  ;;  %v17813_v24 = vld [vmem:[%s19339_s16 + $0x2cc] ss:$168 sps:$4 sm:$0xff]   ;;  %v17808_v25 = vld [vmem:[%s19339_s16 + $0x2c0] ss:$168 sps:$4 sm:$0xff]  }
 0x2f2   : > { %v17811_v26 = vld [vmem:[%s19339_s16 + $0x2c8] ss:$168 sps:$4 sm:$0xff]  }
 0x2f4   : > { %5121 = vmatpush1.bf16.msra.mxu0 %v17724_v27  ;;  %5162 = vmatpush1.bf16.msra.mxu1 %v17727_v28  ;;  %v17816_v27 = vld [vmem:[%s19339_s16 + $0x414] ss:$168 sps:$4 sm:$0xff]  }
 0x2f5   : > { %5122 = vmatprep.subr.bf16.mxu0 %v17732_v29  ;;  %5163 = vmatprep.subr.bf16.mxu1 %v17735_v30  ;;  %v17819_v28 = vld [vmem:[%s19339_s16 + $0x41c] ss:$168 sps:$4 sm:$0xff]   ;;  %v17814_v29 = vld [vmem:[%s19339_s16 + $0x410] ss:$168 sps:$4 sm:$0xff]  }
 0x2f6   : > { %v17817_v30 = vld [vmem:[%s19339_s16 + $0x418] ss:$168 sps:$4 sm:$0xff]  }
 0x2f8   : > { %5123 = vmatpush1.bf16.msra.mxu0 %v17730_v31  ;;  %5164 = vmatpush1.bf16.msra.mxu1 %v17733_v32  ;;  %v17822_v31 = vld [vmem:[%s19339_s16 + $0x564] ss:$168 sps:$4 sm:$0xff]  }
 0x2f9   : > { %5124 = vmatprep.subr.bf16.mxu0 %v17738_v33  ;;  %5165 = vmatprep.subr.bf16.mxu1 %v17741_v34  ;;  %v17825_v32 = vld [vmem:[%s19339_s16 + $0x56c] ss:$168 sps:$4 sm:$0xff]   ;;  %v17820_v33 = vld [vmem:[%s19339_s16 + $0x560] ss:$168 sps:$4 sm:$0xff]  }
 0x2fa   : > { %v17823_v34 = vld [vmem:[%s19339_s16 + $0x568] ss:$168 sps:$4 sm:$0xff]  }
 0x2fc   : > { %5125 = vmatpush1.bf16.msra.mxu0 %v17736_v35  ;;  %5166 = vmatpush1.bf16.msra.mxu1 %v17739_v36  ;;  %v17828_v35 = vld [vmem:[%s19339_s16 + $0x6b4] ss:$168 sps:$4 sm:$0xff]  }
 0x2fd   : > { %5126 = vmatprep.subr.bf16.mxu0 %v17744_v37  ;;  %5167 = vmatprep.subr.bf16.mxu1 %v17747_v38  ;;  %v17831_v36 = vld [vmem:[%s19339_s16 + $0x6bc] ss:$168 sps:$4 sm:$0xff]   ;;  %v17826_v37 = vld [vmem:[%s19339_s16 + $0x6b0] ss:$168 sps:$4 sm:$0xff]  }
 0x2fe   : > { %v17829_v38 = vld [vmem:[%s19339_s16 + $0x6b8] ss:$168 sps:$4 sm:$0xff]  }
 0x300   : > { %5127 = vmatpush1.bf16.msra.mxu0 %v17742_v39  ;;  %5168 = vmatpush1.bf16.msra.mxu1 %v17745_v40  ;;  %v17834_v39 = vld [vmem:[%s19339_s16 + $0x804] ss:$168 sps:$4 sm:$0xff]  }
 0x301   : > { %5128 = vmatprep.subr.bf16.mxu0 %v17750_v41  ;;  %5169 = vmatprep.subr.bf16.mxu1 %v17753_v42  ;;  %v17837_v40 = vld [vmem:[%s19339_s16 + $0x80c] ss:$168 sps:$4 sm:$0xff]   ;;  %v17832_v41 = vld [vmem:[%s19339_s16 + $0x800] ss:$168 sps:$4 sm:$0xff]  }
 0x302   : > { %v17835_v42 = vld [vmem:[%s19339_s16 + $0x808] ss:$168 sps:$4 sm:$0xff]  }
 0x304   : > { %5129 = vmatpush1.bf16.msra.mxu0 %v17748_v43  ;;  %5170 = vmatpush1.bf16.msra.mxu1 %v17751_v44  ;;  %v17840_v43 = vld [vmem:[%s19339_s16 + $0x954] ss:$168 sps:$4 sm:$0xff]  }
 0x305   : > { %5130 = vmatprep.subr.bf16.mxu0 %v17756_v45  ;;  %5171 = vmatprep.subr.bf16.mxu1 %v17759_v46  ;;  %v17843_v44 = vld [vmem:[%s19339_s16 + $0x95c] ss:$168 sps:$4 sm:$0xff]   ;;  %v17838_v45 = vld [vmem:[%s19339_s16 + $0x950] ss:$168 sps:$4 sm:$0xff]  }
 0x306   : > { %v17841_v46 = vld [vmem:[%s19339_s16 + $0x958] ss:$168 sps:$4 sm:$0xff]  }
 0x308   : > { %5131 = vmatpush1.bf16.msra.mxu0 %v17754_v47  ;;  %5172 = vmatpush1.bf16.msra.mxu1 %v17757_v48  ;;  %v17846_v47 = vld [vmem:[%s19339_s16 + $0xaa4] ss:$168 sps:$4 sm:$0xff]  }
 0x309   : > { %5132 = vmatprep.subr.bf16.mxu0 %v17762_v49  ;;  %5173 = vmatprep.subr.bf16.mxu1 %v17765_v50  ;;  %v17849_v48 = vld [vmem:[%s19339_s16 + $0xaac] ss:$168 sps:$4 sm:$0xff]   ;;  %v17844_v49 = vld [vmem:[%s19339_s16 + $0xaa0] ss:$168 sps:$4 sm:$0xff]  }
 0x30a   : > { %v17847_v50 = vld [vmem:[%s19339_s16 + $0xaa8] ss:$168 sps:$4 sm:$0xff]  }
 0x30c   : > { %5133 = vmatpush1.bf16.msra.mxu0 %v17760_v51  ;;  %5174 = vmatpush1.bf16.msra.mxu1 %v17763_v52  ;;  %v17852_v51 = vld [vmem:[%s19339_s16 + $0xbf4] ss:$168 sps:$4 sm:$0xff]  }
 0x30d   : > { %5134 = vmatprep.subr.bf16.mxu0 %v17768_v53  ;;  %5175 = vmatprep.subr.bf16.mxu1 %v17771_v54  ;;  %v17855_v52 = vld [vmem:[%s19339_s16 + $0xbfc] ss:$168 sps:$4 sm:$0xff]   ;;  %v17850_v53 = vld [vmem:[%s19339_s16 + $0xbf0] ss:$168 sps:$4 sm:$0xff]  }
 0x30e   : > { %v17853_v54 = vld [vmem:[%s19339_s16 + $0xbf8] ss:$168 sps:$4 sm:$0xff]  }
 0x310   : > { %5135 = vmatpush1.bf16.msra.mxu0 %v17766_v55  ;;  %5176 = vmatpush1.bf16.msra.mxu1 %v17769_v56  ;;  %v17858_v55 = vld [vmem:[%s19339_s16 + $0xd44] ss:$168 sps:$4 sm:$0xff]  }
 0x311   : > { %5136 = vmatprep.subr.bf16.mxu0 %v17774_v57  ;;  %5177 = vmatprep.subr.bf16.mxu1 %v17777_v58  ;;  %v17861_v56 = vld [vmem:[%s19339_s16 + $0xd4c] ss:$168 sps:$4 sm:$0xff]   ;;  %v17856_v57 = vld [vmem:[%s19339_s16 + $0xd40] ss:$168 sps:$4 sm:$0xff]  }
 0x312   : > { %v17859_v58 = vld [vmem:[%s19339_s16 + $0xd48] ss:$168 sps:$4 sm:$0xff]  }
 0x314   : > { %5137 = vmatpush1.bf16.msra.mxu0 %v17772_v59  ;;  %5178 = vmatpush1.bf16.msra.mxu1 %v17775_v62  ;;  %v17864_v59 = vld [vmem:[%s19339_s16 + $0xe94] ss:$168 sps:$4 sm:$0xff]  }
 0x315   : > { %5138 = vmatprep.subr.bf16.mxu0 %v17780_v1  ;;  %5179 = vmatprep.subr.bf16.mxu1 %v17783_v2  ;;  %v17867_v62 = vld [vmem:[%s19339_s16 + $0xe9c] ss:$168 sps:$4 sm:$0xff]   ;;  %v17862_v1 = vld [vmem:[%s19339_s16 + $0xe90] ss:$168 sps:$4 sm:$0xff]  }
 0x316   : > { %v17865_v2 = vld [vmem:[%s19339_s16 + $0xe98] ss:$168 sps:$4 sm:$0xff]  }
 0x318   : > { %5139 = vmatpush1.bf16.msra.mxu0 %v17778_v3  ;;  %5180 = vmatpush1.bf16.msra.mxu1 %v17781_v4  ;;  %v17870_v3 = vld [vmem:[%s19339_s16 + $0xfe4] ss:$168 sps:$4 sm:$0xff]  }
 0x319   : > { %5140 = vmatprep.subr.bf16.mxu0 %v17786_v5  ;;  %5181 = vmatprep.subr.bf16.mxu1 %v17789_v6  ;;  %v17873_v4 = vld [vmem:[%s19339_s16 + $0xfec] ss:$168 sps:$4 sm:$0xff]   ;;  %v17868_v5 = vld [vmem:[%s19339_s16 + $0xfe0] ss:$168 sps:$4 sm:$0xff]  }
 0x31a   : > { %v17871_v6 = vld [vmem:[%s19339_s16 + $0xfe8] ss:$168 sps:$4 sm:$0xff]  }
 0x31c   : > { %5141 = vmatpush1.bf16.msra.mxu0 %v17784_v7  ;;  %5182 = vmatpush1.bf16.msra.mxu1 %v17787_v8  ;;  %v17876_v7 = vld [vmem:[%s19339_s16 + $0x1134] ss:$168 sps:$4 sm:$0xff]  }
 0x31d   : > { %5142 = vmatprep.subr.bf16.mxu0 %v17792_v10  ;;  %5183 = vmatprep.subr.bf16.mxu1 %v17795_v11  ;;  %v17879_v8 = vld [vmem:[%s19339_s16 + $0x113c] ss:$168 sps:$4 sm:$0xff]   ;;  %v17874_v10 = vld [vmem:[%s19339_s16 + $0x1130] ss:$168 sps:$4 sm:$0xff]  }
 0x31e   : > { %v17877_v11 = vld [vmem:[%s19339_s16 + $0x1138] ss:$168 sps:$4 sm:$0xff]  }
 0x320   : > { %5143 = vmatpush1.bf16.msra.mxu0 %v17790_v13  ;;  %5184 = vmatpush1.bf16.msra.mxu1 %v17793_v14  ;;  %v17882_v13 = vld [vmem:[%s19339_s16 + $0x1284] ss:$168 sps:$4 sm:$0xff]  }
 0x321   : > { %5194 = vmatprep.subr.bf16.mxu0 %v17798_v15  ;;  %5235 = vmatprep.subr.bf16.mxu1 %v17801_v16  ;;  %v17885_v14 = vld [vmem:[%s19339_s16 + $0x128c] ss:$168 sps:$4 sm:$0xff]   ;;  %v17880_v15 = vld [vmem:[%s19339_s16 + $0x1280] ss:$168 sps:$4 sm:$0xff]  }
 0x322   : > { %v17883_v16 = vld [vmem:[%s19339_s16 + $0x1288] ss:$168 sps:$4 sm:$0xff]  }
 0x323   : > { %5145 = vmatmul.mubr.bf16.vlgmr.msra.gmra.mrb[8].mxu0 %v19446_v12  ;;  %5186 = vmatmul.mubr.bf16.vlgmr.msra.gmra.mrb[8].mxu1 %v19446_v12 }
 0x324   : > { %5195 = vmatpush1.bf16.msra.mxu0 %v17796_v17  ;;  %5226 = vmatprep.mubr.bf16.mxu0 %v19442_v9  ;;  %v17888_v17 = vld [vmem:[%s19339_s16 + $0x13d4] ss:$168 sps:$4 sm:$0xff]  }
 0x325   : > { %5236 = vmatpush1.bf16.msra.mxu1 %v17799_v18  ;;  %5267 = vmatprep.mubr.bf16.mxu1 %v19442_v9  ;;  %v17891_v18 = vld [vmem:[%s19339_s16 + $0x13dc] ss:$168 sps:$4 sm:$0xff]  }
 0x326   : > { %5196 = vmatprep.subr.bf16.mxu0 %v17804_v19  ;;  %5237 = vmatprep.subr.bf16.mxu1 %v17807_v20  ;;  %v17886_v19 = vld [vmem:[%s19339_s16 + $0x13d0] ss:$168 sps:$4 sm:$0xff]  }
 0x327   : > { %v17889_v20 = vld [vmem:[%s19339_s16 + $0x13d8] ss:$168 sps:$4 sm:$0xff]  }
 0x328   : > { %5197 = vmatpush1.bf16.msra.mxu0 %v17802_v21  ;;  %v17894_v21 = vld [vmem:[%s19339_s16 + $0x34] ss:$168 sps:$4 sm:$0xff]  }
 0x329   : > { %5238 = vmatpush1.bf16.msra.mxu1 %v17805_v22  ;;  %5198 = vmatprep.subr.bf16.mxu0 %v17810_v23  ;;  %v17897_v22 = vld [vmem:[%s19339_s16 + $0x3c] ss:$168 sps:$4 sm:$0xff]   ;;  %v17892_v23 = vld [vmem:[%s19339_s16 + $0x30] ss:$168 sps:$4 sm:$0xff]  }
 0x32a   : > { %5239 = vmatprep.subr.bf16.mxu1 %v17813_v24  ;;  %v17895_v24 = vld [vmem:[%s19339_s16 + $0x38] ss:$168 sps:$4 sm:$0xff]  }
 0x32c   : > { %5199 = vmatpush1.bf16.msra.mxu0 %v17808_v25  ;;  %v17900_v25 = vld [vmem:[%s19339_s16 + $0x184] ss:$168 sps:$4 sm:$0xff]  }
 0x32d   : > { %5240 = vmatpush1.bf16.msra.mxu1 %v17811_v26  ;;  %5200 = vmatprep.subr.bf16.mxu0 %v17816_v27  ;;  %v17903_v26 = vld [vmem:[%s19339_s16 + $0x18c] ss:$168 sps:$4 sm:$0xff]   ;;  %v17898_v27 = vld [vmem:[%s19339_s16 + $0x180] ss:$168 sps:$4 sm:$0xff]  }
 0x32e   : > { %5241 = vmatprep.subr.bf16.mxu1 %v17819_v28  ;;  %v17901_v28 = vld [vmem:[%s19339_s16 + $0x188] ss:$168 sps:$4 sm:$0xff]  }
 0x330   : > { %5201 = vmatpush1.bf16.msra.mxu0 %v17814_v29  ;;  %v17906_v29 = vld [vmem:[%s19339_s16 + $0x2d4] ss:$168 sps:$4 sm:$0xff]  }
 0x331   : > { %5242 = vmatpush1.bf16.msra.mxu1 %v17817_v30  ;;  %5202 = vmatprep.subr.bf16.mxu0 %v17822_v31  ;;  %v17909_v30 = vld [vmem:[%s19339_s16 + $0x2dc] ss:$168 sps:$4 sm:$0xff]   ;;  %v17904_v31 = vld [vmem:[%s19339_s16 + $0x2d0] ss:$168 sps:$4 sm:$0xff]  }
 0x332   : > { %5243 = vmatprep.subr.bf16.mxu1 %v17825_v32  ;;  %v17907_v32 = vld [vmem:[%s19339_s16 + $0x2d8] ss:$168 sps:$4 sm:$0xff]  }
 0x334   : > { %5203 = vmatpush1.bf16.msra.mxu0 %v17820_v33  ;;  %v17912_v33 = vld [vmem:[%s19339_s16 + $0x424] ss:$168 sps:$4 sm:$0xff]  }
 0x335   : > { %5244 = vmatpush1.bf16.msra.mxu1 %v17823_v34  ;;  %5204 = vmatprep.subr.bf16.mxu0 %v17828_v35  ;;  %v17915_v34 = vld [vmem:[%s19339_s16 + $0x42c] ss:$168 sps:$4 sm:$0xff]   ;;  %v17910_v35 = vld [vmem:[%s19339_s16 + $0x420] ss:$168 sps:$4 sm:$0xff]  }
 0x336   : > { %5245 = vmatprep.subr.bf16.mxu1 %v17831_v36  ;;  %v17913_v36 = vld [vmem:[%s19339_s16 + $0x428] ss:$168 sps:$4 sm:$0xff]  }
 0x338   : > { %5205 = vmatpush1.bf16.msra.mxu0 %v17826_v37  ;;  %v17918_v37 = vld [vmem:[%s19339_s16 + $0x574] ss:$168 sps:$4 sm:$0xff]  }
 0x339   : > { %5246 = vmatpush1.bf16.msra.mxu1 %v17829_v38  ;;  %5206 = vmatprep.subr.bf16.mxu0 %v17834_v39  ;;  %v17921_v38 = vld [vmem:[%s19339_s16 + $0x57c] ss:$168 sps:$4 sm:$0xff]   ;;  %v17916_v39 = vld [vmem:[%s19339_s16 + $0x570] ss:$168 sps:$4 sm:$0xff]  }
 0x33a   : > { %5247 = vmatprep.subr.bf16.mxu1 %v17837_v40  ;;  %v17919_v40 = vld [vmem:[%s19339_s16 + $0x578] ss:$168 sps:$4 sm:$0xff]  }
 0x33c   : > { %5207 = vmatpush1.bf16.msra.mxu0 %v17832_v41  ;;  %v17924_v41 = vld [vmem:[%s19339_s16 + $0x6c4] ss:$168 sps:$4 sm:$0xff]  }
 0x33d   : > { %5248 = vmatpush1.bf16.msra.mxu1 %v17835_v42  ;;  %5208 = vmatprep.subr.bf16.mxu0 %v17840_v43  ;;  %v17927_v42 = vld [vmem:[%s19339_s16 + $0x6cc] ss:$168 sps:$4 sm:$0xff]   ;;  %v17922_v43 = vld [vmem:[%s19339_s16 + $0x6c0] ss:$168 sps:$4 sm:$0xff]  }
 0x33e   : > { %5249 = vmatprep.subr.bf16.mxu1 %v17843_v44  ;;  %v17925_v44 = vld [vmem:[%s19339_s16 + $0x6c8] ss:$168 sps:$4 sm:$0xff]  }
 0x340   : > { %5209 = vmatpush1.bf16.msra.mxu0 %v17838_v45  ;;  %v17930_v45 = vld [vmem:[%s19339_s16 + $0x814] ss:$168 sps:$4 sm:$0xff]  }
 0x341   : > { %5250 = vmatpush1.bf16.msra.mxu1 %v17841_v46  ;;  %5210 = vmatprep.subr.bf16.mxu0 %v17846_v47  ;;  %v17933_v46 = vld [vmem:[%s19339_s16 + $0x81c] ss:$168 sps:$4 sm:$0xff]   ;;  %v17928_v47 = vld [vmem:[%s19339_s16 + $0x810] ss:$168 sps:$4 sm:$0xff]  }
 0x342   : > { %5251 = vmatprep.subr.bf16.mxu1 %v17849_v48  ;;  %v17931_v48 = vld [vmem:[%s19339_s16 + $0x818] ss:$168 sps:$4 sm:$0xff]  }
 0x344   : > { %5211 = vmatpush1.bf16.msra.mxu0 %v17844_v49  ;;  %v17936_v49 = vld [vmem:[%s19339_s16 + $0x964] ss:$168 sps:$4 sm:$0xff]  }
 0x345   : > { %5252 = vmatpush1.bf16.msra.mxu1 %v17847_v50  ;;  %5212 = vmatprep.subr.bf16.mxu0 %v17852_v51  ;;  %v17939_v50 = vld [vmem:[%s19339_s16 + $0x96c] ss:$168 sps:$4 sm:$0xff]   ;;  %v17934_v51 = vld [vmem:[%s19339_s16 + $0x960] ss:$168 sps:$4 sm:$0xff]  }
 0x346   : > { %5253 = vmatprep.subr.bf16.mxu1 %v17855_v52  ;;  %v17937_v52 = vld [vmem:[%s19339_s16 + $0x968] ss:$168 sps:$4 sm:$0xff]  }
 0x348   : > { %5213 = vmatpush1.bf16.msra.mxu0 %v17850_v53  ;;  %v17942_v53 = vld [vmem:[%s19339_s16 + $0xab4] ss:$168 sps:$4 sm:$0xff]  }
 0x349   : > { %5254 = vmatpush1.bf16.msra.mxu1 %v17853_v54  ;;  %5214 = vmatprep.subr.bf16.mxu0 %v17858_v55  ;;  %v17945_v54 = vld [vmem:[%s19339_s16 + $0xabc] ss:$168 sps:$4 sm:$0xff]   ;;  %v17940_v55 = vld [vmem:[%s19339_s16 + $0xab0] ss:$168 sps:$4 sm:$0xff]  }
 0x34a   : > { %5255 = vmatprep.subr.bf16.mxu1 %v17861_v56  ;;  %v17943_v56 = vld [vmem:[%s19339_s16 + $0xab8] ss:$168 sps:$4 sm:$0xff]  }
 0x34c   : > { %5215 = vmatpush1.bf16.msra.mxu0 %v17856_v57  ;;  %v17948_v57 = vld [vmem:[%s19339_s16 + $0xc04] ss:$168 sps:$4 sm:$0xff]  }
 0x34d   : > { %5256 = vmatpush1.bf16.msra.mxu1 %v17859_v58  ;;  %5216 = vmatprep.subr.bf16.mxu0 %v17864_v59  ;;  %v17951_v58 = vld [vmem:[%s19339_s16 + $0xc0c] ss:$168 sps:$4 sm:$0xff]   ;;  %v17946_v59 = vld [vmem:[%s19339_s16 + $0xc00] ss:$168 sps:$4 sm:$0xff]  }
 0x34e   : > { %5257 = vmatprep.subr.bf16.mxu1 %v17867_v62  ;;  %v17949_v62 = vld [vmem:[%s19339_s16 + $0xc08] ss:$168 sps:$4 sm:$0xff]  }
 0x350   : > { %5217 = vmatpush1.bf16.msra.mxu0 %v17862_v1  ;;  %v17954_v1 = vld [vmem:[%s19339_s16 + $0xd54] ss:$168 sps:$4 sm:$0xff]  }
 0x351   : > { %5258 = vmatpush1.bf16.msra.mxu1 %v17865_v2  ;;  %5218 = vmatprep.subr.bf16.mxu0 %v17870_v3  ;;  %v17957_v2 = vld [vmem:[%s19339_s16 + $0xd5c] ss:$168 sps:$4 sm:$0xff]   ;;  %v17952_v3 = vld [vmem:[%s19339_s16 + $0xd50] ss:$168 sps:$4 sm:$0xff]  }
 0x352   : > { %5259 = vmatprep.subr.bf16.mxu1 %v17873_v4  ;;  %v17955_v4 = vld [vmem:[%s19339_s16 + $0xd58] ss:$168 sps:$4 sm:$0xff]  }
 0x354   : > { %5219 = vmatpush1.bf16.msra.mxu0 %v17868_v5  ;;  %v17960_v5 = vld [vmem:[%s19339_s16 + $0xea4] ss:$168 sps:$4 sm:$0xff]  }
 0x355   : > { %5260 = vmatpush1.bf16.msra.mxu1 %v17871_v6  ;;  %5220 = vmatprep.subr.bf16.mxu0 %v17876_v7  ;;  %v17963_v6 = vld [vmem:[%s19339_s16 + $0xeac] ss:$168 sps:$4 sm:$0xff]   ;;  %v17958_v7 = vld [vmem:[%s19339_s16 + $0xea0] ss:$168 sps:$4 sm:$0xff]  }
 0x356   : > { %5261 = vmatprep.subr.bf16.mxu1 %v17879_v8  ;;  %v17961_v8 = vld [vmem:[%s19339_s16 + $0xea8] ss:$168 sps:$4 sm:$0xff]  }
 0x358   : > { %5221 = vmatpush1.bf16.msra.mxu0 %v17874_v10  ;;  %v17966_v10 = vld [vmem:[%s19339_s16 + $0xff4] ss:$168 sps:$4 sm:$0xff]  }
 0x359   : > { %5262 = vmatpush1.bf16.msra.mxu1 %v17877_v11  ;;  %5222 = vmatprep.subr.bf16.mxu0 %v17882_v13  ;;  %v17969_v11 = vld [vmem:[%s19339_s16 + $0xffc] ss:$168 sps:$4 sm:$0xff]   ;;  %v17964_v13 = vld [vmem:[%s19339_s16 + $0xff0] ss:$168 sps:$4 sm:$0xff]  }
 0x35a   : > { %5263 = vmatprep.subr.bf16.mxu1 %v17885_v14  ;;  %v17967_v14 = vld [vmem:[%s19339_s16 + $0xff8] ss:$168 sps:$4 sm:$0xff]  }
 0x35c   : > { %5223 = vmatpush1.bf16.msra.mxu0 %v17880_v15  ;;  %v17972_v15 = vld [vmem:[%s19339_s16 + $0x1144] ss:$168 sps:$4 sm:$0xff]  }
 0x35d   : > { %5264 = vmatpush1.bf16.msra.mxu1 %v17883_v16  ;;  %5224 = vmatprep.subr.bf16.mxu0 %v17888_v17  ;;  %v17975_v16 = vld [vmem:[%s19339_s16 + $0x114c] ss:$168 sps:$4 sm:$0xff]   ;;  %v17970_v17 = vld [vmem:[%s19339_s16 + $0x1140] ss:$168 sps:$4 sm:$0xff]  }
 0x35e   : > { %5265 = vmatprep.subr.bf16.mxu1 %v17891_v18  ;;  %v17973_v18 = vld [vmem:[%s19339_s16 + $0x1148] ss:$168 sps:$4 sm:$0xff]  }
 0x360   : > { %5225 = vmatpush1.bf16.msra.mxu0 %v17886_v19  ;;  %v17978_v19 = vld [vmem:[%s19339_s16 + $0x1294] ss:$168 sps:$4 sm:$0xff]  }
 0x361   : > { %5266 = vmatpush1.bf16.msra.mxu1 %v17889_v20  ;;  %5276 = vmatprep.subr.bf16.mxu0 %v17894_v21  ;;  %v17981_v20 = vld [vmem:[%s19339_s16 + $0x129c] ss:$168 sps:$4 sm:$0xff]   ;;  %v17976_v21 = vld [vmem:[%s19339_s16 + $0x1290] ss:$168 sps:$4 sm:$0xff]  }
 0x362   : > { %5317 = vmatprep.subr.bf16.mxu1 %v17897_v22  ;;  %v17979_v22 = vld [vmem:[%s19339_s16 + $0x1298] ss:$168 sps:$4 sm:$0xff]  }
 0x363   : > { %5227 = vmatmul.mubr.bf16.vlgmr.msra.gmra.mrb[12].mxu0 %v19446_v12 }
 0x364   : > { %5268 = vmatmul.mubr.bf16.vlgmr.msra.gmra.mrb[12].mxu1 %v19446_v12  ;;  %5277 = vmatpush1.bf16.msra.mxu0 %v17892_v23  ;;  %v17984_v23 = vld [vmem:[%s19339_s16 + $0x13e4] ss:$168 sps:$4 sm:$0xff]  }
 0x365   : > { %5308 = vmatprep.mubr.bf16.mxu0 %v19442_v9  ;;  %5318 = vmatpush1.bf16.msra.mxu1 %v17895_v24  ;;  %v17987_v24 = vld [vmem:[%s19339_s16 + $0x13ec] ss:$168 sps:$4 sm:$0xff]  }
 0x366   : > { %5349 = vmatprep.mubr.bf16.mxu1 %v19442_v9  ;;  %5278 = vmatprep.subr.bf16.mxu0 %v17900_v25  ;;  %v17982_v25 = vld [vmem:[%s19339_s16 + $0x13e0] ss:$168 sps:$4 sm:$0xff]  }
 0x367   : > { %5319 = vmatprep.subr.bf16.mxu1 %v17903_v26  ;;  %v17985_v26 = vld [vmem:[%s19339_s16 + $0x13e8] ss:$168 sps:$4 sm:$0xff]  }
 0x368   : > { %5279 = vmatpush1.bf16.msra.mxu0 %v17898_v27  ;;  %v17990_v27 = vld [vmem:[%s19339_s16 + $0x44] ss:$168 sps:$4 sm:$0xff]  }
 0x369   : > { %5320 = vmatpush1.bf16.msra.mxu1 %v17901_v28  ;;  %5280 = vmatprep.subr.bf16.mxu0 %v17906_v29  ;;  %v17993_v28 = vld [vmem:[%s19339_s16 + $0x4c] ss:$168 sps:$4 sm:$0xff]   ;;  %v17988_v29 = vld [vmem:[%s19339_s16 + $0x40] ss:$168 sps:$4 sm:$0xff]  }
 0x36a   : > { %5321 = vmatprep.subr.bf16.mxu1 %v17909_v30  ;;  %v17991_v30 = vld [vmem:[%s19339_s16 + $0x48] ss:$168 sps:$4 sm:$0xff]  }
 0x36c   : > { %5281 = vmatpush1.bf16.msra.mxu0 %v17904_v31  ;;  %v17996_v31 = vld [vmem:[%s19339_s16 + $0x194] ss:$168 sps:$4 sm:$0xff]  }
 0x36d   : > { %5322 = vmatpush1.bf16.msra.mxu1 %v17907_v32  ;;  %5282 = vmatprep.subr.bf16.mxu0 %v17912_v33  ;;  %v17999_v32 = vld [vmem:[%s19339_s16 + $0x19c] ss:$168 sps:$4 sm:$0xff]   ;;  %v17994_v33 = vld [vmem:[%s19339_s16 + $0x190] ss:$168 sps:$4 sm:$0xff]  }
 0x36e   : > { %5323 = vmatprep.subr.bf16.mxu1 %v17915_v34  ;;  %v17997_v34 = vld [vmem:[%s19339_s16 + $0x198] ss:$168 sps:$4 sm:$0xff]  }
 0x370   : > { %5283 = vmatpush1.bf16.msra.mxu0 %v17910_v35  ;;  %v18002_v35 = vld [vmem:[%s19339_s16 + $0x2e4] ss:$168 sps:$4 sm:$0xff]  }
 0x371   : > { %5324 = vmatpush1.bf16.msra.mxu1 %v17913_v36  ;;  %5284 = vmatprep.subr.bf16.mxu0 %v17918_v37  ;;  %v18005_v36 = vld [vmem:[%s19339_s16 + $0x2ec] ss:$168 sps:$4 sm:$0xff]   ;;  %v18000_v37 = vld [vmem:[%s19339_s16 + $0x2e0] ss:$168 sps:$4 sm:$0xff]  }
 0x372   : > { %5325 = vmatprep.subr.bf16.mxu1 %v17921_v38  ;;  %v18003_v38 = vld [vmem:[%s19339_s16 + $0x2e8] ss:$168 sps:$4 sm:$0xff]  }
 0x374   : > { %5285 = vmatpush1.bf16.msra.mxu0 %v17916_v39  ;;  %v18008_v39 = vld [vmem:[%s19339_s16 + $0x434] ss:$168 sps:$4 sm:$0xff]  }
 0x375   : > { %5326 = vmatpush1.bf16.msra.mxu1 %v17919_v40  ;;  %5286 = vmatprep.subr.bf16.mxu0 %v17924_v41  ;;  %v18011_v40 = vld [vmem:[%s19339_s16 + $0x43c] ss:$168 sps:$4 sm:$0xff]   ;;  %v18006_v41 = vld [vmem:[%s19339_s16 + $0x430] ss:$168 sps:$4 sm:$0xff]  }
 0x376   : > { %5327 = vmatprep.subr.bf16.mxu1 %v17927_v42  ;;  %v18009_v42 = vld [vmem:[%s19339_s16 + $0x438] ss:$168 sps:$4 sm:$0xff]  }
 0x378   : > { %5287 = vmatpush1.bf16.msra.mxu0 %v17922_v43  ;;  %v18014_v43 = vld [vmem:[%s19339_s16 + $0x584] ss:$168 sps:$4 sm:$0xff]  }
 0x379   : > { %5328 = vmatpush1.bf16.msra.mxu1 %v17925_v44  ;;  %5288 = vmatprep.subr.bf16.mxu0 %v17930_v45  ;;  %v18017_v44 = vld [vmem:[%s19339_s16 + $0x58c] ss:$168 sps:$4 sm:$0xff]   ;;  %v18012_v45 = vld [vmem:[%s19339_s16 + $0x580] ss:$168 sps:$4 sm:$0xff]  }
 0x37a   : > { %5329 = vmatprep.subr.bf16.mxu1 %v17933_v46  ;;  %v18015_v46 = vld [vmem:[%s19339_s16 + $0x588] ss:$168 sps:$4 sm:$0xff]  }
 0x37c   : > { %5289 = vmatpush1.bf16.msra.mxu0 %v17928_v47  ;;  %v18020_v47 = vld [vmem:[%s19339_s16 + $0x6d4] ss:$168 sps:$4 sm:$0xff]  }
 0x37d   : > { %5330 = vmatpush1.bf16.msra.mxu1 %v17931_v48  ;;  %5290 = vmatprep.subr.bf16.mxu0 %v17936_v49  ;;  %v18023_v48 = vld [vmem:[%s19339_s16 + $0x6dc] ss:$168 sps:$4 sm:$0xff]   ;;  %v18018_v49 = vld [vmem:[%s19339_s16 + $0x6d0] ss:$168 sps:$4 sm:$0xff]  }
 0x37e   : > { %5331 = vmatprep.subr.bf16.mxu1 %v17939_v50  ;;  %v18021_v50 = vld [vmem:[%s19339_s16 + $0x6d8] ss:$168 sps:$4 sm:$0xff]  }
 0x380   : > { %5291 = vmatpush1.bf16.msra.mxu0 %v17934_v51  ;;  %v18026_v51 = vld [vmem:[%s19339_s16 + $0x824] ss:$168 sps:$4 sm:$0xff]  }
 0x381   : > { %5332 = vmatpush1.bf16.msra.mxu1 %v17937_v52  ;;  %5292 = vmatprep.subr.bf16.mxu0 %v17942_v53 }
 0x382   : > { %5333 = vmatprep.subr.bf16.mxu1 %v17945_v54  ;;  %v18029_v54 = vld [vmem:[%s19339_s16 + $0x82c] ss:$168 sps:$4 sm:$0xff]  }
 0x384   : > { %5293 = vmatpush1.bf16.msra.mxu0 %v17940_v55 }
 0x385   : > { %5334 = vmatpush1.bf16.msra.mxu1 %v17943_v56  ;;  %5294 = vmatprep.subr.bf16.mxu0 %v17948_v57 }
 0x386   : > { %5335 = vmatprep.subr.bf16.mxu1 %v17951_v58 }
 0x388   : > { %5295 = vmatpush1.bf16.msra.mxu0 %v17946_v59  ;;  %v18024_v59 = vld [vmem:[%s19339_s16 + $0x820] ss:$168 sps:$4 sm:$0xff]  }
 0x389   : > { %5336 = vmatpush1.bf16.msra.mxu1 %v17949_v62  ;;  %5296 = vmatprep.subr.bf16.mxu0 %v17954_v1 }
 0x38a   : > { %5337 = vmatprep.subr.bf16.mxu1 %v17957_v2  ;;  %v18027_v2 = vld [vmem:[%s19339_s16 + $0x828] ss:$168 sps:$4 sm:$0xff]  }
 0x38c   : > { %5297 = vmatpush1.bf16.msra.mxu0 %v17952_v3  ;;  %v18032_v3 = vld [vmem:[%s19339_s16 + $0x974] ss:$168 sps:$4 sm:$0xff]  }
 0x38d   : > { %5338 = vmatpush1.bf16.msra.mxu1 %v17955_v4  ;;  %5298 = vmatprep.subr.bf16.mxu0 %v17960_v5  ;;  %v18035_v4 = vld [vmem:[%s19339_s16 + $0x97c] ss:$168 sps:$4 sm:$0xff]   ;;  %v18030_v5 = vld [vmem:[%s19339_s16 + $0x970] ss:$168 sps:$4 sm:$0xff]  }
 0x38e   : > { %5339 = vmatprep.subr.bf16.mxu1 %v17963_v6  ;;  %v18033_v6 = vld [vmem:[%s19339_s16 + $0x978] ss:$168 sps:$4 sm:$0xff]  }
 0x390   : > { %5299 = vmatpush1.bf16.msra.mxu0 %v17958_v7  ;;  %v18038_v7 = vld [vmem:[%s19339_s16 + $0xac4] ss:$168 sps:$4 sm:$0xff]  }
 0x391   : > { %5340 = vmatpush1.bf16.msra.mxu1 %v17961_v8  ;;  %5300 = vmatprep.subr.bf16.mxu0 %v17966_v10  ;;  %v18041_v8 = vld [vmem:[%s19339_s16 + $0xacc] ss:$168 sps:$4 sm:$0xff]   ;;  %v18036_v10 = vld [vmem:[%s19339_s16 + $0xac0] ss:$168 sps:$4 sm:$0xff]  }
 0x392   : > { %5341 = vmatprep.subr.bf16.mxu1 %v17969_v11  ;;  %v18039_v11 = vld [vmem:[%s19339_s16 + $0xac8] ss:$168 sps:$4 sm:$0xff]  }
 0x394   : > { %5301 = vmatpush1.bf16.msra.mxu0 %v17964_v13  ;;  %v18044_v13 = vld [vmem:[%s19339_s16 + $0xc14] ss:$168 sps:$4 sm:$0xff]  }
 0x395   : > { %5342 = vmatpush1.bf16.msra.mxu1 %v17967_v14  ;;  %5302 = vmatprep.subr.bf16.mxu0 %v17972_v15  ;;  %v18047_v14 = vld [vmem:[%s19339_s16 + $0xc1c] ss:$168 sps:$4 sm:$0xff]   ;;  %v18042_v15 = vld [vmem:[%s19339_s16 + $0xc10] ss:$168 sps:$4 sm:$0xff]  }
 0x396   : > { %5343 = vmatprep.subr.bf16.mxu1 %v17975_v16  ;;  %v18045_v16 = vld [vmem:[%s19339_s16 + $0xc18] ss:$168 sps:$4 sm:$0xff]  }
 0x398   : > { %5303 = vmatpush1.bf16.msra.mxu0 %v17970_v17  ;;  %v18050_v17 = vld [vmem:[%s19339_s16 + $0xd64] ss:$168 sps:$4 sm:$0xff]  }
 0x399   : > { %5344 = vmatpush1.bf16.msra.mxu1 %v17973_v18  ;;  %5304 = vmatprep.subr.bf16.mxu0 %v17978_v19  ;;  %v18053_v18 = vld [vmem:[%s19339_s16 + $0xd6c] ss:$168 sps:$4 sm:$0xff]   ;;  %v18048_v19 = vld [vmem:[%s19339_s16 + $0xd60] ss:$168 sps:$4 sm:$0xff]  }
 0x39a   : > { %5345 = vmatprep.subr.bf16.mxu1 %v17981_v20  ;;  %v18051_v20 = vld [vmem:[%s19339_s16 + $0xd68] ss:$168 sps:$4 sm:$0xff]  }
 0x39c   : > { %5305 = vmatpush1.bf16.msra.mxu0 %v17976_v21  ;;  %v18056_v21 = vld [vmem:[%s19339_s16 + $0xeb4] ss:$168 sps:$4 sm:$0xff]  }
 0x39d   : > { %5346 = vmatpush1.bf16.msra.mxu1 %v17979_v22  ;;  %5306 = vmatprep.subr.bf16.mxu0 %v17984_v23  ;;  %v18059_v22 = vld [vmem:[%s19339_s16 + $0xebc] ss:$168 sps:$4 sm:$0xff]   ;;  %v18054_v23 = vld [vmem:[%s19339_s16 + $0xeb0] ss:$168 sps:$4 sm:$0xff]  }
 0x39e   : > { %5347 = vmatprep.subr.bf16.mxu1 %v17987_v24  ;;  %v18057_v24 = vld [vmem:[%s19339_s16 + $0xeb8] ss:$168 sps:$4 sm:$0xff]  }
 0x3a0   : > { %5307 = vmatpush1.bf16.msra.mxu0 %v17982_v25  ;;  %v18062_v25 = vld [vmem:[%s19339_s16 + $0x1004] ss:$168 sps:$4 sm:$0xff]  }
 0x3a1   : > { %5348 = vmatpush1.bf16.msra.mxu1 %v17985_v26  ;;  %5358 = vmatprep.subr.bf16.mxu0 %v17990_v27  ;;  %v18065_v26 = vld [vmem:[%s19339_s16 + $0x100c] ss:$168 sps:$4 sm:$0xff]   ;;  %v18060_v27 = vld [vmem:[%s19339_s16 + $0x1000] ss:$168 sps:$4 sm:$0xff]  }
 0x3a2   : > { %5399 = vmatprep.subr.bf16.mxu1 %v17993_v28  ;;  %v18063_v28 = vld [vmem:[%s19339_s16 + $0x1008] ss:$168 sps:$4 sm:$0xff]  }
 0x3a3   : > { %5309 = vmatmul.mubr.bf16.vlgmr.msra.gmra.mrb[16].mxu0 %v19446_v12 }
 0x3a4   : > { %5350 = vmatmul.mubr.bf16.vlgmr.msra.gmra.mrb[16].mxu1 %v19446_v12  ;;  %5359 = vmatpush1.bf16.msra.mxu0 %v17988_v29  ;;  %v18068_v29 = vld [vmem:[%s19339_s16 + $0x1154] ss:$168 sps:$4 sm:$0xff]  }
 0x3a5   : > { %5390 = vmatprep.mubr.bf16.mxu0 %v19442_v9  ;;  %5400 = vmatpush1.bf16.msra.mxu1 %v17991_v30  ;;  %v18071_v30 = vld [vmem:[%s19339_s16 + $0x115c] ss:$168 sps:$4 sm:$0xff]  }
 0x3a6   : > { %5431 = vmatprep.mubr.bf16.mxu1 %v19442_v9  ;;  %5360 = vmatprep.subr.bf16.mxu0 %v17996_v31  ;;  %v18066_v31 = vld [vmem:[%s19339_s16 + $0x1150] ss:$168 sps:$4 sm:$0xff]  }
 0x3a7   : > { %5401 = vmatprep.subr.bf16.mxu1 %v17999_v32  ;;  %v18069_v32 = vld [vmem:[%s19339_s16 + $0x1158] ss:$168 sps:$4 sm:$0xff]  }
 0x3a8   : > { %5361 = vmatpush1.bf16.msra.mxu0 %v17994_v33  ;;  %v18074_v33 = vld [vmem:[%s19339_s16 + $0x12a4] ss:$168 sps:$4 sm:$0xff]  }
 0x3a9   : > { %5402 = vmatpush1.bf16.msra.mxu1 %v17997_v34  ;;  %5362 = vmatprep.subr.bf16.mxu0 %v18002_v35  ;;  %v18077_v34 = vld [vmem:[%s19339_s16 + $0x12ac] ss:$168 sps:$4 sm:$0xff]   ;;  %v18072_v35 = vld [vmem:[%s19339_s16 + $0x12a0] ss:$168 sps:$4 sm:$0xff]  }
 0x3aa   : > { %5403 = vmatprep.subr.bf16.mxu1 %v18005_v36  ;;  %v18075_v36 = vld [vmem:[%s19339_s16 + $0x12a8] ss:$168 sps:$4 sm:$0xff]  }
 0x3ac   : > { %5363 = vmatpush1.bf16.msra.mxu0 %v18000_v37  ;;  %v18080_v37 = vld [vmem:[%s19339_s16 + $0x13f4] ss:$168 sps:$4 sm:$0xff]  }
 0x3ad   : > { %5404 = vmatpush1.bf16.msra.mxu1 %v18003_v38  ;;  %5364 = vmatprep.subr.bf16.mxu0 %v18008_v39  ;;  %v18083_v38 = vld [vmem:[%s19339_s16 + $0x13fc] ss:$168 sps:$4 sm:$0xff]   ;;  %v18078_v39 = vld [vmem:[%s19339_s16 + $0x13f0] ss:$168 sps:$4 sm:$0xff]  }
 0x3ae   : > { %5405 = vmatprep.subr.bf16.mxu1 %v18011_v40  ;;  %v18081_v40 = vld [vmem:[%s19339_s16 + $0x13f8] ss:$168 sps:$4 sm:$0xff]  }
 0x3b0   : > { %5365 = vmatpush1.bf16.msra.mxu0 %v18006_v41  ;;  %v18086_v41 = vld [vmem:[%s19339_s16 + $0x54] ss:$168 sps:$4 sm:$0xff]  }
 0x3b1   : > { %5406 = vmatpush1.bf16.msra.mxu1 %v18009_v42  ;;  %5366 = vmatprep.subr.bf16.mxu0 %v18014_v43  ;;  %v18089_v42 = vld [vmem:[%s19339_s16 + $0x5c] ss:$168 sps:$4 sm:$0xff]   ;;  %v18084_v43 = vld [vmem:[%s19339_s16 + $0x50] ss:$168 sps:$4 sm:$0xff]  }
 0x3b2   : > { %5407 = vmatprep.subr.bf16.mxu1 %v18017_v44  ;;  %v18087_v44 = vld [vmem:[%s19339_s16 + $0x58] ss:$168 sps:$4 sm:$0xff]  }
 0x3b4   : > { %5367 = vmatpush1.bf16.msra.mxu0 %v18012_v45  ;;  %v18092_v45 = vld [vmem:[%s19339_s16 + $0x1a4] ss:$168 sps:$4 sm:$0xff]  }
 0x3b5   : > { %5408 = vmatpush1.bf16.msra.mxu1 %v18015_v46  ;;  %5368 = vmatprep.subr.bf16.mxu0 %v18020_v47  ;;  %v18095_v46 = vld [vmem:[%s19339_s16 + $0x1ac] ss:$168 sps:$4 sm:$0xff]   ;;  %v18090_v47 = vld [vmem:[%s19339_s16 + $0x1a0] ss:$168 sps:$4 sm:$0xff]  }
 0x3b6   : > { %v19679_v52 = vpop.f32.mrb[4].mxu0  ;;  %v19681_v53 = vpop.f32.mrb[4].mxu1  ;;  %5409 = vmatprep.subr.bf16.mxu1 %v18023_v48  ;;  %v18093_v48 = vld [vmem:[%s19339_s16 + $0x1a8] ss:$168 sps:$4 sm:$0xff]  }
 0x3b7   : > { %v19684_v55 = vpop.f32.mrb[5].mxu0  ;;  %v19686_v56 = vpop.f32.mrb[5].mxu1 }
 0x3b8   : > { %5369 = vmatpush1.bf16.msra.mxu0 %v18018_v49  ;;  %v5068_v57 = vpop.f32.mrb[6].mxu0  ;;  %v5109_v58 = vpop.f32.mrb[6].mxu1  ;;  %v18098_v49 = vld [vmem:[%s19339_s16 + $0x2f4] ss:$168 sps:$4 sm:$0xff]  }
 0x3b9   : > { %5410 = vmatpush1.bf16.msra.mxu1 %v18021_v50  ;;  %v5069_v62 = vpop.f32.mrb[7].mxu0  ;;  %v5110_v1 = vpop.f32.mrb[7].mxu1  ;;  %5370 = vmatprep.subr.bf16.mxu0 %v18026_v51  ;;  %v18101_v50 = vld [vmem:[%s19339_s16 + $0x2fc] ss:$168 sps:$4 sm:$0xff]   ;;  %v18096_v51 = vld [vmem:[%s19339_s16 + $0x2f0] ss:$168 sps:$4 sm:$0xff]  }
 0x3ba   : > { %5411 = vmatprep.subr.bf16.mxu1 %v18029_v54  ;;  %v18099_v54 = vld [vmem:[%s19339_s16 + $0x2f8] ss:$168 sps:$4 sm:$0xff]   ;;  %v18104_v57 = vld [vmem:[%s19339_s16 + $0x444] ss:$168 sps:$4 sm:$0xff]   ;;  %v18105_v62 = vld [vmem:[%s19339_s16 + $0x448] ss:$168 sps:$4 sm:$0xff]  }
 0x3bb   : > { %v18107_v58 = vld [vmem:[%s19339_s16 + $0x44c] ss:$168 sps:$4 sm:$0xff]  }
 0x3bc   : > { %5371 = vmatpush1.bf16.msra.mxu0 %v18024_v59  ;;  %v18102_v59 = vld [vmem:[%s19339_s16 + $0x440] ss:$168 sps:$4 sm:$0xff]   ;;  %v18110_v1 = vld [vmem:[%s19339_s16 + $0x594] ss:$168 sps:$4 sm:$0xff]  }
 0x3bd   : > { %5412 = vmatpush1.bf16.msra.mxu1 %v18027_v2  ;;  %5372 = vmatprep.subr.bf16.mxu0 %v18032_v3  ;;  %v18113_v2 = vld [vmem:[%s19339_s16 + $0x59c] ss:$168 sps:$4 sm:$0xff]   ;;  %v18108_v3 = vld [vmem:[%s19339_s16 + $0x590] ss:$168 sps:$4 sm:$0xff]  }
 0x3be   : > { %5413 = vmatprep.subr.bf16.mxu1 %v18035_v4  ;;  %v18111_v4 = vld [vmem:[%s19339_s16 + $0x598] ss:$168 sps:$4 sm:$0xff]  }
 0x3c0   : > { %5373 = vmatpush1.bf16.msra.mxu0 %v18030_v5  ;;  %v18116_v5 = vld [vmem:[%s19339_s16 + $0x6e4] ss:$168 sps:$4 sm:$0xff]  }
 0x3c1   : > { %5414 = vmatpush1.bf16.msra.mxu1 %v18033_v6  ;;  %5374 = vmatprep.subr.bf16.mxu0 %v18038_v7  ;;  %v18119_v6 = vld [vmem:[%s19339_s16 + $0x6ec] ss:$168 sps:$4 sm:$0xff]   ;;  %v18114_v7 = vld [vmem:[%s19339_s16 + $0x6e0] ss:$168 sps:$4 sm:$0xff]  }
 0x3c2   : > { %5415 = vmatprep.subr.bf16.mxu1 %v18041_v8  ;;  %v18117_v8 = vld [vmem:[%s19339_s16 + $0x6e8] ss:$168 sps:$4 sm:$0xff]  }
 0x3c4   : > { %5375 = vmatpush1.bf16.msra.mxu0 %v18036_v10  ;;  %v18122_v10 = vld [vmem:[%s19339_s16 + $0x834] ss:$168 sps:$4 sm:$0xff]  }
 0x3c5   : > { %5416 = vmatpush1.bf16.msra.mxu1 %v18039_v11  ;;  %5376 = vmatprep.subr.bf16.mxu0 %v18044_v13 }
 0x3c6   : > { %5417 = vmatprep.subr.bf16.mxu1 %v18047_v14  ;;  %v18125_v14 = vld [vmem:[%s19339_s16 + $0x83c] ss:$168 sps:$4 sm:$0xff]  }
 0x3c8   : > { %5377 = vmatpush1.bf16.msra.mxu0 %v18042_v15 }
 0x3c9   : > { %5418 = vmatpush1.bf16.msra.mxu1 %v18045_v16  ;;  %5378 = vmatprep.subr.bf16.mxu0 %v18050_v17 }
 0x3ca   : > { %5419 = vmatprep.subr.bf16.mxu1 %v18053_v18 }
 0x3cc   : > { %5379 = vmatpush1.bf16.msra.mxu0 %v18048_v19  ;;  %v18120_v19 = vld [vmem:[%s19339_s16 + $0x830] ss:$168 sps:$4 sm:$0xff]  }
 0x3cd   : > { %5420 = vmatpush1.bf16.msra.mxu1 %v18051_v20  ;;  %5380 = vmatprep.subr.bf16.mxu0 %v18056_v21 }
 0x3ce   : > { %5421 = vmatprep.subr.bf16.mxu1 %v18059_v22  ;;  %v18123_v22 = vld [vmem:[%s19339_s16 + $0x838] ss:$168 sps:$4 sm:$0xff]  }
 0x3d0   : > { %5381 = vmatpush1.bf16.msra.mxu0 %v18054_v23  ;;  %v18128_v23 = vld [vmem:[%s19339_s16 + $0x984] ss:$168 sps:$4 sm:$0xff]  }
 0x3d1   : > { %5422 = vmatpush1.bf16.msra.mxu1 %v18057_v24  ;;  %5382 = vmatprep.subr.bf16.mxu0 %v18062_v25  ;;  %v18131_v24 = vld [vmem:[%s19339_s16 + $0x98c] ss:$168 sps:$4 sm:$0xff]   ;;  %v18126_v25 = vld [vmem:[%s19339_s16 + $0x980] ss:$168 sps:$4 sm:$0xff]  }
 0x3d2   : > { %5423 = vmatprep.subr.bf16.mxu1 %v18065_v26  ;;  %v18129_v26 = vld [vmem:[%s19339_s16 + $0x988] ss:$168 sps:$4 sm:$0xff]  }
 0x3d4   : > { %5383 = vmatpush1.bf16.msra.mxu0 %v18060_v27  ;;  %v18134_v27 = vld [vmem:[%s19339_s16 + $0xad4] ss:$168 sps:$4 sm:$0xff]  }
 0x3d5   : > { %5424 = vmatpush1.bf16.msra.mxu1 %v18063_v28  ;;  %5384 = vmatprep.subr.bf16.mxu0 %v18068_v29  ;;  %v18137_v28 = vld [vmem:[%s19339_s16 + $0xadc] ss:$168 sps:$4 sm:$0xff]   ;;  %v18132_v29 = vld [vmem:[%s19339_s16 + $0xad0] ss:$168 sps:$4 sm:$0xff]  }
 0x3d6   : > { %5425 = vmatprep.subr.bf16.mxu1 %v18071_v30  ;;  %v18135_v30 = vld [vmem:[%s19339_s16 + $0xad8] ss:$168 sps:$4 sm:$0xff]  }
 0x3d8   : > { %5385 = vmatpush1.bf16.msra.mxu0 %v18066_v31  ;;  %v18140_v31 = vld [vmem:[%s19339_s16 + $0xc24] ss:$168 sps:$4 sm:$0xff]  }
 0x3d9   : > { %5426 = vmatpush1.bf16.msra.mxu1 %v18069_v32  ;;  %5386 = vmatprep.subr.bf16.mxu0 %v18074_v33  ;;  %v18143_v32 = vld [vmem:[%s19339_s16 + $0xc2c] ss:$168 sps:$4 sm:$0xff]   ;;  %v18138_v33 = vld [vmem:[%s19339_s16 + $0xc20] ss:$168 sps:$4 sm:$0xff]  }
 0x3da   : > { %5427 = vmatprep.subr.bf16.mxu1 %v18077_v34  ;;  %v18141_v34 = vld [vmem:[%s19339_s16 + $0xc28] ss:$168 sps:$4 sm:$0xff]  }
 0x3dc   : > { %5387 = vmatpush1.bf16.msra.mxu0 %v18072_v35  ;;  %v18146_v35 = vld [vmem:[%s19339_s16 + $0xd74] ss:$168 sps:$4 sm:$0xff]  }
 0x3dd   : > { %5428 = vmatpush1.bf16.msra.mxu1 %v18075_v36  ;;  %5388 = vmatprep.subr.bf16.mxu0 %v18080_v37  ;;  %v18149_v36 = vld [vmem:[%s19339_s16 + $0xd7c] ss:$168 sps:$4 sm:$0xff]   ;;  %v18144_v37 = vld [vmem:[%s19339_s16 + $0xd70] ss:$168 sps:$4 sm:$0xff]  }
 0x3de   : > { %5429 = vmatprep.subr.bf16.mxu1 %v18083_v38  ;;  %v18147_v38 = vld [vmem:[%s19339_s16 + $0xd78] ss:$168 sps:$4 sm:$0xff]  }
 0x3e0   : > { %5389 = vmatpush1.bf16.msra.mxu0 %v18078_v39  ;;  %v18152_v39 = vld [vmem:[%s19339_s16 + $0xec4] ss:$168 sps:$4 sm:$0xff]  }
 0x3e1   : > { %5430 = vmatpush1.bf16.msra.mxu1 %v18081_v40  ;;  %5440 = vmatprep.subr.bf16.mxu0 %v18086_v41  ;;  %v18155_v40 = vld [vmem:[%s19339_s16 + $0xecc] ss:$168 sps:$4 sm:$0xff]   ;;  %v18150_v41 = vld [vmem:[%s19339_s16 + $0xec0] ss:$168 sps:$4 sm:$0xff]  }
 0x3e2   : > { %5481 = vmatprep.subr.bf16.mxu1 %v18089_v42  ;;  %v18153_v42 = vld [vmem:[%s19339_s16 + $0xec8] ss:$168 sps:$4 sm:$0xff]  }
 0x3e3   : > { %5391 = vmatmul.mubr.bf16.vlgmr.msra.gmra.mrb[20].mxu0 %v19446_v12 }
 0x3e4   : > { %5432 = vmatmul.mubr.bf16.vlgmr.msra.gmra.mrb[20].mxu1 %v19446_v12  ;;  %5441 = vmatpush1.bf16.msra.mxu0 %v18084_v43  ;;  %v18158_v43 = vld [vmem:[%s19339_s16 + $0x1014] ss:$168 sps:$4 sm:$0xff]  }
 0x3e5   : > { %5472 = vmatprep.mubr.bf16.mxu0 %v19442_v9  ;;  %5482 = vmatpush1.bf16.msra.mxu1 %v18087_v44  ;;  %v18161_v44 = vld [vmem:[%s19339_s16 + $0x101c] ss:$168 sps:$4 sm:$0xff]  }
 0x3e6   : > { %5513 = vmatprep.mubr.bf16.mxu1 %v19442_v9  ;;  %5442 = vmatprep.subr.bf16.mxu0 %v18092_v45  ;;  %v18156_v45 = vld [vmem:[%s19339_s16 + $0x1010] ss:$168 sps:$4 sm:$0xff]  }
 0x3e7   : > { %5483 = vmatprep.subr.bf16.mxu1 %v18095_v46  ;;  %v18159_v46 = vld [vmem:[%s19339_s16 + $0x1018] ss:$168 sps:$4 sm:$0xff]  }
 0x3e8   : > { %5443 = vmatpush1.bf16.msra.mxu0 %v18090_v47  ;;  %v18164_v47 = vld [vmem:[%s19339_s16 + $0x1164] ss:$168 sps:$4 sm:$0xff]  }
 0x3e9   : > { %5484 = vmatpush1.bf16.msra.mxu1 %v18093_v48  ;;  %5444 = vmatprep.subr.bf16.mxu0 %v18098_v49  ;;  %v18167_v48 = vld [vmem:[%s19339_s16 + $0x116c] ss:$168 sps:$4 sm:$0xff]   ;;  %v18162_v49 = vld [vmem:[%s19339_s16 + $0x1160] ss:$168 sps:$4 sm:$0xff]  }
 0x3ea   : > { %5485 = vmatprep.subr.bf16.mxu1 %v18101_v50  ;;  %v18165_v50 = vld [vmem:[%s19339_s16 + $0x1168] ss:$168 sps:$4 sm:$0xff]  }
 0x3ec   : > { %5445 = vmatpush1.bf16.msra.mxu0 %v18096_v51  ;;  %v18170_v51 = vld [vmem:[%s19339_s16 + $0x12b4] ss:$168 sps:$4 sm:$0xff]  }
 0x3ed   : > { %5486 = vmatpush1.bf16.msra.mxu1 %v18099_v54  ;;  %5446 = vmatprep.subr.bf16.mxu0 %v18104_v57  ;;  %v18173_v54 = vld [vmem:[%s19339_s16 + $0x12bc] ss:$168 sps:$4 sm:$0xff]   ;;  %v18168_v57 = vld [vmem:[%s19339_s16 + $0x12b0] ss:$168 sps:$4 sm:$0xff]  }
 0x3ee   : > { %5487 = vmatprep.subr.bf16.mxu1 %v18107_v58  ;;  %v18171_v58 = vld [vmem:[%s19339_s16 + $0x12b8] ss:$168 sps:$4 sm:$0xff]  }
 0x3f0   : > { %5447 = vmatpush1.bf16.msra.mxu0 %v18102_v59  ;;  %v18176_v59 = vld [vmem:[%s19339_s16 + $0x1404] ss:$168 sps:$4 sm:$0xff]  }
 0x3f1   : > { %5488 = vmatpush1.bf16.msra.mxu1 %v18105_v62  ;;  %5448 = vmatprep.subr.bf16.mxu0 %v18110_v1  ;;  %v18179_v62 = vld [vmem:[%s19339_s16 + $0x140c] ss:$168 sps:$4 sm:$0xff]   ;;  %v18174_v1 = vld [vmem:[%s19339_s16 + $0x1400] ss:$168 sps:$4 sm:$0xff]  }
 0x3f2   : > { %5489 = vmatprep.subr.bf16.mxu1 %v18113_v2  ;;  %v18177_v2 = vld [vmem:[%s19339_s16 + $0x1408] ss:$168 sps:$4 sm:$0xff]  }
 0x3f4   : > { %5449 = vmatpush1.bf16.msra.mxu0 %v18108_v3  ;;  %v18182_v3 = vld [vmem:[%s19339_s16 + $0x64] ss:$168 sps:$4 sm:$0xff]  }
 0x3f5   : > { %5490 = vmatpush1.bf16.msra.mxu1 %v18111_v4  ;;  %5450 = vmatprep.subr.bf16.mxu0 %v18116_v5  ;;  %v18185_v4 = vld [vmem:[%s19339_s16 + $0x6c] ss:$168 sps:$4 sm:$0xff]   ;;  %v18180_v5 = vld [vmem:[%s19339_s16 + $0x60] ss:$168 sps:$4 sm:$0xff]  }
 0x3f6   : > { %v19755_v11 = vpop.f32.mrb[8].mxu0  ;;  %v19757_v13 = vpop.f32.mrb[8].mxu1  ;;  %5491 = vmatprep.subr.bf16.mxu1 %v18119_v6  ;;  %v18183_v6 = vld [vmem:[%s19339_s16 + $0x68] ss:$168 sps:$4 sm:$0xff]  }
 0x3f7   : > { %v19760_v15 = vpop.f32.mrb[9].mxu0  ;;  %v19762_v16 = vpop.f32.mrb[9].mxu1 }
 0x3f8   : > { %v5150_v17 = vpop.f32.mrb[10].mxu0  ;;  %v5191_v18 = vpop.f32.mrb[10].mxu1  ;;  %5451 = vmatpush1.bf16.msra.mxu0 %v18114_v7  ;;  %v18188_v7 = vld [vmem:[%s19339_s16 + $0x1b4] ss:$168 sps:$4 sm:$0xff]  }
 0x3f9   : > { %5492 = vmatpush1.bf16.msra.mxu1 %v18117_v8  ;;  %v5151_v20 = vpop.f32.mrb[11].mxu0  ;;  %v5192_v21 = vpop.f32.mrb[11].mxu1  ;;  %5452 = vmatprep.subr.bf16.mxu0 %v18122_v10  ;;  %v18191_v8 = vld [vmem:[%s19339_s16 + $0x1bc] ss:$168 sps:$4 sm:$0xff]   ;;  %v18186_v10 = vld [vmem:[%s19339_s16 + $0x1b0] ss:$168 sps:$4 sm:$0xff]  }
 0x3fa   : > { %5493 = vmatprep.subr.bf16.mxu1 %v18125_v14  ;;  %v18189_v14 = vld [vmem:[%s19339_s16 + $0x1b8] ss:$168 sps:$4 sm:$0xff]   ;;  %v18194_v17 = vld [vmem:[%s19339_s16 + $0x304] ss:$168 sps:$4 sm:$0xff]   ;;  %v18195_v20 = vld [vmem:[%s19339_s16 + $0x308] ss:$168 sps:$4 sm:$0xff]  }
 0x3fb   : > { %v18197_v18 = vld [vmem:[%s19339_s16 + $0x30c] ss:$168 sps:$4 sm:$0xff]  }
 0x3fc   : > { %5453 = vmatpush1.bf16.msra.mxu0 %v18120_v19  ;;  %v18192_v19 = vld [vmem:[%s19339_s16 + $0x300] ss:$168 sps:$4 sm:$0xff]   ;;  %v18200_v21 = vld [vmem:[%s19339_s16 + $0x454] ss:$168 sps:$4 sm:$0xff]  }
 0x3fd   : > { %5494 = vmatpush1.bf16.msra.mxu1 %v18123_v22  ;;  %5454 = vmatprep.subr.bf16.mxu0 %v18128_v23  ;;  %v18203_v22 = vld [vmem:[%s19339_s16 + $0x45c] ss:$168 sps:$4 sm:$0xff]   ;;  %v18198_v23 = vld [vmem:[%s19339_s16 + $0x450] ss:$168 sps:$4 sm:$0xff]  }
 0x3fe   : > { %5495 = vmatprep.subr.bf16.mxu1 %v18131_v24  ;;  %v18201_v24 = vld [vmem:[%s19339_s16 + $0x458] ss:$168 sps:$4 sm:$0xff]  }
 0x400   : > { %5455 = vmatpush1.bf16.msra.mxu0 %v18126_v25  ;;  %v18206_v25 = vld [vmem:[%s19339_s16 + $0x5a4] ss:$168 sps:$4 sm:$0xff]  }
 0x401   : > { %5496 = vmatpush1.bf16.msra.mxu1 %v18129_v26  ;;  %5456 = vmatprep.subr.bf16.mxu0 %v18134_v27  ;;  %v18209_v26 = vld [vmem:[%s19339_s16 + $0x5ac] ss:$168 sps:$4 sm:$0xff]   ;;  %v18204_v27 = vld [vmem:[%s19339_s16 + $0x5a0] ss:$168 sps:$4 sm:$0xff]  }
 0x402   : > { %5497 = vmatprep.subr.bf16.mxu1 %v18137_v28  ;;  %v18207_v28 = vld [vmem:[%s19339_s16 + $0x5a8] ss:$168 sps:$4 sm:$0xff]  }
 0x404   : > { %5457 = vmatpush1.bf16.msra.mxu0 %v18132_v29  ;;  %v18212_v29 = vld [vmem:[%s19339_s16 + $0x6f4] ss:$168 sps:$4 sm:$0xff]  }
 0x405   : > { %5498 = vmatpush1.bf16.msra.mxu1 %v18135_v30  ;;  %5458 = vmatprep.subr.bf16.mxu0 %v18140_v31  ;;  %v18215_v30 = vld [vmem:[%s19339_s16 + $0x6fc] ss:$168 sps:$4 sm:$0xff]   ;;  %v18210_v31 = vld [vmem:[%s19339_s16 + $0x6f0] ss:$168 sps:$4 sm:$0xff]  }
 0x406   : > { %5499 = vmatprep.subr.bf16.mxu1 %v18143_v32  ;;  %v18213_v32 = vld [vmem:[%s19339_s16 + $0x6f8] ss:$168 sps:$4 sm:$0xff]  }
 0x408   : > { %5459 = vmatpush1.bf16.msra.mxu0 %v18138_v33  ;;  %v18218_v33 = vld [vmem:[%s19339_s16 + $0x844] ss:$168 sps:$4 sm:$0xff]  }
 0x409   : > { %5500 = vmatpush1.bf16.msra.mxu1 %v18141_v34  ;;  %5460 = vmatprep.subr.bf16.mxu0 %v18146_v35  ;;  %v18221_v35 = vld [vmem:[%s19339_s16 + $0x84c] ss:$168 sps:$4 sm:$0xff]  }
 0x40a   : > { %5501 = vmatprep.subr.bf16.mxu1 %v18149_v36 }
 0x40c   : > { %5461 = vmatpush1.bf16.msra.mxu0 %v18144_v37 }
 0x40d   : > { %5502 = vmatpush1.bf16.msra.mxu1 %v18147_v38  ;;  %5462 = vmatprep.subr.bf16.mxu0 %v18152_v39 }
 0x40e   : > { %5503 = vmatprep.subr.bf16.mxu1 %v18155_v40  ;;  %v18216_v40 = vld [vmem:[%s19339_s16 + $0x840] ss:$168 sps:$4 sm:$0xff]  }
 0x410   : > { %5463 = vmatpush1.bf16.msra.mxu0 %v18150_v41 }
 0x411   : > { %5504 = vmatpush1.bf16.msra.mxu1 %v18153_v42  ;;  %5464 = vmatprep.subr.bf16.mxu0 %v18158_v43  ;;  %v18219_v43 = vld [vmem:[%s19339_s16 + $0x848] ss:$168 sps:$4 sm:$0xff]  }
 0x412   : > { %5505 = vmatprep.subr.bf16.mxu1 %v18161_v44  ;;  %v18224_v44 = vld [vmem:[%s19339_s16 + $0x994] ss:$168 sps:$4 sm:$0xff]  }
 0x414   : > { %5465 = vmatpush1.bf16.msra.mxu0 %v18156_v45 }
 0x415   : > { %5506 = vmatpush1.bf16.msra.mxu1 %v18159_v46  ;;  %5466 = vmatprep.subr.bf16.mxu0 %v18164_v47  ;;  %v18227_v46 = vld [vmem:[%s19339_s16 + $0x99c] ss:$168 sps:$4 sm:$0xff]   ;;  %v18222_v47 = vld [vmem:[%s19339_s16 + $0x990] ss:$168 sps:$4 sm:$0xff]  }
 0x416   : > { %5507 = vmatprep.subr.bf16.mxu1 %v18167_v48  ;;  %v18225_v48 = vld [vmem:[%s19339_s16 + $0x998] ss:$168 sps:$4 sm:$0xff]  }
 0x418   : > { %5467 = vmatpush1.bf16.msra.mxu0 %v18162_v49  ;;  %v18230_v49 = vld [vmem:[%s19339_s16 + $0xae4] ss:$168 sps:$4 sm:$0xff]  }
 0x419   : > { %5508 = vmatpush1.bf16.msra.mxu1 %v18165_v50  ;;  %5468 = vmatprep.subr.bf16.mxu0 %v18170_v51  ;;  %v18233_v50 = vld [vmem:[%s19339_s16 + $0xaec] ss:$168 sps:$4 sm:$0xff]   ;;  %v18228_v51 = vld [vmem:[%s19339_s16 + $0xae0] ss:$168 sps:$4 sm:$0xff]  }
 0x41a   : > { %5509 = vmatprep.subr.bf16.mxu1 %v18173_v54  ;;  %v18231_v54 = vld [vmem:[%s19339_s16 + $0xae8] ss:$168 sps:$4 sm:$0xff]  }
 0x41c   : > { %5469 = vmatpush1.bf16.msra.mxu0 %v18168_v57  ;;  %v18236_v57 = vld [vmem:[%s19339_s16 + $0xc34] ss:$168 sps:$4 sm:$0xff]  }
 0x41d   : > { %5510 = vmatpush1.bf16.msra.mxu1 %v18171_v58  ;;  %5470 = vmatprep.subr.bf16.mxu0 %v18176_v59  ;;  %v18239_v58 = vld [vmem:[%s19339_s16 + $0xc3c] ss:$168 sps:$4 sm:$0xff]   ;;  %v18234_v59 = vld [vmem:[%s19339_s16 + $0xc30] ss:$168 sps:$4 sm:$0xff]  }
 0x41e   : > { %5511 = vmatprep.subr.bf16.mxu1 %v18179_v62  ;;  %v18237_v62 = vld [vmem:[%s19339_s16 + $0xc38] ss:$168 sps:$4 sm:$0xff]  }
 0x420   : > { %5471 = vmatpush1.bf16.msra.mxu0 %v18174_v1  ;;  %v18242_v1 = vld [vmem:[%s19339_s16 + $0xd84] ss:$168 sps:$4 sm:$0xff]  }
 0x421   : > { %5512 = vmatpush1.bf16.msra.mxu1 %v18177_v2  ;;  %5522 = vmatprep.subr.bf16.mxu0 %v18182_v3  ;;  %v18245_v2 = vld [vmem:[%s19339_s16 + $0xd8c] ss:$168 sps:$4 sm:$0xff]   ;;  %v18240_v3 = vld [vmem:[%s19339_s16 + $0xd80] ss:$168 sps:$4 sm:$0xff]  }
 0x422   : > { %5563 = vmatprep.subr.bf16.mxu1 %v18185_v4  ;;  %v18243_v4 = vld [vmem:[%s19339_s16 + $0xd88] ss:$168 sps:$4 sm:$0xff]  }
 0x423   : > { %5473 = vmatmul.mubr.bf16.vlgmr.msra.gmra.mrb[24].mxu0 %v19446_v12 }
 0x424   : > { %5514 = vmatmul.mubr.bf16.vlgmr.msra.gmra.mrb[24].mxu1 %v19446_v12  ;;  %5523 = vmatpush1.bf16.msra.mxu0 %v18180_v5  ;;  %v18248_v5 = vld [vmem:[%s19339_s16 + $0xed4] ss:$168 sps:$4 sm:$0xff]  }
 0x425   : > { %5554 = vmatprep.mubr.bf16.mxu0 %v19442_v9  ;;  %5564 = vmatpush1.bf16.msra.mxu1 %v18183_v6  ;;  %v18251_v6 = vld [vmem:[%s19339_s16 + $0xedc] ss:$168 sps:$4 sm:$0xff]  }
 0x426   : > { %5595 = vmatprep.mubr.bf16.mxu1 %v19442_v9  ;;  %5524 = vmatprep.subr.bf16.mxu0 %v18188_v7  ;;  %v18246_v7 = vld [vmem:[%s19339_s16 + $0xed0] ss:$168 sps:$4 sm:$0xff]  }
 0x427   : > { %5565 = vmatprep.subr.bf16.mxu1 %v18191_v8  ;;  %v18249_v8 = vld [vmem:[%s19339_s16 + $0xed8] ss:$168 sps:$4 sm:$0xff]  }
 0x428   : > { %5525 = vmatpush1.bf16.msra.mxu0 %v18186_v10  ;;  %v18254_v10 = vld [vmem:[%s19339_s16 + $0x1024] ss:$168 sps:$4 sm:$0xff]  }
 0x429   : > { %5566 = vmatpush1.bf16.msra.mxu1 %v18189_v14  ;;  %5526 = vmatprep.subr.bf16.mxu0 %v18194_v17  ;;  %v18257_v14 = vld [vmem:[%s19339_s16 + $0x102c] ss:$168 sps:$4 sm:$0xff]   ;;  %v18252_v17 = vld [vmem:[%s19339_s16 + $0x1020] ss:$168 sps:$4 sm:$0xff]  }
 0x42a   : > { %5567 = vmatprep.subr.bf16.mxu1 %v18197_v18  ;;  %v18255_v18 = vld [vmem:[%s19339_s16 + $0x1028] ss:$168 sps:$4 sm:$0xff]  }
 0x42c   : > { %5527 = vmatpush1.bf16.msra.mxu0 %v18192_v19  ;;  %v18260_v19 = vld [vmem:[%s19339_s16 + $0x1174] ss:$168 sps:$4 sm:$0xff]  }
 0x42d   : > { %5568 = vmatpush1.bf16.msra.mxu1 %v18195_v20  ;;  %5528 = vmatprep.subr.bf16.mxu0 %v18200_v21  ;;  %v18263_v20 = vld [vmem:[%s19339_s16 + $0x117c] ss:$168 sps:$4 sm:$0xff]   ;;  %v18258_v21 = vld [vmem:[%s19339_s16 + $0x1170] ss:$168 sps:$4 sm:$0xff]  }
 0x42e   : > { %5569 = vmatprep.subr.bf16.mxu1 %v18203_v22  ;;  %v18261_v22 = vld [vmem:[%s19339_s16 + $0x1178] ss:$168 sps:$4 sm:$0xff]  }
 0x430   : > { %5529 = vmatpush1.bf16.msra.mxu0 %v18198_v23  ;;  %v18266_v23 = vld [vmem:[%s19339_s16 + $0x12c4] ss:$168 sps:$4 sm:$0xff]  }
 0x431   : > { %5570 = vmatpush1.bf16.msra.mxu1 %v18201_v24  ;;  %5530 = vmatprep.subr.bf16.mxu0 %v18206_v25  ;;  %v18269_v24 = vld [vmem:[%s19339_s16 + $0x12cc] ss:$168 sps:$4 sm:$0xff]   ;;  %v18264_v25 = vld [vmem:[%s19339_s16 + $0x12c0] ss:$168 sps:$4 sm:$0xff]  }
 0x432   : > { %5571 = vmatprep.subr.bf16.mxu1 %v18209_v26  ;;  %v18267_v26 = vld [vmem:[%s19339_s16 + $0x12c8] ss:$168 sps:$4 sm:$0xff]  }
 0x434   : > { %5531 = vmatpush1.bf16.msra.mxu0 %v18204_v27  ;;  %v18272_v27 = vld [vmem:[%s19339_s16 + $0x1414] ss:$168 sps:$4 sm:$0xff]  }
 0x435   : > { %5572 = vmatpush1.bf16.msra.mxu1 %v18207_v28  ;;  %5532 = vmatprep.subr.bf16.mxu0 %v18212_v29  ;;  %v18275_v28 = vld [vmem:[%s19339_s16 + $0x141c] ss:$168 sps:$4 sm:$0xff]   ;;  %v18270_v29 = vld [vmem:[%s19339_s16 + $0x1410] ss:$168 sps:$4 sm:$0xff]  }
 0x436   : > { %v19831_v34 = vpop.f32.mrb[12].mxu0  ;;  %5573 = vmatprep.subr.bf16.mxu1 %v18215_v30  ;;  %v18273_v30 = vld [vmem:[%s19339_s16 + $0x1418] ss:$168 sps:$4 sm:$0xff]  }
 0x437   : > { %v19834_v36 = vpop.f32.mrb[12].mxu1  ;;  %v19836_v37 = vpop.f32.mrb[13].mxu0 }
 0x438   : > { %v19838_v38 = vpop.f32.mrb[13].mxu1  ;;  %v5232_v39 = vpop.f32.mrb[14].mxu0  ;;  %5533 = vmatpush1.bf16.msra.mxu0 %v18210_v31  ;;  %v18278_v31 = vld [vmem:[%s19339_s16 + $0x74] ss:$168 sps:$4 sm:$0xff]  }
 0x439   : > { %v5273_v41 = vpop.f32.mrb[14].mxu1  ;;  %5574 = vmatpush1.bf16.msra.mxu1 %v18213_v32  ;;  %v5233_v42 = vpop.f32.mrb[15].mxu0  ;;  %5534 = vmatprep.subr.bf16.mxu0 %v18218_v33  ;;  %v18281_v32 = vld [vmem:[%s19339_s16 + $0x7c] ss:$168 sps:$4 sm:$0xff]   ;;  %v18276_v33 = vld [vmem:[%s19339_s16 + $0x70] ss:$168 sps:$4 sm:$0xff]  }
 0x43a   : > { %v5274_v45 = vpop.f32.mrb[15].mxu1  ;;  %5575 = vmatprep.subr.bf16.mxu1 %v18221_v35  ;;  %v18279_v35 = vld [vmem:[%s19339_s16 + $0x78] ss:$168 sps:$4 sm:$0xff]   ;;  %v18284_v39 = vld [vmem:[%s19339_s16 + $0x1c4] ss:$168 sps:$4 sm:$0xff]  }
 0x43b   : > { %v18282_v41 = vld [vmem:[%s19339_s16 + $0x1c0] ss:$168 sps:$4 sm:$0xff]   ;;  %v18288_v45 = vld [vmem:[%s19339_s16 + $0x310] ss:$168 sps:$4 sm:$0xff]  }
 0x43c   : > { %5535 = vmatpush1.bf16.msra.mxu0 %v18216_v40  ;;  %v18287_v40 = vld [vmem:[%s19339_s16 + $0x1cc] ss:$168 sps:$4 sm:$0xff]   ;;  %v18285_v42 = vld [vmem:[%s19339_s16 + $0x1c8] ss:$168 sps:$4 sm:$0xff]  }
 0x43d   : > { %5576 = vmatpush1.bf16.msra.mxu1 %v18219_v43  ;;  %5536 = vmatprep.subr.bf16.mxu0 %v18224_v44  ;;  %v18290_v43 = vld [vmem:[%s19339_s16 + $0x314] ss:$168 sps:$4 sm:$0xff]  }
 0x43e   : > { %5577 = vmatprep.subr.bf16.mxu1 %v18227_v46  ;;  %v18293_v44 = vld [vmem:[%s19339_s16 + $0x31c] ss:$168 sps:$4 sm:$0xff]   ;;  %v18291_v46 = vld [vmem:[%s19339_s16 + $0x318] ss:$168 sps:$4 sm:$0xff]  }
 0x440   : > { %5537 = vmatpush1.bf16.msra.mxu0 %v18222_v47  ;;  %v18296_v47 = vld [vmem:[%s19339_s16 + $0x464] ss:$168 sps:$4 sm:$0xff]  }
 0x441   : > { %5578 = vmatpush1.bf16.msra.mxu1 %v18225_v48  ;;  %5538 = vmatprep.subr.bf16.mxu0 %v18230_v49  ;;  %v18299_v48 = vld [vmem:[%s19339_s16 + $0x46c] ss:$168 sps:$4 sm:$0xff]   ;;  %v18294_v49 = vld [vmem:[%s19339_s16 + $0x460] ss:$168 sps:$4 sm:$0xff]  }
 0x442   : > { %5579 = vmatprep.subr.bf16.mxu1 %v18233_v50  ;;  %v18297_v50 = vld [vmem:[%s19339_s16 + $0x468] ss:$168 sps:$4 sm:$0xff]  }
 0x444   : > { %5539 = vmatpush1.bf16.msra.mxu0 %v18228_v51  ;;  %v18302_v51 = vld [vmem:[%s19339_s16 + $0x5b4] ss:$168 sps:$4 sm:$0xff]  }
 0x445   : > { %5580 = vmatpush1.bf16.msra.mxu1 %v18231_v54  ;;  %5540 = vmatprep.subr.bf16.mxu0 %v18236_v57  ;;  %v18305_v54 = vld [vmem:[%s19339_s16 + $0x5bc] ss:$168 sps:$4 sm:$0xff]   ;;  %v18300_v57 = vld [vmem:[%s19339_s16 + $0x5b0] ss:$168 sps:$4 sm:$0xff]  }
 0x446   : > { %5581 = vmatprep.subr.bf16.mxu1 %v18239_v58  ;;  %v18303_v58 = vld [vmem:[%s19339_s16 + $0x5b8] ss:$168 sps:$4 sm:$0xff]  }
 0x448   : > { %5541 = vmatpush1.bf16.msra.mxu0 %v18234_v59  ;;  %v18308_v59 = vld [vmem:[%s19339_s16 + $0x704] ss:$168 sps:$4 sm:$0xff]  }
 0x449   : > { %5582 = vmatpush1.bf16.msra.mxu1 %v18237_v62  ;;  %5542 = vmatprep.subr.bf16.mxu0 %v18242_v1  ;;  %v18311_v62 = vld [vmem:[%s19339_s16 + $0x70c] ss:$168 sps:$4 sm:$0xff]   ;;  %v18306_v1 = vld [vmem:[%s19339_s16 + $0x700] ss:$168 sps:$4 sm:$0xff]  }
 0x44a   : > { %5583 = vmatprep.subr.bf16.mxu1 %v18245_v2  ;;  %v18309_v2 = vld [vmem:[%s19339_s16 + $0x708] ss:$168 sps:$4 sm:$0xff]  }
 0x44c   : > { %5543 = vmatpush1.bf16.msra.mxu0 %v18240_v3  ;;  %v18314_v3 = vld [vmem:[%s19339_s16 + $0x854] ss:$168 sps:$4 sm:$0xff]  }
 0x44d   : > { %5584 = vmatpush1.bf16.msra.mxu1 %v18243_v4  ;;  %5544 = vmatprep.subr.bf16.mxu0 %v18248_v5  ;;  %v18317_v5 = vld [vmem:[%s19339_s16 + $0x85c] ss:$168 sps:$4 sm:$0xff]  }
 0x44e   : > { %5585 = vmatprep.subr.bf16.mxu1 %v18251_v6 }
 0x450   : > { %5545 = vmatpush1.bf16.msra.mxu0 %v18246_v7 }
 0x451   : > { %5586 = vmatpush1.bf16.msra.mxu1 %v18249_v8  ;;  %5546 = vmatprep.subr.bf16.mxu0 %v18254_v10 }
 0x452   : > { %5587 = vmatprep.subr.bf16.mxu1 %v18257_v14  ;;  %v18312_v14 = vld [vmem:[%s19339_s16 + $0x850] ss:$168 sps:$4 sm:$0xff]  }
 0x454   : > { %5547 = vmatpush1.bf16.msra.mxu0 %v18252_v17 }
 0x455   : > { %5588 = vmatpush1.bf16.msra.mxu1 %v18255_v18  ;;  %5548 = vmatprep.subr.bf16.mxu0 %v18260_v19  ;;  %v18315_v19 = vld [vmem:[%s19339_s16 + $0x858] ss:$168 sps:$4 sm:$0xff]  }
 0x456   : > { %5589 = vmatprep.subr.bf16.mxu1 %v18263_v20  ;;  %v18320_v20 = vld [vmem:[%s19339_s16 + $0x9a4] ss:$168 sps:$4 sm:$0xff]  }
 0x458   : > { %5549 = vmatpush1.bf16.msra.mxu0 %v18258_v21 }
 0x459   : > { %5590 = vmatpush1.bf16.msra.mxu1 %v18261_v22  ;;  %5550 = vmatprep.subr.bf16.mxu0 %v18266_v23  ;;  %v18323_v22 = vld [vmem:[%s19339_s16 + $0x9ac] ss:$168 sps:$4 sm:$0xff]   ;;  %v18318_v23 = vld [vmem:[%s19339_s16 + $0x9a0] ss:$168 sps:$4 sm:$0xff]  }
 0x45a   : > { %5591 = vmatprep.subr.bf16.mxu1 %v18269_v24  ;;  %v18321_v24 = vld [vmem:[%s19339_s16 + $0x9a8] ss:$168 sps:$4 sm:$0xff]  }
 0x45c   : > { %5551 = vmatpush1.bf16.msra.mxu0 %v18264_v25  ;;  %v18326_v25 = vld [vmem:[%s19339_s16 + $0xaf4] ss:$168 sps:$4 sm:$0xff]  }
 0x45d   : > { %5592 = vmatpush1.bf16.msra.mxu1 %v18267_v26  ;;  %5552 = vmatprep.subr.bf16.mxu0 %v18272_v27  ;;  %v18329_v26 = vld [vmem:[%s19339_s16 + $0xafc] ss:$168 sps:$4 sm:$0xff]   ;;  %v18324_v27 = vld [vmem:[%s19339_s16 + $0xaf0] ss:$168 sps:$4 sm:$0xff]  }
 0x45e   : > { %5593 = vmatprep.subr.bf16.mxu1 %v18275_v28  ;;  %v18327_v28 = vld [vmem:[%s19339_s16 + $0xaf8] ss:$168 sps:$4 sm:$0xff]  }
 0x460   : > { %5553 = vmatpush1.bf16.msra.mxu0 %v18270_v29  ;;  %v18332_v29 = vld [vmem:[%s19339_s16 + $0xc44] ss:$168 sps:$4 sm:$0xff]  }
 0x461   : > { %5594 = vmatpush1.bf16.msra.mxu1 %v18273_v30  ;;  %5604 = vmatprep.subr.bf16.mxu0 %v18278_v31  ;;  %v18335_v30 = vld [vmem:[%s19339_s16 + $0xc4c] ss:$168 sps:$4 sm:$0xff]   ;;  %v18330_v31 = vld [vmem:[%s19339_s16 + $0xc40] ss:$168 sps:$4 sm:$0xff]  }
 0x462   : > { %5645 = vmatprep.subr.bf16.mxu1 %v18281_v32  ;;  %v18333_v32 = vld [vmem:[%s19339_s16 + $0xc48] ss:$168 sps:$4 sm:$0xff]  }
 0x463   : > { %5555 = vmatmul.mubr.bf16.vlgmr.msra.gmra.mrb[28].mxu0 %v19446_v12 }
 0x464   : > { %5596 = vmatmul.mubr.bf16.vlgmr.msra.gmra.mrb[28].mxu1 %v19446_v12  ;;  %5605 = vmatpush1.bf16.msra.mxu0 %v18276_v33  ;;  %v18338_v33 = vld [vmem:[%s19339_s16 + $0xd94] ss:$168 sps:$4 sm:$0xff]  }
 0x465   : > { %5636 = vmatprep.mubr.bf16.mxu0 %v19442_v9  ;;  %5646 = vmatpush1.bf16.msra.mxu1 %v18279_v35  ;;  %v18341_v35 = vld [vmem:[%s19339_s16 + $0xd9c] ss:$168 sps:$4 sm:$0xff]  }
 0x466   : > { %5677 = vmatprep.mubr.bf16.mxu1 %v19442_v9  ;;  %5606 = vmatprep.subr.bf16.mxu0 %v18284_v39  ;;  %v18336_v39 = vld [vmem:[%s19339_s16 + $0xd90] ss:$168 sps:$4 sm:$0xff]  }
 0x467   : > { %5647 = vmatprep.subr.bf16.mxu1 %v18287_v40  ;;  %v18339_v40 = vld [vmem:[%s19339_s16 + $0xd98] ss:$168 sps:$4 sm:$0xff]  }
 0x468   : > { %5607 = vmatpush1.bf16.msra.mxu0 %v18282_v41  ;;  %v18344_v41 = vld [vmem:[%s19339_s16 + $0xee4] ss:$168 sps:$4 sm:$0xff]  }
 0x469   : > { %5648 = vmatpush1.bf16.msra.mxu1 %v18285_v42  ;;  %5608 = vmatprep.subr.bf16.mxu0 %v18290_v43  ;;  %v18347_v42 = vld [vmem:[%s19339_s16 + $0xeec] ss:$168 sps:$4 sm:$0xff]   ;;  %v18342_v43 = vld [vmem:[%s19339_s16 + $0xee0] ss:$168 sps:$4 sm:$0xff]  }
 0x46a   : > { %5649 = vmatprep.subr.bf16.mxu1 %v18293_v44  ;;  %v18345_v44 = vld [vmem:[%s19339_s16 + $0xee8] ss:$168 sps:$4 sm:$0xff]  }
 0x46c   : > { %5609 = vmatpush1.bf16.msra.mxu0 %v18288_v45  ;;  %v18350_v45 = vld [vmem:[%s19339_s16 + $0x1034] ss:$168 sps:$4 sm:$0xff]  }
 0x46d   : > { %5650 = vmatpush1.bf16.msra.mxu1 %v18291_v46  ;;  %5610 = vmatprep.subr.bf16.mxu0 %v18296_v47  ;;  %v18353_v46 = vld [vmem:[%s19339_s16 + $0x103c] ss:$168 sps:$4 sm:$0xff]   ;;  %v18348_v47 = vld [vmem:[%s19339_s16 + $0x1030] ss:$168 sps:$4 sm:$0xff]  }
 0x46e   : > { %5651 = vmatprep.subr.bf16.mxu1 %v18299_v48  ;;  %v18351_v48 = vld [vmem:[%s19339_s16 + $0x1038] ss:$168 sps:$4 sm:$0xff]  }
 0x470   : > { %5611 = vmatpush1.bf16.msra.mxu0 %v18294_v49  ;;  %v18356_v49 = vld [vmem:[%s19339_s16 + $0x1184] ss:$168 sps:$4 sm:$0xff]  }
 0x471   : > { %5652 = vmatpush1.bf16.msra.mxu1 %v18297_v50  ;;  %5612 = vmatprep.subr.bf16.mxu0 %v18302_v51  ;;  %v18359_v50 = vld [vmem:[%s19339_s16 + $0x118c] ss:$168 sps:$4 sm:$0xff]   ;;  %v18354_v51 = vld [vmem:[%s19339_s16 + $0x1180] ss:$168 sps:$4 sm:$0xff]  }
 0x472   : > { %5653 = vmatprep.subr.bf16.mxu1 %v18305_v54  ;;  %v18357_v54 = vld [vmem:[%s19339_s16 + $0x1188] ss:$168 sps:$4 sm:$0xff]  }
 0x474   : > { %5613 = vmatpush1.bf16.msra.mxu0 %v18300_v57  ;;  %v18362_v57 = vld [vmem:[%s19339_s16 + $0x12d4] ss:$168 sps:$4 sm:$0xff]  }
 0x475   : > { %5654 = vmatpush1.bf16.msra.mxu1 %v18303_v58  ;;  %5614 = vmatprep.subr.bf16.mxu0 %v18308_v59  ;;  %v18365_v58 = vld [vmem:[%s19339_s16 + $0x12dc] ss:$168 sps:$4 sm:$0xff]   ;;  %v18360_v59 = vld [vmem:[%s19339_s16 + $0x12d0] ss:$168 sps:$4 sm:$0xff]  }
 0x476   : > { %v19907_v4 = vpop.f32.mrb[16].mxu0  ;;  %5655 = vmatprep.subr.bf16.mxu1 %v18311_v62  ;;  %v18363_v62 = vld [vmem:[%s19339_s16 + $0x12d8] ss:$168 sps:$4 sm:$0xff]  }
 0x477   : > { %v19910_v6 = vpop.f32.mrb[16].mxu1  ;;  %v19912_v7 = vpop.f32.mrb[17].mxu0 }
 0x478   : > { %v19914_v8 = vpop.f32.mrb[17].mxu1  ;;  %v5314_v10 = vpop.f32.mrb[18].mxu0  ;;  %5615 = vmatpush1.bf16.msra.mxu0 %v18306_v1  ;;  %v18368_v1 = vld [vmem:[%s19339_s16 + $0x1424] ss:$168 sps:$4 sm:$0xff]  }
 0x479   : > { %v5355_v17 = vpop.f32.mrb[18].mxu1  ;;  %5656 = vmatpush1.bf16.msra.mxu1 %v18309_v2  ;;  %v5315_v18 = vpop.f32.mrb[19].mxu0  ;;  %5616 = vmatprep.subr.bf16.mxu0 %v18314_v3  ;;  %v18371_v2 = vld [vmem:[%s19339_s16 + $0x142c] ss:$168 sps:$4 sm:$0xff]   ;;  %v18366_v3 = vld [vmem:[%s19339_s16 + $0x1420] ss:$168 sps:$4 sm:$0xff]  }
 0x47a   : > { %v5356_v21 = vpop.f32.mrb[19].mxu1  ;;  %5657 = vmatprep.subr.bf16.mxu1 %v18317_v5  ;;  %v18369_v5 = vld [vmem:[%s19339_s16 + $0x1428] ss:$168 sps:$4 sm:$0xff]   ;;  %v18374_v10 = vld [vmem:[%s19339_s16 + $0x84] ss:$168 sps:$4 sm:$0xff]  }
 0x47b   : > { %v18372_v17 = vld [vmem:[%s19339_s16 + $0x80] ss:$168 sps:$4 sm:$0xff]   ;;  %v18378_v21 = vld [vmem:[%s19339_s16 + $0x1d0] ss:$168 sps:$4 sm:$0xff]  }
 0x47c   : > { %5617 = vmatpush1.bf16.msra.mxu0 %v18312_v14  ;;  %v18377_v14 = vld [vmem:[%s19339_s16 + $0x8c] ss:$168 sps:$4 sm:$0xff]   ;;  %v18375_v18 = vld [vmem:[%s19339_s16 + $0x88] ss:$168 sps:$4 sm:$0xff]  }
 0x47d   : > { %5658 = vmatpush1.bf16.msra.mxu1 %v18315_v19  ;;  %5618 = vmatprep.subr.bf16.mxu0 %v18320_v20  ;;  %v18380_v19 = vld [vmem:[%s19339_s16 + $0x1d4] ss:$168 sps:$4 sm:$0xff]  }
 0x47e   : > { %5659 = vmatprep.subr.bf16.mxu1 %v18323_v22  ;;  %v18383_v20 = vld [vmem:[%s19339_s16 + $0x1dc] ss:$168 sps:$4 sm:$0xff]   ;;  %v18381_v22 = vld [vmem:[%s19339_s16 + $0x1d8] ss:$168 sps:$4 sm:$0xff]  }
 0x480   : > { %5619 = vmatpush1.bf16.msra.mxu0 %v18318_v23  ;;  %v18386_v23 = vld [vmem:[%s19339_s16 + $0x324] ss:$168 sps:$4 sm:$0xff]  }
 0x481   : > { %5660 = vmatpush1.bf16.msra.mxu1 %v18321_v24  ;;  %5620 = vmatprep.subr.bf16.mxu0 %v18326_v25  ;;  %v18389_v24 = vld [vmem:[%s19339_s16 + $0x32c] ss:$168 sps:$4 sm:$0xff]   ;;  %v18384_v25 = vld [vmem:[%s19339_s16 + $0x320] ss:$168 sps:$4 sm:$0xff]  }
 0x482   : > { %5661 = vmatprep.subr.bf16.mxu1 %v18329_v26  ;;  %v18387_v26 = vld [vmem:[%s19339_s16 + $0x328] ss:$168 sps:$4 sm:$0xff]  }
 0x484   : > { %5621 = vmatpush1.bf16.msra.mxu0 %v18324_v27  ;;  %v18392_v27 = vld [vmem:[%s19339_s16 + $0x474] ss:$168 sps:$4 sm:$0xff]  }
 0x485   : > { %5662 = vmatpush1.bf16.msra.mxu1 %v18327_v28  ;;  %5622 = vmatprep.subr.bf16.mxu0 %v18332_v29  ;;  %v18395_v28 = vld [vmem:[%s19339_s16 + $0x47c] ss:$168 sps:$4 sm:$0xff]   ;;  %v18390_v29 = vld [vmem:[%s19339_s16 + $0x470] ss:$168 sps:$4 sm:$0xff]  }
 0x486   : > { %5663 = vmatprep.subr.bf16.mxu1 %v18335_v30  ;;  %v18393_v30 = vld [vmem:[%s19339_s16 + $0x478] ss:$168 sps:$4 sm:$0xff]  }
 0x488   : > { %5623 = vmatpush1.bf16.msra.mxu0 %v18330_v31  ;;  %v18398_v31 = vld [vmem:[%s19339_s16 + $0x5c4] ss:$168 sps:$4 sm:$0xff]  }
 0x489   : > { %5664 = vmatpush1.bf16.msra.mxu1 %v18333_v32  ;;  %5624 = vmatprep.subr.bf16.mxu0 %v18338_v33  ;;  %v18401_v32 = vld [vmem:[%s19339_s16 + $0x5cc] ss:$168 sps:$4 sm:$0xff]   ;;  %v18396_v33 = vld [vmem:[%s19339_s16 + $0x5c0] ss:$168 sps:$4 sm:$0xff]  }
 0x48a   : > { %5665 = vmatprep.subr.bf16.mxu1 %v18341_v35  ;;  %v18399_v35 = vld [vmem:[%s19339_s16 + $0x5c8] ss:$168 sps:$4 sm:$0xff]  }
 0x48c   : > { %5625 = vmatpush1.bf16.msra.mxu0 %v18336_v39  ;;  %v18404_v39 = vld [vmem:[%s19339_s16 + $0x714] ss:$168 sps:$4 sm:$0xff]  }
 0x48d   : > { %5666 = vmatpush1.bf16.msra.mxu1 %v18339_v40  ;;  %5626 = vmatprep.subr.bf16.mxu0 %v18344_v41  ;;  %v18407_v40 = vld [vmem:[%s19339_s16 + $0x71c] ss:$168 sps:$4 sm:$0xff]   ;;  %v18402_v41 = vld [vmem:[%s19339_s16 + $0x710] ss:$168 sps:$4 sm:$0xff]  }
 0x48e   : > { %5667 = vmatprep.subr.bf16.mxu1 %v18347_v42  ;;  %v18405_v42 = vld [vmem:[%s19339_s16 + $0x718] ss:$168 sps:$4 sm:$0xff]  }
 0x490   : > { %5627 = vmatpush1.bf16.msra.mxu0 %v18342_v43  ;;  %v18410_v43 = vld [vmem:[%s19339_s16 + $0x864] ss:$168 sps:$4 sm:$0xff]  }
 0x491   : > { %5668 = vmatpush1.bf16.msra.mxu1 %v18345_v44  ;;  %5628 = vmatprep.subr.bf16.mxu0 %v18350_v45  ;;  %v18413_v45 = vld [vmem:[%s19339_s16 + $0x86c] ss:$168 sps:$4 sm:$0xff]  }
 0x492   : > { %5669 = vmatprep.subr.bf16.mxu1 %v18353_v46 }
 0x494   : > { %5629 = vmatpush1.bf16.msra.mxu0 %v18348_v47 }
 0x495   : > { %5670 = vmatpush1.bf16.msra.mxu1 %v18351_v48  ;;  %5630 = vmatprep.subr.bf16.mxu0 %v18356_v49 }
 0x496   : > { %5671 = vmatprep.subr.bf16.mxu1 %v18359_v50  ;;  %v18408_v50 = vld [vmem:[%s19339_s16 + $0x860] ss:$168 sps:$4 sm:$0xff]  }
 0x498   : > { %5631 = vmatpush1.bf16.msra.mxu0 %v18354_v51 }
 0x499   : > { %5672 = vmatpush1.bf16.msra.mxu1 %v18357_v54  ;;  %5632 = vmatprep.subr.bf16.mxu0 %v18362_v57  ;;  %v18411_v57 = vld [vmem:[%s19339_s16 + $0x868] ss:$168 sps:$4 sm:$0xff]  }
 0x49a   : > { %5673 = vmatprep.subr.bf16.mxu1 %v18365_v58  ;;  %v18416_v58 = vld [vmem:[%s19339_s16 + $0x9b4] ss:$168 sps:$4 sm:$0xff]  }
 0x49c   : > { %5633 = vmatpush1.bf16.msra.mxu0 %v18360_v59 }
 0x49d   : > { %5674 = vmatpush1.bf16.msra.mxu1 %v18363_v62  ;;  %5634 = vmatprep.subr.bf16.mxu0 %v18368_v1  ;;  %v18419_v62 = vld [vmem:[%s19339_s16 + $0x9bc] ss:$168 sps:$4 sm:$0xff]   ;;  %v18414_v1 = vld [vmem:[%s19339_s16 + $0x9b0] ss:$168 sps:$4 sm:$0xff]  }
 0x49e   : > { %5675 = vmatprep.subr.bf16.mxu1 %v18371_v2  ;;  %v18417_v2 = vld [vmem:[%s19339_s16 + $0x9b8] ss:$168 sps:$4 sm:$0xff]  }
 0x4a0   : > { %5635 = vmatpush1.bf16.msra.mxu0 %v18366_v3  ;;  %v18422_v3 = vld [vmem:[%s19339_s16 + $0xb04] ss:$168 sps:$4 sm:$0xff]  }
 0x4a1   : > { %5676 = vmatpush1.bf16.msra.mxu1 %v18369_v5  ;;  %5686 = vmatprep.subr.bf16.mxu0 %v18374_v10  ;;  %v18425_v5 = vld [vmem:[%s19339_s16 + $0xb0c] ss:$168 sps:$4 sm:$0xff]   ;;  %v18420_v10 = vld [vmem:[%s19339_s16 + $0xb00] ss:$168 sps:$4 sm:$0xff]  }
 0x4a2   : > { %5727 = vmatprep.subr.bf16.mxu1 %v18377_v14  ;;  %v18423_v14 = vld [vmem:[%s19339_s16 + $0xb08] ss:$168 sps:$4 sm:$0xff]  }
 0x4a3   : > { %5637 = vmatmul.mubr.bf16.vlgmr.msra.gmra.mrb[32].mxu0 %v19446_v12 }
 0x4a4   : > { %5678 = vmatmul.mubr.bf16.vlgmr.msra.gmra.mrb[32].mxu1 %v19446_v12  ;;  %5687 = vmatpush1.bf16.msra.mxu0 %v18372_v17  ;;  %v18428_v17 = vld [vmem:[%s19339_s16 + $0xc54] ss:$168 sps:$4 sm:$0xff]  }
 0x4a5   : > { %5718 = vmatprep.mubr.bf16.mxu0 %v19442_v9  ;;  %5728 = vmatpush1.bf16.msra.mxu1 %v18375_v18  ;;  %v18431_v18 = vld [vmem:[%s19339_s16 + $0xc5c] ss:$168 sps:$4 sm:$0xff]  }
 0x4a6   : > { %5759 = vmatprep.mubr.bf16.mxu1 %v19442_v9  ;;  %5688 = vmatprep.subr.bf16.mxu0 %v18380_v19  ;;  %v18426_v19 = vld [vmem:[%s19339_s16 + $0xc50] ss:$168 sps:$4 sm:$0xff]  }
 0x4a7   : > { %5729 = vmatprep.subr.bf16.mxu1 %v18383_v20  ;;  %v18429_v20 = vld [vmem:[%s19339_s16 + $0xc58] ss:$168 sps:$4 sm:$0xff]  }
 0x4a8   : > { %5689 = vmatpush1.bf16.msra.mxu0 %v18378_v21  ;;  %v18434_v21 = vld [vmem:[%s19339_s16 + $0xda4] ss:$168 sps:$4 sm:$0xff]  }
 0x4a9   : > { %5730 = vmatpush1.bf16.msra.mxu1 %v18381_v22  ;;  %5690 = vmatprep.subr.bf16.mxu0 %v18386_v23  ;;  %v18437_v22 = vld [vmem:[%s19339_s16 + $0xdac] ss:$168 sps:$4 sm:$0xff]   ;;  %v18432_v23 = vld [vmem:[%s19339_s16 + $0xda0] ss:$168 sps:$4 sm:$0xff]  }
 0x4aa   : > { %5731 = vmatprep.subr.bf16.mxu1 %v18389_v24  ;;  %v18435_v24 = vld [vmem:[%s19339_s16 + $0xda8] ss:$168 sps:$4 sm:$0xff]  }
 0x4ac   : > { %5691 = vmatpush1.bf16.msra.mxu0 %v18384_v25  ;;  %v18440_v25 = vld [vmem:[%s19339_s16 + $0xef4] ss:$168 sps:$4 sm:$0xff]  }
 0x4ad   : > { %5732 = vmatpush1.bf16.msra.mxu1 %v18387_v26  ;;  %5692 = vmatprep.subr.bf16.mxu0 %v18392_v27  ;;  %v18443_v26 = vld [vmem:[%s19339_s16 + $0xefc] ss:$168 sps:$4 sm:$0xff]   ;;  %v18438_v27 = vld [vmem:[%s19339_s16 + $0xef0] ss:$168 sps:$4 sm:$0xff]  }
 0x4ae   : > { %5733 = vmatprep.subr.bf16.mxu1 %v18395_v28  ;;  %v18441_v28 = vld [vmem:[%s19339_s16 + $0xef8] ss:$168 sps:$4 sm:$0xff]  }
 0x4b0   : > { %5693 = vmatpush1.bf16.msra.mxu0 %v18390_v29  ;;  %v18446_v29 = vld [vmem:[%s19339_s16 + $0x1044] ss:$168 sps:$4 sm:$0xff]  }
 0x4b1   : > { %5734 = vmatpush1.bf16.msra.mxu1 %v18393_v30  ;;  %5694 = vmatprep.subr.bf16.mxu0 %v18398_v31  ;;  %v18449_v30 = vld [vmem:[%s19339_s16 + $0x104c] ss:$168 sps:$4 sm:$0xff]   ;;  %v18444_v31 = vld [vmem:[%s19339_s16 + $0x1040] ss:$168 sps:$4 sm:$0xff]  }
 0x4b2   : > { %5735 = vmatprep.subr.bf16.mxu1 %v18401_v32  ;;  %v18447_v32 = vld [vmem:[%s19339_s16 + $0x1048] ss:$168 sps:$4 sm:$0xff]  }
 0x4b4   : > { %5695 = vmatpush1.bf16.msra.mxu0 %v18396_v33  ;;  %v18452_v33 = vld [vmem:[%s19339_s16 + $0x1194] ss:$168 sps:$4 sm:$0xff]  }
 0x4b5   : > { %5736 = vmatpush1.bf16.msra.mxu1 %v18399_v35  ;;  %5696 = vmatprep.subr.bf16.mxu0 %v18404_v39  ;;  %v18455_v35 = vld [vmem:[%s19339_s16 + $0x119c] ss:$168 sps:$4 sm:$0xff]   ;;  %v18450_v39 = vld [vmem:[%s19339_s16 + $0x1190] ss:$168 sps:$4 sm:$0xff]  }
 0x4b6   : > { %v19983_v44 = vpop.f32.mrb[20].mxu0  ;;  %5737 = vmatprep.subr.bf16.mxu1 %v18407_v40  ;;  %v18453_v40 = vld [vmem:[%s19339_s16 + $0x1198] ss:$168 sps:$4 sm:$0xff]  }
 0x4b7   : > { %v19986_v46 = vpop.f32.mrb[20].mxu1  ;;  %v19988_v47 = vpop.f32.mrb[21].mxu0 }
 0x4b8   : > { %v19990_v48 = vpop.f32.mrb[21].mxu1  ;;  %v5396_v49 = vpop.f32.mrb[22].mxu0  ;;  %5697 = vmatpush1.bf16.msra.mxu0 %v18402_v41  ;;  %v18458_v41 = vld [vmem:[%s19339_s16 + $0x12e4] ss:$168 sps:$4 sm:$0xff]  }
 0x4b9   : > { %v5437_v51 = vpop.f32.mrb[22].mxu1  ;;  %5738 = vmatpush1.bf16.msra.mxu1 %v18405_v42  ;;  %v5397_v54 = vpop.f32.mrb[23].mxu0  ;;  %5698 = vmatprep.subr.bf16.mxu0 %v18410_v43  ;;  %v18461_v42 = vld [vmem:[%s19339_s16 + $0x12ec] ss:$168 sps:$4 sm:$0xff]   ;;  %v18456_v43 = vld [vmem:[%s19339_s16 + $0x12e0] ss:$168 sps:$4 sm:$0xff]  }
 0x4ba   : > { %v5438_v59 = vpop.f32.mrb[23].mxu1  ;;  %5739 = vmatprep.subr.bf16.mxu1 %v18413_v45  ;;  %v18459_v45 = vld [vmem:[%s19339_s16 + $0x12e8] ss:$168 sps:$4 sm:$0xff]   ;;  %v18464_v49 = vld [vmem:[%s19339_s16 + $0x1434] ss:$168 sps:$4 sm:$0xff]  }
 0x4bb   : > { %v18462_v51 = vld [vmem:[%s19339_s16 + $0x1430] ss:$168 sps:$4 sm:$0xff]  }
 0x4bc   : > { %5699 = vmatpush1.bf16.msra.mxu0 %v18408_v50  ;;  %v18467_v50 = vld [vmem:[%s19339_s16 + $0x143c] ss:$168 sps:$4 sm:$0xff]   ;;  %v18465_v54 = vld [vmem:[%s19339_s16 + $0x1438] ss:$168 sps:$4 sm:$0xff]  }
 0x4bd   : > { %5740 = vmatpush1.bf16.msra.mxu1 %v18411_v57  ;;  %5700 = vmatprep.subr.bf16.mxu0 %v18416_v58  ;;  %v18470_v57 = vld [vmem:[%s19339_s16 + $0x94] ss:$168 sps:$4 sm:$0xff]   ;;  %v18468_v59 = vld [vmem:[%s19339_s16 + $0x90] ss:$168 sps:$4 sm:$0xff]  }
 0x4be   : > { %5741 = vmatprep.subr.bf16.mxu1 %v18419_v62  ;;  %v18473_v58 = vld [vmem:[%s19339_s16 + $0x9c] ss:$168 sps:$4 sm:$0xff]   ;;  %v18471_v62 = vld [vmem:[%s19339_s16 + $0x98] ss:$168 sps:$4 sm:$0xff]  }
 0x4c0   : > { %5701 = vmatpush1.bf16.msra.mxu0 %v18414_v1  ;;  %v18476_v1 = vld [vmem:[%s19339_s16 + $0x1e4] ss:$168 sps:$4 sm:$0xff]  }
 0x4c1   : > { %5742 = vmatpush1.bf16.msra.mxu1 %v18417_v2  ;;  %5702 = vmatprep.subr.bf16.mxu0 %v18422_v3  ;;  %v18479_v2 = vld [vmem:[%s19339_s16 + $0x1ec] ss:$168 sps:$4 sm:$0xff]   ;;  %v18474_v3 = vld [vmem:[%s19339_s16 + $0x1e0] ss:$168 sps:$4 sm:$0xff]  }
 0x4c2   : > { %5743 = vmatprep.subr.bf16.mxu1 %v18425_v5  ;;  %v18477_v5 = vld [vmem:[%s19339_s16 + $0x1e8] ss:$168 sps:$4 sm:$0xff]  }
 0x4c4   : > { %5703 = vmatpush1.bf16.msra.mxu0 %v18420_v10  ;;  %v18482_v10 = vld [vmem:[%s19339_s16 + $0x334] ss:$168 sps:$4 sm:$0xff]  }
 0x4c5   : > { %5744 = vmatpush1.bf16.msra.mxu1 %v18423_v14  ;;  %5704 = vmatprep.subr.bf16.mxu0 %v18428_v17  ;;  %v18485_v14 = vld [vmem:[%s19339_s16 + $0x33c] ss:$168 sps:$4 sm:$0xff]   ;;  %v18480_v17 = vld [vmem:[%s19339_s16 + $0x330] ss:$168 sps:$4 sm:$0xff]  }
 0x4c6   : > { %5745 = vmatprep.subr.bf16.mxu1 %v18431_v18  ;;  %v18483_v18 = vld [vmem:[%s19339_s16 + $0x338] ss:$168 sps:$4 sm:$0xff]  }
 0x4c8   : > { %5705 = vmatpush1.bf16.msra.mxu0 %v18426_v19  ;;  %v18488_v19 = vld [vmem:[%s19339_s16 + $0x484] ss:$168 sps:$4 sm:$0xff]  }
 0x4c9   : > { %5746 = vmatpush1.bf16.msra.mxu1 %v18429_v20  ;;  %5706 = vmatprep.subr.bf16.mxu0 %v18434_v21  ;;  %v18491_v20 = vld [vmem:[%s19339_s16 + $0x48c] ss:$168 sps:$4 sm:$0xff]   ;;  %v18486_v21 = vld [vmem:[%s19339_s16 + $0x480] ss:$168 sps:$4 sm:$0xff]  }
 0x4ca   : > { %5747 = vmatprep.subr.bf16.mxu1 %v18437_v22  ;;  %v18489_v22 = vld [vmem:[%s19339_s16 + $0x488] ss:$168 sps:$4 sm:$0xff]  }
 0x4cc   : > { %5707 = vmatpush1.bf16.msra.mxu0 %v18432_v23  ;;  %v18494_v23 = vld [vmem:[%s19339_s16 + $0x5d4] ss:$168 sps:$4 sm:$0xff]  }
 0x4cd   : > { %5748 = vmatpush1.bf16.msra.mxu1 %v18435_v24  ;;  %5708 = vmatprep.subr.bf16.mxu0 %v18440_v25  ;;  %v18497_v24 = vld [vmem:[%s19339_s16 + $0x5dc] ss:$168 sps:$4 sm:$0xff]   ;;  %v18492_v25 = vld [vmem:[%s19339_s16 + $0x5d0] ss:$168 sps:$4 sm:$0xff]  }
 0x4ce   : > { %5749 = vmatprep.subr.bf16.mxu1 %v18443_v26  ;;  %v18495_v26 = vld [vmem:[%s19339_s16 + $0x5d8] ss:$168 sps:$4 sm:$0xff]  }
 0x4d0   : > { %5709 = vmatpush1.bf16.msra.mxu0 %v18438_v27  ;;  %v18500_v27 = vld [vmem:[%s19339_s16 + $0x724] ss:$168 sps:$4 sm:$0xff]  }
 0x4d1   : > { %5750 = vmatpush1.bf16.msra.mxu1 %v18441_v28  ;;  %5710 = vmatprep.subr.bf16.mxu0 %v18446_v29  ;;  %v18503_v28 = vld [vmem:[%s19339_s16 + $0x72c] ss:$168 sps:$4 sm:$0xff]   ;;  %v18498_v29 = vld [vmem:[%s19339_s16 + $0x720] ss:$168 sps:$4 sm:$0xff]  }
 0x4d2   : > { %5751 = vmatprep.subr.bf16.mxu1 %v18449_v30  ;;  %v18501_v30 = vld [vmem:[%s19339_s16 + $0x728] ss:$168 sps:$4 sm:$0xff]  }
 0x4d4   : > { %5711 = vmatpush1.bf16.msra.mxu0 %v18444_v31  ;;  %v18506_v31 = vld [vmem:[%s19339_s16 + $0x874] ss:$168 sps:$4 sm:$0xff]  }
 0x4d5   : > { %5752 = vmatpush1.bf16.msra.mxu1 %v18447_v32  ;;  %5712 = vmatprep.subr.bf16.mxu0 %v18452_v33  ;;  %v18509_v33 = vld [vmem:[%s19339_s16 + $0x87c] ss:$168 sps:$4 sm:$0xff]  }
 0x4d6   : > { %5753 = vmatprep.subr.bf16.mxu1 %v18455_v35 }
 0x4d8   : > { %5713 = vmatpush1.bf16.msra.mxu0 %v18450_v39 }
 0x4d9   : > { %5754 = vmatpush1.bf16.msra.mxu1 %v18453_v40  ;;  %5714 = vmatprep.subr.bf16.mxu0 %v18458_v41 }
 0x4da   : > { %5755 = vmatprep.subr.bf16.mxu1 %v18461_v42  ;;  %v18504_v42 = vld [vmem:[%s19339_s16 + $0x870] ss:$168 sps:$4 sm:$0xff]  }
 0x4dc   : > { %5715 = vmatpush1.bf16.msra.mxu0 %v18456_v43 }
 0x4dd   : > { %5756 = vmatpush1.bf16.msra.mxu1 %v18459_v45  ;;  %5716 = vmatprep.subr.bf16.mxu0 %v18464_v49  ;;  %v18507_v49 = vld [vmem:[%s19339_s16 + $0x878] ss:$168 sps:$4 sm:$0xff]  }
 0x4de   : > { %5757 = vmatprep.subr.bf16.mxu1 %v18467_v50  ;;  %v18512_v50 = vld [vmem:[%s19339_s16 + $0x9c4] ss:$168 sps:$4 sm:$0xff]  }
 0x4e0   : > { %5717 = vmatpush1.bf16.msra.mxu0 %v18462_v51 }
 0x4e1   : > { %5758 = vmatpush1.bf16.msra.mxu1 %v18465_v54  ;;  %5768 = vmatprep.subr.bf16.mxu0 %v18470_v57  ;;  %v18515_v54 = vld [vmem:[%s19339_s16 + $0x9cc] ss:$168 sps:$4 sm:$0xff]   ;;  %v18510_v57 = vld [vmem:[%s19339_s16 + $0x9c0] ss:$168 sps:$4 sm:$0xff]  }
 0x4e2   : > { %5809 = vmatprep.subr.bf16.mxu1 %v18473_v58  ;;  %v18513_v58 = vld [vmem:[%s19339_s16 + $0x9c8] ss:$168 sps:$4 sm:$0xff]  }
 0x4e3   : > { %5719 = vmatmul.mubr.bf16.vlgmr.msra.gmra.mrb[36].mxu0 %v19446_v12 }
 0x4e4   : > { %5760 = vmatmul.mubr.bf16.vlgmr.msra.gmra.mrb[36].mxu1 %v19446_v12  ;;  %5769 = vmatpush1.bf16.msra.mxu0 %v18468_v59  ;;  %v18518_v59 = vld [vmem:[%s19339_s16 + $0xb14] ss:$168 sps:$4 sm:$0xff]  }
 0x4e5   : > { %5800 = vmatprep.mubr.bf16.mxu0 %v19442_v9  ;;  %5810 = vmatpush1.bf16.msra.mxu1 %v18471_v62  ;;  %v18521_v62 = vld [vmem:[%s19339_s16 + $0xb1c] ss:$168 sps:$4 sm:$0xff]  }
 0x4e6   : > { %5841 = vmatprep.mubr.bf16.mxu1 %v19442_v9  ;;  %5770 = vmatprep.subr.bf16.mxu0 %v18476_v1  ;;  %v18516_v1 = vld [vmem:[%s19339_s16 + $0xb10] ss:$168 sps:$4 sm:$0xff]  }
 0x4e7   : > { %5811 = vmatprep.subr.bf16.mxu1 %v18479_v2  ;;  %v18519_v2 = vld [vmem:[%s19339_s16 + $0xb18] ss:$168 sps:$4 sm:$0xff]  }
 0x4e8   : > { %5771 = vmatpush1.bf16.msra.mxu0 %v18474_v3  ;;  %v18524_v3 = vld [vmem:[%s19339_s16 + $0xc64] ss:$168 sps:$4 sm:$0xff]  }
 0x4e9   : > { %5812 = vmatpush1.bf16.msra.mxu1 %v18477_v5  ;;  %5772 = vmatprep.subr.bf16.mxu0 %v18482_v10  ;;  %v18527_v5 = vld [vmem:[%s19339_s16 + $0xc6c] ss:$168 sps:$4 sm:$0xff]   ;;  %v18522_v10 = vld [vmem:[%s19339_s16 + $0xc60] ss:$168 sps:$4 sm:$0xff]  }
 0x4ea   : > { %5813 = vmatprep.subr.bf16.mxu1 %v18485_v14  ;;  %v18525_v14 = vld [vmem:[%s19339_s16 + $0xc68] ss:$168 sps:$4 sm:$0xff]  }
 0x4ec   : > { %5773 = vmatpush1.bf16.msra.mxu0 %v18480_v17  ;;  %v18530_v17 = vld [vmem:[%s19339_s16 + $0xdb4] ss:$168 sps:$4 sm:$0xff]  }
 0x4ed   : > { %5814 = vmatpush1.bf16.msra.mxu1 %v18483_v18  ;;  %5774 = vmatprep.subr.bf16.mxu0 %v18488_v19  ;;  %v18533_v18 = vld [vmem:[%s19339_s16 + $0xdbc] ss:$168 sps:$4 sm:$0xff]   ;;  %v18528_v19 = vld [vmem:[%s19339_s16 + $0xdb0] ss:$168 sps:$4 sm:$0xff]  }
 0x4ee   : > { %5815 = vmatprep.subr.bf16.mxu1 %v18491_v20  ;;  %v18531_v20 = vld [vmem:[%s19339_s16 + $0xdb8] ss:$168 sps:$4 sm:$0xff]  }
 0x4f0   : > { %5775 = vmatpush1.bf16.msra.mxu0 %v18486_v21  ;;  %v18536_v21 = vld [vmem:[%s19339_s16 + $0xf04] ss:$168 sps:$4 sm:$0xff]  }
 0x4f1   : > { %5816 = vmatpush1.bf16.msra.mxu1 %v18489_v22  ;;  %5776 = vmatprep.subr.bf16.mxu0 %v18494_v23  ;;  %v18539_v22 = vld [vmem:[%s19339_s16 + $0xf0c] ss:$168 sps:$4 sm:$0xff]   ;;  %v18534_v23 = vld [vmem:[%s19339_s16 + $0xf00] ss:$168 sps:$4 sm:$0xff]  }
 0x4f2   : > { %5817 = vmatprep.subr.bf16.mxu1 %v18497_v24  ;;  %v18537_v24 = vld [vmem:[%s19339_s16 + $0xf08] ss:$168 sps:$4 sm:$0xff]  }
 0x4f4   : > { %5777 = vmatpush1.bf16.msra.mxu0 %v18492_v25  ;;  %v18542_v25 = vld [vmem:[%s19339_s16 + $0x1054] ss:$168 sps:$4 sm:$0xff]  }
 0x4f5   : > { %5818 = vmatpush1.bf16.msra.mxu1 %v18495_v26  ;;  %5778 = vmatprep.subr.bf16.mxu0 %v18500_v27  ;;  %v18545_v26 = vld [vmem:[%s19339_s16 + $0x105c] ss:$168 sps:$4 sm:$0xff]   ;;  %v18540_v27 = vld [vmem:[%s19339_s16 + $0x1050] ss:$168 sps:$4 sm:$0xff]  }
 0x4f6   : > { %v20059_v32 = vpop.f32.mrb[24].mxu0  ;;  %5819 = vmatprep.subr.bf16.mxu1 %v18503_v28  ;;  %v18543_v28 = vld [vmem:[%s19339_s16 + $0x1058] ss:$168 sps:$4 sm:$0xff]  }
 0x4f7   : > { %v20062_v35 = vpop.f32.mrb[24].mxu1  ;;  %v20064_v39 = vpop.f32.mrb[25].mxu0 }
 0x4f8   : > { %v20066_v40 = vpop.f32.mrb[25].mxu1  ;;  %v5478_v41 = vpop.f32.mrb[26].mxu0  ;;  %5779 = vmatpush1.bf16.msra.mxu0 %v18498_v29  ;;  %v18548_v29 = vld [vmem:[%s19339_s16 + $0x11a4] ss:$168 sps:$4 sm:$0xff]  }
 0x4f9   : > { %v5519_v43 = vpop.f32.mrb[26].mxu1  ;;  %5820 = vmatpush1.bf16.msra.mxu1 %v18501_v30  ;;  %v5479_v45 = vpop.f32.mrb[27].mxu0  ;;  %5780 = vmatprep.subr.bf16.mxu0 %v18506_v31  ;;  %v18551_v30 = vld [vmem:[%s19339_s16 + $0x11ac] ss:$168 sps:$4 sm:$0xff]   ;;  %v18546_v31 = vld [vmem:[%s19339_s16 + $0x11a0] ss:$168 sps:$4 sm:$0xff]  }
 0x4fa   : > { %v5520_v51 = vpop.f32.mrb[27].mxu1  ;;  %5821 = vmatprep.subr.bf16.mxu1 %v18509_v33  ;;  %v18549_v33 = vld [vmem:[%s19339_s16 + $0x11a8] ss:$168 sps:$4 sm:$0xff]   ;;  %v18554_v41 = vld [vmem:[%s19339_s16 + $0x12f4] ss:$168 sps:$4 sm:$0xff]  }
 0x4fb   : > { %v18552_v43 = vld [vmem:[%s19339_s16 + $0x12f0] ss:$168 sps:$4 sm:$0xff]   ;;  %v18558_v51 = vld [vmem:[%s19339_s16 + $0x1440] ss:$168 sps:$4 sm:$0xff]  }
 0x4fc   : > { %5781 = vmatpush1.bf16.msra.mxu0 %v18504_v42  ;;  %v18557_v42 = vld [vmem:[%s19339_s16 + $0x12fc] ss:$168 sps:$4 sm:$0xff]   ;;  %v18555_v45 = vld [vmem:[%s19339_s16 + $0x12f8] ss:$168 sps:$4 sm:$0xff]  }
 0x4fd   : > { %5822 = vmatpush1.bf16.msra.mxu1 %v18507_v49  ;;  %5782 = vmatprep.subr.bf16.mxu0 %v18512_v50  ;;  %v18560_v49 = vld [vmem:[%s19339_s16 + $0x1444] ss:$168 sps:$4 sm:$0xff]  }
 0x4fe   : > { %5823 = vmatprep.subr.bf16.mxu1 %v18515_v54  ;;  %v18563_v50 = vld [vmem:[%s19339_s16 + $0x144c] ss:$168 sps:$4 sm:$0xff]   ;;  %v18561_v54 = vld [vmem:[%s19339_s16 + $0x1448] ss:$168 sps:$4 sm:$0xff]  }
 0x500   : > { %5783 = vmatpush1.bf16.msra.mxu0 %v18510_v57  ;;  %v18566_v57 = vld [vmem:[%s19339_s16 + $0xa4] ss:$168 sps:$4 sm:$0xff]  }
 0x501   : > { %5824 = vmatpush1.bf16.msra.mxu1 %v18513_v58  ;;  %5784 = vmatprep.subr.bf16.mxu0 %v18518_v59  ;;  %v5933_v58 = vld [vmem:[%s21865_s7] sm:$0xff]  ;;  %v5934_v59 = vld [vmem:[%s21865_s7 + $0x8] sm:$0xff] }
 0x502   : > { %5825 = vmatprep.subr.bf16.mxu1 %v18521_v62  ;;  %v18564_v62 = vld [vmem:[%s19339_s16 + $0xa0] ss:$168 sps:$4 sm:$0xff]  }
 0x504   : > { %5785 = vmatpush1.bf16.msra.mxu0 %v18516_v1  ;;  %v20114_v1 = vpack.c.bf16 %v5934_v59, %v5933_v58 }
 0x505   : > { %5826 = vmatpush1.bf16.msra.mxu1 %v18519_v2  ;;  %5786 = vmatprep.subr.bf16.mxu0 %v18524_v3  ;;  %v21826_v2 = vmov 0.0|0.0   ;;  %v18569_v3 = vld [vmem:[%s19339_s16 + $0x1f4] ss:$168 sps:$4 sm:$0xff]  }
 0x506   : > { %5827 = vmatprep.subr.bf16.mxu1 %v18527_v5  ;;  %v5935_v5 = vld [vmem:[%s21865_s7 + $0x10] sm:$0xff] }
 0x508   : > { %5787 = vmatpush1.bf16.msra.mxu0 %v18522_v10  ;;  %v5936_v10 = vld [vmem:[%s21865_s7 + $0x18] sm:$0xff] }
 0x509   : > { %5828 = vmatpush1.bf16.msra.mxu1 %v18525_v14  ;;  %5788 = vmatprep.subr.bf16.mxu0 %v18530_v17  ;;  %v18567_v14 = vld [vmem:[%s19339_s16 + $0x1f0] ss:$168 sps:$4 sm:$0xff]   ;;  %v20129_v17 = vpack.c.bf16 %v5936_v10, %v5935_v5  ;;  %v18582_v5 = vld [vmem:[%s19339_s16 + $0x880] ss:$168 sps:$4 sm:$0xff]  }
 0x50a   : > { %5829 = vmatprep.subr.bf16.mxu1 %v18533_v18  ;;  %v18572_v18 = vld [vmem:[%s19339_s16 + $0x344] ss:$168 sps:$4 sm:$0xff]  }
 0x50c   : > { %5789 = vmatpush1.bf16.msra.mxu0 %v18528_v19  ;;  %v5937_v19 = vld [vmem:[%s21865_s7 + $0x20] sm:$0xff] }
 0x50d   : > { %5830 = vmatpush1.bf16.msra.mxu1 %v18531_v20  ;;  %5790 = vmatprep.subr.bf16.mxu0 %v18536_v21  ;;  %v5938_v20 = vld [vmem:[%s21865_s7 + $0x28] sm:$0xff] }
 0x50e   : > { %5831 = vmatprep.subr.bf16.mxu1 %v18539_v22  ;;  %v20143_v21 = vpack.c.bf16 %v5938_v20, %v5937_v19  ;;  %v18575_v22 = vld [vmem:[%s19339_s16 + $0x494] ss:$168 sps:$4 sm:$0xff]  }
 0x50f   : > { %v18587_v19 = vld [vmem:[%s19339_s16 + $0x9d4] ss:$168 sps:$4 sm:$0xff]  }
 0x510   : > { %5791 = vmatpush1.bf16.msra.mxu0 %v18534_v23  ;;  %v5939_v23 = vld [vmem:[%s21865_s7 + $0x30] sm:$0xff] }
 0x511   : > { %5832 = vmatpush1.bf16.msra.mxu1 %v18537_v24  ;;  %5792 = vmatprep.subr.bf16.mxu0 %v18542_v25  ;;  %v5940_v24 = vld [vmem:[%s21865_s7 + $0x38] sm:$0xff] }
 0x512   : > { %5833 = vmatprep.subr.bf16.mxu1 %v18545_v26  ;;  %v18573_v25 = vld [vmem:[%s19339_s16 + $0x490] ss:$168 sps:$4 sm:$0xff]   ;;  %v20155_v26 = vpack.c.bf16 %v5940_v24, %v5939_v23 }
 0x513   : > { %v5948_v23 = vld [vmem:[%s21865_s7 + $0x78] sm:$0xff] }
 0x514   : > { %5793 = vmatpush1.bf16.msra.mxu0 %v18540_v27  ;;  %v18578_v27 = vld [vmem:[%s19339_s16 + $0x5e4] ss:$168 sps:$4 sm:$0xff]   ;;  %v18585_v24 = vld [vmem:[%s19339_s16 + $0x9d0] ss:$168 sps:$4 sm:$0xff]  }
 0x515   : > { %5834 = vmatpush1.bf16.msra.mxu1 %v18543_v28  ;;  %5794 = vmatprep.subr.bf16.mxu0 %v18548_v29  ;;  %v5941_v28 = vld [vmem:[%s21865_s7 + $0x40] sm:$0xff]  ;;  %v5942_v29 = vld [vmem:[%s21865_s7 + $0x48] sm:$0xff] }
 0x516   : > { %5835 = vmatprep.subr.bf16.mxu1 %v18551_v30  ;;  %v18576_v30 = vld [vmem:[%s19339_s16 + $0x5e0] ss:$168 sps:$4 sm:$0xff]  }
 0x518   : > { %5795 = vmatpush1.bf16.msra.mxu0 %v18546_v31  ;;  %v20167_v31 = vpack.c.bf16 %v5942_v29, %v5941_v28  ;;  %v18588_v29 = vld [vmem:[%s19339_s16 + $0xb20] ss:$168 sps:$4 sm:$0xff]  }
 0x519   : > { %5836 = vmatpush1.bf16.msra.mxu1 %v18549_v33  ;;  %5796 = vmatprep.subr.bf16.mxu0 %v18554_v41  ;;  %v18581_v33 = vld [vmem:[%s19339_s16 + $0x734] ss:$168 sps:$4 sm:$0xff]   ;;  %v5943_v41 = vld [vmem:[%s21865_s7 + $0x50] sm:$0xff] }
 0x51a   : > { %5837 = vmatprep.subr.bf16.mxu1 %v18557_v42  ;;  %v5944_v42 = vld [vmem:[%s21865_s7 + $0x58] sm:$0xff] }
 0x51c   : > { %5797 = vmatpush1.bf16.msra.mxu0 %v18552_v43  ;;  %v18579_v43 = vld [vmem:[%s19339_s16 + $0x730] ss:$168 sps:$4 sm:$0xff]  }
 0x51d   : > { %5838 = vmatpush1.bf16.msra.mxu1 %v18555_v45  ;;  %5798 = vmatprep.subr.bf16.mxu0 %v18560_v49  ;;  %v20179_v45 = vpack.c.bf16 %v5944_v42, %v5943_v41  ;;  %v18584_v49 = vld [vmem:[%s19339_s16 + $0x884] ss:$168 sps:$4 sm:$0xff]   ;;  %v18591_v41 = vld [vmem:[%s19339_s16 + $0xc70] ss:$168 sps:$4 sm:$0xff]   ;;  %v18594_v42 = vld [vmem:[%s19339_s16 + $0xdc0] ss:$168 sps:$4 sm:$0xff]  }
 0x51e   : > { %5839 = vmatprep.subr.bf16.mxu1 %v18563_v50 }
 0x520   : > { %5799 = vmatpush1.bf16.msra.mxu0 %v18558_v51  ;;  %v5945_v51 = vld [vmem:[%s21865_s7 + $0x60] sm:$0xff] }
 0x521   : > { %5840 = vmatpush1.bf16.msra.mxu1 %v18561_v54  ;;  %5850 = vmatprep.subr.bf16.mxu0 %v18566_v57  ;;  %v5946_v54 = vld [vmem:[%s21865_s7 + $0x68] sm:$0xff] }
 0x522   : > { %15781 = vmatprep.subr.bf16.mxu1 %v21826_v2  ;;  %v20192_v57 = vld [vmem:[%s19345_s26] sm:$0xff] }
 0x523   : > { %5801 = vmatmul.mubr.bf16.vlgmr.msra.gmra.mrb[40].mxu0 %v19446_v12  ;;  %v1463_v20 = vrot.slane %v20192_v57, %v19435_v61 }
 0x524   : > { %5842 = vmatmul.mubr.bf16.vlgmr.msra.gmra.mrb[40].mxu1 %v19446_v12  ;;  %5851 = vmatpush1.bf16.msra.mxu0 %v18564_v62 }
 0x525   : > { %5882 = vmatprep.mubr.bf16.mxu0 %v19442_v9  ;;  %15783 = vmatpush3.bf16.msra.mxu1 %v20114_v1  ;;  %v18570_v9 = vld [vmem:[%s19339_s16 + $0x340] ss:$168 sps:$4 sm:$0xff]   ;;  %v5065_v28 = vadd.f32 %v19679_v52, %v1463_v20  ;;  %v18596_v52 = vld [vmem:[%s19339_s16 + $0xdc4] ss:$168 sps:$4 sm:$0xff]   ;;  %v18609_v20 = vld [vmem:[%s19339_s16 + $0x1450] ss:$168 sps:$4 sm:$0xff]  }
 0x526   : > { %5852 = vmatprep.subr.bf16.mxu0 %v18569_v3  ;;  %15784 = vmatprep.subr.bf16.mxu1 %v21826_v2 }
 0x527   : > { %14311 = vmatprep.mubr.msk.f32.mxu1 %vm18963_vm0, %v21828_v0 }
 0x528   : > { %5853 = vmatpush1.bf16.msra.mxu0 %v18567_v14 }
 0x529   : > { %15786 = vmatpush3.bf16.msra.mxu1 %v20129_v17  ;;  %5854 = vmatprep.subr.bf16.mxu0 %v18572_v18  ;;  %v20202_v18 = vpack.c.bf16 %v5946_v54, %v5945_v51  ;;  %v18602_v51 = vld [vmem:[%s19339_s16 + $0x1064] ss:$168 sps:$4 sm:$0xff]   ;;  %v18600_v54 = vld [vmem:[%s19339_s16 + $0x1060] ss:$168 sps:$4 sm:$0xff]  }
 0x52a   : > { %15787 = vmatprep.subr.bf16.mxu1 %v21826_v2 }
 0x52c   : > { %5855 = vmatpush1.bf16.msra.mxu0 %v18570_v9 }
 0x52d   : > { %15789 = vmatpush3.bf16.msra.mxu1 %v20143_v21  ;;  %5856 = vmatprep.subr.bf16.mxu0 %v18575_v22  ;;  %v5947_v22 = vld [vmem:[%s21865_s7 + $0x70] sm:$0xff] }
 0x52e   : > { %15790 = vmatprep.subr.bf16.mxu1 %v21826_v2 }
 0x530   : > { %5857 = vmatpush1.bf16.msra.mxu0 %v18573_v25  ;;  %v20216_v25 = vpack.c.bf16 %v5948_v23, %v5947_v22 }
 0x531   : > { %15792 = vmatpush3.bf16.msra.mxu1 %v20155_v26  ;;  %5858 = vmatprep.subr.bf16.mxu0 %v18578_v27  ;;  %v18590_v27 = vld [vmem:[%s19339_s16 + $0xb24] ss:$168 sps:$4 sm:$0xff]  }
 0x532   : > { %15793 = vmatprep.subr.bf16.mxu1 %v21826_v2 }
 0x534   : > { %5859 = vmatpush1.bf16.msra.mxu0 %v18576_v30  ;;  %v18593_v30 = vld [vmem:[%s19339_s16 + $0xc74] ss:$168 sps:$4 sm:$0xff]  }
 0x535   : > { %15795 = vmatpush3.bf16.msra.mxu1 %v20167_v31  ;;  %5860 = vmatprep.subr.bf16.mxu0 %v18581_v33  ;;  %v5891_v33 = vmax.f32 %v5065_v28, 0.0 }
 0x536   : > { %v20182_v50 = vpop.f32.mrb[28].mxu0  ;;  %15796 = vmatprep.subr.bf16.mxu1 %v21826_v2 }
 0x537   : > { %v20194_v58 = vpop.f32.mrb[28].mxu1  ;;  %v20196_v59 = vpop.f32.mrb[29].mxu0 }
 0x538   : > { %v20198_v62 = vpop.f32.mrb[29].mxu1  ;;  %v5560_v3 = vpop.f32.mrb[30].mxu0  ;;  %5861 = vmatpush1.bf16.msra.mxu0 %v18579_v43  ;;  %v18599_v43 = vld [vmem:[%s19339_s16 + $0xf14] ss:$168 sps:$4 sm:$0xff]  }
 0x539   : > { %v5601_v10 = vpop.f32.mrb[30].mxu1  ;;  %15798 = vmatpush3.bf16.msra.mxu1 %v20179_v45  ;;  %v5561_v14 = vpop.f32.mrb[31].mxu0  ;;  %5862 = vmatprep.subr.bf16.mxu0 %v18584_v49  ;;  %v18597_v49 = vld [vmem:[%s19339_s16 + $0xf10] ss:$168 sps:$4 sm:$0xff]   ;;  %v18605_v3 = vld [vmem:[%s19339_s16 + $0x11b4] ss:$168 sps:$4 sm:$0xff]  }
 0x53a   : > { %v5602_v9 = vpop.f32.mrb[31].mxu1  ;;  %15799 = vmatprep.subr.bf16.mxu1 %v21826_v2  ;;  %v18608_v10 = vld [vmem:[%s19339_s16 + $0x1304] ss:$168 sps:$4 sm:$0xff]   ;;  %v18606_v14 = vld [vmem:[%s19339_s16 + $0x1300] ss:$168 sps:$4 sm:$0xff]  }
 0x53c   : > { %5863 = vmatpush1.bf16.msra.mxu0 %v18582_v5  ;;  %v18603_v5 = vld [vmem:[%s19339_s16 + $0x11b0] ss:$168 sps:$4 sm:$0xff]  }
 0x53d   : > { %15801 = vmatpush3.bf16.msra.mxu1 %v20202_v18  ;;  %5864 = vmatprep.subr.bf16.mxu0 %v18587_v19  ;;  %v18611_v19 = vld [vmem:[%s19339_s16 + $0x1454] ss:$168 sps:$4 sm:$0xff]   ;;  %s21881_s16 = sld [smem:[#allocation22_spill]] }
 0x53e   : > { %15802 = vmatprep.subr.bf16.mxu1 %v21826_v2 }
 0x540   : > { %5865 = vmatpush1.bf16.msra.mxu0 %v18585_v24 }
 0x541   : > { %15804 = vmatpush3.bf16.msra.mxu1 %v20216_v25  ;;  %5866 = vmatprep.subr.bf16.mxu0 %v18590_v27  ;;  %v1467_v27 = vrot.slane %v20192_v57, %v19438_v63 }
 0x543   : > { %s563_s12 = smul.u32 84, %s21881_s16 }
 0x544   : > { %14312 = vmatmul.mubr.f32.vlgmr.msra.gmra.mrb[2].mxu1 %v5891_v33  ;;  %5867 = vmatpush1.bf16.msra.mxu0 %v18588_v29  ;;  %v5951_v33 = vld [vmem:[#allocation12 + $0x8] sm:$0xff] }
 0x545   : > { %5868 = vmatprep.subr.bf16.mxu0 %v18593_v30  ;;  %6123 = vmatprep.mubr.f32.mxu1 %v21828_v0  ;;  %p566_p13 = scmp.lt.s32.totalorder %s563_s12, 419 }
 0x547   : > { %s21906_s12 = smov (!%p566_p13, %s563_s12), 419 }
 0x548   : > { %5869 = vmatpush1.bf16.msra.mxu0 %v18591_v41  ;;  %v5953_v41 = vld [vmem:[#allocation12 + $0x18] sm:$0xff]  ;;  %s12794_s17 = sshll.u32 %s21906_s12, 1 }
 0x549   : > { %5870 = vmatprep.subr.bf16.mxu0 %v18596_v52  ;;  %v5950_v52 = vld [vmem:[#allocation12] sm:$0xff]  ;;  %s20385_s11 = scalar_lea.vmem %s21882_s15, %s12794_s17 }
 0x54c   : > { %5871 = vmatpush1.bf16.msra.mxu0 %v18594_v42  ;;  %v20265_v42 = vpack.c.bf16 %v5953_v41, %v5951_v33  ;;  %v5963_v33 = vld [vmem:[#allocation12 + $0x68] sm:$0xff]  ;;  %v5965_v41 = vld [vmem:[#allocation12 + $0x78] sm:$0xff] }
 0x54d   : > { %5872 = vmatprep.subr.bf16.mxu0 %v18599_v43  ;;  %v5952_v43 = vld [vmem:[#allocation12 + $0x10] sm:$0xff] }
 0x54e   : > { %15806 = vmatprep.subr.bf16.mxu1 %v20265_v42 }
 0x550   : > { %5873 = vmatpush1.bf16.msra.mxu0 %v18597_v49  ;;  %v5955_v49 = vld [vmem:[#allocation12 + $0x28] sm:$0xff] }
 0x551   : > { %5874 = vmatprep.subr.bf16.mxu0 %v18602_v51  ;;  %v5957_v51 = vld [vmem:[#allocation12 + $0x38] sm:$0xff] }
 0x554   : > { %5875 = vmatpush1.bf16.msra.mxu0 %v18600_v54  ;;  %v5067_v54 = vadd.f32 %v19684_v55, %v1467_v27  ;;  %v5958_v27 = vld [vmem:[#allocation12 + $0x40] sm:$0xff] }
 0x555   : > { %5876 = vmatprep.subr.bf16.mxu0 %v18605_v3  ;;  %v20269_v3 = vpack.c.bf16 %v5952_v43, %v5950_v52  ;;  %v20293_v52 = vpack.c.bf16 %v5965_v41, %v5963_v33  ;;  %v5962_v43 = vld [vmem:[#allocation12 + $0x60] sm:$0xff] }
 0x557   : > { %15808 = vmatpush1.bf16.msra.mxu1 %v20269_v3 }
 0x558   : > { %5877 = vmatpush1.bf16.msra.mxu0 %v18603_v5  ;;  %v20271_v5 = vpack.c.bf16 %v5957_v51, %v5955_v49  ;;  %v5964_v49 = vld [vmem:[#allocation12 + $0x70] sm:$0xff] }
 0x559   : > { %5878 = vmatprep.subr.bf16.mxu0 %v18608_v10  ;;  %v5954_v10 = vld [vmem:[#allocation12 + $0x20] sm:$0xff]  ;;  %v20295_v51 = vpack.c.bf16 %v5964_v49, %v5962_v43 }
 0x55a   : > { %15810 = vmatprep.subr.bf16.mxu1 %v20271_v5 }
 0x55c   : > { %5879 = vmatpush1.bf16.msra.mxu0 %v18606_v14  ;;  %v5956_v14 = vld [vmem:[#allocation12 + $0x30] sm:$0xff] }
 0x55d   : > { %5880 = vmatprep.subr.bf16.mxu0 %v18611_v19  ;;  %v5959_v19 = vld [vmem:[#allocation12 + $0x48] sm:$0xff] }
 0x560   : > { %5881 = vmatpush1.bf16.msra.mxu0 %v18609_v20  ;;  %v5961_v20 = vld [vmem:[#allocation12 + $0x58] sm:$0xff] }
 0x561   : > { %15821 = vmatprep.subr.bf16.mxu0 %v21826_v2  ;;  %v20279_v55 = vpack.c.bf16 %v5961_v20, %v5959_v19 }
 0x563   : > { %5883 = vmatmul.mubr.bf16.vlgmr.msra.gmra.mrb[44].mxu0 %v19446_v12 }
 0x564   : > { %15823 = vmatpush3.bf16.msra.mxu0 %v20114_v1  ;;  %14346 = vmatprep.mubr.msk.f32.mxu0 %vm18963_vm0, %v21828_v0 }
 0x565   : > { %15824 = vmatprep.subr.bf16.mxu0 %v21826_v2 }
 0x568   : > { %15826 = vmatpush3.bf16.msra.mxu0 %v20129_v17 }
 0x569   : > { %15827 = vmatprep.subr.bf16.mxu0 %v21826_v2 }
 0x56c   : > { %15829 = vmatpush3.bf16.msra.mxu0 %v20143_v21 }
 0x56d   : > { %15830 = vmatprep.subr.bf16.mxu0 %v21826_v2 }
 0x570   : > { %15832 = vmatpush3.bf16.msra.mxu0 %v20155_v26 }
 0x571   : > { %15833 = vmatprep.subr.bf16.mxu0 %v21826_v2 }
 0x574   : > { %15835 = vmatpush3.bf16.msra.mxu0 %v20167_v31 }
 0x575   : > { %15836 = vmatprep.subr.bf16.mxu0 %v21826_v2 }
 0x576   : > { %v20252_v12 = vpop.f32.mrb[32].mxu0 }
 0x577   : > { %v20254_v9 = vpop.f32.mrb[32].mxu1  ;;  %v20256_v22 = vpop.f32.mrb[33].mxu0 }
 0x578   : > { %21866 = vst [vmem:[#allocation25_spill] sm:$0xff] %v20254_v9  ;;  %21867 = vst [vmem:[#allocation26_spill] sm:$0xff] %v20256_v22  ;;  %v20258_v23 = vpop.f32.mrb[33].mxu1  ;;  %v5642_v24 = vpop.f32.mrb[34].mxu0  ;;  %15838 = vmatpush3.bf16.msra.mxu0 %v20179_v45 }
 0x579   : > { %21868 = vst [vmem:[#allocation27_spill] sm:$0xff] %v20258_v23  ;;  %v5683_v28 = vpop.f32.mrb[34].mxu1  ;;  %v5643_v29 = vpop.f32.mrb[35].mxu0  ;;  %15839 = vmatprep.subr.bf16.mxu0 %v21826_v2  ;;  %v20275_v24 = vpack.c.bf16 %v5956_v14, %v5954_v10  ;;  %v20319_v23 = vld [vmem:[#allocation11] ss:$0 sm:$0xff] }
 0x57a   : > { %v5684_v30 = vpop.f32.mrb[35].mxu1  ;;  %v5960_v28 = vld [vmem:[#allocation12 + $0x50] sm:$0xff]  ;;  %v5892_v29 = vmax.f32 %v5067_v54, 0.0 }
 0x57b   : > { %15812 = vmatpush1.bf16.msra.mxu1 %v20275_v24  ;;  %v20283_v30 = vpack.c.bf16 %v5960_v28, %v5958_v27 }
 0x57c   : > { %15841 = vmatpush3.bf16.msra.mxu0 %v20202_v18  ;;  %15814 = vmatprep.subr.bf16.mxu1 %v20279_v55 }
 0x57d   : > { %15842 = vmatprep.subr.bf16.mxu0 %v21826_v2 }
 0x57f   : > { %15816 = vmatpush1.bf16.msra.mxu1 %v20283_v30 }
 0x580   : > { %15844 = vmatpush3.bf16.msra.mxu0 %v20216_v25  ;;  %15818 = vmatprep.subr.bf16.mxu1 %v20293_v52 }
 0x581   : > { %15886 = vmatprep.subr.bf16.mxu0 %v20265_v42 }
 0x583   : > { %14347 = vmatmul.mubr.f32.vlgmr.msra.gmra.mrb[2].mxu0 %v5892_v29  ;;  %15820 = vmatpush1.bf16.msra.mxu1 %v20295_v51 }
 0x584   : > { %15888 = vmatpush1.bf16.msra.mxu0 %v20269_v3  ;;  %6437 = vmatprep.mubr.f32.mxu0 %v21828_v0 }
 0x585   : > { %15890 = vmatprep.subr.bf16.mxu0 %v20271_v5  ;;  %15846 = vmatprep.subr.bf16.mxu1 %v20265_v42 }
 0x588   : > { %15892 = vmatpush1.bf16.msra.mxu0 %v20275_v24 }
 0x589   : > { %15894 = vmatprep.subr.bf16.mxu0 %v20279_v55 }
 0x58c   : > { %15896 = vmatpush1.bf16.msra.mxu0 %v20283_v30 }
 0x58d   : > { %15898 = vmatprep.subr.bf16.mxu0 %v20293_v52 }
 0x590   : > { %15900 = vmatpush1.bf16.msra.mxu0 %v20295_v51 }
 0x591   : > { %15901 = vmatprep.subr.bf16.mxu0 %v21826_v2 }
 0x5b6   : > { %v20303_v54 = vpop.f32.mrb[36].mxu0 }
 0x5b7   : > { %21869 = vst [vmem:[#allocation28_spill] sm:$0xff] %v20303_v54  ;;  %v20305_v10 = vpop.f32.mrb[36].mxu1  ;;  %v20307_v14 = vpop.f32.mrb[37].mxu0 }
 0x5b8   : > { %21870 = vst [vmem:[#allocation29_spill] sm:$0xff] %v20305_v10  ;;  %21871 = vst [vmem:[#allocation30_spill] sm:$0xff] %v20307_v14  ;;  %v20309_v19 = vpop.f32.mrb[37].mxu1  ;;  %v5724_v20 = vpop.f32.mrb[38].mxu0 }
 0x5b9   : > { %21872 = vst [vmem:[#allocation31_spill] sm:$0xff] %v20309_v19  ;;  %v5765_v27 = vpop.f32.mrb[38].mxu1  ;;  %v5725_v28 = vpop.f32.mrb[39].mxu0 }
 0x5ba   : > { %v5766_v29 = vpop.f32.mrb[39].mxu1 }
 0x5bb   : > { %v21877_v29 = vmov 0.0  }
 0x5f6   : > { %v20311_v33 = vpop.f32.mrb[40].mxu0 }
 0x5f7   : > { %21873 = vst [vmem:[#allocation32_spill] sm:$0xff] %v20311_v33  ;;  %v20313_v41 = vpop.f32.mrb[40].mxu1  ;;  %v20315_v43 = vpop.f32.mrb[41].mxu0 }
 0x5f8   : > { %21874 = vst [vmem:[#allocation33_spill] sm:$0xff] %v20313_v41  ;;  %21875 = vst [vmem:[#allocation34_spill] sm:$0xff] %v20315_v43  ;;  %v20317_v49 = vpop.f32.mrb[41].mxu1  ;;  %v5806_v2 = vpop.f32.mrb[42].mxu0 }
 0x5f9   : > { %21876 = vst [vmem:[#allocation35_spill] sm:$0xff] %v20317_v49  ;;  %v5847_v0 = vpop.f32.mrb[42].mxu1  ;;  %v5807_v54 = vpop.f32.mrb[43].mxu0  ;;  %v1453_v2 = vld [vmem:[%s19345_s26 + $0x28] sm:$0x3] }
 0x5fa   : > { %v5848_v10 = vpop.f32.mrb[43].mxu1  ;;  %v21878_v0 = vmov 0.0|0.0   ;;  %v1627_v54 = vrot.slane %v1453_v2, %v19438_v63 }
 0x617   : > { %v6039_v19 = vpop.f32.mrb[2].mxu1 }
 0x618   : > { %v6040_v20 = vadd.f32 %v20319_v23, %v6039_v19  ;;  %v14313_v27 = vpop.f32.mrb[3].mxu1 }
 0x61a   : > { %v6043_v28 = vmax.f32 %v6040_v20, 0.0 }
 0x61c   : > { %13470 = vmatmul.mubr.msk.f32.vlgmr.msra.gmra.mrb[44].mxu1 %vm6055_vm2, %v6043_v28 }
 0x61d   : > { %15848 = vmatpush1.bf16.msra.mxu1 %v20269_v3  ;;  %6280 = vmatprep.mubr.f32.mxu1 %v21877_v29 }
 0x61e   : > { %15850 = vmatprep.subr.bf16.mxu1 %v20271_v5 }
 0x621   : > { %15852 = vmatpush1.bf16.msra.mxu1 %v20275_v24 }
 0x622   : > { %15854 = vmatprep.subr.bf16.mxu1 %v20279_v55 }
 0x625   : > { %15856 = vmatpush1.bf16.msra.mxu1 %v20283_v30 }
 0x626   : > { %15858 = vmatprep.subr.bf16.mxu1 %v20293_v52 }
 0x629   : > { %15860 = vmatpush1.bf16.msra.mxu1 %v20295_v51 }
 0x62a   : > { %15861 = vmatprep.subr.bf16.mxu1 %v21878_v0 }
 0x636   : > { %v20334_v10 = vpop.f32.mrb[44].mxu0 }
 0x637   : > { %21879 = vst [vmem:[#allocation36_spill] sm:$0xff] %v20334_v10  ;;  %v5886_v19 = vpop.f32.mrb[45].mxu0 }
 0x638   : > { %v20336_v20 = vadd.f32 %v5886_v19, %v1627_v54  ;;  %v5888_v27 = vpop.f32.mrb[46].mxu0 }
 0x639   : > { %v5889_v28 = vpop.f32.mrb[47].mxu0 }
 0x63a   : > { %21880 = vst [vmem:[#allocation37_spill] sm:$0xff] %v20336_v20 }
 0x656   : > { %v6208_v49 = vpop.f32.mrb[2].mxu0 }
 0x657   : > { %v6209_v41 = vadd.f32 %v20319_v23, %v6208_v49  ;;  %v14348_v43 = vpop.f32.mrb[3].mxu0 }
 0x659   : > { %v6212_v33 = vmax.f32 %v6209_v41, 0.0 }
 0x65b   : > { %13472 = vmatmul.mubr.msk.f32.vlgmr.msra.gmra.mrb[46].mxu1 %vm6055_vm2, %v6212_v33  ;;  %v20352_v33 = vsub.s32 2, %v19432_v60 }
 0x65c   : > { %15863 = vmatpush3.bf16.msra.mxu1 %v20114_v1  ;;  %14381 = vmatprep.mubr.msk.f32.mxu1 %vm18963_vm0, %v21877_v29 }
 0x65d   : > { %15864 = vmatprep.subr.bf16.mxu1 %v21878_v0  ;;  %v1471_v41 = vrot.slane %v20192_v57, %v20352_v33 }
 0x65f   : > { %v5106_v43 = vadd.f32 %v19681_v53, %v1471_v41  ;;  %v5966_v53 = vld [vmem:[#allocation13] sm:$0x3] }
 0x660   : > { %15866 = vmatpush3.bf16.msra.mxu1 %v20129_v17  ;;  %v20375_v2 = vrot.slane %v5966_v53, %v19435_v61  ;;  %v20378_v54 = vrot.slane %v5966_v53, %v19438_v63 }
 0x661   : > { %15867 = vmatprep.subr.bf16.mxu1 %v21878_v0  ;;  %v5893_v49 = vmax.f32 %v5106_v43, 0.0 }
 0x664   : > { %15869 = vmatpush3.bf16.msra.mxu1 %v20143_v21 }
 0x665   : > { %15870 = vmatprep.subr.bf16.mxu1 %v21878_v0 }
 0x668   : > { %15872 = vmatpush3.bf16.msra.mxu1 %v20155_v26 }
 0x669   : > { %15873 = vmatprep.subr.bf16.mxu1 %v21878_v0 }
 0x66c   : > { %15875 = vmatpush3.bf16.msra.mxu1 %v20167_v31 }
 0x66d   : > { %15876 = vmatprep.subr.bf16.mxu1 %v21878_v0 }
 0x670   : > { %15878 = vmatpush3.bf16.msra.mxu1 %v20179_v45 }
 0x671   : > { %15879 = vmatprep.subr.bf16.mxu1 %v21878_v0 }
 0x674   : > { %15881 = vmatpush3.bf16.msra.mxu1 %v20202_v18 }
 0x675   : > { %15882 = vmatprep.subr.bf16.mxu1 %v21878_v0 }
 0x678   : > { %15884 = vmatpush3.bf16.msra.mxu1 %v20216_v25 }
 0x679   : > { %15926 = vmatprep.subr.bf16.mxu1 %v20265_v42 }
 0x67b   : > { %14382 = vmatmul.mubr.f32.vlgmr.msra.gmra.mrb[48].mxu1 %v5893_v49 }
 0x67c   : > { %15928 = vmatpush1.bf16.msra.mxu1 %v20269_v3  ;;  %6594 = vmatprep.mubr.f32.mxu1 %v21877_v29 }
 0x67d   : > { %15930 = vmatprep.subr.bf16.mxu1 %v20271_v5 }
 0x680   : > { %15932 = vmatpush1.bf16.msra.mxu1 %v20275_v24 }
 0x681   : > { %15934 = vmatprep.subr.bf16.mxu1 %v20279_v55 }
 0x684   : > { %15936 = vmatpush1.bf16.msra.mxu1 %v20283_v30 }
 0x685   : > { %15938 = vmatprep.subr.bf16.mxu1 %v20293_v52 }
 0x688   : > { %15940 = vmatpush1.bf16.msra.mxu1 %v20295_v51 }
 0x689   : > { %15941 = vmatprep.subr.bf16.mxu1 %v21878_v0 }
 0x6ef   : > { %v6125_v19 = vpop.f32.mrb[44].mxu1 }
 0x6f0   : > { %v6126_v27 = vadd.f32 %v6125_v19, %v20375_v2  ;;  %v6127_v28 = vpop.f32.mrb[45].mxu1 }
 0x6f1   : > { %v6128_v41 = vadd.f32 %v6127_v28, %v20378_v54 }
 0x6f3   : > { %v6132_v43 = vcombine.low %v6126_v27, %v6128_v41 }
 0x6f5   : > { %13471 = vst.sshfl [vmem:[%s20385_s11] sm:$0x33 pattern:$0x76325410] %v6132_v43 }
 0x72e   : > { %v6282_v49 = vpop.f32.mrb[46].mxu1 }
 0x72f   : > { %v6283_v53 = vadd.f32 %v6282_v49, %v20375_v2  ;;  %v6284_v20 = vpop.f32.mrb[47].mxu1 }
 0x730   : > { %v6285_v10 = vadd.f32 %v6284_v20, %v20378_v54 }
 0x732   : > { %v6289_v14 = vcombine.low %v6283_v53, %v6285_v10 }
 0x734   : > { %13473 = vst.sshfl [vmem:[%s20385_s11 + $0x4] sm:$0x33 pattern:$0x76325410] %v6289_v14 }
 0x74e   : > { %v6365_v19 = vpop.f32.mrb[48].mxu1 }
 0x74f   : > { %v6366_v28 = vadd.f32 %v20319_v23, %v6365_v19  ;;  %v14383_v9 = vpop.f32.mrb[49].mxu1 }
 0x750   : > { %v20405_v9 = vsub.s32 3, %v19432_v60 }
 0x751   : > { %v6369_v22 = vmax.f32 %v6366_v28, 0.0 }
 0x753   : > { %13474 = vmatmul.mubr.msk.f32.vlgmr.msra.gmra.mrb[48].mxu0 %vm6055_vm2, %v6369_v22  ;;  %v1475_v22 = vrot.slane %v20192_v57, %v20405_v9 }
 0x754   : > { %15903 = vmatpush3.bf16.msra.mxu0 %v20114_v1  ;;  %14416 = vmatprep.mubr.msk.f32.mxu0 %vm18963_vm0, %v21877_v29 }
 0x755   : > { %15904 = vmatprep.subr.bf16.mxu0 %v21878_v0  ;;  %v5108_v14 = vadd.f32 %v19686_v56, %v1475_v22  ;;  %v20443_v22 = vsub.s32 4, %v19432_v60 }
 0x757   : > { %v5894_v10 = vmax.f32 %v5108_v14, 0.0  ;;  %v1479_v14 = vrot.slane %v20192_v57, %v20443_v22 }
 0x758   : > { %15906 = vmatpush3.bf16.msra.mxu0 %v20129_v17 }
 0x759   : > { %15907 = vmatprep.subr.bf16.mxu0 %v21878_v0 }
 0x75c   : > { %15909 = vmatpush3.bf16.msra.mxu0 %v20143_v21 }
 0x75d   : > { %15910 = vmatprep.subr.bf16.mxu0 %v21878_v0 }
 0x760   : > { %15912 = vmatpush3.bf16.msra.mxu0 %v20155_v26 }
 0x761   : > { %15913 = vmatprep.subr.bf16.mxu0 %v21878_v0 }
 0x764   : > { %15915 = vmatpush3.bf16.msra.mxu0 %v20167_v31 }
 0x765   : > { %15916 = vmatprep.subr.bf16.mxu0 %v21878_v0 }
 0x768   : > { %15918 = vmatpush3.bf16.msra.mxu0 %v20179_v45 }
 0x769   : > { %15919 = vmatprep.subr.bf16.mxu0 %v21878_v0 }
 0x76c   : > { %15921 = vmatpush3.bf16.msra.mxu0 %v20202_v18 }
 0x76d   : > { %15922 = vmatprep.subr.bf16.mxu0 %v21878_v0 }
 0x770   : > { %15924 = vmatpush3.bf16.msra.mxu0 %v20216_v25 }
 0x771   : > { %15966 = vmatprep.subr.bf16.mxu0 %v20265_v42 }
 0x773   : > { %14417 = vmatmul.mubr.f32.vlgmr.msra.gmra.mrb[50].mxu0 %v5894_v10  ;;  %v5147_v10 = vadd.f32 %v19755_v11, %v1479_v14  ;;  %v20481_v14 = vsub.s32 5, %v19432_v60 }
 0x774   : > { %15968 = vmatpush1.bf16.msra.mxu0 %v20269_v3  ;;  %6751 = vmatprep.mubr.f32.mxu0 %v21877_v29 }
 0x775   : > { %15970 = vmatprep.subr.bf16.mxu0 %v20271_v5 }
 0x778   : > { %15972 = vmatpush1.bf16.msra.mxu0 %v20275_v24 }
 0x779   : > { %15974 = vmatprep.subr.bf16.mxu0 %v20279_v55 }
 0x77c   : > { %15976 = vmatpush1.bf16.msra.mxu0 %v20283_v30 }
 0x77d   : > { %15978 = vmatprep.subr.bf16.mxu0 %v20293_v52 }
 0x780   : > { %15980 = vmatpush1.bf16.msra.mxu0 %v20295_v51 }
 0x781   : > { %15981 = vmatprep.subr.bf16.mxu0 %v21878_v0 }
 0x826   : > { %v6439_v56 = vpop.f32.mrb[48].mxu0 }
 0x827   : > { %v6440_v20 = vadd.f32 %v6439_v56, %v20375_v2  ;;  %v6441_v27 = vpop.f32.mrb[49].mxu0  ;;  %v5895_v56 = vmax.f32 %v5147_v10, 0.0  ;;  %v1483_v10 = vrot.slane %v20192_v57, %v20481_v14 }
 0x828   : > { %v6442_v41 = vadd.f32 %v6441_v27, %v20378_v54 }
 0x82a   : > { %v6446_v43 = vcombine.low %v6440_v20, %v6442_v41 }
 0x82c   : > { %13475 = vst.sshfl [vmem:[%s20385_s11 + $0x8] sm:$0x33 pattern:$0x76325410] %v6446_v43 }
 0x846   : > { %v6522_v49 = vpop.f32.mrb[50].mxu0 }
 0x847   : > { %v6523_v53 = vadd.f32 %v20319_v23, %v6522_v49  ;;  %v14418_v19 = vpop.f32.mrb[51].mxu0 }
 0x849   : > { %v6526_v28 = vmax.f32 %v6523_v53, 0.0 }
 0x84b   : > { %13476 = vmatmul.mubr.msk.f32.vlgmr.msra.gmra.mrb[50].mxu1 %vm6055_vm2, %v6526_v28 }
 0x84c   : > { %15943 = vmatpush3.bf16.msra.mxu1 %v20114_v1  ;;  %14451 = vmatprep.mubr.msk.f32.mxu1 %vm18963_vm0, %v21877_v29 }
 0x84d   : > { %15944 = vmatprep.subr.bf16.mxu1 %v21878_v0 }
 0x850   : > { %15946 = vmatpush3.bf16.msra.mxu1 %v20129_v17 }
 0x851   : > { %15947 = vmatprep.subr.bf16.mxu1 %v21878_v0 }
 0x854   : > { %15949 = vmatpush3.bf16.msra.mxu1 %v20143_v21 }
 0x855   : > { %15950 = vmatprep.subr.bf16.mxu1 %v21878_v0 }
 0x858   : > { %15952 = vmatpush3.bf16.msra.mxu1 %v20155_v26 }
 0x859   : > { %15953 = vmatprep.subr.bf16.mxu1 %v21878_v0 }
 0x85c   : > { %15955 = vmatpush3.bf16.msra.mxu1 %v20167_v31 }
 0x85d   : > { %15956 = vmatprep.subr.bf16.mxu1 %v21878_v0 }
 0x860   : > { %15958 = vmatpush3.bf16.msra.mxu1 %v20179_v45 }
 0x861   : > { %15959 = vmatprep.subr.bf16.mxu1 %v21878_v0 }
 0x864   : > { %15961 = vmatpush3.bf16.msra.mxu1 %v20202_v18 }
 0x865   : > { %15962 = vmatprep.subr.bf16.mxu1 %v21878_v0 }
 0x868   : > { %15964 = vmatpush3.bf16.msra.mxu1 %v20216_v25 }
 0x869   : > { %16006 = vmatprep.subr.bf16.mxu1 %v20265_v42 }
 0x86b   : > { %14452 = vmatmul.mubr.f32.vlgmr.msra.gmra.mrb[52].mxu1 %v5895_v56  ;;  %v5149_v56 = vadd.f32 %v19760_v15, %v1483_v10  ;;  %v20519_v10 = vsub.s32 6, %v19432_v60 }
 0x86c   : > { %16008 = vmatpush1.bf16.msra.mxu1 %v20269_v3  ;;  %6908 = vmatprep.mubr.f32.mxu1 %v21877_v29 }
 0x86d   : > { %16010 = vmatprep.subr.bf16.mxu1 %v20271_v5 }
 0x870   : > { %16012 = vmatpush1.bf16.msra.mxu1 %v20275_v24 }
 0x871   : > { %16014 = vmatprep.subr.bf16.mxu1 %v20279_v55 }
 0x874   : > { %16016 = vmatpush1.bf16.msra.mxu1 %v20283_v30 }
 0x875   : > { %16018 = vmatprep.subr.bf16.mxu1 %v20293_v52 }
 0x878   : > { %16020 = vmatpush1.bf16.msra.mxu1 %v20295_v51 }
 0x879   : > { %16021 = vmatprep.subr.bf16.mxu1 %v21878_v0 }
 0x91e   : > { %v6596_v11 = vpop.f32.mrb[50].mxu1 }
 0x91f   : > { %v6597_v20 = vadd.f32 %v6596_v11, %v20375_v2  ;;  %v6598_v27 = vpop.f32.mrb[51].mxu1  ;;  %v5896_v11 = vmax.f32 %v5149_v56, 0.0  ;;  %v1487_v56 = vrot.slane %v20192_v57, %v20519_v10 }
 0x920   : > { %v6599_v41 = vadd.f32 %v6598_v27, %v20378_v54 }
 0x922   : > { %v6603_v43 = vcombine.low %v6597_v20, %v6599_v41 }
 0x924   : > { %13477 = vst.sshfl [vmem:[%s20385_s11 + $0xc] sm:$0x33 pattern:$0x76325410] %v6603_v43 }
 0x93e   : > { %v6679_v49 = vpop.f32.mrb[52].mxu1 }
 0x93f   : > { %v6680_v53 = vadd.f32 %v20319_v23, %v6679_v49  ;;  %v14453_v19 = vpop.f32.mrb[53].mxu1 }
 0x941   : > { %v6683_v28 = vmax.f32 %v6680_v53, 0.0 }
 0x943   : > { %13478 = vmatmul.mubr.msk.f32.vlgmr.msra.gmra.mrb[52].mxu0 %vm6055_vm2, %v6683_v28 }
 0x944   : > { %15983 = vmatpush3.bf16.msra.mxu0 %v20114_v1  ;;  %14486 = vmatprep.mubr.msk.f32.mxu0 %vm18963_vm0, %v21877_v29 }
 0x945   : > { %15984 = vmatprep.subr.bf16.mxu0 %v21878_v0 }
 0x948   : > { %15986 = vmatpush3.bf16.msra.mxu0 %v20129_v17 }
 0x949   : > { %15987 = vmatprep.subr.bf16.mxu0 %v21878_v0 }
 0x94c   : > { %15989 = vmatpush3.bf16.msra.mxu0 %v20143_v21 }
 0x94d   : > { %15990 = vmatprep.subr.bf16.mxu0 %v21878_v0 }
 0x950   : > { %15992 = vmatpush3.bf16.msra.mxu0 %v20155_v26 }
 0x951   : > { %15993 = vmatprep.subr.bf16.mxu0 %v21878_v0 }
 0x954   : > { %15995 = vmatpush3.bf16.msra.mxu0 %v20167_v31 }
 0x955   : > { %15996 = vmatprep.subr.bf16.mxu0 %v21878_v0 }
 0x958   : > { %15998 = vmatpush3.bf16.msra.mxu0 %v20179_v45 }
 0x959   : > { %15999 = vmatprep.subr.bf16.mxu0 %v21878_v0 }
 0x95c   : > { %16001 = vmatpush3.bf16.msra.mxu0 %v20202_v18 }
 0x95d   : > { %16002 = vmatprep.subr.bf16.mxu0 %v21878_v0 }
 0x960   : > { %16004 = vmatpush3.bf16.msra.mxu0 %v20216_v25 }
 0x961   : > { %16046 = vmatprep.subr.bf16.mxu0 %v20265_v42 }
 0x963   : > { %14487 = vmatmul.mubr.f32.vlgmr.msra.gmra.mrb[54].mxu0 %v5896_v11  ;;  %v5188_v11 = vadd.f32 %v19757_v13, %v1487_v56  ;;  %v20557_v56 = vsub.s32 7, %v19432_v60 }
 0x964   : > { %16048 = vmatpush1.bf16.msra.mxu0 %v20269_v3  ;;  %7065 = vmatprep.mubr.f32.mxu0 %v21877_v29 }
 0x965   : > { %16050 = vmatprep.subr.bf16.mxu0 %v20271_v5 }
 0x968   : > { %16052 = vmatpush1.bf16.msra.mxu0 %v20275_v24 }
 0x969   : > { %16054 = vmatprep.subr.bf16.mxu0 %v20279_v55 }
 0x96c   : > { %16056 = vmatpush1.bf16.msra.mxu0 %v20283_v30 }
 0x96d   : > { %16058 = vmatprep.subr.bf16.mxu0 %v20293_v52 }
 0x970   : > { %16060 = vmatpush1.bf16.msra.mxu0 %v20295_v51 }
 0x971   : > { %16061 = vmatprep.subr.bf16.mxu0 %v21878_v0 }
 0xa16   : > { %v6753_v15 = vpop.f32.mrb[52].mxu0 }
 0xa17   : > { %v6754_v20 = vadd.f32 %v6753_v15, %v20375_v2  ;;  %v6755_v27 = vpop.f32.mrb[53].mxu0  ;;  %v5897_v15 = vmax.f32 %v5188_v11, 0.0  ;;  %v1491_v11 = vrot.slane %v20192_v57, %v20557_v56 }
 0xa18   : > { %v6756_v41 = vadd.f32 %v6755_v27, %v20378_v54 }
 0xa1a   : > { %v6760_v43 = vcombine.low %v6754_v20, %v6756_v41 }
 0xa1c   : > { %13479 = vst.sshfl [vmem:[%s20385_s11 + $0x10] sm:$0x33 pattern:$0x76325410] %v6760_v43 }
 0xa36   : > { %v6836_v49 = vpop.f32.mrb[54].mxu0 }
 0xa37   : > { %v6837_v53 = vadd.f32 %v20319_v23, %v6836_v49  ;;  %v14488_v19 = vpop.f32.mrb[55].mxu0 }
 0xa39   : > { %v6840_v28 = vmax.f32 %v6837_v53, 0.0 }
 0xa3b   : > { %13480 = vmatmul.mubr.msk.f32.vlgmr.msra.gmra.mrb[54].mxu1 %vm6055_vm2, %v6840_v28 }
 0xa3c   : > { %16023 = vmatpush3.bf16.msra.mxu1 %v20114_v1  ;;  %14521 = vmatprep.mubr.msk.f32.mxu1 %vm18963_vm0, %v21877_v29 }
 0xa3d   : > { %16024 = vmatprep.subr.bf16.mxu1 %v21878_v0 }
 0xa40   : > { %16026 = vmatpush3.bf16.msra.mxu1 %v20129_v17 }
 0xa41   : > { %16027 = vmatprep.subr.bf16.mxu1 %v21878_v0 }
 0xa44   : > { %16029 = vmatpush3.bf16.msra.mxu1 %v20143_v21 }
 0xa45   : > { %16030 = vmatprep.subr.bf16.mxu1 %v21878_v0 }
 0xa48   : > { %16032 = vmatpush3.bf16.msra.mxu1 %v20155_v26 }
 0xa49   : > { %16033 = vmatprep.subr.bf16.mxu1 %v21878_v0 }
 0xa4c   : > { %16035 = vmatpush3.bf16.msra.mxu1 %v20167_v31 }
 0xa4d   : > { %16036 = vmatprep.subr.bf16.mxu1 %v21878_v0 }
 0xa50   : > { %16038 = vmatpush3.bf16.msra.mxu1 %v20179_v45 }
 0xa51   : > { %16039 = vmatprep.subr.bf16.mxu1 %v21878_v0 }
 0xa54   : > { %16041 = vmatpush3.bf16.msra.mxu1 %v20202_v18 }
 0xa55   : > { %16042 = vmatprep.subr.bf16.mxu1 %v21878_v0 }
 0xa58   : > { %16044 = vmatpush3.bf16.msra.mxu1 %v20216_v25 }
 0xa59   : > { %16086 = vmatprep.subr.bf16.mxu1 %v20265_v42 }
 0xa5b   : > { %14522 = vmatmul.mubr.f32.vlgmr.msra.gmra.mrb[56].mxu1 %v5897_v15  ;;  %v5190_v15 = vadd.f32 %v19762_v16, %v1491_v11 }
 0xa5c   : > { %16088 = vmatpush1.bf16.msra.mxu1 %v20269_v3  ;;  %7222 = vmatprep.mubr.f32.mxu1 %v21877_v29 }
 0xa5d   : > { %16090 = vmatprep.subr.bf16.mxu1 %v20271_v5 }
 0xa60   : > { %16092 = vmatpush1.bf16.msra.mxu1 %v20275_v24 }
 0xa61   : > { %16094 = vmatprep.subr.bf16.mxu1 %v20279_v55 }
 0xa64   : > { %16096 = vmatpush1.bf16.msra.mxu1 %v20283_v30 }
 0xa65   : > { %16098 = vmatprep.subr.bf16.mxu1 %v20293_v52 }
 0xa68   : > { %16100 = vmatpush1.bf16.msra.mxu1 %v20295_v51 }
 0xa69   : > { %16101 = vmatprep.subr.bf16.mxu1 %v21878_v0 }
 0xb0e   : > { %v6910_v13 = vpop.f32.mrb[54].mxu1 }
 0xb0f   : > { %v6911_v20 = vadd.f32 %v6910_v13, %v20375_v2  ;;  %v6912_v27 = vpop.f32.mrb[55].mxu1  ;;  %v5898_v13 = vmax.f32 %v5190_v15, 0.0 }
 0xb10   : > { %v6913_v41 = vadd.f32 %v6912_v27, %v20378_v54 }
 0xb12   : > { %v6917_v43 = vcombine.low %v6911_v20, %v6913_v41 }
 0xb14   : > { %13481 = vst.sshfl [vmem:[%s20385_s11 + $0x14] sm:$0x33 pattern:$0x76325410] %v6917_v43 }
 0xb2e   : > { %v6993_v49 = vpop.f32.mrb[56].mxu1 }
 0xb2f   : > { %v6994_v53 = vadd.f32 %v20319_v23, %v6993_v49  ;;  %v14523_v19 = vpop.f32.mrb[57].mxu1 }
 0xb30   : > { %v20596_v19 = vld [vmem:[%s19345_s26 + $0x8] sm:$0xff] }
 0xb31   : > { %v6997_v28 = vmax.f32 %v6994_v53, 0.0 }
 0xb33   : > { %13482 = vmatmul.mubr.msk.f32.vlgmr.msra.gmra.mrb[56].mxu0 %vm6055_vm2, %v6997_v28  ;;  %v1495_v28 = vrot.slane %v20596_v19, %v19435_v61 }
 0xb34   : > { %16063 = vmatpush3.bf16.msra.mxu0 %v20114_v1  ;;  %14556 = vmatprep.mubr.msk.f32.mxu0 %vm18963_vm0, %v21877_v29 }
 0xb35   : > { %16064 = vmatprep.subr.bf16.mxu0 %v21878_v0  ;;  %v5229_v11 = vadd.f32 %v19831_v34, %v1495_v28 }
 0xb37   : > { %v5899_v15 = vmax.f32 %v5229_v11, 0.0 }
 0xb38   : > { %16066 = vmatpush3.bf16.msra.mxu0 %v20129_v17 }
 0xb39   : > { %16067 = vmatprep.subr.bf16.mxu0 %v21878_v0 }
 0xb3c   : > { %16069 = vmatpush3.bf16.msra.mxu0 %v20143_v21 }
 0xb3d   : > { %16070 = vmatprep.subr.bf16.mxu0 %v21878_v0 }
 0xb40   : > { %16072 = vmatpush3.bf16.msra.mxu0 %v20155_v26 }
 0xb41   : > { %16073 = vmatprep.subr.bf16.mxu0 %v21878_v0 }
 0xb44   : > { %16075 = vmatpush3.bf16.msra.mxu0 %v20167_v31 }
 0xb45   : > { %16076 = vmatprep.subr.bf16.mxu0 %v21878_v0 }
 0xb48   : > { %16078 = vmatpush3.bf16.msra.mxu0 %v20179_v45 }
 0xb49   : > { %16079 = vmatprep.subr.bf16.mxu0 %v21878_v0 }
 0xb4c   : > { %16081 = vmatpush3.bf16.msra.mxu0 %v20202_v18 }
 0xb4d   : > { %16082 = vmatprep.subr.bf16.mxu0 %v21878_v0 }
 0xb50   : > { %16084 = vmatpush3.bf16.msra.mxu0 %v20216_v25 }
 0xb51   : > { %16126 = vmatprep.subr.bf16.mxu0 %v20265_v42 }
 0xb53   : > { %14557 = vmatmul.mubr.f32.vlgmr.msra.gmra.mrb[58].mxu0 %v5898_v13 }
 0xb54   : > { %16128 = vmatpush1.bf16.msra.mxu0 %v20269_v3  ;;  %7379 = vmatprep.mubr.f32.mxu0 %v21877_v29 }
 0xb55   : > { %16130 = vmatprep.subr.bf16.mxu0 %v20271_v5 }
 0xb58   : > { %16132 = vmatpush1.bf16.msra.mxu0 %v20275_v24 }
 0xb59   : > { %16134 = vmatprep.subr.bf16.mxu0 %v20279_v55 }
 0xb5c   : > { %16136 = vmatpush1.bf16.msra.mxu0 %v20283_v30 }
 0xb5d   : > { %16138 = vmatprep.subr.bf16.mxu0 %v20293_v52 }
 0xb60   : > { %16140 = vmatpush1.bf16.msra.mxu0 %v20295_v51 }
 0xb61   : > { %16141 = vmatprep.subr.bf16.mxu0 %v21878_v0 }
 0xc06   : > { %v7067_v60 = vpop.f32.mrb[56].mxu0 }
 0xc07   : > { %v7068_v16 = vadd.f32 %v7067_v60, %v20375_v2  ;;  %v7069_v57 = vpop.f32.mrb[57].mxu0 }
 0xc08   : > { %v7070_v20 = vadd.f32 %v7069_v57, %v20378_v54 }
 0xc0a   : > { %v7074_v27 = vcombine.low %v7068_v16, %v7070_v20 }
 0xc0c   : > { %13483 = vst.sshfl [vmem:[%s20385_s11 + $0x18] sm:$0x33 pattern:$0x76325410] %v7074_v27 }
 0xc26   : > { %v7150_v41 = vpop.f32.mrb[58].mxu0 }
 0xc27   : > { %v7151_v43 = vadd.f32 %v20319_v23, %v7150_v41  ;;  %v14558_v49 = vpop.f32.mrb[59].mxu0 }
 0xc28   : > { %v1499_v49 = vrot.slane %v20596_v19, %v19438_v63 }
 0xc29   : > { %v7154_v53 = vmax.f32 %v7151_v43, 0.0 }
 0xc2b   : > { %13484 = vmatmul.mubr.msk.f32.vlgmr.msra.gmra.mrb[58].mxu1 %vm6055_vm2, %v7154_v53  ;;  %v5231_v53 = vadd.f32 %v19836_v37, %v1499_v49 }
 0xc2c   : > { %16103 = vmatpush3.bf16.msra.mxu1 %v20114_v1  ;;  %14591 = vmatprep.mubr.msk.f32.mxu1 %vm18963_vm0, %v21877_v29 }
 0xc2d   : > { %16104 = vmatprep.subr.bf16.mxu1 %v21878_v0  ;;  %v5900_v28 = vmax.f32 %v5231_v53, 0.0 }
 0xc30   : > { %16106 = vmatpush3.bf16.msra.mxu1 %v20129_v17 }
 0xc31   : > { %16107 = vmatprep.subr.bf16.mxu1 %v21878_v0 }
 0xc34   : > { %16109 = vmatpush3.bf16.msra.mxu1 %v20143_v21 }
 0xc35   : > { %16110 = vmatprep.subr.bf16.mxu1 %v21878_v0 }
 0xc38   : > { %16112 = vmatpush3.bf16.msra.mxu1 %v20155_v26 }
 0xc39   : > { %16113 = vmatprep.subr.bf16.mxu1 %v21878_v0 }
 0xc3c   : > { %16115 = vmatpush3.bf16.msra.mxu1 %v20167_v31 }
 0xc3d   : > { %16116 = vmatprep.subr.bf16.mxu1 %v21878_v0 }
 0xc40   : > { %16118 = vmatpush3.bf16.msra.mxu1 %v20179_v45 }
 0xc41   : > { %16119 = vmatprep.subr.bf16.mxu1 %v21878_v0 }
 0xc44   : > { %16121 = vmatpush3.bf16.msra.mxu1 %v20202_v18 }
 0xc45   : > { %16122 = vmatprep.subr.bf16.mxu1 %v21878_v0 }
 0xc48   : > { %16124 = vmatpush3.bf16.msra.mxu1 %v20216_v25 }
 0xc49   : > { %16166 = vmatprep.subr.bf16.mxu1 %v20265_v42 }
 0xc4b   : > { %14592 = vmatmul.mubr.f32.vlgmr.msra.gmra.mrb[60].mxu1 %v5899_v15 }
 0xc4c   : > { %16168 = vmatpush1.bf16.msra.mxu1 %v20269_v3  ;;  %7536 = vmatprep.mubr.f32.mxu1 %v21877_v29 }
 0xc4d   : > { %16170 = vmatprep.subr.bf16.mxu1 %v20271_v5 }
 0xc50   : > { %16172 = vmatpush1.bf16.msra.mxu1 %v20275_v24 }
 0xc51   : > { %16174 = vmatprep.subr.bf16.mxu1 %v20279_v55 }
 0xc54   : > { %16176 = vmatpush1.bf16.msra.mxu1 %v20283_v30 }
 0xc55   : > { %16178 = vmatprep.subr.bf16.mxu1 %v20293_v52 }
 0xc58   : > { %16180 = vmatpush1.bf16.msra.mxu1 %v20295_v51 }
 0xc59   : > { %16181 = vmatprep.subr.bf16.mxu1 %v21878_v0 }
 0xcfe   : > { %v7224_v34 = vpop.f32.mrb[58].mxu1 }
 0xcff   : > { %v7225_v13 = vadd.f32 %v7224_v34, %v20375_v2  ;;  %v7226_v60 = vpop.f32.mrb[59].mxu1 }
 0xd00   : > { %v7227_v16 = vadd.f32 %v7226_v60, %v20378_v54 }
 0xd02   : > { %v7231_v57 = vcombine.low %v7225_v13, %v7227_v16 }
 0xd04   : > { %13485 = vst.sshfl [vmem:[%s20385_s11 + $0x1c] sm:$0x33 pattern:$0x76325410] %v7231_v57 }
 0xd1e   : > { %v7307_v20 = vpop.f32.mrb[60].mxu1 }
 0xd1f   : > { %v7308_v27 = vadd.f32 %v20319_v23, %v7307_v20  ;;  %v14593_v41 = vpop.f32.mrb[61].mxu1 }
 0xd21   : > { %v7311_v43 = vmax.f32 %v7308_v27, 0.0  ;;  %v1503_v27 = vrot.slane %v20596_v19, %v20352_v33 }
 0xd23   : > { %13486 = vmatmul.mubr.msk.f32.vlgmr.msra.gmra.mrb[60].mxu0 %vm6055_vm2, %v7311_v43  ;;  %v5270_v41 = vadd.f32 %v19834_v36, %v1503_v27 }
 0xd24   : > { %16143 = vmatpush3.bf16.msra.mxu0 %v20114_v1  ;;  %14626 = vmatprep.mubr.msk.f32.mxu0 %vm18963_vm0, %v21877_v29 }
 0xd25   : > { %16144 = vmatprep.subr.bf16.mxu0 %v21878_v0  ;;  %v5901_v43 = vmax.f32 %v5270_v41, 0.0 }
 0xd28   : > { %16146 = vmatpush3.bf16.msra.mxu0 %v20129_v17 }
 0xd29   : > { %16147 = vmatprep.subr.bf16.mxu0 %v21878_v0 }
 0xd2c   : > { %16149 = vmatpush3.bf16.msra.mxu0 %v20143_v21 }
 0xd2d   : > { %16150 = vmatprep.subr.bf16.mxu0 %v21878_v0 }
 0xd30   : > { %16152 = vmatpush3.bf16.msra.mxu0 %v20155_v26 }
 0xd31   : > { %16153 = vmatprep.subr.bf16.mxu0 %v21878_v0 }
 0xd34   : > { %16155 = vmatpush3.bf16.msra.mxu0 %v20167_v31 }
 0xd35   : > { %16156 = vmatprep.subr.bf16.mxu0 %v21878_v0 }
 0xd38   : > { %16158 = vmatpush3.bf16.msra.mxu0 %v20179_v45 }
 0xd39   : > { %16159 = vmatprep.subr.bf16.mxu0 %v21878_v0 }
 0xd3c   : > { %16161 = vmatpush3.bf16.msra.mxu0 %v20202_v18 }
 0xd3d   : > { %16162 = vmatprep.subr.bf16.mxu0 %v21878_v0 }
 0xd40   : > { %16164 = vmatpush3.bf16.msra.mxu0 %v20216_v25 }
 0xd41   : > { %16206 = vmatprep.subr.bf16.mxu0 %v20265_v42 }
 0xd43   : > { %14627 = vmatmul.mubr.f32.vlgmr.msra.gmra.mrb[62].mxu0 %v5900_v28 }
 0xd44   : > { %16208 = vmatpush1.bf16.msra.mxu0 %v20269_v3  ;;  %7693 = vmatprep.mubr.f32.mxu0 %v21877_v29 }
 0xd45   : > { %16210 = vmatprep.subr.bf16.mxu0 %v20271_v5 }
 0xd48   : > { %16212 = vmatpush1.bf16.msra.mxu0 %v20275_v24 }
 0xd49   : > { %16214 = vmatprep.subr.bf16.mxu0 %v20279_v55 }
 0xd4c   : > { %16216 = vmatpush1.bf16.msra.mxu0 %v20283_v30 }
 0xd4d   : > { %16218 = vmatprep.subr.bf16.mxu0 %v20293_v52 }
 0xd50   : > { %16220 = vmatpush1.bf16.msra.mxu0 %v20295_v51 }
 0xd51   : > { %16221 = vmatprep.subr.bf16.mxu0 %v21878_v0 }
 0xdf6   : > { %v7381_v37 = vpop.f32.mrb[60].mxu0 }
 0xdf7   : > { %v7382_v11 = vadd.f32 %v7381_v37, %v20375_v2  ;;  %v7383_v15 = vpop.f32.mrb[61].mxu0 }
 0xdf8   : > { %v7384_v34 = vadd.f32 %v7383_v15, %v20378_v54 }
 0xdfa   : > { %v7388_v13 = vcombine.low %v7382_v11, %v7384_v34 }
 0xdfc   : > { %13487 = vst.sshfl [vmem:[%s20385_s11 + $0x20] sm:$0x33 pattern:$0x76325410] %v7388_v13 }
 0xe16   : > { %v7464_v60 = vpop.f32.mrb[62].mxu0 }
 0xe17   : > { %v7465_v16 = vadd.f32 %v20319_v23, %v7464_v60  ;;  %v14628_v57 = vpop.f32.mrb[63].mxu0  ;;  %v1507_v60 = vrot.slane %v20596_v19, %v20405_v9 }
 0xe19   : > { %v7468_v20 = vmax.f32 %v7465_v16, 0.0  ;;  %v5272_v16 = vadd.f32 %v19838_v38, %v1507_v60 }
 0xe1b   : > { %13488 = vmatmul.mubr.msk.f32.vlgmr.msra.gmra.mrb[62].mxu1 %vm6055_vm2, %v7468_v20  ;;  %v5902_v57 = vmax.f32 %v5272_v16, 0.0 }
 0xe1c   : > { %16183 = vmatpush3.bf16.msra.mxu1 %v20114_v1  ;;  %14661 = vmatprep.mubr.msk.f32.mxu1 %vm18963_vm0, %v21877_v29 }
 0xe1d   : > { %16184 = vmatprep.subr.bf16.mxu1 %v21878_v0 }
 0xe20   : > { %16186 = vmatpush3.bf16.msra.mxu1 %v20129_v17 }
 0xe21   : > { %16187 = vmatprep.subr.bf16.mxu1 %v21878_v0 }
 0xe24   : > { %16189 = vmatpush3.bf16.msra.mxu1 %v20143_v21 }
 0xe25   : > { %16190 = vmatprep.subr.bf16.mxu1 %v21878_v0 }
 0xe28   : > { %16192 = vmatpush3.bf16.msra.mxu1 %v20155_v26 }
 0xe29   : > { %16193 = vmatprep.subr.bf16.mxu1 %v21878_v0 }
 0xe2c   : > { %16195 = vmatpush3.bf16.msra.mxu1 %v20167_v31 }
 0xe2d   : > { %16196 = vmatprep.subr.bf16.mxu1 %v21878_v0 }
 0xe30   : > { %16198 = vmatpush3.bf16.msra.mxu1 %v20179_v45 }
 0xe31   : > { %16199 = vmatprep.subr.bf16.mxu1 %v21878_v0 }
 0xe34   : > { %16201 = vmatpush3.bf16.msra.mxu1 %v20202_v18 }
 0xe35   : > { %16202 = vmatprep.subr.bf16.mxu1 %v21878_v0 }
 0xe38   : > { %16204 = vmatpush3.bf16.msra.mxu1 %v20216_v25 }
 0xe39   : > { %16246 = vmatprep.subr.bf16.mxu1 %v20265_v42 }
 0xe3b   : > { %14662 = vmatmul.mubr.f32.vlgmr.msra.gmra.mrb[64].mxu1 %v5901_v43 }
 0xe3c   : > { %16248 = vmatpush1.bf16.msra.mxu1 %v20269_v3  ;;  %7850 = vmatprep.mubr.f32.mxu1 %v21877_v29 }
 0xe3d   : > { %16250 = vmatprep.subr.bf16.mxu1 %v20271_v5 }
 0xe40   : > { %16252 = vmatpush1.bf16.msra.mxu1 %v20275_v24 }
 0xe41   : > { %16254 = vmatprep.subr.bf16.mxu1 %v20279_v55 }
 0xe44   : > { %16256 = vmatpush1.bf16.msra.mxu1 %v20283_v30 }
 0xe45   : > { %16258 = vmatprep.subr.bf16.mxu1 %v20293_v52 }
 0xe48   : > { %16260 = vmatpush1.bf16.msra.mxu1 %v20295_v51 }
 0xe49   : > { %16261 = vmatprep.subr.bf16.mxu1 %v21878_v0 }
 0xeee   : > { %v7538_v36 = vpop.f32.mrb[62].mxu1 }
 0xeef   : > { %v7539_v49 = vadd.f32 %v7538_v36, %v20375_v2  ;;  %v7540_v53 = vpop.f32.mrb[63].mxu1 }
 0xef0   : > { %v7541_v28 = vadd.f32 %v7540_v53, %v20378_v54 }
 0xef2   : > { %v7545_v37 = vcombine.low %v7539_v49, %v7541_v28 }
 0xef4   : > { %13489 = vst.sshfl [vmem:[%s20385_s11 + $0x24] sm:$0x33 pattern:$0x76325410] %v7545_v37  ;;  %v1511_v37 = vrot.slane %v20596_v19, %v20443_v22 }
 0xf0e   : > { %v7621_v11 = vpop.f32.mrb[64].mxu1 }
 0xf0f   : > { %v7622_v15 = vadd.f32 %v20319_v23, %v7621_v11  ;;  %v14663_v34 = vpop.f32.mrb[65].mxu1  ;;  %v5311_v11 = vadd.f32 %v19907_v4, %v1511_v37 }
 0xf11   : > { %v7625_v13 = vmax.f32 %v7622_v15, 0.0  ;;  %v5903_v15 = vmax.f32 %v5311_v11, 0.0  ;;  %v20794_v11 = vld [vmem:[#allocation11] ss:$0 sm:$0xff] }
 0xf13   : > { %13490 = vmatmul.mubr.msk.f32.vlgmr.msra.gmra.mrb[64].mxu0 %vm6055_vm2, %v7625_v13 }
 0xf14   : > { %16223 = vmatpush3.bf16.msra.mxu0 %v20114_v1  ;;  %14696 = vmatprep.mubr.msk.f32.mxu0 %vm18963_vm0, %v21877_v29 }
 0xf15   : > { %16224 = vmatprep.subr.bf16.mxu0 %v21878_v0 }
 0xf18   : > { %16226 = vmatpush3.bf16.msra.mxu0 %v20129_v17 }
 0xf19   : > { %16227 = vmatprep.subr.bf16.mxu0 %v21878_v0 }
 0xf1c   : > { %16229 = vmatpush3.bf16.msra.mxu0 %v20143_v21 }
 0xf1d   : > { %16230 = vmatprep.subr.bf16.mxu0 %v21878_v0 }
 0xf20   : > { %16232 = vmatpush3.bf16.msra.mxu0 %v20155_v26 }
 0xf21   : > { %16233 = vmatprep.subr.bf16.mxu0 %v21878_v0 }
 0xf24   : > { %16235 = vmatpush3.bf16.msra.mxu0 %v20167_v31 }
 0xf25   : > { %16236 = vmatprep.subr.bf16.mxu0 %v21878_v0 }
 0xf28   : > { %16238 = vmatpush3.bf16.msra.mxu0 %v20179_v45 }
 0xf29   : > { %16239 = vmatprep.subr.bf16.mxu0 %v21878_v0 }
 0xf2c   : > { %16241 = vmatpush3.bf16.msra.mxu0 %v20202_v18 }
 0xf2d   : > { %16242 = vmatprep.subr.bf16.mxu0 %v21878_v0 }
 0xf30   : > { %16244 = vmatpush3.bf16.msra.mxu0 %v20216_v25 }
 0xf31   : > { %16286 = vmatprep.subr.bf16.mxu0 %v20265_v42 }
 0xf33   : > { %14697 = vmatmul.mubr.f32.vlgmr.msra.gmra.mrb[66].mxu0 %v5902_v57 }
 0xf34   : > { %16288 = vmatpush1.bf16.msra.mxu0 %v20269_v3  ;;  %8007 = vmatprep.mubr.f32.mxu0 %v21877_v29 }
 0xf35   : > { %16290 = vmatprep.subr.bf16.mxu0 %v20271_v5 }
 0xf38   : > { %16292 = vmatpush1.bf16.msra.mxu0 %v20275_v24 }
 0xf39   : > { %16294 = vmatprep.subr.bf16.mxu0 %v20279_v55 }
 0xf3c   : > { %16296 = vmatpush1.bf16.msra.mxu0 %v20283_v30 }
 0xf3d   : > { %16298 = vmatprep.subr.bf16.mxu0 %v20293_v52 }
 0xf40   : > { %16300 = vmatpush1.bf16.msra.mxu0 %v20295_v51 }
 0xf41   : > { %16301 = vmatprep.subr.bf16.mxu0 %v21878_v0 }
 0xfe6   : > { %v7695_v38 = vpop.f32.mrb[64].mxu0 }
 0xfe7   : > { %v7696_v20 = vadd.f32 %v7695_v38, %v20375_v2  ;;  %v7697_v27 = vpop.f32.mrb[65].mxu0 }
 0xfe8   : > { %v7698_v41 = vadd.f32 %v7697_v27, %v20378_v54 }
 0xfea   : > { %v7702_v43 = vcombine.low %v7696_v20, %v7698_v41 }
 0xfec   : > { %13491 = vst.sshfl [vmem:[%s20385_s11 + $0x28] sm:$0x33 pattern:$0x76325410] %v7702_v43 }
0x1006   : > { %v7778_v36 = vpop.f32.mrb[66].mxu0 }
0x1007   : > { %v7779_v49 = vadd.f32 %v20319_v23, %v7778_v36  ;;  %v14698_v53 = vpop.f32.mrb[67].mxu0 }
0x1009   : > { %v7782_v28 = vmax.f32 %v7779_v49, 0.0 }
0x100b   : > { %13492 = vmatmul.mubr.msk.f32.vlgmr.msra.gmra.mrb[66].mxu1 %vm6055_vm2, %v7782_v28 }
0x100c   : > { %16263 = vmatpush3.bf16.msra.mxu1 %v20114_v1  ;;  %14731 = vmatprep.mubr.msk.f32.mxu1 %vm18963_vm0, %v21877_v29 }
0x100d   : > { %16264 = vmatprep.subr.bf16.mxu1 %v21878_v0 }
0x1010   : > { %16266 = vmatpush3.bf16.msra.mxu1 %v20129_v17 }
0x1011   : > { %16267 = vmatprep.subr.bf16.mxu1 %v21878_v0 }
0x1014   : > { %16269 = vmatpush3.bf16.msra.mxu1 %v20143_v21 }
0x1015   : > { %16270 = vmatprep.subr.bf16.mxu1 %v21878_v0 }
0x1018   : > { %16272 = vmatpush3.bf16.msra.mxu1 %v20155_v26 }
0x1019   : > { %16273 = vmatprep.subr.bf16.mxu1 %v21878_v0 }
0x101c   : > { %16275 = vmatpush3.bf16.msra.mxu1 %v20167_v31 }
0x101d   : > { %16276 = vmatprep.subr.bf16.mxu1 %v21878_v0 }
0x1020   : > { %16278 = vmatpush3.bf16.msra.mxu1 %v20179_v45 }
0x1021   : > { %16279 = vmatprep.subr.bf16.mxu1 %v21878_v0 }
0x1024   : > { %16281 = vmatpush3.bf16.msra.mxu1 %v20202_v18 }
0x1025   : > { %16282 = vmatprep.subr.bf16.mxu1 %v21878_v0 }
0x1028   : > { %16284 = vmatpush3.bf16.msra.mxu1 %v20216_v25 }
0x1029   : > { %16326 = vmatprep.subr.bf16.mxu1 %v20265_v42 }
0x102b   : > { %14732 = vmatmul.mubr.f32.vlgmr.msra.gmra.mrb[68].mxu1 %v5903_v15 }
0x102c   : > { %16328 = vmatpush1.bf16.msra.mxu1 %v20269_v3  ;;  %8164 = vmatprep.mubr.f32.mxu1 %v21877_v29 }
0x102d   : > { %16330 = vmatprep.subr.bf16.mxu1 %v20271_v5 }
0x1030   : > { %16332 = vmatpush1.bf16.msra.mxu1 %v20275_v24 }
0x1031   : > { %16334 = vmatprep.subr.bf16.mxu1 %v20279_v55 }
0x1034   : > { %16336 = vmatpush1.bf16.msra.mxu1 %v20283_v30 }
0x1035   : > { %16338 = vmatprep.subr.bf16.mxu1 %v20293_v52 }
0x1038   : > { %16340 = vmatpush1.bf16.msra.mxu1 %v20295_v51 }
0x1039   : > { %16341 = vmatprep.subr.bf16.mxu1 %v21878_v0 }
0x10de   : > { %v7852_v4 = vpop.f32.mrb[66].mxu1 }
0x10df   : > { %v7853_v34 = vadd.f32 %v7852_v4, %v20375_v2  ;;  %v7854_v13 = vpop.f32.mrb[67].mxu1 }
0x10e0   : > { %v7855_v60 = vadd.f32 %v7854_v13, %v20378_v54  ;;  %v1519_v13 = vrot.slane %v20596_v19, %v20519_v10 }
0x10e2   : > { %v7859_v16 = vcombine.low %v7853_v34, %v7855_v60  ;;  %v5352_v60 = vadd.f32 %v19910_v6, %v1519_v13 }
0x10e4   : > { %13493 = vst.sshfl [vmem:[%s20385_s11 + $0x2c] sm:$0x33 pattern:$0x76325410] %v7859_v16  ;;  %v5905_v16 = vmax.f32 %v5352_v60, 0.0 }
0x10fe   : > { %v7935_v57 = vpop.f32.mrb[68].mxu1 }
0x10ff   : > { %v7936_v38 = vadd.f32 %v20319_v23, %v7935_v57  ;;  %v14733_v20 = vpop.f32.mrb[69].mxu1  ;;  %v1515_v23 = vrot.slane %v20596_v19, %v20481_v14 }
0x1101   : > { %v7939_v27 = vmax.f32 %v7936_v38, 0.0  ;;  %v5313_v41 = vadd.f32 %v19912_v7, %v1515_v23 }
0x1103   : > { %13494 = vmatmul.mubr.msk.f32.vlgmr.msra.gmra.mrb[68].mxu0 %vm6055_vm2, %v7939_v27  ;;  %v5904_v43 = vmax.f32 %v5313_v41, 0.0 }
0x1104   : > { %16303 = vmatpush3.bf16.msra.mxu0 %v20114_v1  ;;  %14766 = vmatprep.mubr.msk.f32.mxu0 %vm18963_vm0, %v21877_v29 }
0x1105   : > { %16304 = vmatprep.subr.bf16.mxu0 %v21878_v0 }
0x1108   : > { %16306 = vmatpush3.bf16.msra.mxu0 %v20129_v17 }
0x1109   : > { %16307 = vmatprep.subr.bf16.mxu0 %v21878_v0 }
0x110c   : > { %16309 = vmatpush3.bf16.msra.mxu0 %v20143_v21 }
0x110d   : > { %16310 = vmatprep.subr.bf16.mxu0 %v21878_v0 }
0x1110   : > { %16312 = vmatpush3.bf16.msra.mxu0 %v20155_v26 }
0x1111   : > { %16313 = vmatprep.subr.bf16.mxu0 %v21878_v0 }
0x1114   : > { %16315 = vmatpush3.bf16.msra.mxu0 %v20167_v31 }
0x1115   : > { %16316 = vmatprep.subr.bf16.mxu0 %v21878_v0 }
0x1118   : > { %16318 = vmatpush3.bf16.msra.mxu0 %v20179_v45 }
0x1119   : > { %16319 = vmatprep.subr.bf16.mxu0 %v21878_v0 }
0x111c   : > { %16321 = vmatpush3.bf16.msra.mxu0 %v20202_v18 }
0x111d   : > { %16322 = vmatprep.subr.bf16.mxu0 %v21878_v0 }
0x1120   : > { %16324 = vmatpush3.bf16.msra.mxu0 %v20216_v25 }
0x1121   : > { %16366 = vmatprep.subr.bf16.mxu0 %v20265_v42 }
0x1123   : > { %14767 = vmatmul.mubr.f32.vlgmr.msra.gmra.mrb[70].mxu0 %v5904_v43 }
0x1124   : > { %16368 = vmatpush1.bf16.msra.mxu0 %v20269_v3  ;;  %8321 = vmatprep.mubr.f32.mxu0 %v21877_v29 }
0x1125   : > { %16370 = vmatprep.subr.bf16.mxu0 %v20271_v5 }
0x1128   : > { %16372 = vmatpush1.bf16.msra.mxu0 %v20275_v24 }
0x1129   : > { %16374 = vmatprep.subr.bf16.mxu0 %v20279_v55 }
0x112c   : > { %16376 = vmatpush1.bf16.msra.mxu0 %v20283_v30 }
0x112d   : > { %16378 = vmatprep.subr.bf16.mxu0 %v20293_v52 }
0x1130   : > { %16380 = vmatpush1.bf16.msra.mxu0 %v20295_v51 }
0x1131   : > { %16381 = vmatprep.subr.bf16.mxu0 %v21878_v0 }
0x11d6   : > { %v8009_v7 = vpop.f32.mrb[68].mxu0 }
0x11d7   : > { %v8010_v36 = vadd.f32 %v8009_v7, %v20375_v2  ;;  %v8011_v49 = vpop.f32.mrb[69].mxu0 }
0x11d8   : > { %v8012_v53 = vadd.f32 %v8011_v49, %v20378_v54 }
0x11da   : > { %v8016_v28 = vcombine.low %v8010_v36, %v8012_v53  ;;  %v1523_v36 = vrot.slane %v20596_v19, %v20557_v56 }
0x11dc   : > { %13495 = vst.sshfl [vmem:[%s20385_s11 + $0x30] sm:$0x33 pattern:$0x76325410] %v8016_v28  ;;  %v5354_v49 = vadd.f32 %v19914_v8, %v1523_v36 }
0x11de   : > { %v5906_v53 = vmax.f32 %v5354_v49, 0.0 }
0x11f6   : > { %v8092_v37 = vpop.f32.mrb[70].mxu0 }
0x11f7   : > { %v8093_v15 = vadd.f32 %v20794_v11, %v8092_v37  ;;  %v14768_v4 = vpop.f32.mrb[71].mxu0 }
0x11f9   : > { %v8096_v34 = vmax.f32 %v8093_v15, 0.0 }
0x11fb   : > { %13496 = vmatmul.mubr.msk.f32.vlgmr.msra.gmra.mrb[70].mxu1 %vm6055_vm2, %v8096_v34 }
0x11fc   : > { %16343 = vmatpush3.bf16.msra.mxu1 %v20114_v1  ;;  %14801 = vmatprep.mubr.msk.f32.mxu1 %vm18963_vm0, %v21877_v29 }
0x11fd   : > { %16344 = vmatprep.subr.bf16.mxu1 %v21878_v0 }
0x1200   : > { %16346 = vmatpush3.bf16.msra.mxu1 %v20129_v17 }
0x1201   : > { %16347 = vmatprep.subr.bf16.mxu1 %v21878_v0 }
0x1204   : > { %16349 = vmatpush3.bf16.msra.mxu1 %v20143_v21 }
0x1205   : > { %16350 = vmatprep.subr.bf16.mxu1 %v21878_v0 }
0x1208   : > { %16352 = vmatpush3.bf16.msra.mxu1 %v20155_v26 }
0x1209   : > { %16353 = vmatprep.subr.bf16.mxu1 %v21878_v0 }
0x120c   : > { %16355 = vmatpush3.bf16.msra.mxu1 %v20167_v31 }
0x120d   : > { %16356 = vmatprep.subr.bf16.mxu1 %v21878_v0 }
0x1210   : > { %16358 = vmatpush3.bf16.msra.mxu1 %v20179_v45 }
0x1211   : > { %16359 = vmatprep.subr.bf16.mxu1 %v21878_v0 }
0x1214   : > { %16361 = vmatpush3.bf16.msra.mxu1 %v20202_v18 }
0x1215   : > { %16362 = vmatprep.subr.bf16.mxu1 %v21878_v0 }
0x1218   : > { %16364 = vmatpush3.bf16.msra.mxu1 %v20216_v25 }
0x1219   : > { %16406 = vmatprep.subr.bf16.mxu1 %v20265_v42 }
0x121b   : > { %14802 = vmatmul.mubr.f32.vlgmr.msra.gmra.mrb[72].mxu1 %v5905_v16  ;;  %v20881_v16 = vld [vmem:[%s19345_s26 + $0x10] sm:$0xff] }
0x121c   : > { %16408 = vmatpush1.bf16.msra.mxu1 %v20269_v3  ;;  %8478 = vmatprep.mubr.f32.mxu1 %v21877_v29 }
0x121d   : > { %16410 = vmatprep.subr.bf16.mxu1 %v20271_v5 }
0x1220   : > { %16412 = vmatpush1.bf16.msra.mxu1 %v20275_v24 }
0x1221   : > { %16414 = vmatprep.subr.bf16.mxu1 %v20279_v55 }
0x1224   : > { %16416 = vmatpush1.bf16.msra.mxu1 %v20283_v30 }
0x1225   : > { %16418 = vmatprep.subr.bf16.mxu1 %v20293_v52 }
0x1228   : > { %16420 = vmatpush1.bf16.msra.mxu1 %v20295_v51 }
0x1229   : > { %16421 = vmatprep.subr.bf16.mxu1 %v21878_v0 }
0x12ce   : > { %v8166_v6 = vpop.f32.mrb[70].mxu1 }
0x12cf   : > { %v8167_v57 = vadd.f32 %v8166_v6, %v20375_v2  ;;  %v8168_v38 = vpop.f32.mrb[71].mxu1  ;;  %v1527_v6 = vrot.slane %v20881_v16, %v19435_v61 }
0x12d0   : > { %v8169_v20 = vadd.f32 %v8168_v38, %v20378_v54 }
0x12d2   : > { %v8173_v27 = vcombine.low %v8167_v57, %v8169_v20  ;;  %v5393_v57 = vadd.f32 %v19983_v44, %v1527_v6 }
0x12d4   : > { %13497 = vst.sshfl [vmem:[%s20385_s11 + $0x34] sm:$0x33 pattern:$0x76325410] %v8173_v27  ;;  %v5907_v38 = vmax.f32 %v5393_v57, 0.0  ;;  %v1535_v57 = vrot.slane %v20881_v16, %v20352_v33 }
0x12ee   : > { %v8249_v23 = vpop.f32.mrb[72].mxu1 }
0x12ef   : > { %v8250_v41 = vadd.f32 %v20794_v11, %v8249_v23  ;;  %v14803_v43 = vpop.f32.mrb[73].mxu1 }
0x12f1   : > { %v8253_v7 = vmax.f32 %v8250_v41, 0.0 }
0x12f3   : > { %13498 = vmatmul.mubr.msk.f32.vlgmr.msra.gmra.mrb[72].mxu0 %vm6055_vm2, %v8253_v7 }
0x12f4   : > { %16383 = vmatpush3.bf16.msra.mxu0 %v20114_v1  ;;  %14836 = vmatprep.mubr.msk.f32.mxu0 %vm18963_vm0, %v21877_v29 }
0x12f5   : > { %16384 = vmatprep.subr.bf16.mxu0 %v21878_v0 }
0x12f8   : > { %16386 = vmatpush3.bf16.msra.mxu0 %v20129_v17 }
0x12f9   : > { %16387 = vmatprep.subr.bf16.mxu0 %v21878_v0 }
0x12fc   : > { %16389 = vmatpush3.bf16.msra.mxu0 %v20143_v21 }
0x12fd   : > { %16390 = vmatprep.subr.bf16.mxu0 %v21878_v0 }
0x1300   : > { %16392 = vmatpush3.bf16.msra.mxu0 %v20155_v26 }
0x1301   : > { %16393 = vmatprep.subr.bf16.mxu0 %v21878_v0 }
0x1304   : > { %16395 = vmatpush3.bf16.msra.mxu0 %v20167_v31 }
0x1305   : > { %16396 = vmatprep.subr.bf16.mxu0 %v21878_v0 }
0x1308   : > { %16398 = vmatpush3.bf16.msra.mxu0 %v20179_v45 }
0x1309   : > { %16399 = vmatprep.subr.bf16.mxu0 %v21878_v0 }
0x130c   : > { %16401 = vmatpush3.bf16.msra.mxu0 %v20202_v18 }
0x130d   : > { %16402 = vmatprep.subr.bf16.mxu0 %v21878_v0 }
0x1310   : > { %16404 = vmatpush3.bf16.msra.mxu0 %v20216_v25 }
0x1311   : > { %16446 = vmatprep.subr.bf16.mxu0 %v20265_v42 }
0x1313   : > { %14837 = vmatmul.mubr.f32.vlgmr.msra.gmra.mrb[74].mxu0 %v5906_v53  ;;  %v1531_v53 = vrot.slane %v20881_v16, %v19438_v63 }
0x1314   : > { %16448 = vmatpush1.bf16.msra.mxu0 %v20269_v3  ;;  %8635 = vmatprep.mubr.f32.mxu0 %v21877_v29 }
0x1315   : > { %16450 = vmatprep.subr.bf16.mxu0 %v20271_v5 }
0x1318   : > { %16452 = vmatpush1.bf16.msra.mxu0 %v20275_v24 }
0x1319   : > { %16454 = vmatprep.subr.bf16.mxu0 %v20279_v55 }
0x131c   : > { %16456 = vmatpush1.bf16.msra.mxu0 %v20283_v30 }
0x131d   : > { %16458 = vmatprep.subr.bf16.mxu0 %v20293_v52 }
0x1320   : > { %16460 = vmatpush1.bf16.msra.mxu0 %v20295_v51 }
0x1321   : > { %16461 = vmatprep.subr.bf16.mxu0 %v21878_v0 }
0x13c6   : > { %v8323_v8 = vpop.f32.mrb[72].mxu0 }
0x13c7   : > { %v8324_v19 = vadd.f32 %v8323_v8, %v20375_v2  ;;  %v8325_v28 = vpop.f32.mrb[73].mxu0  ;;  %v5395_v8 = vadd.f32 %v19988_v47, %v1531_v53  ;;  %v1539_v53 = vrot.slane %v20881_v16, %v20405_v9 }
0x13c8   : > { %v8326_v37 = vadd.f32 %v8325_v28, %v20378_v54 }
0x13ca   : > { %v8330_v15 = vcombine.low %v8324_v19, %v8326_v37  ;;  %v5908_v19 = vmax.f32 %v5395_v8, 0.0  ;;  %v5436_v8 = vadd.f32 %v19990_v48, %v1539_v53 }
0x13cc   : > { %13499 = vst.sshfl [vmem:[%s20385_s11 + $0x38] sm:$0x33 pattern:$0x76325410] %v8330_v15 }
0x13e6   : > { %v8406_v4 = vpop.f32.mrb[74].mxu0 }
0x13e7   : > { %v8407_v34 = vadd.f32 %v20794_v11, %v8406_v4  ;;  %v14838_v13 = vpop.f32.mrb[75].mxu0 }
0x13e9   : > { %v8410_v60 = vmax.f32 %v8407_v34, 0.0 }
0x13eb   : > { %13500 = vmatmul.mubr.msk.f32.vlgmr.msra.gmra.mrb[74].mxu1 %vm6055_vm2, %v8410_v60 }
0x13ec   : > { %16423 = vmatpush3.bf16.msra.mxu1 %v20114_v1  ;;  %14871 = vmatprep.mubr.msk.f32.mxu1 %vm18963_vm0, %v21877_v29 }
0x13ed   : > { %16424 = vmatprep.subr.bf16.mxu1 %v21878_v0 }
0x13f0   : > { %16426 = vmatpush3.bf16.msra.mxu1 %v20129_v17 }
0x13f1   : > { %16427 = vmatprep.subr.bf16.mxu1 %v21878_v0 }
0x13f4   : > { %16429 = vmatpush3.bf16.msra.mxu1 %v20143_v21 }
0x13f5   : > { %16430 = vmatprep.subr.bf16.mxu1 %v21878_v0 }
0x13f8   : > { %16432 = vmatpush3.bf16.msra.mxu1 %v20155_v26 }
0x13f9   : > { %16433 = vmatprep.subr.bf16.mxu1 %v21878_v0 }
0x13fc   : > { %16435 = vmatpush3.bf16.msra.mxu1 %v20167_v31 }
0x13fd   : > { %16436 = vmatprep.subr.bf16.mxu1 %v21878_v0 }
0x1400   : > { %16438 = vmatpush3.bf16.msra.mxu1 %v20179_v45 }
0x1401   : > { %16439 = vmatprep.subr.bf16.mxu1 %v21878_v0 }
0x1404   : > { %16441 = vmatpush3.bf16.msra.mxu1 %v20202_v18 }
0x1405   : > { %16442 = vmatprep.subr.bf16.mxu1 %v21878_v0 }
0x1408   : > { %16444 = vmatpush3.bf16.msra.mxu1 %v20216_v25 }
0x1409   : > { %16486 = vmatprep.subr.bf16.mxu1 %v20265_v42 }
0x140b   : > { %14872 = vmatmul.mubr.f32.vlgmr.msra.gmra.mrb[76].mxu1 %v5907_v38  ;;  %v5434_v38 = vadd.f32 %v19986_v46, %v1535_v57 }
0x140c   : > { %16488 = vmatpush1.bf16.msra.mxu1 %v20269_v3  ;;  %8792 = vmatprep.mubr.f32.mxu1 %v21877_v29 }
0x140d   : > { %16490 = vmatprep.subr.bf16.mxu1 %v20271_v5 }
0x1410   : > { %16492 = vmatpush1.bf16.msra.mxu1 %v20275_v24 }
0x1411   : > { %16494 = vmatprep.subr.bf16.mxu1 %v20279_v55 }
0x1414   : > { %16496 = vmatpush1.bf16.msra.mxu1 %v20283_v30 }
0x1415   : > { %16498 = vmatprep.subr.bf16.mxu1 %v20293_v52 }
0x1418   : > { %16500 = vmatpush1.bf16.msra.mxu1 %v20295_v51 }
0x1419   : > { %16501 = vmatprep.subr.bf16.mxu1 %v21878_v0 }
0x14be   : > { %v8480_v44 = vpop.f32.mrb[74].mxu1 }
0x14bf   : > { %v8481_v20 = vadd.f32 %v8480_v44, %v20375_v2  ;;  %v8482_v27 = vpop.f32.mrb[75].mxu1  ;;  %v5909_v44 = vmax.f32 %v5434_v38, 0.0 }
0x14c0   : > { %v8483_v23 = vadd.f32 %v8482_v27, %v20378_v54 }
0x14c2   : > { %v8487_v41 = vcombine.low %v8481_v20, %v8483_v23 }
0x14c4   : > { %13501 = vst.sshfl [vmem:[%s20385_s11 + $0x3c] sm:$0x33 pattern:$0x76325410] %v8487_v41 }
0x14de   : > { %v8563_v43 = vpop.f32.mrb[76].mxu1 }
0x14df   : > { %v8564_v7 = vadd.f32 %v20794_v11, %v8563_v43  ;;  %v14873_v36 = vpop.f32.mrb[77].mxu1 }
0x14e1   : > { %v8567_v49 = vmax.f32 %v8564_v7, 0.0 }
0x14e3   : > { %13502 = vmatmul.mubr.msk.f32.vlgmr.msra.gmra.mrb[76].mxu0 %vm6055_vm2, %v8567_v49 }
0x14e4   : > { %16463 = vmatpush3.bf16.msra.mxu0 %v20114_v1  ;;  %14906 = vmatprep.mubr.msk.f32.mxu0 %vm18963_vm0, %v21877_v29 }
0x14e5   : > { %16464 = vmatprep.subr.bf16.mxu0 %v21878_v0 }
0x14e8   : > { %16466 = vmatpush3.bf16.msra.mxu0 %v20129_v17 }
0x14e9   : > { %16467 = vmatprep.subr.bf16.mxu0 %v21878_v0 }
0x14ec   : > { %16469 = vmatpush3.bf16.msra.mxu0 %v20143_v21 }
0x14ed   : > { %16470 = vmatprep.subr.bf16.mxu0 %v21878_v0 }
0x14f0   : > { %16472 = vmatpush3.bf16.msra.mxu0 %v20155_v26 }
0x14f1   : > { %16473 = vmatprep.subr.bf16.mxu0 %v21878_v0 }
0x14f4   : > { %16475 = vmatpush3.bf16.msra.mxu0 %v20167_v31 }
0x14f5   : > { %16476 = vmatprep.subr.bf16.mxu0 %v21878_v0 }
0x14f8   : > { %16478 = vmatpush3.bf16.msra.mxu0 %v20179_v45 }
0x14f9   : > { %16479 = vmatprep.subr.bf16.mxu0 %v21878_v0 }
0x14fc   : > { %16481 = vmatpush3.bf16.msra.mxu0 %v20202_v18 }
0x14fd   : > { %16482 = vmatprep.subr.bf16.mxu0 %v21878_v0 }
0x1500   : > { %16484 = vmatpush3.bf16.msra.mxu0 %v20216_v25 }
0x1501   : > { %16526 = vmatprep.subr.bf16.mxu0 %v20265_v42 }
0x1503   : > { %14907 = vmatmul.mubr.f32.vlgmr.msra.gmra.mrb[78].mxu0 %v5908_v19  ;;  %v5910_v19 = vmax.f32 %v5436_v8, 0.0 }
0x1504   : > { %16528 = vmatpush1.bf16.msra.mxu0 %v20269_v3  ;;  %8949 = vmatprep.mubr.f32.mxu0 %v21877_v29 }
0x1505   : > { %16530 = vmatprep.subr.bf16.mxu0 %v20271_v5 }
0x1508   : > { %16532 = vmatpush1.bf16.msra.mxu0 %v20275_v24 }
0x1509   : > { %16534 = vmatprep.subr.bf16.mxu0 %v20279_v55 }
0x150c   : > { %16536 = vmatpush1.bf16.msra.mxu0 %v20283_v30 }
0x150d   : > { %16538 = vmatprep.subr.bf16.mxu0 %v20293_v52 }
0x1510   : > { %16540 = vmatpush1.bf16.msra.mxu0 %v20295_v51 }
0x1511   : > { %16541 = vmatprep.subr.bf16.mxu0 %v21878_v0 }
0x15b6   : > { %v8637_v47 = vpop.f32.mrb[76].mxu0 }
0x15b7   : > { %v8638_v28 = vadd.f32 %v8637_v47, %v20375_v2  ;;  %v8639_v37 = vpop.f32.mrb[77].mxu0 }
0x15b8   : > { %v8640_v15 = vadd.f32 %v8639_v37, %v20378_v54 }
0x15ba   : > { %v8644_v4 = vcombine.low %v8638_v28, %v8640_v15 }
0x15bc   : > { %13503 = vst.sshfl [vmem:[%s20385_s11 + $0x40] sm:$0x33 pattern:$0x76325410] %v8644_v4 }
0x15d6   : > { %v8720_v34 = vpop.f32.mrb[78].mxu0 }
0x15d7   : > { %v8721_v13 = vadd.f32 %v20794_v11, %v8720_v34  ;;  %v14908_v60 = vpop.f32.mrb[79].mxu0 }
0x15d9   : > { %v8724_v6 = vmax.f32 %v8721_v13, 0.0 }
0x15db   : > { %13504 = vmatmul.mubr.msk.f32.vlgmr.msra.gmra.mrb[78].mxu1 %vm6055_vm2, %v8724_v6  ;;  %v1543_v6 = vrot.slane %v20881_v16, %v20443_v22 }
0x15dc   : > { %16503 = vmatpush3.bf16.msra.mxu1 %v20114_v1  ;;  %14941 = vmatprep.mubr.msk.f32.mxu1 %vm18963_vm0, %v21877_v29 }
0x15dd   : > { %16504 = vmatprep.subr.bf16.mxu1 %v21878_v0  ;;  %v5475_v57 = vadd.f32 %v20059_v32, %v1543_v6 }
0x15df   : > { %v5911_v38 = vmax.f32 %v5475_v57, 0.0 }
0x15e0   : > { %16506 = vmatpush3.bf16.msra.mxu1 %v20129_v17 }
0x15e1   : > { %16507 = vmatprep.subr.bf16.mxu1 %v21878_v0 }
0x15e4   : > { %16509 = vmatpush3.bf16.msra.mxu1 %v20143_v21 }
0x15e5   : > { %16510 = vmatprep.subr.bf16.mxu1 %v21878_v0 }
0x15e8   : > { %16512 = vmatpush3.bf16.msra.mxu1 %v20155_v26 }
0x15e9   : > { %16513 = vmatprep.subr.bf16.mxu1 %v21878_v0 }
0x15ec   : > { %16515 = vmatpush3.bf16.msra.mxu1 %v20167_v31 }
0x15ed   : > { %16516 = vmatprep.subr.bf16.mxu1 %v21878_v0 }
0x15f0   : > { %16518 = vmatpush3.bf16.msra.mxu1 %v20179_v45 }
0x15f1   : > { %16519 = vmatprep.subr.bf16.mxu1 %v21878_v0 }
0x15f4   : > { %16521 = vmatpush3.bf16.msra.mxu1 %v20202_v18 }
0x15f5   : > { %16522 = vmatprep.subr.bf16.mxu1 %v21878_v0 }
0x15f8   : > { %16524 = vmatpush3.bf16.msra.mxu1 %v20216_v25 }
0x15f9   : > { %16566 = vmatprep.subr.bf16.mxu1 %v20265_v42 }
0x15fb   : > { %14942 = vmatmul.mubr.f32.vlgmr.msra.gmra.mrb[80].mxu1 %v5909_v44 }
0x15fc   : > { %16568 = vmatpush1.bf16.msra.mxu1 %v20269_v3  ;;  %9106 = vmatprep.mubr.f32.mxu1 %v21877_v29 }
0x15fd   : > { %16570 = vmatprep.subr.bf16.mxu1 %v20271_v5 }
0x1600   : > { %16572 = vmatpush1.bf16.msra.mxu1 %v20275_v24 }
0x1601   : > { %16574 = vmatprep.subr.bf16.mxu1 %v20279_v55 }
0x1604   : > { %16576 = vmatpush1.bf16.msra.mxu1 %v20283_v30 }
0x1605   : > { %16578 = vmatprep.subr.bf16.mxu1 %v20293_v52 }
0x1608   : > { %16580 = vmatpush1.bf16.msra.mxu1 %v20295_v51 }
0x1609   : > { %16581 = vmatprep.subr.bf16.mxu1 %v21878_v0 }
0x16ae   : > { %v8794_v46 = vpop.f32.mrb[78].mxu1 }
0x16af   : > { %v8795_v20 = vadd.f32 %v8794_v46, %v20375_v2  ;;  %v8796_v27 = vpop.f32.mrb[79].mxu1 }
0x16b0   : > { %v8797_v23 = vadd.f32 %v8796_v27, %v20378_v54 }
0x16b2   : > { %v8801_v41 = vcombine.low %v8795_v20, %v8797_v23 }
0x16b4   : > { %13505 = vst.sshfl [vmem:[%s20385_s11 + $0x44] sm:$0x33 pattern:$0x76325410] %v8801_v41 }
0x16ce   : > { %v8877_v43 = vpop.f32.mrb[80].mxu1 }
0x16cf   : > { %v8878_v7 = vadd.f32 %v20794_v11, %v8877_v43  ;;  %v14943_v36 = vpop.f32.mrb[81].mxu1 }
0x16d0   : > { %v1547_v36 = vrot.slane %v20881_v16, %v20481_v14 }
0x16d1   : > { %v8881_v49 = vmax.f32 %v8878_v7, 0.0 }
0x16d3   : > { %13506 = vmatmul.mubr.msk.f32.vlgmr.msra.gmra.mrb[80].mxu0 %vm6055_vm2, %v8881_v49  ;;  %v5477_v49 = vadd.f32 %v20064_v39, %v1547_v36 }
0x16d4   : > { %16543 = vmatpush3.bf16.msra.mxu0 %v20114_v1  ;;  %14976 = vmatprep.mubr.msk.f32.mxu0 %vm18963_vm0, %v21877_v29 }
0x16d5   : > { %16544 = vmatprep.subr.bf16.mxu0 %v21878_v0  ;;  %v5912_v53 = vmax.f32 %v5477_v49, 0.0 }
0x16d8   : > { %16546 = vmatpush3.bf16.msra.mxu0 %v20129_v17 }
0x16d9   : > { %16547 = vmatprep.subr.bf16.mxu0 %v21878_v0 }
0x16dc   : > { %16549 = vmatpush3.bf16.msra.mxu0 %v20143_v21 }
0x16dd   : > { %16550 = vmatprep.subr.bf16.mxu0 %v21878_v0 }
0x16e0   : > { %16552 = vmatpush3.bf16.msra.mxu0 %v20155_v26 }
0x16e1   : > { %16553 = vmatprep.subr.bf16.mxu0 %v21878_v0 }
0x16e4   : > { %16555 = vmatpush3.bf16.msra.mxu0 %v20167_v31 }
0x16e5   : > { %16556 = vmatprep.subr.bf16.mxu0 %v21878_v0 }
0x16e8   : > { %16558 = vmatpush3.bf16.msra.mxu0 %v20179_v45 }
0x16e9   : > { %16559 = vmatprep.subr.bf16.mxu0 %v21878_v0 }
0x16ec   : > { %16561 = vmatpush3.bf16.msra.mxu0 %v20202_v18 }
0x16ed   : > { %16562 = vmatprep.subr.bf16.mxu0 %v21878_v0 }
0x16f0   : > { %16564 = vmatpush3.bf16.msra.mxu0 %v20216_v25 }
0x16f1   : > { %16606 = vmatprep.subr.bf16.mxu0 %v20265_v42 }
0x16f3   : > { %14977 = vmatmul.mubr.f32.vlgmr.msra.gmra.mrb[82].mxu0 %v5910_v19 }
0x16f4   : > { %16608 = vmatpush1.bf16.msra.mxu0 %v20269_v3  ;;  %9263 = vmatprep.mubr.f32.mxu0 %v21877_v29 }
0x16f5   : > { %16610 = vmatprep.subr.bf16.mxu0 %v20271_v5 }
0x16f8   : > { %16612 = vmatpush1.bf16.msra.mxu0 %v20275_v24 }
0x16f9   : > { %16614 = vmatprep.subr.bf16.mxu0 %v20279_v55 }
0x16fc   : > { %16616 = vmatpush1.bf16.msra.mxu0 %v20283_v30 }
0x16fd   : > { %16618 = vmatprep.subr.bf16.mxu0 %v20293_v52 }
0x1700   : > { %16620 = vmatpush1.bf16.msra.mxu0 %v20295_v51 }
0x1701   : > { %16621 = vmatprep.subr.bf16.mxu0 %v21878_v0 }
0x17a6   : > { %v8951_v48 = vpop.f32.mrb[80].mxu0 }
0x17a7   : > { %v8952_v47 = vadd.f32 %v8951_v48, %v20375_v2  ;;  %v8953_v28 = vpop.f32.mrb[81].mxu0 }
0x17a8   : > { %v8954_v37 = vadd.f32 %v8953_v28, %v20378_v54 }
0x17aa   : > { %v8958_v15 = vcombine.low %v8952_v47, %v8954_v37 }
0x17ac   : > { %13507 = vst.sshfl [vmem:[%s20385_s11 + $0x48] sm:$0x33 pattern:$0x76325410] %v8958_v15 }
0x17c6   : > { %v9034_v4 = vpop.f32.mrb[82].mxu0 }
0x17c7   : > { %v9035_v34 = vadd.f32 %v20794_v11, %v9034_v4  ;;  %v14978_v13 = vpop.f32.mrb[83].mxu0 }
0x17c9   : > { %v9038_v60 = vmax.f32 %v9035_v34, 0.0  ;;  %v1551_v34 = vrot.slane %v20881_v16, %v20519_v10 }
0x17cb   : > { %13508 = vmatmul.mubr.msk.f32.vlgmr.msra.gmra.mrb[82].mxu1 %vm6055_vm2, %v9038_v60  ;;  %v5516_v13 = vadd.f32 %v20062_v35, %v1551_v34 }
0x17cc   : > { %16583 = vmatpush3.bf16.msra.mxu1 %v20114_v1  ;;  %15011 = vmatprep.mubr.msk.f32.mxu1 %vm18963_vm0, %v21877_v29 }
0x17cd   : > { %16584 = vmatprep.subr.bf16.mxu1 %v21878_v0  ;;  %v5913_v60 = vmax.f32 %v5516_v13, 0.0 }
0x17d0   : > { %16586 = vmatpush3.bf16.msra.mxu1 %v20129_v17 }
0x17d1   : > { %16587 = vmatprep.subr.bf16.mxu1 %v21878_v0 }
0x17d4   : > { %16589 = vmatpush3.bf16.msra.mxu1 %v20143_v21 }
0x17d5   : > { %16590 = vmatprep.subr.bf16.mxu1 %v21878_v0 }
0x17d8   : > { %16592 = vmatpush3.bf16.msra.mxu1 %v20155_v26 }
0x17d9   : > { %16593 = vmatprep.subr.bf16.mxu1 %v21878_v0 }
0x17dc   : > { %16595 = vmatpush3.bf16.msra.mxu1 %v20167_v31 }
0x17dd   : > { %16596 = vmatprep.subr.bf16.mxu1 %v21878_v0 }
0x17e0   : > { %16598 = vmatpush3.bf16.msra.mxu1 %v20179_v45 }
0x17e1   : > { %16599 = vmatprep.subr.bf16.mxu1 %v21878_v0 }
0x17e4   : > { %16601 = vmatpush3.bf16.msra.mxu1 %v20202_v18 }
0x17e5   : > { %16602 = vmatprep.subr.bf16.mxu1 %v21878_v0 }
0x17e8   : > { %16604 = vmatpush3.bf16.msra.mxu1 %v20216_v25 }
0x17e9   : > { %16646 = vmatprep.subr.bf16.mxu1 %v20265_v42 }
0x17eb   : > { %15012 = vmatmul.mubr.f32.vlgmr.msra.gmra.mrb[84].mxu1 %v5911_v38 }
0x17ec   : > { %16648 = vmatpush1.bf16.msra.mxu1 %v20269_v3  ;;  %9420 = vmatprep.mubr.f32.mxu1 %v21877_v29 }
0x17ed   : > { %16650 = vmatprep.subr.bf16.mxu1 %v20271_v5 }
0x17f0   : > { %16652 = vmatpush1.bf16.msra.mxu1 %v20275_v24 }
0x17f1   : > { %16654 = vmatprep.subr.bf16.mxu1 %v20279_v55 }
0x17f4   : > { %16656 = vmatpush1.bf16.msra.mxu1 %v20283_v30 }
0x17f5   : > { %16658 = vmatprep.subr.bf16.mxu1 %v20293_v52 }
0x17f8   : > { %16660 = vmatpush1.bf16.msra.mxu1 %v20295_v51 }
0x17f9   : > { %16661 = vmatprep.subr.bf16.mxu1 %v21878_v0 }
0x189e   : > { %v9108_v32 = vpop.f32.mrb[82].mxu1 }
0x189f   : > { %v9109_v44 = vadd.f32 %v9108_v32, %v20375_v2  ;;  %v9110_v46 = vpop.f32.mrb[83].mxu1 }
0x18a0   : > { %v9111_v20 = vadd.f32 %v9110_v46, %v20378_v54 }
0x18a2   : > { %v9115_v27 = vcombine.low %v9109_v44, %v9111_v20 }
0x18a4   : > { %13509 = vst.sshfl [vmem:[%s20385_s11 + $0x4c] sm:$0x33 pattern:$0x76325410] %v9115_v27 }
0x18be   : > { %v9191_v23 = vpop.f32.mrb[84].mxu1 }
0x18bf   : > { %v9192_v41 = vadd.f32 %v20794_v11, %v9191_v23  ;;  %v15013_v43 = vpop.f32.mrb[85].mxu1  ;;  %v1555_v23 = vrot.slane %v20881_v16, %v20557_v56 }
0x18c1   : > { %v9195_v7 = vmax.f32 %v9192_v41, 0.0  ;;  %v5518_v41 = vadd.f32 %v20066_v40, %v1555_v23 }
0x18c3   : > { %13510 = vmatmul.mubr.msk.f32.vlgmr.msra.gmra.mrb[84].mxu0 %vm6055_vm2, %v9195_v7  ;;  %v5914_v43 = vmax.f32 %v5518_v41, 0.0 }
0x18c4   : > { %16623 = vmatpush3.bf16.msra.mxu0 %v20114_v1  ;;  %15046 = vmatprep.mubr.msk.f32.mxu0 %vm18963_vm0, %v21877_v29 }
0x18c5   : > { %16624 = vmatprep.subr.bf16.mxu0 %v21878_v0 }
0x18c8   : > { %16626 = vmatpush3.bf16.msra.mxu0 %v20129_v17 }
0x18c9   : > { %16627 = vmatprep.subr.bf16.mxu0 %v21878_v0 }
0x18cc   : > { %16629 = vmatpush3.bf16.msra.mxu0 %v20143_v21 }
0x18cd   : > { %16630 = vmatprep.subr.bf16.mxu0 %v21878_v0 }
0x18d0   : > { %16632 = vmatpush3.bf16.msra.mxu0 %v20155_v26 }
0x18d1   : > { %16633 = vmatprep.subr.bf16.mxu0 %v21878_v0 }
0x18d4   : > { %16635 = vmatpush3.bf16.msra.mxu0 %v20167_v31 }
0x18d5   : > { %16636 = vmatprep.subr.bf16.mxu0 %v21878_v0 }
0x18d8   : > { %16638 = vmatpush3.bf16.msra.mxu0 %v20179_v45 }
0x18d9   : > { %16639 = vmatprep.subr.bf16.mxu0 %v21878_v0 }
0x18dc   : > { %16641 = vmatpush3.bf16.msra.mxu0 %v20202_v18 }
0x18dd   : > { %16642 = vmatprep.subr.bf16.mxu0 %v21878_v0 }
0x18e0   : > { %16644 = vmatpush3.bf16.msra.mxu0 %v20216_v25 }
0x18e1   : > { %16686 = vmatprep.subr.bf16.mxu0 %v20265_v42 }
0x18e3   : > { %15047 = vmatmul.mubr.f32.vlgmr.msra.gmra.mrb[86].mxu0 %v5912_v53 }
0x18e4   : > { %16688 = vmatpush1.bf16.msra.mxu0 %v20269_v3  ;;  %9577 = vmatprep.mubr.f32.mxu0 %v21877_v29 }
0x18e5   : > { %16690 = vmatprep.subr.bf16.mxu0 %v20271_v5 }
0x18e8   : > { %16692 = vmatpush1.bf16.msra.mxu0 %v20275_v24 }
0x18e9   : > { %16694 = vmatprep.subr.bf16.mxu0 %v20279_v55 }
0x18ec   : > { %16696 = vmatpush1.bf16.msra.mxu0 %v20283_v30 }
0x18ed   : > { %16698 = vmatprep.subr.bf16.mxu0 %v20293_v52 }
0x18f0   : > { %16700 = vmatpush1.bf16.msra.mxu0 %v20295_v51 }
0x18f1   : > { %16701 = vmatprep.subr.bf16.mxu0 %v21878_v0 }
0x1996   : > { %v9265_v39 = vpop.f32.mrb[84].mxu0 }
0x1997   : > { %v9266_v8 = vadd.f32 %v9265_v39, %v20375_v2  ;;  %v9267_v19 = vpop.f32.mrb[85].mxu0 }
0x1998   : > { %v9268_v48 = vadd.f32 %v9267_v19, %v20378_v54 }
0x199a   : > { %v9272_v47 = vcombine.low %v9266_v8, %v9268_v48  ;;  %v21164_v48 = vld [vmem:[%s19345_s26 + $0x18] sm:$0xff] }
0x199c   : > { %13511 = vst.sshfl [vmem:[%s20385_s11 + $0x50] sm:$0x33 pattern:$0x76325410] %v9272_v47  ;;  %v1559_v47 = vrot.slane %v21164_v48, %v19435_v61 }
0x19b6   : > { %v9348_v28 = vpop.f32.mrb[86].mxu0 }
0x19b7   : > { %v9349_v37 = vadd.f32 %v20794_v11, %v9348_v28  ;;  %v15048_v15 = vpop.f32.mrb[87].mxu0  ;;  %v5557_v28 = vadd.f32 %v20182_v50, %v1559_v47  ;;  %v21257_v47 = vld [vmem:[#allocation11] ss:$0 sm:$0xff] }
0x19b9   : > { %v9352_v4 = vmax.f32 %v9349_v37, 0.0  ;;  %v5915_v37 = vmax.f32 %v5557_v28, 0.0 }
0x19bb   : > { %13512 = vmatmul.mubr.msk.f32.vlgmr.msra.gmra.mrb[86].mxu1 %vm6055_vm2, %v9352_v4 }
0x19bc   : > { %16663 = vmatpush3.bf16.msra.mxu1 %v20114_v1  ;;  %15081 = vmatprep.mubr.msk.f32.mxu1 %vm18963_vm0, %v21877_v29 }
0x19bd   : > { %16664 = vmatprep.subr.bf16.mxu1 %v21878_v0 }
0x19c0   : > { %16666 = vmatpush3.bf16.msra.mxu1 %v20129_v17 }
0x19c1   : > { %16667 = vmatprep.subr.bf16.mxu1 %v21878_v0 }
0x19c4   : > { %16669 = vmatpush3.bf16.msra.mxu1 %v20143_v21 }
0x19c5   : > { %16670 = vmatprep.subr.bf16.mxu1 %v21878_v0 }
0x19c8   : > { %16672 = vmatpush3.bf16.msra.mxu1 %v20155_v26 }
0x19c9   : > { %16673 = vmatprep.subr.bf16.mxu1 %v21878_v0 }
0x19cc   : > { %16675 = vmatpush3.bf16.msra.mxu1 %v20167_v31 }
0x19cd   : > { %16676 = vmatprep.subr.bf16.mxu1 %v21878_v0 }
0x19d0   : > { %16678 = vmatpush3.bf16.msra.mxu1 %v20179_v45 }
0x19d1   : > { %16679 = vmatprep.subr.bf16.mxu1 %v21878_v0 }
0x19d4   : > { %16681 = vmatpush3.bf16.msra.mxu1 %v20202_v18 }
0x19d5   : > { %16682 = vmatprep.subr.bf16.mxu1 %v21878_v0 }
0x19d8   : > { %16684 = vmatpush3.bf16.msra.mxu1 %v20216_v25 }
0x19d9   : > { %16726 = vmatprep.subr.bf16.mxu1 %v20265_v42 }
0x19db   : > { %15082 = vmatmul.mubr.f32.vlgmr.msra.gmra.mrb[88].mxu1 %v5913_v60 }
0x19dc   : > { %16728 = vmatpush1.bf16.msra.mxu1 %v20269_v3  ;;  %9734 = vmatprep.mubr.f32.mxu1 %v21877_v29 }
0x19dd   : > { %16730 = vmatprep.subr.bf16.mxu1 %v20271_v5 }
0x19e0   : > { %16732 = vmatpush1.bf16.msra.mxu1 %v20275_v24 }
0x19e1   : > { %16734 = vmatprep.subr.bf16.mxu1 %v20279_v55 }
0x19e4   : > { %16736 = vmatpush1.bf16.msra.mxu1 %v20283_v30 }
0x19e5   : > { %16738 = vmatprep.subr.bf16.mxu1 %v20293_v52 }
0x19e8   : > { %16740 = vmatpush1.bf16.msra.mxu1 %v20295_v51 }
0x19e9   : > { %16741 = vmatprep.subr.bf16.mxu1 %v21878_v0 }
0x1a8e   : > { %v9422_v35 = vpop.f32.mrb[86].mxu1 }
0x1a8f   : > { %v9423_v6 = vadd.f32 %v9422_v35, %v20375_v2  ;;  %v9424_v57 = vpop.f32.mrb[87].mxu1 }
0x1a90   : > { %v9425_v38 = vadd.f32 %v9424_v57, %v20378_v54 }
0x1a92   : > { %v9429_v32 = vcombine.low %v9423_v6, %v9425_v38  ;;  %v1563_v38 = vrot.slane %v21164_v48, %v19438_v63 }
0x1a94   : > { %13513 = vst.sshfl [vmem:[%s20385_s11 + $0x54] sm:$0x33 pattern:$0x76325410] %v9429_v32  ;;  %v5559_v32 = vadd.f32 %v20196_v59, %v1563_v38 }
0x1aae   : > { %v9505_v44 = vpop.f32.mrb[88].mxu1 }
0x1aaf   : > { %v9506_v46 = vadd.f32 %v20794_v11, %v9505_v44  ;;  %v15083_v20 = vpop.f32.mrb[89].mxu1  ;;  %v5916_v44 = vmax.f32 %v5559_v32, 0.0 }
0x1ab1   : > { %v9509_v27 = vmax.f32 %v9506_v46, 0.0 }
0x1ab3   : > { %13514 = vmatmul.mubr.msk.f32.vlgmr.msra.gmra.mrb[88].mxu0 %vm6055_vm2, %v9509_v27 }
0x1ab4   : > { %16703 = vmatpush3.bf16.msra.mxu0 %v20114_v1  ;;  %15116 = vmatprep.mubr.msk.f32.mxu0 %vm18963_vm0, %v21877_v29 }
0x1ab5   : > { %16704 = vmatprep.subr.bf16.mxu0 %v21878_v0 }
0x1ab8   : > { %16706 = vmatpush3.bf16.msra.mxu0 %v20129_v17 }
0x1ab9   : > { %16707 = vmatprep.subr.bf16.mxu0 %v21878_v0 }
0x1abc   : > { %16709 = vmatpush3.bf16.msra.mxu0 %v20143_v21 }
0x1abd   : > { %16710 = vmatprep.subr.bf16.mxu0 %v21878_v0 }
0x1ac0   : > { %16712 = vmatpush3.bf16.msra.mxu0 %v20155_v26 }
0x1ac1   : > { %16713 = vmatprep.subr.bf16.mxu0 %v21878_v0 }
0x1ac4   : > { %16715 = vmatpush3.bf16.msra.mxu0 %v20167_v31 }
0x1ac5   : > { %16716 = vmatprep.subr.bf16.mxu0 %v21878_v0 }
0x1ac8   : > { %16718 = vmatpush3.bf16.msra.mxu0 %v20179_v45 }
0x1ac9   : > { %16719 = vmatprep.subr.bf16.mxu0 %v21878_v0 }
0x1acc   : > { %16721 = vmatpush3.bf16.msra.mxu0 %v20202_v18 }
0x1acd   : > { %16722 = vmatprep.subr.bf16.mxu0 %v21878_v0 }
0x1ad0   : > { %16724 = vmatpush3.bf16.msra.mxu0 %v20216_v25 }
0x1ad1   : > { %16766 = vmatprep.subr.bf16.mxu0 %v20265_v42 }
0x1ad3   : > { %15117 = vmatmul.mubr.f32.vlgmr.msra.gmra.mrb[90].mxu0 %v5914_v43 }
0x1ad4   : > { %16768 = vmatpush1.bf16.msra.mxu0 %v20269_v3  ;;  %9891 = vmatprep.mubr.f32.mxu0 %v21877_v29 }
0x1ad5   : > { %16770 = vmatprep.subr.bf16.mxu0 %v20271_v5 }
0x1ad8   : > { %16772 = vmatpush1.bf16.msra.mxu0 %v20275_v24 }
0x1ad9   : > { %16774 = vmatprep.subr.bf16.mxu0 %v20279_v55 }
0x1adc   : > { %16776 = vmatpush1.bf16.msra.mxu0 %v20283_v30 }
0x1add   : > { %16778 = vmatprep.subr.bf16.mxu0 %v20293_v52 }
0x1ae0   : > { %16780 = vmatpush1.bf16.msra.mxu0 %v20295_v51 }
0x1ae1   : > { %16781 = vmatprep.subr.bf16.mxu0 %v21878_v0 }
0x1b86   : > { %v9579_v40 = vpop.f32.mrb[88].mxu0 }
0x1b87   : > { %v9580_v16 = vadd.f32 %v9579_v40, %v20375_v2  ;;  %v9581_v7 = vpop.f32.mrb[89].mxu0 }
0x1b88   : > { %v9582_v36 = vadd.f32 %v9581_v7, %v20378_v54 }
0x1b8a   : > { %v9586_v49 = vcombine.low %v9580_v16, %v9582_v36 }
0x1b8c   : > { %13515 = vst.sshfl [vmem:[%s20385_s11 + $0x58] sm:$0x33 pattern:$0x76325410] %v9586_v49 }
0x1ba6   : > { %v9662_v53 = vpop.f32.mrb[90].mxu0 }
0x1ba7   : > { %v9663_v39 = vadd.f32 %v20794_v11, %v9662_v53  ;;  %v15118_v8 = vpop.f32.mrb[91].mxu0 }
0x1ba9   : > { %v9666_v19 = vmax.f32 %v9663_v39, 0.0 }
0x1bab   : > { %13516 = vmatmul.mubr.msk.f32.vlgmr.msra.gmra.mrb[90].mxu1 %vm6055_vm2, %v9666_v19 }
0x1bac   : > { %16743 = vmatpush3.bf16.msra.mxu1 %v20114_v1  ;;  %15151 = vmatprep.mubr.msk.f32.mxu1 %vm18963_vm0, %v21877_v29 }
0x1bad   : > { %16744 = vmatprep.subr.bf16.mxu1 %v21878_v0 }
0x1bb0   : > { %16746 = vmatpush3.bf16.msra.mxu1 %v20129_v17 }
0x1bb1   : > { %16747 = vmatprep.subr.bf16.mxu1 %v21878_v0 }
0x1bb4   : > { %16749 = vmatpush3.bf16.msra.mxu1 %v20143_v21 }
0x1bb5   : > { %16750 = vmatprep.subr.bf16.mxu1 %v21878_v0 }
0x1bb8   : > { %16752 = vmatpush3.bf16.msra.mxu1 %v20155_v26 }
0x1bb9   : > { %16753 = vmatprep.subr.bf16.mxu1 %v21878_v0 }
0x1bbc   : > { %16755 = vmatpush3.bf16.msra.mxu1 %v20167_v31 }
0x1bbd   : > { %16756 = vmatprep.subr.bf16.mxu1 %v21878_v0 }
0x1bc0   : > { %16758 = vmatpush3.bf16.msra.mxu1 %v20179_v45 }
0x1bc1   : > { %16759 = vmatprep.subr.bf16.mxu1 %v21878_v0 }
0x1bc4   : > { %16761 = vmatpush3.bf16.msra.mxu1 %v20202_v18 }
0x1bc5   : > { %16762 = vmatprep.subr.bf16.mxu1 %v21878_v0 }
0x1bc8   : > { %16764 = vmatpush3.bf16.msra.mxu1 %v20216_v25 }
0x1bc9   : > { %16806 = vmatprep.subr.bf16.mxu1 %v20265_v42 }
0x1bcb   : > { %15152 = vmatmul.mubr.f32.vlgmr.msra.gmra.mrb[92].mxu1 %v5915_v37 }
0x1bcc   : > { %16808 = vmatpush1.bf16.msra.mxu1 %v20269_v3  ;;  %10048 = vmatprep.mubr.f32.mxu1 %v21877_v29 }
0x1bcd   : > { %16810 = vmatprep.subr.bf16.mxu1 %v20271_v5 }
0x1bd0   : > { %16812 = vmatpush1.bf16.msra.mxu1 %v20275_v24 }
0x1bd1   : > { %16814 = vmatprep.subr.bf16.mxu1 %v20279_v55 }
0x1bd4   : > { %16816 = vmatpush1.bf16.msra.mxu1 %v20283_v30 }
0x1bd5   : > { %16818 = vmatprep.subr.bf16.mxu1 %v20293_v52 }
0x1bd8   : > { %16820 = vmatpush1.bf16.msra.mxu1 %v20295_v51 }
0x1bd9   : > { %16821 = vmatprep.subr.bf16.mxu1 %v21878_v0 }
0x1c7e   : > { %v9736_v50 = vpop.f32.mrb[90].mxu1 }
0x1c7f   : > { %v9737_v15 = vadd.f32 %v9736_v50, %v20375_v2  ;;  %v9738_v4 = vpop.f32.mrb[91].mxu1 }
0x1c80   : > { %v9739_v34 = vadd.f32 %v9738_v4, %v20378_v54 }
0x1c82   : > { %v9743_v13 = vcombine.low %v9737_v15, %v9739_v34  ;;  %v1571_v15 = vrot.slane %v21164_v48, %v20405_v9 }
0x1c84   : > { %13517 = vst.sshfl [vmem:[%s20385_s11 + $0x5c] sm:$0x33 pattern:$0x76325410] %v9743_v13  ;;  %v5600_v4 = vadd.f32 %v20198_v62, %v1571_v15 }
0x1c86   : > { %v5918_v34 = vmax.f32 %v5600_v4, 0.0 }
0x1c9e   : > { %v9819_v60 = vpop.f32.mrb[92].mxu1 }
0x1c9f   : > { %v9820_v35 = vadd.f32 %v20794_v11, %v9819_v60  ;;  %v15153_v6 = vpop.f32.mrb[93].mxu1 }
0x1ca1   : > { %v9823_v57 = vmax.f32 %v9820_v35, 0.0 }
0x1ca3   : > { %13518 = vmatmul.mubr.msk.f32.vlgmr.msra.gmra.mrb[92].mxu0 %vm6055_vm2, %v9823_v57 }
0x1ca4   : > { %16783 = vmatpush3.bf16.msra.mxu0 %v20114_v1  ;;  %15186 = vmatprep.mubr.msk.f32.mxu0 %vm18963_vm0, %v21877_v29 }
0x1ca5   : > { %16784 = vmatprep.subr.bf16.mxu0 %v21878_v0 }
0x1ca8   : > { %16786 = vmatpush3.bf16.msra.mxu0 %v20129_v17 }
0x1ca9   : > { %16787 = vmatprep.subr.bf16.mxu0 %v21878_v0 }
0x1cac   : > { %16789 = vmatpush3.bf16.msra.mxu0 %v20143_v21 }
0x1cad   : > { %16790 = vmatprep.subr.bf16.mxu0 %v21878_v0 }
0x1cb0   : > { %16792 = vmatpush3.bf16.msra.mxu0 %v20155_v26 }
0x1cb1   : > { %16793 = vmatprep.subr.bf16.mxu0 %v21878_v0 }
0x1cb4   : > { %16795 = vmatpush3.bf16.msra.mxu0 %v20167_v31 }
0x1cb5   : > { %16796 = vmatprep.subr.bf16.mxu0 %v21878_v0 }
0x1cb8   : > { %16798 = vmatpush3.bf16.msra.mxu0 %v20179_v45 }
0x1cb9   : > { %16799 = vmatprep.subr.bf16.mxu0 %v21878_v0 }
0x1cbc   : > { %16801 = vmatpush3.bf16.msra.mxu0 %v20202_v18 }
0x1cbd   : > { %16802 = vmatprep.subr.bf16.mxu0 %v21878_v0 }
0x1cc0   : > { %16804 = vmatpush3.bf16.msra.mxu0 %v20216_v25 }
0x1cc1   : > { %16846 = vmatprep.subr.bf16.mxu0 %v20265_v42 }
0x1cc3   : > { %15187 = vmatmul.mubr.f32.vlgmr.msra.gmra.mrb[94].mxu0 %v5916_v44 }
0x1cc4   : > { %16848 = vmatpush1.bf16.msra.mxu0 %v20269_v3  ;;  %10205 = vmatprep.mubr.f32.mxu0 %v21877_v29 }
0x1cc5   : > { %16850 = vmatprep.subr.bf16.mxu0 %v20271_v5 }
0x1cc8   : > { %16852 = vmatpush1.bf16.msra.mxu0 %v20275_v24 }
0x1cc9   : > { %16854 = vmatprep.subr.bf16.mxu0 %v20279_v55 }
0x1ccc   : > { %16856 = vmatpush1.bf16.msra.mxu0 %v20283_v30 }
0x1ccd   : > { %16858 = vmatprep.subr.bf16.mxu0 %v20293_v52 }
0x1cd0   : > { %16860 = vmatpush1.bf16.msra.mxu0 %v20295_v51 }
0x1cd1   : > { %16861 = vmatprep.subr.bf16.mxu0 %v21878_v0 }
0x1d76   : > { %v9893_v59 = vpop.f32.mrb[92].mxu0 }
0x1d77   : > { %v9894_v46 = vadd.f32 %v9893_v59, %v20375_v2  ;;  %v9895_v20 = vpop.f32.mrb[93].mxu0  ;;  %v1575_v59 = vrot.slane %v21164_v48, %v20443_v22 }
0x1d78   : > { %v9896_v27 = vadd.f32 %v9895_v20, %v20378_v54 }
0x1d7a   : > { %v9900_v23 = vcombine.low %v9894_v46, %v9896_v27  ;;  %v5639_v46 = vadd.f32 %v20252_v12, %v1575_v59 }
0x1d7c   : > { %13519 = vst.sshfl [vmem:[%s20385_s11 + $0x60] sm:$0x33 pattern:$0x76325410] %v9900_v23  ;;  %v5919_v20 = vmax.f32 %v5639_v46, 0.0 }
0x1d96   : > { %v9976_v41 = vpop.f32.mrb[94].mxu0 }
0x1d97   : > { %v9977_v43 = vadd.f32 %v20794_v11, %v9976_v41  ;;  %v15188_v40 = vpop.f32.mrb[95].mxu0  ;;  %v1567_v11 = vrot.slane %v21164_v48, %v20352_v33 }
0x1d99   : > { %v9980_v16 = vmax.f32 %v9977_v43, 0.0  ;;  %v5598_v7 = vadd.f32 %v20194_v58, %v1567_v11 }
0x1d9b   : > { %13520 = vmatmul.mubr.msk.f32.vlgmr.msra.gmra.mrb[94].mxu1 %vm6055_vm2, %v9980_v16  ;;  %v5917_v36 = vmax.f32 %v5598_v7, 0.0 }
0x1d9c   : > { %16823 = vmatpush3.bf16.msra.mxu1 %v20114_v1  ;;  %15221 = vmatprep.mubr.msk.f32.mxu1 %vm18963_vm0, %v21877_v29 }
0x1d9d   : > { %16824 = vmatprep.subr.bf16.mxu1 %v21878_v0 }
0x1da0   : > { %16826 = vmatpush3.bf16.msra.mxu1 %v20129_v17 }
0x1da1   : > { %16827 = vmatprep.subr.bf16.mxu1 %v21878_v0 }
0x1da4   : > { %16829 = vmatpush3.bf16.msra.mxu1 %v20143_v21 }
0x1da5   : > { %16830 = vmatprep.subr.bf16.mxu1 %v21878_v0 }
0x1da8   : > { %16832 = vmatpush3.bf16.msra.mxu1 %v20155_v26 }
0x1da9   : > { %16833 = vmatprep.subr.bf16.mxu1 %v21878_v0 }
0x1dac   : > { %16835 = vmatpush3.bf16.msra.mxu1 %v20167_v31 }
0x1dad   : > { %16836 = vmatprep.subr.bf16.mxu1 %v21878_v0 }
0x1db0   : > { %16838 = vmatpush3.bf16.msra.mxu1 %v20179_v45 }
0x1db1   : > { %16839 = vmatprep.subr.bf16.mxu1 %v21878_v0 }
0x1db4   : > { %16841 = vmatpush3.bf16.msra.mxu1 %v20202_v18 }
0x1db5   : > { %16842 = vmatprep.subr.bf16.mxu1 %v21878_v0 }
0x1db8   : > { %16844 = vmatpush3.bf16.msra.mxu1 %v20216_v25 }
0x1db9   : > { %16886 = vmatprep.subr.bf16.mxu1 %v20265_v42 }
0x1dbb   : > { %15222 = vmatmul.mubr.f32.vlgmr.msra.gmra.mrb[96].mxu1 %v5917_v36  ;;  %v1579_v36 = vrot.slane %v21164_v48, %v20481_v14 }
0x1dbc   : > { %16888 = vmatpush1.bf16.msra.mxu1 %v20269_v3  ;;  %10362 = vmatprep.mubr.f32.mxu1 %v21877_v29 }
0x1dbd   : > { %16890 = vmatprep.subr.bf16.mxu1 %v20271_v5 }
0x1dc0   : > { %16892 = vmatpush1.bf16.msra.mxu1 %v20275_v24 }
0x1dc1   : > { %16894 = vmatprep.subr.bf16.mxu1 %v20279_v55 }
0x1dc4   : > { %16896 = vmatpush1.bf16.msra.mxu1 %v20283_v30 }
0x1dc5   : > { %16898 = vmatprep.subr.bf16.mxu1 %v20293_v52 }
0x1dc8   : > { %16900 = vmatpush1.bf16.msra.mxu1 %v20295_v51 }
0x1dc9   : > { %16901 = vmatprep.subr.bf16.mxu1 %v21878_v0 }
0x1e6e   : > { %v10050_v58 = vpop.f32.mrb[94].mxu1 }
0x1e6f   : > { %v10051_v49 = vadd.f32 %v10050_v58, %v20375_v2  ;;  %v10052_v53 = vpop.f32.mrb[95].mxu1  ;;  %v21883_v58 = vld [vmem:[#allocation26_spill] sm:$0xff] }
0x1e70   : > { %v10053_v39 = vadd.f32 %v10052_v53, %v20378_v54 }
0x1e72   : > { %v10057_v8 = vcombine.low %v10051_v49, %v10053_v39  ;;  %v5641_v49 = vadd.f32 %v21883_v58, %v1579_v36 }
0x1e74   : > { %13521 = vst.sshfl [vmem:[%s20385_s11 + $0x64] sm:$0x33 pattern:$0x76325410] %v10057_v8  ;;  %v5920_v53 = vmax.f32 %v5641_v49, 0.0 }
0x1e8e   : > { %v10133_v19 = vpop.f32.mrb[96].mxu1 }
0x1e8f   : > { %v10134_v28 = vadd.f32 %v21257_v47, %v10133_v19  ;;  %v15223_v37 = vpop.f32.mrb[97].mxu1 }
0x1e91   : > { %v10137_v50 = vmax.f32 %v10134_v28, 0.0 }
0x1e93   : > { %13522 = vmatmul.mubr.msk.f32.vlgmr.msra.gmra.mrb[96].mxu0 %vm6055_vm2, %v10137_v50 }
0x1e94   : > { %16863 = vmatpush3.bf16.msra.mxu0 %v20114_v1  ;;  %15256 = vmatprep.mubr.msk.f32.mxu0 %vm18963_vm0, %v21877_v29 }
0x1e95   : > { %16864 = vmatprep.subr.bf16.mxu0 %v21878_v0 }
0x1e98   : > { %16866 = vmatpush3.bf16.msra.mxu0 %v20129_v17 }
0x1e99   : > { %16867 = vmatprep.subr.bf16.mxu0 %v21878_v0 }
0x1e9c   : > { %16869 = vmatpush3.bf16.msra.mxu0 %v20143_v21 }
0x1e9d   : > { %16870 = vmatprep.subr.bf16.mxu0 %v21878_v0 }
0x1ea0   : > { %16872 = vmatpush3.bf16.msra.mxu0 %v20155_v26 }
0x1ea1   : > { %16873 = vmatprep.subr.bf16.mxu0 %v21878_v0 }
0x1ea4   : > { %16875 = vmatpush3.bf16.msra.mxu0 %v20167_v31 }
0x1ea5   : > { %16876 = vmatprep.subr.bf16.mxu0 %v21878_v0 }
0x1ea8   : > { %16878 = vmatpush3.bf16.msra.mxu0 %v20179_v45 }
0x1ea9   : > { %16879 = vmatprep.subr.bf16.mxu0 %v21878_v0 }
0x1eac   : > { %16881 = vmatpush3.bf16.msra.mxu0 %v20202_v18 }
0x1ead   : > { %16882 = vmatprep.subr.bf16.mxu0 %v21878_v0 }
0x1eb0   : > { %16884 = vmatpush3.bf16.msra.mxu0 %v20216_v25 }
0x1eb1   : > { %16926 = vmatprep.subr.bf16.mxu0 %v20265_v42 }
0x1eb3   : > { %15257 = vmatmul.mubr.f32.vlgmr.msra.gmra.mrb[98].mxu0 %v5918_v34 }
0x1eb4   : > { %16928 = vmatpush1.bf16.msra.mxu0 %v20269_v3  ;;  %10519 = vmatprep.mubr.f32.mxu0 %v21877_v29 }
0x1eb5   : > { %16930 = vmatprep.subr.bf16.mxu0 %v20271_v5 }
0x1eb8   : > { %16932 = vmatpush1.bf16.msra.mxu0 %v20275_v24 }
0x1eb9   : > { %16934 = vmatprep.subr.bf16.mxu0 %v20279_v55 }
0x1ebc   : > { %16936 = vmatpush1.bf16.msra.mxu0 %v20283_v30 }
0x1ebd   : > { %16938 = vmatprep.subr.bf16.mxu0 %v20293_v52 }
0x1ec0   : > { %16940 = vmatpush1.bf16.msra.mxu0 %v20295_v51 }
0x1ec1   : > { %16941 = vmatprep.subr.bf16.mxu0 %v21878_v0 }
0x1f66   : > { %v10207_v62 = vpop.f32.mrb[96].mxu0 }
0x1f67   : > { %v10208_v13 = vadd.f32 %v10207_v62, %v20375_v2  ;;  %v10209_v60 = vpop.f32.mrb[97].mxu0  ;;  %v1583_v62 = vrot.slane %v21164_v48, %v20519_v10 }
0x1f68   : > { %v10210_v35 = vadd.f32 %v10209_v60, %v20378_v54 }
0x1f6a   : > { %v10214_v6 = vcombine.low %v10208_v13, %v10210_v35  ;;  %v21884_v13 = vld [vmem:[#allocation25_spill] sm:$0xff] }
0x1f6b   : > { %v5680_v60 = vadd.f32 %v21884_v13, %v1583_v62 }
0x1f6c   : > { %13523 = vst.sshfl [vmem:[%s20385_s11 + $0x68] sm:$0x33 pattern:$0x76325410] %v10214_v6 }
0x1f6d   : > { %v5921_v35 = vmax.f32 %v5680_v60, 0.0 }
0x1f86   : > { %v10290_v57 = vpop.f32.mrb[98].mxu0 }
0x1f87   : > { %v10291_v38 = vadd.f32 %v21257_v47, %v10290_v57  ;;  %v15258_v32 = vpop.f32.mrb[99].mxu0 }
0x1f89   : > { %v10294_v44 = vmax.f32 %v10291_v38, 0.0 }
0x1f8b   : > { %13524 = vmatmul.mubr.msk.f32.vlgmr.msra.gmra.mrb[98].mxu1 %vm6055_vm2, %v10294_v44 }
0x1f8c   : > { %16903 = vmatpush3.bf16.msra.mxu1 %v20114_v1  ;;  %15291 = vmatprep.mubr.msk.f32.mxu1 %vm18963_vm0, %v21877_v29 }
0x1f8d   : > { %16904 = vmatprep.subr.bf16.mxu1 %v21878_v0 }
0x1f90   : > { %16906 = vmatpush3.bf16.msra.mxu1 %v20129_v17 }
0x1f91   : > { %16907 = vmatprep.subr.bf16.mxu1 %v21878_v0 }
0x1f94   : > { %16909 = vmatpush3.bf16.msra.mxu1 %v20143_v21 }
0x1f95   : > { %16910 = vmatprep.subr.bf16.mxu1 %v21878_v0 }
0x1f98   : > { %16912 = vmatpush3.bf16.msra.mxu1 %v20155_v26 }
0x1f99   : > { %16913 = vmatprep.subr.bf16.mxu1 %v21878_v0 }
0x1f9c   : > { %16915 = vmatpush3.bf16.msra.mxu1 %v20167_v31 }
0x1f9d   : > { %16916 = vmatprep.subr.bf16.mxu1 %v21878_v0 }
0x1fa0   : > { %16918 = vmatpush3.bf16.msra.mxu1 %v20179_v45 }
0x1fa1   : > { %16919 = vmatprep.subr.bf16.mxu1 %v21878_v0 }
0x1fa4   : > { %16921 = vmatpush3.bf16.msra.mxu1 %v20202_v18 }
0x1fa5   : > { %16922 = vmatprep.subr.bf16.mxu1 %v21878_v0 }
0x1fa8   : > { %16924 = vmatpush3.bf16.msra.mxu1 %v20216_v25 }
0x1fa9   : > { %16966 = vmatprep.subr.bf16.mxu1 %v20265_v42 }
0x1fab   : > { %15292 = vmatmul.mubr.f32.vlgmr.msra.gmra.mrb[100].mxu1 %v5919_v20 }
0x1fac   : > { %16968 = vmatpush1.bf16.msra.mxu1 %v20269_v3  ;;  %10676 = vmatprep.mubr.f32.mxu1 %v21877_v29 }
0x1fad   : > { %16970 = vmatprep.subr.bf16.mxu1 %v20271_v5 }
0x1fb0   : > { %16972 = vmatpush1.bf16.msra.mxu1 %v20275_v24 }
0x1fb1   : > { %16974 = vmatprep.subr.bf16.mxu1 %v20279_v55 }
0x1fb4   : > { %16976 = vmatpush1.bf16.msra.mxu1 %v20283_v30 }
0x1fb5   : > { %16978 = vmatprep.subr.bf16.mxu1 %v20293_v52 }
0x1fb8   : > { %16980 = vmatpush1.bf16.msra.mxu1 %v20295_v51 }
0x1fb9   : > { %16981 = vmatprep.subr.bf16.mxu1 %v21878_v0 }
0x205e   : > { %v10364_v12 = vpop.f32.mrb[98].mxu1 }
0x205f   : > { %v10365_v27 = vadd.f32 %v10364_v12, %v20375_v2  ;;  %v10366_v23 = vpop.f32.mrb[99].mxu1 }
0x2060   : > { %v10367_v41 = vadd.f32 %v10366_v23, %v20378_v54  ;;  %v21885_v23 = vld [vmem:[#allocation27_spill] sm:$0xff] }
0x2062   : > { %v10371_v43 = vcombine.low %v10365_v27, %v10367_v41  ;;  %v1587_v27 = vrot.slane %v21164_v48, %v20557_v56 }
0x2064   : > { %13525 = vst.sshfl [vmem:[%s20385_s11 + $0x6c] sm:$0x33 pattern:$0x76325410] %v10371_v43  ;;  %v5682_v41 = vadd.f32 %v21885_v23, %v1587_v27 }
0x2066   : > { %v5922_v43 = vmax.f32 %v5682_v41, 0.0 }
0x207e   : > { %v10447_v40 = vpop.f32.mrb[100].mxu1 }
0x207f   : > { %v10448_v16 = vadd.f32 %v21257_v47, %v10447_v40  ;;  %v15293_v11 = vpop.f32.mrb[101].mxu1 }
0x2081   : > { %v10451_v7 = vmax.f32 %v10448_v16, 0.0 }
0x2083   : > { %13526 = vmatmul.mubr.msk.f32.vlgmr.msra.gmra.mrb[100].mxu0 %vm6055_vm2, %v10451_v7 }
0x2084   : > { %16943 = vmatpush3.bf16.msra.mxu0 %v20114_v1  ;;  %15326 = vmatprep.mubr.msk.f32.mxu0 %vm18963_vm0, %v21877_v29 }
0x2085   : > { %16944 = vmatprep.subr.bf16.mxu0 %v21878_v0 }
0x2088   : > { %16946 = vmatpush3.bf16.msra.mxu0 %v20129_v17 }
0x2089   : > { %16947 = vmatprep.subr.bf16.mxu0 %v21878_v0 }
0x208c   : > { %16949 = vmatpush3.bf16.msra.mxu0 %v20143_v21 }
0x208d   : > { %16950 = vmatprep.subr.bf16.mxu0 %v21878_v0 }
0x2090   : > { %16952 = vmatpush3.bf16.msra.mxu0 %v20155_v26 }
0x2091   : > { %16953 = vmatprep.subr.bf16.mxu0 %v21878_v0 }
0x2094   : > { %16955 = vmatpush3.bf16.msra.mxu0 %v20167_v31 }
0x2095   : > { %16956 = vmatprep.subr.bf16.mxu0 %v21878_v0 }
0x2098   : > { %16958 = vmatpush3.bf16.msra.mxu0 %v20179_v45 }
0x2099   : > { %16959 = vmatprep.subr.bf16.mxu0 %v21878_v0 }
0x209c   : > { %16961 = vmatpush3.bf16.msra.mxu0 %v20202_v18 }
0x209d   : > { %16962 = vmatprep.subr.bf16.mxu0 %v21878_v0 }
0x20a0   : > { %16964 = vmatpush3.bf16.msra.mxu0 %v20216_v25 }
0x20a1   : > { %17006 = vmatprep.subr.bf16.mxu0 %v20265_v42 }
0x20a3   : > { %15327 = vmatmul.mubr.f32.vlgmr.msra.gmra.mrb[102].mxu0 %v5920_v53 }
0x20a4   : > { %17008 = vmatpush1.bf16.msra.mxu0 %v20269_v3  ;;  %10833 = vmatprep.mubr.f32.mxu0 %v21877_v29 }
0x20a5   : > { %17010 = vmatprep.subr.bf16.mxu0 %v20271_v5 }
0x20a8   : > { %17012 = vmatpush1.bf16.msra.mxu0 %v20275_v24 }
0x20a9   : > { %17014 = vmatprep.subr.bf16.mxu0 %v20279_v55 }
0x20ac   : > { %17016 = vmatpush1.bf16.msra.mxu0 %v20283_v30 }
0x20ad   : > { %17018 = vmatprep.subr.bf16.mxu0 %v20293_v52 }
0x20b0   : > { %17020 = vmatpush1.bf16.msra.mxu0 %v20295_v51 }
0x20b1   : > { %17021 = vmatprep.subr.bf16.mxu0 %v21878_v0 }
0x2156   : > { %v10521_v39 = vpop.f32.mrb[100].mxu0 }
0x2157   : > { %v10522_v8 = vadd.f32 %v10521_v39, %v20375_v2  ;;  %v10523_v19 = vpop.f32.mrb[101].mxu0  ;;  %v21449_v39 = vld [vmem:[%s19345_s26 + $0x20] sm:$0xff] }
0x2158   : > { %v10524_v28 = vadd.f32 %v10523_v19, %v20378_v54  ;;  %v21886_v19 = vld [vmem:[#allocation28_spill] sm:$0xff] }
0x215a   : > { %v10528_v37 = vcombine.low %v10522_v8, %v10524_v28  ;;  %v1591_v8 = vrot.slane %v21449_v39, %v19435_v61 }
0x215c   : > { %13527 = vst.sshfl [vmem:[%s20385_s11 + $0x70] sm:$0x33 pattern:$0x76325410] %v10528_v37  ;;  %v5721_v28 = vadd.f32 %v21886_v19, %v1591_v8 }
0x215e   : > { %v5923_v37 = vmax.f32 %v5721_v28, 0.0 }
0x2176   : > { %v10604_v50 = vpop.f32.mrb[102].mxu0 }
0x2177   : > { %v10605_v15 = vadd.f32 %v21257_v47, %v10604_v50  ;;  %v15328_v4 = vpop.f32.mrb[103].mxu0 }
0x2179   : > { %v10608_v34 = vmax.f32 %v10605_v15, 0.0 }
0x217b   : > { %13528 = vmatmul.mubr.msk.f32.vlgmr.msra.gmra.mrb[102].mxu1 %vm6055_vm2, %v10608_v34 }
0x217c   : > { %16983 = vmatpush3.bf16.msra.mxu1 %v20114_v1  ;;  %15361 = vmatprep.mubr.msk.f32.mxu1 %vm18963_vm0, %v21877_v29 }
0x217d   : > { %16984 = vmatprep.subr.bf16.mxu1 %v21878_v0 }
0x2180   : > { %16986 = vmatpush3.bf16.msra.mxu1 %v20129_v17 }
0x2181   : > { %16987 = vmatprep.subr.bf16.mxu1 %v21878_v0 }
0x2184   : > { %16989 = vmatpush3.bf16.msra.mxu1 %v20143_v21 }
0x2185   : > { %16990 = vmatprep.subr.bf16.mxu1 %v21878_v0 }
0x2188   : > { %16992 = vmatpush3.bf16.msra.mxu1 %v20155_v26 }
0x2189   : > { %16993 = vmatprep.subr.bf16.mxu1 %v21878_v0 }
0x218c   : > { %16995 = vmatpush3.bf16.msra.mxu1 %v20167_v31 }
0x218d   : > { %16996 = vmatprep.subr.bf16.mxu1 %v21878_v0 }
0x2190   : > { %16998 = vmatpush3.bf16.msra.mxu1 %v20179_v45 }
0x2191   : > { %16999 = vmatprep.subr.bf16.mxu1 %v21878_v0 }
0x2194   : > { %17001 = vmatpush3.bf16.msra.mxu1 %v20202_v18 }
0x2195   : > { %17002 = vmatprep.subr.bf16.mxu1 %v21878_v0 }
0x2198   : > { %17004 = vmatpush3.bf16.msra.mxu1 %v20216_v25 }
0x2199   : > { %17046 = vmatprep.subr.bf16.mxu1 %v20265_v42 }
0x219b   : > { %15362 = vmatmul.mubr.f32.vlgmr.msra.gmra.mrb[104].mxu1 %v5921_v35 }
0x219c   : > { %17048 = vmatpush1.bf16.msra.mxu1 %v20269_v3  ;;  %10990 = vmatprep.mubr.f32.mxu1 %v21877_v29 }
0x219d   : > { %17050 = vmatprep.subr.bf16.mxu1 %v20271_v5 }
0x21a0   : > { %17052 = vmatpush1.bf16.msra.mxu1 %v20275_v24 }
0x21a1   : > { %17054 = vmatprep.subr.bf16.mxu1 %v20279_v55 }
0x21a4   : > { %17056 = vmatpush1.bf16.msra.mxu1 %v20283_v30 }
0x21a5   : > { %17058 = vmatprep.subr.bf16.mxu1 %v20293_v52 }
0x21a8   : > { %17060 = vmatpush1.bf16.msra.mxu1 %v20295_v51 }
0x21a9   : > { %17061 = vmatprep.subr.bf16.mxu1 %v21878_v0 }
0x224e   : > { %v10678_v6 = vpop.f32.mrb[102].mxu1 }
0x224f   : > { %v10679_v57 = vadd.f32 %v10678_v6, %v20375_v2  ;;  %v10680_v38 = vpop.f32.mrb[103].mxu1 }
0x2250   : > { %v10681_v32 = vadd.f32 %v10680_v38, %v20378_v54  ;;  %v21887_v38 = vld [vmem:[#allocation30_spill] sm:$0xff] }
0x2252   : > { %v10685_v44 = vcombine.low %v10679_v57, %v10681_v32  ;;  %v1595_v57 = vrot.slane %v21449_v39, %v19438_v63 }
0x2254   : > { %13529 = vst.sshfl [vmem:[%s20385_s11 + $0x74] sm:$0x33 pattern:$0x76325410] %v10685_v44  ;;  %v5723_v32 = vadd.f32 %v21887_v38, %v1595_v57 }
0x2256   : > { %v5924_v44 = vmax.f32 %v5723_v32, 0.0  ;;  %v1607_v32 = vrot.slane %v21449_v39, %v20443_v22 }
0x226e   : > { %v10761_v59 = vpop.f32.mrb[104].mxu1 }
0x226f   : > { %v10762_v46 = vadd.f32 %v21257_v47, %v10761_v59  ;;  %v15363_v20 = vpop.f32.mrb[105].mxu1 }
0x2271   : > { %v10765_v12 = vmax.f32 %v10762_v46, 0.0 }
0x2273   : > { %13530 = vmatmul.mubr.msk.f32.vlgmr.msra.gmra.mrb[104].mxu0 %vm6055_vm2, %v10765_v12 }
0x2274   : > { %17023 = vmatpush3.bf16.msra.mxu0 %v20114_v1  ;;  %15396 = vmatprep.mubr.msk.f32.mxu0 %vm18963_vm0, %v21877_v29 }
0x2275   : > { %17024 = vmatprep.subr.bf16.mxu0 %v21878_v0 }
0x2278   : > { %17026 = vmatpush3.bf16.msra.mxu0 %v20129_v17 }
0x2279   : > { %17027 = vmatprep.subr.bf16.mxu0 %v21878_v0 }
0x227c   : > { %17029 = vmatpush3.bf16.msra.mxu0 %v20143_v21 }
0x227d   : > { %17030 = vmatprep.subr.bf16.mxu0 %v21878_v0 }
0x2280   : > { %17032 = vmatpush3.bf16.msra.mxu0 %v20155_v26 }
0x2281   : > { %17033 = vmatprep.subr.bf16.mxu0 %v21878_v0 }
0x2284   : > { %17035 = vmatpush3.bf16.msra.mxu0 %v20167_v31 }
0x2285   : > { %17036 = vmatprep.subr.bf16.mxu0 %v21878_v0 }
0x2288   : > { %17038 = vmatpush3.bf16.msra.mxu0 %v20179_v45 }
0x2289   : > { %17039 = vmatprep.subr.bf16.mxu0 %v21878_v0 }
0x228c   : > { %17041 = vmatpush3.bf16.msra.mxu0 %v20202_v18 }
0x228d   : > { %17042 = vmatprep.subr.bf16.mxu0 %v21878_v0 }
0x2290   : > { %17044 = vmatpush3.bf16.msra.mxu0 %v20216_v25 }
0x2291   : > { %17086 = vmatprep.subr.bf16.mxu0 %v20265_v42 }
0x2293   : > { %15397 = vmatmul.mubr.f32.vlgmr.msra.gmra.mrb[106].mxu0 %v5922_v43 }
0x2294   : > { %17088 = vmatpush1.bf16.msra.mxu0 %v20269_v3  ;;  %11147 = vmatprep.mubr.f32.mxu0 %v21877_v29 }
0x2295   : > { %17090 = vmatprep.subr.bf16.mxu0 %v20271_v5 }
0x2298   : > { %17092 = vmatpush1.bf16.msra.mxu0 %v20275_v24 }
0x2299   : > { %17094 = vmatprep.subr.bf16.mxu0 %v20279_v55 }
0x229c   : > { %17096 = vmatpush1.bf16.msra.mxu0 %v20283_v30 }
0x229d   : > { %17098 = vmatprep.subr.bf16.mxu0 %v20293_v52 }
0x22a0   : > { %17100 = vmatpush1.bf16.msra.mxu0 %v20295_v51 }
0x22a1   : > { %17101 = vmatprep.subr.bf16.mxu0 %v21878_v0 }
0x2346   : > { %v10835_v48 = vpop.f32.mrb[104].mxu0 }
0x2347   : > { %v10836_v40 = vadd.f32 %v10835_v48, %v20375_v2  ;;  %v10837_v16 = vpop.f32.mrb[105].mxu0  ;;  %v1599_v48 = vrot.slane %v21449_v39, %v20352_v33 }
0x2348   : > { %v10838_v11 = vadd.f32 %v10837_v16, %v20378_v54 }
0x234a   : > { %v10842_v7 = vcombine.low %v10836_v40, %v10838_v11  ;;  %v21888_v40 = vld [vmem:[#allocation29_spill] sm:$0xff] }
0x234b   : > { %v5762_v16 = vadd.f32 %v21888_v40, %v1599_v48  ;;  %v1611_v40 = vrot.slane %v21449_v39, %v20481_v14 }
0x234c   : > { %13531 = vst.sshfl [vmem:[%s20385_s11 + $0x78] sm:$0x33 pattern:$0x76325410] %v10842_v7 }
0x234d   : > { %v5925_v11 = vmax.f32 %v5762_v16, 0.0  ;;  %v21891_v16 = vld [vmem:[#allocation34_spill] sm:$0xff] }
0x2366   : > { %v10918_v36 = vpop.f32.mrb[106].mxu0 }
0x2367   : > { %v10919_v58 = vadd.f32 %v21257_v47, %v10918_v36  ;;  %v15398_v49 = vpop.f32.mrb[107].mxu0 }
0x2369   : > { %v10922_v53 = vmax.f32 %v10919_v58, 0.0 }
0x236b   : > { %13532 = vmatmul.mubr.msk.f32.vlgmr.msra.gmra.mrb[106].mxu1 %vm6055_vm2, %v10922_v53 }
0x236c   : > { %17063 = vmatpush3.bf16.msra.mxu1 %v20114_v1  ;;  %15431 = vmatprep.mubr.msk.f32.mxu1 %vm18963_vm0, %v21877_v29 }
0x236d   : > { %17064 = vmatprep.subr.bf16.mxu1 %v21878_v0 }
0x2370   : > { %17066 = vmatpush3.bf16.msra.mxu1 %v20129_v17 }
0x2371   : > { %17067 = vmatprep.subr.bf16.mxu1 %v21878_v0 }
0x2374   : > { %17069 = vmatpush3.bf16.msra.mxu1 %v20143_v21 }
0x2375   : > { %17070 = vmatprep.subr.bf16.mxu1 %v21878_v0 }
0x2378   : > { %17072 = vmatpush3.bf16.msra.mxu1 %v20155_v26 }
0x2379   : > { %17073 = vmatprep.subr.bf16.mxu1 %v21878_v0 }
0x237c   : > { %17075 = vmatpush3.bf16.msra.mxu1 %v20167_v31 }
0x237d   : > { %17076 = vmatprep.subr.bf16.mxu1 %v21878_v0 }
0x2380   : > { %17078 = vmatpush3.bf16.msra.mxu1 %v20179_v45 }
0x2381   : > { %17079 = vmatprep.subr.bf16.mxu1 %v21878_v0 }
0x2384   : > { %17081 = vmatpush3.bf16.msra.mxu1 %v20202_v18 }
0x2385   : > { %17082 = vmatprep.subr.bf16.mxu1 %v21878_v0 }
0x2388   : > { %17084 = vmatpush3.bf16.msra.mxu1 %v20216_v25 }
0x2389   : > { %17126 = vmatprep.subr.bf16.mxu1 %v20265_v42 }
0x238b   : > { %15432 = vmatmul.mubr.f32.vlgmr.msra.gmra.mrb[108].mxu1 %v5923_v37  ;;  %v1603_v37 = vrot.slane %v21449_v39, %v20405_v9 }
0x238c   : > { %17128 = vmatpush1.bf16.msra.mxu1 %v20269_v3  ;;  %11304 = vmatprep.mubr.f32.mxu1 %v21877_v29 }
0x238d   : > { %17130 = vmatprep.subr.bf16.mxu1 %v20271_v5 }
0x2390   : > { %17132 = vmatpush1.bf16.msra.mxu1 %v20275_v24 }
0x2391   : > { %17134 = vmatprep.subr.bf16.mxu1 %v20279_v55 }
0x2394   : > { %17136 = vmatpush1.bf16.msra.mxu1 %v20283_v30 }
0x2395   : > { %17138 = vmatprep.subr.bf16.mxu1 %v20293_v52 }
0x2398   : > { %17140 = vmatpush1.bf16.msra.mxu1 %v20295_v51 }
0x2399   : > { %17141 = vmatprep.subr.bf16.mxu1 %v21878_v0 }
0x243e   : > { %v10992_v50 = vpop.f32.mrb[106].mxu1 }
0x243f   : > { %v10993_v15 = vadd.f32 %v10992_v50, %v20375_v2  ;;  %v10994_v4 = vpop.f32.mrb[107].mxu1  ;;  %v21889_v50 = vld [vmem:[#allocation31_spill] sm:$0xff] }
0x2440   : > { %v10995_v34 = vadd.f32 %v10994_v4, %v20378_v54 }
0x2442   : > { %v10999_v62 = vcombine.low %v10993_v15, %v10995_v34  ;;  %v5764_v15 = vadd.f32 %v21889_v50, %v1603_v37  ;;  %v1615_v37 = vrot.slane %v21449_v39, %v20519_v10  ;;  %v21892_v50 = vld [vmem:[#allocation33_spill] sm:$0xff] }
0x2444   : > { %13533 = vst.sshfl [vmem:[%s20385_s11 + $0x7c] sm:$0x33 pattern:$0x76325410] %v10999_v62  ;;  %v5926_v4 = vmax.f32 %v5764_v15, 0.0  ;;  %v5844_v15 = vadd.f32 %v21892_v50, %v1615_v37 }
0x245e   : > { %v11075_v13 = vpop.f32.mrb[108].mxu1 }
0x245f   : > { %v11076_v60 = vadd.f32 %v21257_v47, %v11075_v13  ;;  %v15433_v35 = vpop.f32.mrb[109].mxu1 }
0x2461   : > { %v11079_v6 = vmax.f32 %v11076_v60, 0.0 }
0x2463   : > { %13534 = vmatmul.mubr.msk.f32.vlgmr.msra.gmra.mrb[108].mxu0 %vm6055_vm2, %v11079_v6 }
0x2464   : > { %17103 = vmatpush3.bf16.msra.mxu0 %v20114_v1  ;;  %15466 = vmatprep.mubr.msk.f32.mxu0 %vm18963_vm0, %v21877_v29 }
0x2465   : > { %17104 = vmatprep.subr.bf16.mxu0 %v21878_v0 }
0x2468   : > { %17106 = vmatpush3.bf16.msra.mxu0 %v20129_v17 }
0x2469   : > { %17107 = vmatprep.subr.bf16.mxu0 %v21878_v0 }
0x246c   : > { %17109 = vmatpush3.bf16.msra.mxu0 %v20143_v21 }
0x246d   : > { %17110 = vmatprep.subr.bf16.mxu0 %v21878_v0 }
0x2470   : > { %17112 = vmatpush3.bf16.msra.mxu0 %v20155_v26 }
0x2471   : > { %17113 = vmatprep.subr.bf16.mxu0 %v21878_v0 }
0x2474   : > { %17115 = vmatpush3.bf16.msra.mxu0 %v20167_v31 }
0x2475   : > { %17116 = vmatprep.subr.bf16.mxu0 %v21878_v0 }
0x2478   : > { %17118 = vmatpush3.bf16.msra.mxu0 %v20179_v45 }
0x2479   : > { %17119 = vmatprep.subr.bf16.mxu0 %v21878_v0 }
0x247c   : > { %17121 = vmatpush3.bf16.msra.mxu0 %v20202_v18 }
0x247d   : > { %17122 = vmatprep.subr.bf16.mxu0 %v21878_v0 }
0x2480   : > { %17124 = vmatpush3.bf16.msra.mxu0 %v20216_v25 }
0x2481   : > { %17166 = vmatprep.subr.bf16.mxu0 %v20265_v42 }
0x2483   : > { %15467 = vmatmul.mubr.f32.vlgmr.msra.gmra.mrb[110].mxu0 %v5924_v44  ;;  %v21890_v44 = vld [vmem:[#allocation32_spill] sm:$0xff] }
0x2484   : > { %17168 = vmatpush1.bf16.msra.mxu0 %v20269_v3  ;;  %11461 = vmatprep.mubr.f32.mxu0 %v21877_v29 }
0x2485   : > { %17170 = vmatprep.subr.bf16.mxu0 %v20271_v5 }
0x2488   : > { %17172 = vmatpush1.bf16.msra.mxu0 %v20275_v24 }
0x2489   : > { %17174 = vmatprep.subr.bf16.mxu0 %v20279_v55 }
0x248c   : > { %17176 = vmatpush1.bf16.msra.mxu0 %v20283_v30 }
0x248d   : > { %17178 = vmatprep.subr.bf16.mxu0 %v20293_v52 }
0x2490   : > { %17180 = vmatpush1.bf16.msra.mxu0 %v20295_v51 }
0x2491   : > { %17181 = vmatprep.subr.bf16.mxu0 %v21878_v0 }
0x2536   : > { %v11149_v63 = vpop.f32.mrb[108].mxu0 }
0x2537   : > { %v11150_v59 = vadd.f32 %v11149_v63, %v20375_v2  ;;  %v11151_v46 = vpop.f32.mrb[109].mxu0  ;;  %v5803_v63 = vadd.f32 %v21890_v44, %v1607_v32 }
0x2538   : > { %v11152_v20 = vadd.f32 %v11151_v46, %v20378_v54 }
0x253a   : > { %v11156_v12 = vcombine.low %v11150_v59, %v11152_v20  ;;  %v5927_v59 = vmax.f32 %v5803_v63, 0.0 }
0x253c   : > { %13535 = vst.sshfl [vmem:[%s20385_s11 + $0x80] sm:$0x33 pattern:$0x76325410] %v11156_v12 }
0x2556   : > { %v11232_v27 = vpop.f32.mrb[110].mxu0 }
0x2557   : > { %v11233_v23 = vadd.f32 %v21257_v47, %v11232_v27  ;;  %v15468_v41 = vpop.f32.mrb[111].mxu0 }
0x2559   : > { %v11236_v43 = vmax.f32 %v11233_v23, 0.0 }
0x255b   : > { %13536 = vmatmul.mubr.msk.f32.vlgmr.msra.gmra.mrb[110].mxu1 %vm6055_vm2, %v11236_v43 }
0x255c   : > { %17143 = vmatpush3.bf16.msra.mxu1 %v20114_v1  ;;  %15501 = vmatprep.mubr.msk.f32.mxu1 %vm18963_vm0, %v21877_v29 }
0x255d   : > { %17144 = vmatprep.subr.bf16.mxu1 %v21878_v0 }
0x2560   : > { %17146 = vmatpush3.bf16.msra.mxu1 %v20129_v17 }
0x2561   : > { %17147 = vmatprep.subr.bf16.mxu1 %v21878_v0 }
0x2564   : > { %17149 = vmatpush3.bf16.msra.mxu1 %v20143_v21 }
0x2565   : > { %17150 = vmatprep.subr.bf16.mxu1 %v21878_v0 }
0x2568   : > { %17152 = vmatpush3.bf16.msra.mxu1 %v20155_v26 }
0x2569   : > { %17153 = vmatprep.subr.bf16.mxu1 %v21878_v0 }
0x256c   : > { %17155 = vmatpush3.bf16.msra.mxu1 %v20167_v31 }
0x256d   : > { %17156 = vmatprep.subr.bf16.mxu1 %v21878_v0 }
0x2570   : > { %17158 = vmatpush3.bf16.msra.mxu1 %v20179_v45 }
0x2571   : > { %17159 = vmatprep.subr.bf16.mxu1 %v21878_v0 }
0x2574   : > { %17161 = vmatpush3.bf16.msra.mxu1 %v20202_v18 }
0x2575   : > { %17162 = vmatprep.subr.bf16.mxu1 %v21878_v0 }
0x2578   : > { %17164 = vmatpush3.bf16.msra.mxu1 %v20216_v25 }
0x2579   : > { %17206 = vmatprep.subr.bf16.mxu1 %v20265_v42 }
0x257b   : > { %15502 = vmatmul.mubr.f32.vlgmr.msra.gmra.mrb[112].mxu1 %v5925_v11  ;;  %v5805_v11 = vadd.f32 %v21891_v16, %v1611_v40 }
0x257c   : > { %17208 = vmatpush1.bf16.msra.mxu1 %v20269_v3  ;;  %11618 = vmatprep.mubr.f32.mxu1 %v21877_v29 }
0x257d   : > { %17210 = vmatprep.subr.bf16.mxu1 %v20271_v5 }
0x2580   : > { %17212 = vmatpush1.bf16.msra.mxu1 %v20275_v24 }
0x2581   : > { %17214 = vmatprep.subr.bf16.mxu1 %v20279_v55 }
0x2584   : > { %17216 = vmatpush1.bf16.msra.mxu1 %v20283_v30 }
0x2585   : > { %17218 = vmatprep.subr.bf16.mxu1 %v20293_v52 }
0x2588   : > { %17220 = vmatpush1.bf16.msra.mxu1 %v20295_v51 }
0x2589   : > { %17221 = vmatprep.subr.bf16.mxu1 %v21878_v0 }
0x262e   : > { %v11306_v33 = vpop.f32.mrb[110].mxu1 }
0x262f   : > { %v11307_v7 = vadd.f32 %v11306_v33, %v20375_v2  ;;  %v11308_v36 = vpop.f32.mrb[111].mxu1  ;;  %v5928_v33 = vmax.f32 %v5805_v11, 0.0 }
0x2630   : > { %v11309_v58 = vadd.f32 %v11308_v36, %v20378_v54 }
0x2632   : > { %v11313_v49 = vcombine.low %v11307_v7, %v11309_v58 }
0x2634   : > { %13537 = vst.sshfl [vmem:[%s20385_s11 + $0x84] sm:$0x33 pattern:$0x76325410] %v11313_v49 }
0x264e   : > { %v11389_v53 = vpop.f32.mrb[112].mxu1 }
0x264f   : > { %v11390_v8 = vadd.f32 %v21257_v47, %v11389_v53  ;;  %v15503_v19 = vpop.f32.mrb[113].mxu1 }
0x2651   : > { %v11393_v28 = vmax.f32 %v11390_v8, 0.0 }
0x2653   : > { %13538 = vmatmul.mubr.msk.f32.vlgmr.msra.gmra.mrb[112].mxu0 %vm6055_vm2, %v11393_v28 }
0x2654   : > { %17183 = vmatpush3.bf16.msra.mxu0 %v20114_v1  ;;  %15536 = vmatprep.mubr.msk.f32.mxu0 %vm18963_vm0, %v21877_v29 }
0x2655   : > { %17184 = vmatprep.subr.bf16.mxu0 %v21878_v0 }
0x2658   : > { %17186 = vmatpush3.bf16.msra.mxu0 %v20129_v17 }
0x2659   : > { %17187 = vmatprep.subr.bf16.mxu0 %v21878_v0 }
0x265c   : > { %17189 = vmatpush3.bf16.msra.mxu0 %v20143_v21 }
0x265d   : > { %17190 = vmatprep.subr.bf16.mxu0 %v21878_v0 }
0x2660   : > { %17192 = vmatpush3.bf16.msra.mxu0 %v20155_v26 }
0x2661   : > { %17193 = vmatprep.subr.bf16.mxu0 %v21878_v0 }
0x2664   : > { %17195 = vmatpush3.bf16.msra.mxu0 %v20167_v31 }
0x2665   : > { %17196 = vmatprep.subr.bf16.mxu0 %v21878_v0 }
0x2668   : > { %17198 = vmatpush3.bf16.msra.mxu0 %v20179_v45 }
0x2669   : > { %17199 = vmatprep.subr.bf16.mxu0 %v21878_v0 }
0x266c   : > { %17201 = vmatpush3.bf16.msra.mxu0 %v20202_v18 }
0x266d   : > { %17202 = vmatprep.subr.bf16.mxu0 %v21878_v0 }
0x2670   : > { %17204 = vmatpush3.bf16.msra.mxu0 %v20216_v25 }
0x2671   : > { %17246 = vmatprep.subr.bf16.mxu0 %v20265_v42 }
0x2673   : > { %15537 = vmatmul.mubr.f32.vlgmr.msra.gmra.mrb[114].mxu0 %v5926_v4  ;;  %v5929_v4 = vmax.f32 %v5844_v15, 0.0 }
0x2674   : > { %17248 = vmatpush1.bf16.msra.mxu0 %v20269_v3  ;;  %11775 = vmatprep.mubr.f32.mxu0 %v21877_v29 }
0x2675   : > { %17250 = vmatprep.subr.bf16.mxu0 %v20271_v5 }
0x2678   : > { %17252 = vmatpush1.bf16.msra.mxu0 %v20275_v24 }
0x2679   : > { %17254 = vmatprep.subr.bf16.mxu0 %v20279_v55 }
0x267c   : > { %17256 = vmatpush1.bf16.msra.mxu0 %v20283_v30 }
0x267d   : > { %17258 = vmatprep.subr.bf16.mxu0 %v20293_v52 }
0x2680   : > { %17260 = vmatpush1.bf16.msra.mxu0 %v20295_v51 }
0x2681   : > { %17261 = vmatprep.subr.bf16.mxu0 %v21878_v0 }
0x2726   : > { %v11463_v9 = vpop.f32.mrb[112].mxu0 }
0x2727   : > { %v11464_v34 = vadd.f32 %v11463_v9, %v20375_v2  ;;  %v11465_v62 = vpop.f32.mrb[113].mxu0 }
0x2728   : > { %v11466_v13 = vadd.f32 %v11465_v62, %v20378_v54 }
0x272a   : > { %v11470_v60 = vcombine.low %v11464_v34, %v11466_v13 }
0x272c   : > { %13539 = vst.sshfl [vmem:[%s20385_s11 + $0x88] sm:$0x33 pattern:$0x76325410] %v11470_v60 }
0x2746   : > { %v11546_v35 = vpop.f32.mrb[114].mxu0 }
0x2747   : > { %v11547_v6 = vadd.f32 %v21257_v47, %v11546_v35  ;;  %v15538_v57 = vpop.f32.mrb[115].mxu0 }
0x2749   : > { %v11550_v38 = vmax.f32 %v11547_v6, 0.0 }
0x274b   : > { %13540 = vmatmul.mubr.msk.f32.vlgmr.msra.gmra.mrb[114].mxu1 %vm6055_vm2, %v11550_v38  ;;  %v21893_v38 = vld [vmem:[#allocation35_spill] sm:$0xff] }
0x274c   : > { %17223 = vmatpush3.bf16.msra.mxu1 %v20114_v1  ;;  %15571 = vmatprep.mubr.msk.f32.mxu1 %vm18963_vm0, %v21877_v29 }
0x274d   : > { %17224 = vmatprep.subr.bf16.mxu1 %v21878_v0 }
0x2750   : > { %17226 = vmatpush3.bf16.msra.mxu1 %v20129_v17 }
0x2751   : > { %17227 = vmatprep.subr.bf16.mxu1 %v21878_v0 }
0x2754   : > { %17229 = vmatpush3.bf16.msra.mxu1 %v20143_v21 }
0x2755   : > { %17230 = vmatprep.subr.bf16.mxu1 %v21878_v0 }
0x2758   : > { %17232 = vmatpush3.bf16.msra.mxu1 %v20155_v26 }
0x2759   : > { %17233 = vmatprep.subr.bf16.mxu1 %v21878_v0 }
0x275c   : > { %17235 = vmatpush3.bf16.msra.mxu1 %v20167_v31 }
0x275d   : > { %17236 = vmatprep.subr.bf16.mxu1 %v21878_v0 }
0x2760   : > { %17238 = vmatpush3.bf16.msra.mxu1 %v20179_v45 }
0x2761   : > { %17239 = vmatprep.subr.bf16.mxu1 %v21878_v0 }
0x2764   : > { %17241 = vmatpush3.bf16.msra.mxu1 %v20202_v18 }
0x2765   : > { %17242 = vmatprep.subr.bf16.mxu1 %v21878_v0 }
0x2768   : > { %17244 = vmatpush3.bf16.msra.mxu1 %v20216_v25 }
0x2769   : > { %17286 = vmatprep.subr.bf16.mxu1 %v20265_v42 }
0x276b   : > { %15572 = vmatmul.mubr.f32.vlgmr.msra.gmra.mrb[116].mxu1 %v5927_v59 }
0x276c   : > { %17288 = vmatpush1.bf16.msra.mxu1 %v20269_v3  ;;  %11932 = vmatprep.mubr.f32.mxu1 %v21877_v29 }
0x276d   : > { %17290 = vmatprep.subr.bf16.mxu1 %v20271_v5 }
0x2770   : > { %17292 = vmatpush1.bf16.msra.mxu1 %v20275_v24 }
0x2771   : > { %17294 = vmatprep.subr.bf16.mxu1 %v20279_v55 }
0x2774   : > { %17296 = vmatpush1.bf16.msra.mxu1 %v20283_v30 }
0x2775   : > { %17298 = vmatprep.subr.bf16.mxu1 %v20293_v52 }
0x2778   : > { %17300 = vmatpush1.bf16.msra.mxu1 %v20295_v51 }
0x2779   : > { %17301 = vmatprep.subr.bf16.mxu1 %v21878_v0 }
0x281e   : > { %v11620_v22 = vpop.f32.mrb[114].mxu1 }
0x281f   : > { %v11621_v46 = vadd.f32 %v11620_v22, %v20375_v2  ;;  %v11622_v20 = vpop.f32.mrb[115].mxu1 }
0x2820   : > { %v11623_v12 = vadd.f32 %v11622_v20, %v20378_v54  ;;  %v21717_v20 = vld [vmem:[#allocation11] ss:$0 sm:$0xff] }
0x2822   : > { %v11627_v27 = vcombine.low %v11621_v46, %v11623_v12 }
0x2824   : > { %13541 = vst.sshfl [vmem:[%s20385_s11 + $0x8c] sm:$0x33 pattern:$0x76325410] %v11627_v27 }
0x283e   : > { %v11703_v23 = vpop.f32.mrb[116].mxu1 }
0x283f   : > { %v11704_v41 = vadd.f32 %v21257_v47, %v11703_v23  ;;  %v15573_v43 = vpop.f32.mrb[117].mxu1 }
0x2841   : > { %v11707_v48 = vmax.f32 %v11704_v41, 0.0  ;;  %v18615_v41 = vld [vmem:[%s19345_s26 + $0x28] sm:$0x3] }
0x2842   : > { %v1623_v43 = vrot.slane %v18615_v41, %v19435_v61 }
0x2843   : > { %13542 = vmatmul.mubr.msk.f32.vlgmr.msra.gmra.mrb[116].mxu0 %vm6055_vm2, %v11707_v48  ;;  %v21894_v48 = vld [vmem:[#allocation36_spill] sm:$0xff] }
0x2844   : > { %17263 = vmatpush3.bf16.msra.mxu0 %v20114_v1  ;;  %15606 = vmatprep.mubr.msk.f32.mxu0 %vm18963_vm0, %v21877_v29  ;;  %v5885_v40 = vadd.f32 %v21894_v48, %v1623_v43 }
0x2845   : > { %17264 = vmatprep.subr.bf16.mxu0 %v21878_v0 }
0x2846   : > { %v5931_v16 = vmax.f32 %v5885_v40, 0.0 }
0x2848   : > { %17266 = vmatpush3.bf16.msra.mxu0 %v20129_v17 }
0x2849   : > { %17267 = vmatprep.subr.bf16.mxu0 %v21878_v0 }
0x284c   : > { %17269 = vmatpush3.bf16.msra.mxu0 %v20143_v21 }
0x284d   : > { %17270 = vmatprep.subr.bf16.mxu0 %v21878_v0 }
0x2850   : > { %17272 = vmatpush3.bf16.msra.mxu0 %v20155_v26 }
0x2851   : > { %17273 = vmatprep.subr.bf16.mxu0 %v21878_v0 }
0x2854   : > { %17275 = vmatpush3.bf16.msra.mxu0 %v20167_v31 }
0x2855   : > { %17276 = vmatprep.subr.bf16.mxu0 %v21878_v0 }
0x2858   : > { %17278 = vmatpush3.bf16.msra.mxu0 %v20179_v45 }
0x2859   : > { %17279 = vmatprep.subr.bf16.mxu0 %v21878_v0 }
0x285c   : > { %17281 = vmatpush3.bf16.msra.mxu0 %v20202_v18 }
0x285d   : > { %17282 = vmatprep.subr.bf16.mxu0 %v21878_v0 }
0x2860   : > { %17284 = vmatpush3.bf16.msra.mxu0 %v20216_v25 }
0x2861   : > { %17326 = vmatprep.subr.bf16.mxu0 %v20265_v42 }
0x2863   : > { %15607 = vmatmul.mubr.f32.vlgmr.msra.gmra.mrb[118].mxu0 %v5928_v33 }
0x2864   : > { %17328 = vmatpush1.bf16.msra.mxu0 %v20269_v3  ;;  %12089 = vmatprep.mubr.f32.mxu0 %v21877_v29 }
0x2865   : > { %17330 = vmatprep.subr.bf16.mxu0 %v20271_v5 }
0x2868   : > { %17332 = vmatpush1.bf16.msra.mxu0 %v20275_v24 }
0x2869   : > { %17334 = vmatprep.subr.bf16.mxu0 %v20279_v55 }
0x286c   : > { %17336 = vmatpush1.bf16.msra.mxu0 %v20283_v30 }
0x286d   : > { %17338 = vmatprep.subr.bf16.mxu0 %v20293_v52 }
0x2870   : > { %17340 = vmatpush1.bf16.msra.mxu0 %v20295_v51 }
0x2871   : > { %17341 = vmatprep.subr.bf16.mxu0 %v21878_v0 }
0x2916   : > { %v11777_v14 = vpop.f32.mrb[116].mxu0 }
0x2917   : > { %v11778_v7 = vadd.f32 %v11777_v14, %v20375_v2  ;;  %v11779_v36 = vpop.f32.mrb[117].mxu0 }
0x2918   : > { %v11780_v58 = vadd.f32 %v11779_v36, %v20378_v54 }
0x291a   : > { %v11784_v49 = vcombine.low %v11778_v7, %v11780_v58 }
0x291c   : > { %13543 = vst.sshfl [vmem:[%s20385_s11 + $0x90] sm:$0x33 pattern:$0x76325410] %v11784_v49 }
0x2936   : > { %v11860_v53 = vpop.f32.mrb[118].mxu0 }
0x2937   : > { %v11861_v8 = vadd.f32 %v21257_v47, %v11860_v53  ;;  %v15608_v19 = vpop.f32.mrb[119].mxu0 }
0x2939   : > { %v11864_v28 = vmax.f32 %v11861_v8, 0.0 }
0x293b   : > { %13544 = vmatmul.mubr.msk.f32.vlgmr.msra.gmra.mrb[118].mxu1 %vm6055_vm2, %v11864_v28 }
0x293c   : > { %17303 = vmatpush3.bf16.msra.mxu1 %v20114_v1  ;;  %15641 = vmatprep.mubr.msk.f32.mxu1 %vm18963_vm0, %v21877_v29 }
0x293d   : > { %17304 = vmatprep.subr.bf16.mxu1 %v21878_v0 }
0x2940   : > { %17306 = vmatpush3.bf16.msra.mxu1 %v20129_v17 }
0x2941   : > { %17307 = vmatprep.subr.bf16.mxu1 %v21878_v0 }
0x2944   : > { %17309 = vmatpush3.bf16.msra.mxu1 %v20143_v21 }
0x2945   : > { %17310 = vmatprep.subr.bf16.mxu1 %v21878_v0 }
0x2948   : > { %17312 = vmatpush3.bf16.msra.mxu1 %v20155_v26 }
0x2949   : > { %17313 = vmatprep.subr.bf16.mxu1 %v21878_v0 }
0x294c   : > { %17315 = vmatpush3.bf16.msra.mxu1 %v20167_v31 }
0x294d   : > { %17316 = vmatprep.subr.bf16.mxu1 %v21878_v0 }
0x2950   : > { %17318 = vmatpush3.bf16.msra.mxu1 %v20179_v45 }
0x2951   : > { %17319 = vmatprep.subr.bf16.mxu1 %v21878_v0 }
0x2954   : > { %17321 = vmatpush3.bf16.msra.mxu1 %v20202_v18 }
0x2955   : > { %17322 = vmatprep.subr.bf16.mxu1 %v21878_v0 }
0x2958   : > { %17324 = vmatpush3.bf16.msra.mxu1 %v20216_v25 }
0x2959   : > { %17366 = vmatprep.subr.bf16.mxu1 %v20265_v42 }
0x295b   : > { %15642 = vmatmul.mubr.f32.vlgmr.msra.gmra.mrb[120].mxu1 %v5929_v4 }
0x295c   : > { %17368 = vmatpush1.bf16.msra.mxu1 %v20269_v3  ;;  %12246 = vmatprep.mubr.f32.mxu1 %v21877_v29 }
0x295d   : > { %17370 = vmatprep.subr.bf16.mxu1 %v20271_v5 }
0x2960   : > { %17372 = vmatpush1.bf16.msra.mxu1 %v20275_v24 }
0x2961   : > { %17374 = vmatprep.subr.bf16.mxu1 %v20279_v55 }
0x2964   : > { %17376 = vmatpush1.bf16.msra.mxu1 %v20283_v30 }
0x2965   : > { %17378 = vmatprep.subr.bf16.mxu1 %v20293_v52 }
0x2968   : > { %17380 = vmatpush1.bf16.msra.mxu1 %v20295_v51 }
0x2969   : > { %17381 = vmatprep.subr.bf16.mxu1 %v21878_v0 }
0x2a0e   : > { %v11934_v10 = vpop.f32.mrb[118].mxu1 }
0x2a0f   : > { %v11935_v9 = vadd.f32 %v11934_v10, %v20375_v2  ;;  %v11936_v34 = vpop.f32.mrb[119].mxu1 }
0x2a10   : > { %v11937_v62 = vadd.f32 %v11936_v34, %v20378_v54 }
0x2a12   : > { %v11941_v13 = vcombine.low %v11935_v9, %v11937_v62 }
0x2a14   : > { %13545 = vst.sshfl [vmem:[%s20385_s11 + $0x94] sm:$0x33 pattern:$0x76325410] %v11941_v13 }
0x2a2e   : > { %v12017_v60 = vpop.f32.mrb[120].mxu1 }
0x2a2f   : > { %v12018_v35 = vadd.f32 %v21257_v47, %v12017_v60  ;;  %v15643_v6 = vpop.f32.mrb[121].mxu1  ;;  %v1619_v47 = vrot.slane %v21449_v39, %v20557_v56 }
0x2a31   : > { %v12021_v57 = vmax.f32 %v12018_v35, 0.0  ;;  %v5846_v32 = vadd.f32 %v21893_v38, %v1619_v47 }
0x2a33   : > { %13546 = vmatmul.mubr.msk.f32.vlgmr.msra.gmra.mrb[120].mxu0 %vm6055_vm2, %v12021_v57  ;;  %v5930_v44 = vmax.f32 %v5846_v32, 0.0 }
0x2a34   : > { %17343 = vmatpush3.bf16.msra.mxu0 %v20114_v1  ;;  %15676 = vmatprep.mubr.msk.f32.mxu0 %vm18963_vm0, %v21877_v29 }
0x2a35   : > { %17344 = vmatprep.subr.bf16.mxu0 %v21878_v0 }
0x2a38   : > { %17346 = vmatpush3.bf16.msra.mxu0 %v20129_v17 }
0x2a39   : > { %17347 = vmatprep.subr.bf16.mxu0 %v21878_v0 }
0x2a3c   : > { %17349 = vmatpush3.bf16.msra.mxu0 %v20143_v21 }
0x2a3d   : > { %17350 = vmatprep.subr.bf16.mxu0 %v21878_v0 }
0x2a40   : > { %17352 = vmatpush3.bf16.msra.mxu0 %v20155_v26 }
0x2a41   : > { %17353 = vmatprep.subr.bf16.mxu0 %v21878_v0 }
0x2a44   : > { %17355 = vmatpush3.bf16.msra.mxu0 %v20167_v31 }
0x2a45   : > { %17356 = vmatprep.subr.bf16.mxu0 %v21878_v0 }
0x2a48   : > { %17358 = vmatpush3.bf16.msra.mxu0 %v20179_v45 }
0x2a49   : > { %17359 = vmatprep.subr.bf16.mxu0 %v21878_v0 }
0x2a4c   : > { %17361 = vmatpush3.bf16.msra.mxu0 %v20202_v18 }
0x2a4d   : > { %17362 = vmatprep.subr.bf16.mxu0 %v21878_v0 }
0x2a50   : > { %17364 = vmatpush3.bf16.msra.mxu0 %v20216_v25 }
0x2a51   : > { %17406 = vmatprep.subr.bf16.mxu0 %v20265_v42 }
0x2a53   : > { %15677 = vmatmul.mubr.f32.vlgmr.msra.gmra.mrb[122].mxu0 %v5930_v44 }
0x2a54   : > { %17408 = vmatpush1.bf16.msra.mxu0 %v20269_v3  ;;  %12403 = vmatprep.mubr.f32.mxu0 %v21877_v29 }
0x2a55   : > { %17410 = vmatprep.subr.bf16.mxu0 %v20271_v5 }
0x2a58   : > { %17412 = vmatpush1.bf16.msra.mxu0 %v20275_v24 }
0x2a59   : > { %17414 = vmatprep.subr.bf16.mxu0 %v20279_v55 }
0x2a5c   : > { %17416 = vmatpush1.bf16.msra.mxu0 %v20283_v30 }
0x2a5d   : > { %17418 = vmatprep.subr.bf16.mxu0 %v20293_v52 }
0x2a60   : > { %17420 = vmatpush1.bf16.msra.mxu0 %v20295_v51 }
0x2a61   : > { %17421 = vmatprep.subr.bf16.mxu0 %v21878_v0 }
0x2b06   : > { %v12091_v56 = vpop.f32.mrb[120].mxu0 }
0x2b07   : > { %v12092_v39 = vadd.f32 %v12091_v56, %v20375_v2  ;;  %v12093_v63 = vpop.f32.mrb[121].mxu0 }
0x2b08   : > { %v12094_v59 = vadd.f32 %v12093_v63, %v20378_v54 }
0x2b0a   : > { %v12098_v22 = vcombine.low %v12092_v39, %v12094_v59 }
0x2b0c   : > { %13547 = vst.sshfl [vmem:[%s20385_s11 + $0x98] sm:$0x33 pattern:$0x76325410] %v12098_v22 }
0x2b26   : > { %v12174_v46 = vpop.f32.mrb[122].mxu0 }
0x2b27   : > { %v12175_v12 = vadd.f32 %v21717_v20, %v12174_v46  ;;  %v15678_v27 = vpop.f32.mrb[123].mxu0 }
0x2b29   : > { %v12178_v23 = vmax.f32 %v12175_v12, 0.0 }
0x2b2b   : > { %13548 = vmatmul.mubr.msk.f32.vlgmr.msra.gmra.mrb[122].mxu1 %vm6055_vm2, %v12178_v23 }
0x2b2c   : > { %17383 = vmatpush3.bf16.msra.mxu1 %v20114_v1  ;;  %15711 = vmatprep.mubr.msk.f32.mxu1 %vm18963_vm0, %v21877_v29 }
0x2b2d   : > { %17384 = vmatprep.subr.bf16.mxu1 %v21878_v0 }
0x2b30   : > { %17386 = vmatpush3.bf16.msra.mxu1 %v20129_v17 }
0x2b31   : > { %17387 = vmatprep.subr.bf16.mxu1 %v21878_v0 }
0x2b34   : > { %17389 = vmatpush3.bf16.msra.mxu1 %v20143_v21 }
0x2b35   : > { %17390 = vmatprep.subr.bf16.mxu1 %v21878_v0 }
0x2b38   : > { %17392 = vmatpush3.bf16.msra.mxu1 %v20155_v26 }
0x2b39   : > { %17393 = vmatprep.subr.bf16.mxu1 %v21878_v0 }
0x2b3c   : > { %17395 = vmatpush3.bf16.msra.mxu1 %v20167_v31 }
0x2b3d   : > { %17396 = vmatprep.subr.bf16.mxu1 %v21878_v0 }
0x2b40   : > { %17398 = vmatpush3.bf16.msra.mxu1 %v20179_v45 }
0x2b41   : > { %17399 = vmatprep.subr.bf16.mxu1 %v21878_v0 }
0x2b44   : > { %17401 = vmatpush3.bf16.msra.mxu1 %v20202_v18 }
0x2b45   : > { %17402 = vmatprep.subr.bf16.mxu1 %v21878_v0 }
0x2b48   : > { %17404 = vmatpush3.bf16.msra.mxu1 %v20216_v25 }
0x2b49   : > { %17446 = vmatprep.subr.bf16.mxu1 %v20265_v42 }
0x2b4b   : > { %15712 = vmatmul.mubr.f32.vlgmr.msra.gmra.mrb[124].mxu1 %v5931_v16 }
0x2b4c   : > { %17448 = vmatpush1.bf16.msra.mxu1 %v20269_v3  ;;  %12560 = vmatprep.mubr.f32.mxu1 %v21877_v29 }
0x2b4d   : > { %17450 = vmatprep.subr.bf16.mxu1 %v20271_v5 }
0x2b50   : > { %17452 = vmatpush1.bf16.msra.mxu1 %v20275_v24 }
0x2b51   : > { %17454 = vmatprep.subr.bf16.mxu1 %v20279_v55 }
0x2b54   : > { %17456 = vmatpush1.bf16.msra.mxu1 %v20283_v30 }
0x2b55   : > { %17458 = vmatprep.subr.bf16.mxu1 %v20293_v52 }
0x2b58   : > { %17460 = vmatpush1.bf16.msra.mxu1 %v20295_v51 }
0x2bfe   : > { %v12248_v61 = vpop.f32.mrb[122].mxu1 }
0x2bff   : > { %v12249_v42 = vadd.f32 %v12248_v61, %v20375_v2  ;;  %v12250_v11 = vpop.f32.mrb[123].mxu1 }
0x2c00   : > { %v12251_v3 = vadd.f32 %v12250_v11, %v20378_v54 }
0x2c02   : > { %v12255_v33 = vcombine.low %v12249_v42, %v12251_v3 }
0x2c04   : > { %13549 = vst.sshfl [vmem:[%s20385_s11 + $0x9c] sm:$0x33 pattern:$0x76325410] %v12255_v33 }
0x2c1e   : > { %v12331_v14 = vpop.f32.mrb[124].mxu1 }
0x2c1f   : > { %v12332_v5 = vadd.f32 %v21717_v20, %v12331_v14  ;;  %v15713_v24 = vpop.f32.mrb[125].mxu1 }
0x2c21   : > { %v12335_v7 = vmax.f32 %v12332_v5, 0.0 }
0x2c23   : > { %13550 = vmatmul.mubr.msk.f32.vlgmr.msra.gmra.mrb[124].mxu0 %vm6055_vm2, %v12335_v7 }
0x2c24   : > { %17423 = vmatpush3.bf16.msra.mxu0 %v20114_v1  ;;  %15746 = vmatprep.mubr.msk.f32.mxu0 %vm18963_vm0, %v21877_v29  ;;  %v21895_v1 = vld [vmem:[#allocation37_spill] sm:$0xff] }
0x2c25   : > { %17424 = vmatprep.subr.bf16.mxu0 %v21878_v0 }
0x2c28   : > { %17426 = vmatpush3.bf16.msra.mxu0 %v20129_v17  ;;  %v5932_v17 = vmax.f32 %v21895_v1, 0.0 }
0x2c29   : > { %17427 = vmatprep.subr.bf16.mxu0 %v21878_v0 }
0x2c2c   : > { %17429 = vmatpush3.bf16.msra.mxu0 %v20143_v21 }
0x2c2d   : > { %17430 = vmatprep.subr.bf16.mxu0 %v21878_v0 }
0x2c30   : > { %17432 = vmatpush3.bf16.msra.mxu0 %v20155_v26 }
0x2c31   : > { %17433 = vmatprep.subr.bf16.mxu0 %v21878_v0 }
0x2c34   : > { %17435 = vmatpush3.bf16.msra.mxu0 %v20167_v31 }
0x2c35   : > { %17436 = vmatprep.subr.bf16.mxu0 %v21878_v0 }
0x2c38   : > { %17438 = vmatpush3.bf16.msra.mxu0 %v20179_v45 }
0x2c39   : > { %17439 = vmatprep.subr.bf16.mxu0 %v21878_v0 }
0x2c3c   : > { %17441 = vmatpush3.bf16.msra.mxu0 %v20202_v18 }
0x2c3d   : > { %17442 = vmatprep.subr.bf16.mxu0 %v21878_v0 }
0x2c40   : > { %17444 = vmatpush3.bf16.msra.mxu0 %v20216_v25 }
0x2c43   : > { %15747 = vmatmul.mubr.f32.vlgmr.msra.gmra.mrb[126].mxu0 %v5932_v17 }
0x2cf6   : > { %v12405_v21 = vpop.f32.mrb[124].mxu0 }
0x2cf7   : > { %v12406_v26 = vadd.f32 %v12405_v21, %v20375_v2  ;;  %v12407_v31 = vpop.f32.mrb[125].mxu0 }
0x2cf8   : > { %v12408_v55 = vadd.f32 %v12407_v31, %v20378_v54 }
0x2cfa   : > { %v12412_v30 = vcombine.low %v12406_v26, %v12408_v55 }
0x2cfc   : > { %13551 = vst.sshfl [vmem:[%s20385_s11 + $0xa0] sm:$0x33 pattern:$0x76325410] %v12412_v30 }
0x2d16   : > { %v12488_v45 = vpop.f32.mrb[126].mxu0 }
0x2d17   : > { %v12489_v52 = vadd.f32 %v21717_v20, %v12488_v45  ;;  %v15748_v18 = vpop.f32.mrb[127].mxu0 }
0x2d19   : > { %v12492_v51 = vmax.f32 %v12489_v52, 0.0 }
0x2d1b   : > { %13552 = vmatmul.mubr.msk.f32.vlgmr.msra.gmra.mrb[126].mxu1 %vm6055_vm2, %v12492_v51 }
0x2dee   : > { %v12562_v25 = vpop.f32.mrb[126].mxu1 }
0x2def   : > { %v12563_v29 = vadd.f32 %v12562_v25, %v20375_v2  ;;  %v12564_v0 = vpop.f32.mrb[127].mxu1 }
0x2df0   : > { %v12565_v36 = vadd.f32 %v12564_v0, %v20378_v54 }
0x2df2   : > { %v12569_v58 = vcombine.low %v12563_v29, %v12565_v36 }
0x2df4   : > { %13553 = vst.sshfl [vmem:[%s20385_s11 + $0xa4] sm:$0x33 pattern:$0x76325410] %v12569_v58 }
0x2df5 PF: > { %s25_s22 = sadd.s32 1, %s18946_s22   ;;  %s21896_s26 = sld [smem:[#allocation24_spill]] }
0x2df6   : > { %p22_p2 = scmp.ge.s32.totalorder %s25_s22, 7   ;;  %s21897_s1 = sld [smem:[#allocation23_spill]] }
0x2df7   : > { %s21898_s17 = smov %s18930_s18  ;;  %s21899_s18 = smov %s18934_s19 }
0x2df8   : > { %s21901_s20 = smov %s18942_s21  ;;  %24 = sbr.rel (!%p22_p2) target bundleno = 15 (0xf), region = 145 }
0x2dfb   : > { %s21900_s19 = smov %s21896_s26 }
0x2dfc   : > { %s21902_s21 = smov %s21897_s1 }
0x2dff   :  { %12609 = vsyncpa [#allocation3], 1 }
0x2e00   :  { %12611 = vsyncpa [#allocation3 + $0x1], 1 }
0x2e01   :  { %12612 = vsyncpa [#allocation5], 1 }
0x2e02   :  { %12613 = vsyncpa [#allocation8], 1 }
0x2e03   :  { %12614 = vsyncpa [#allocation14], 1 }

</bundles_post_ra>
